<compile_context>
chip_gen: v5e
topology: v5e:2x2
jax: 0.10.0
libtpu: 0.0.40
codegen_flags: <defaults>
</compile_context>

<pallas_src>
import jax
import jax.numpy as jnp
from jax import lax
from jax.experimental import pallas as pl
from jax.experimental.pallas import tpu as pltpu  # noqa: F401  (TPU backend; future tiling)

# ---- small shapes consistent with the module (n_embd % n_head == 0, T <= block_size) ----
B = 2
T = 16
N_EMBD = 384                       # C (module's n_embd; 3*128 -> lane-dense)
N_HEAD = 6
HEAD_SIZE = N_EMBD // N_HEAD       # 64
FF_HIDDEN = 4 * N_EMBD             # 1536
LN_EPS = 1e-5                      # PyTorch LayerNorm default
NEG_INF = float("-inf")


def _layer_norm(z, gamma, beta):
    # z: (R, C) f32; gamma/beta: (1, C) f32
    mu = jnp.mean(z, axis=-1, keepdims=True)
    zc = z - mu
    var = jnp.mean(zc * zc, axis=-1, keepdims=True)
    return zc * lax.rsqrt(var + LN_EPS) * gamma + beta


# ---------------- fused Block kernel: whole (B, T, C) batch in one invocation ----------------
def _block_kernel(x_ref, g1_ref, b1_ref, wqkv_ref, wp_ref, bp_ref,
                  g2_ref, b2_ref, w1_ref, bf1_ref, w2_ref, bf2_ref, o_ref):
    Bn, Tn, C = x_ref.shape
    hs = C // N_HEAD

    x2d = x_ref[...].reshape(Bn * Tn, C)                     # (B*T, C) f32; tile-aligned merge

    # ---- ln1 + packed QKV projection ([q | k | v], one MXU matmul, bf16 in / f32 acc) ----
    xn = _layer_norm(x2d, g1_ref[...], b1_ref[...])
    qkv = jnp.dot(xn.astype(jnp.bfloat16), wqkv_ref[...],
                  preferred_element_type=jnp.float32)        # (B*T, 3C) f32
    scale = float(C) ** -0.5                                 # module scales by n_embd**-0.5
    q = qkv[:, :C] * scale                                   # fold the scale into q once
    k = qkv[:, C:2 * C]
    v = qkv[:, 2 * C:]

    row = lax.broadcasted_iota(jnp.int32, (Tn, Tn), 0)
    col = lax.broadcasted_iota(jnp.int32, (Tn, Tn), 1)
    causal = col <= row                                      # tril[:T, :T]; diagonal unmasked

    wp = wp_ref[...]                                         # (C, C) bf16, loaded once
    sa_rows = []
    for b in range(Bn):                                      # static unroll over batch
        rs = slice(b * Tn, (b + 1) * Tn)
        acc = jnp.zeros((Tn, C), jnp.float32)
        for h in range(N_HEAD):                              # static unroll over heads
            cs = slice(h * hs, (h + 1) * hs)
            qh, kh, vh = q[rs, cs], k[rs, cs], v[rs, cs]
            # contract last dims directly -> no explicit k transpose
            wei = lax.dot_general(qh, kh, (((1,), (1,)), ((), ())),
                                  preferred_element_type=jnp.float32)     # (T, T)
            wei = jnp.where(causal, wei, NEG_INF)            # diag always unmasked -> no NaN
            m = jnp.max(wei, axis=-1, keepdims=True)
            e = jnp.exp(wei - m)
            s = jnp.sum(e, axis=-1, keepdims=True)
            p = e * pl.reciprocal(s, approx=True)            # EUP slot
            # attention dropout: identity in eval mode
            oh = jnp.dot(p, vh, preferred_element_type=jnp.float32)       # (T, hs)
            # head concat folded into the output projection: accumulate out_h @ Wp[h-block]
            acc = acc + jnp.dot(oh.astype(jnp.bfloat16), wp[cs, :],
                                preferred_element_type=jnp.float32)
        sa_rows.append(acc)
    sa = jnp.concatenate(sa_rows, axis=0)                    # (B*T, C)
    x1 = x2d + sa + bp_ref[...]                              # residual 1 (+ proj bias)

    # ---- ln2 + feed-forward ----
    xn2 = _layer_norm(x1, g2_ref[...], b2_ref[...])
    h1 = jnp.dot(xn2.astype(jnp.bfloat16), w1_ref[...],
                 preferred_element_type=jnp.float32) + bf1_ref[...]
    h1 = jnp.maximum(h1, 0.0)                                # ReLU
    ff = jnp.dot(h1.astype(jnp.bfloat16), w2_ref[...],
                 preferred_element_type=jnp.float32) + bf2_ref[...]
    # ffwd dropout: identity in eval mode
    o_ref[...] = (x1 + ff).reshape(Bn, Tn, C)                # residual 2, lane-dense store


def block_forward(x, params):
    """Forward pass of Block (eval mode, deterministic).

    x: (B, T, C) float32; weight matrices bf16, biases / LN params f32.
    """
    (g1, b1, w_qkv, w_proj, b_proj, g2, b2, w_ff1, b_ff1, w_ff2, b_ff2) = params
    Bx, Tx, Cx = x.shape
    # Grid-free call: every operand (x + ~3.5 MB of bf16 weights) is copied to VMEM
    # exactly once and single-buffered; fits the default scoped-VMEM budget on
    # v5e / v6e / v7x, so no vmem_limit_bytes override is needed.
    return pl.pallas_call(
        _block_kernel,
        out_shape=jax.ShapeDtypeStruct((Bx, Tx, Cx), jnp.float32),
    )(x, g1, b1, w_qkv, w_proj, b_proj, g2, b2, w_ff1, b_ff1, w_ff2, b_ff2)


def init_params(key):
    ks = jax.random.split(key, 13)
    # per-head projections stored column-blocked inside full (C, C) matrices, then packed;
    # weight matrices are kept in bf16 (MXU-native), biases / LN params stay f32.
    wq = 0.02 * jax.random.normal(ks[0], (N_EMBD, N_EMBD), jnp.float32)
    wk = 0.02 * jax.random.normal(ks[1], (N_EMBD, N_EMBD), jnp.float32)
    wv = 0.02 * jax.random.normal(ks[2], (N_EMBD, N_EMBD), jnp.float32)
    w_qkv = jnp.concatenate([wq, wk, wv], axis=1).astype(jnp.bfloat16)          # (C, 3C)
    w_proj = (0.02 * jax.random.normal(ks[3], (N_EMBD, N_EMBD), jnp.float32)
              ).astype(jnp.bfloat16)                                            # (in, out)
    b_proj = 0.02 * jax.random.normal(ks[4], (1, N_EMBD), jnp.float32)
    g1 = 1.0 + 0.1 * jax.random.normal(ks[5], (1, N_EMBD), jnp.float32)
    b1 = 0.05 * jax.random.normal(ks[6], (1, N_EMBD), jnp.float32)
    g2 = 1.0 + 0.1 * jax.random.normal(ks[7], (1, N_EMBD), jnp.float32)
    b2 = 0.05 * jax.random.normal(ks[8], (1, N_EMBD), jnp.float32)
    w_ff1 = (0.02 * jax.random.normal(ks[9], (N_EMBD, FF_HIDDEN), jnp.float32)
             ).astype(jnp.bfloat16)
    b_ff1 = 0.02 * jax.random.normal(ks[10], (1, FF_HIDDEN), jnp.float32)
    w_ff2 = (0.02 * jax.random.normal(ks[11], (FF_HIDDEN, N_EMBD), jnp.float32)
             ).astype(jnp.bfloat16)
    b_ff2 = 0.02 * jax.random.normal(ks[12], (1, N_EMBD), jnp.float32)
    return (g1, b1, w_qkv, w_proj, b_proj, g2, b2, w_ff1, b_ff1, w_ff2, b_ff2)


def _reference(x, params):
    # pure-JAX f32 reference with identical semantics (bf16 weights upcast to f32)
    (g1, b1, w_qkv, w_proj, b_proj, g2, b2, w_ff1, b_ff1, w_ff2, b_ff2) = [
        jnp.asarray(p, jnp.float32) for p in params]
    C = x.shape[-1]
    Tn = x.shape[1]

    def ln(z, g, bb):
        mu = z.mean(-1, keepdims=True)
        var = ((z - mu) ** 2).mean(-1, keepdims=True)
        return (z - mu) / jnp.sqrt(var + LN_EPS) * g + bb

    xn = ln(x, g1, b1)
    qkv = xn @ w_qkv
    q, k, v = qkv[..., :C], qkv[..., C:2 * C], qkv[..., 2 * C:]
    mask = jnp.tril(jnp.ones((Tn, Tn), bool))
    outs = []
    for h in range(N_HEAD):
        sl = slice(h * HEAD_SIZE, (h + 1) * HEAD_SIZE)
        wei = jnp.einsum('btd,bsd->bts', q[..., sl], k[..., sl]) * (C ** -0.5)
        wei = jnp.where(mask[None], wei, -jnp.inf)
        wei = jax.nn.softmax(wei, axis=-1)
        outs.append(jnp.einsum('bts,bsd->btd', wei, v[..., sl]))
    cat = jnp.concatenate(outs, axis=-1)
    x1 = x + cat @ w_proj + b_proj
    xn2 = ln(x1, g2, b2)
    ff = jnp.maximum(xn2 @ w_ff1 + b_ff1, 0.0) @ w_ff2 + b_ff2
    return x1 + ff


if __name__ == "__main__":
    key = jax.random.PRNGKey(0)
    kx, kp = jax.random.split(key)
    x = jax.random.normal(kx, (B, T, N_EMBD), jnp.float32)
    params = init_params(kp)

    out = jax.block_until_ready(block_forward(x, params))
    ref = _reference(x, params)

    assert out.shape == (B, T, N_EMBD)
    max_err = float(jnp.max(jnp.abs(out - ref)))
    # kernel rounds MXU-feeding activations to bf16 and uses approx reciprocal, so the
    # tolerance vs. the f32 reference is looser than the previous all-f32 version.
    assert jnp.allclose(out, ref, atol=2e-2, rtol=2e-2), f"max_abs_err={max_err}"

    print("KERNEL_OK")
</pallas_src>

<mosaic_0001>
module attributes {stable_mosaic.version = 11 : i64} {
  func.func @_block_kernel(%arg0: memref<2x16x384xf32, #tpu.memory_space<vmem>>, %arg1: memref<1x384xf32, #tpu.memory_space<vmem>>, %arg2: memref<1x384xf32, #tpu.memory_space<vmem>>, %arg3: memref<384x1152xbf16, #tpu.memory_space<vmem>>, %arg4: memref<384x384xbf16, #tpu.memory_space<vmem>>, %arg5: memref<1x384xf32, #tpu.memory_space<vmem>>, %arg6: memref<1x384xf32, #tpu.memory_space<vmem>>, %arg7: memref<1x384xf32, #tpu.memory_space<vmem>>, %arg8: memref<384x1536xbf16, #tpu.memory_space<vmem>>, %arg9: memref<1x1536xf32, #tpu.memory_space<vmem>>, %arg10: memref<1536x384xbf16, #tpu.memory_space<vmem>>, %arg11: memref<1x384xf32, #tpu.memory_space<vmem>>, %arg12: memref<2x16x384xf32, #tpu.memory_space<vmem>>) attributes {dimension_semantics = [], scalar_prefetch = 0 : i64, scratch_operands = 0 : i64, tpu.core_type = #tpu.core_type<tc>} {
    %c0 = arith.constant 0 : index
    %c0_0 = arith.constant 0 : index
    %c0_1 = arith.constant 0 : index
    %0 = vector.load %arg0[%c0, %c0_0, %c0_1] : memref<2x16x384xf32, #tpu.memory_space<vmem>>, vector<2x16x384xf32>
    %1 = vector.shape_cast %0 : vector<2x16x384xf32> to vector<32x384xf32>
    %c0_2 = arith.constant 0 : index
    %c0_3 = arith.constant 0 : index
    %2 = vector.load %arg1[%c0_2, %c0_3] : memref<1x384xf32, #tpu.memory_space<vmem>>, vector<1x384xf32>
    %c0_4 = arith.constant 0 : index
    %c0_5 = arith.constant 0 : index
    %3 = vector.load %arg2[%c0_4, %c0_5] : memref<1x384xf32, #tpu.memory_space<vmem>>, vector<1x384xf32>
    %cst = arith.constant dense<0.000000e+00> : vector<32xf32>
    %4 = vector.multi_reduction <add>, %1, %cst [1] : vector<32x384xf32> to vector<32xf32>
    %5 = vector.shape_cast %4 : vector<32xf32> to vector<32x1xf32>
    %cst_6 = arith.constant 3.840000e+02 : f32
    %6 = vector.broadcast %cst_6 : f32 to vector<32x1xf32>
    %7 = arith.divf %5, %6 : vector<32x1xf32>
    %8 = vector.broadcast %7 : vector<32x1xf32> to vector<32x384xf32>
    %9 = arith.subf %1, %8 : vector<32x384xf32>
    %10 = arith.mulf %9, %9 : vector<32x384xf32>
    %cst_7 = arith.constant dense<0.000000e+00> : vector<32xf32>
    %11 = vector.multi_reduction <add>, %10, %cst_7 [1] : vector<32x384xf32> to vector<32xf32>
    %12 = vector.shape_cast %11 : vector<32xf32> to vector<32x1xf32>
    %cst_8 = arith.constant 3.840000e+02 : f32
    %13 = vector.broadcast %cst_8 : f32 to vector<32x1xf32>
    %14 = arith.divf %12, %13 : vector<32x1xf32>
    %cst_9 = arith.constant 9.99999974E-6 : f32
    %15 = vector.broadcast %cst_9 : f32 to vector<32x1xf32>
    %16 = arith.addf %14, %15 : vector<32x1xf32>
    %17 = math.rsqrt %16 : vector<32x1xf32>
    %18 = vector.broadcast %17 : vector<32x1xf32> to vector<32x384xf32>
    %19 = arith.mulf %9, %18 : vector<32x384xf32>
    %20 = vector.broadcast %2 : vector<1x384xf32> to vector<32x384xf32>
    %21 = arith.mulf %19, %20 : vector<32x384xf32>
    %22 = vector.broadcast %3 : vector<1x384xf32> to vector<32x384xf32>
    %23 = arith.addf %21, %22 : vector<32x384xf32>
    %24 = arith.truncf %23 : vector<32x384xf32> to vector<32x384xbf16>
    %c0_10 = arith.constant 0 : index
    %c0_11 = arith.constant 0 : index
    %25 = vector.load %arg3[%c0_10, %c0_11] : memref<384x1152xbf16, #tpu.memory_space<vmem>>, vector<384x1152xbf16>
    %cst_12 = arith.constant dense<0.000000e+00> : vector<32x1152xf32>
    %26 = tpu.matmul %24, %25, %cst_12 {dimension_numbers = #tpu.dot_dimension_numbers<[1], [0], [0], [1], [0, 0, 1, 1], [], []>} : vector<32x384xbf16>, vector<384x1152xbf16>, vector<32x1152xf32> -> vector<32x1152xf32>
    %27 = vector.extract_strided_slice %26 {offsets = [0, 0], sizes = [32, 384], strides = [1, 1]} : vector<32x1152xf32> to vector<32x384xf32>
    %cst_13 = arith.constant 0.0510310382 : f32
    %28 = vector.broadcast %cst_13 : f32 to vector<32x384xf32>
    %29 = arith.mulf %27, %28 : vector<32x384xf32>
    %30 = vector.extract_strided_slice %26 {offsets = [0, 384], sizes = [32, 384], strides = [1, 1]} : vector<32x1152xf32> to vector<32x384xf32>
    %31 = vector.extract_strided_slice %26 {offsets = [0, 768], sizes = [32, 384], strides = [1, 1]} : vector<32x1152xf32> to vector<32x384xf32>
    %32 = tpu.iota {dimensions = array<i32: 0>} : vector<16x16xi32>
    %33 = tpu.iota {dimensions = array<i32: 1>} : vector<16x16xi32>
    %34 = arith.cmpi sle, %33, %32 : vector<16x16xi32>
    %c0_14 = arith.constant 0 : index
    %c0_15 = arith.constant 0 : index
    %35 = vector.load %arg4[%c0_14, %c0_15] : memref<384x384xbf16, #tpu.memory_space<vmem>>, vector<384x384xbf16>
    %cst_16 = arith.constant 0.000000e+00 : f32
    %36 = vector.broadcast %cst_16 : f32 to vector<16x384xf32>
    %37 = vector.extract_strided_slice %29 {offsets = [0, 0], sizes = [16, 64], strides = [1, 1]} : vector<32x384xf32> to vector<16x64xf32>
    %38 = vector.extract_strided_slice %30 {offsets = [0, 0], sizes = [16, 64], strides = [1, 1]} : vector<32x384xf32> to vector<16x64xf32>
    %39 = vector.extract_strided_slice %31 {offsets = [0, 0], sizes = [16, 64], strides = [1, 1]} : vector<32x384xf32> to vector<16x64xf32>
    %cst_17 = arith.constant dense<0.000000e+00> : vector<16x16xf32>
    %40 = tpu.matmul %37, %38, %cst_17 {dimension_numbers = #tpu.dot_dimension_numbers<[1], [1], [0], [0], [0, 0, 1, 0], [], []>} : vector<16x64xf32>, vector<16x64xf32>, vector<16x16xf32> -> vector<16x16xf32>
    %cst_18 = arith.constant 0xFF800000 : f32
    %41 = vector.broadcast %cst_18 : f32 to vector<16x16xf32>
    %42 = arith.select %34, %40, %41 : vector<16x16xi1>, vector<16x16xf32>
    %cst_19 = arith.constant dense<0xFF800000> : vector<16xf32>
    %43 = vector.multi_reduction <maximumf>, %42, %cst_19 [1] : vector<16x16xf32> to vector<16xf32>
    %44 = vector.shape_cast %43 : vector<16xf32> to vector<16x1xf32>
    %45 = vector.broadcast %44 : vector<16x1xf32> to vector<16x16xf32>
    %46 = arith.subf %42, %45 : vector<16x16xf32>
    %47 = math.exp %46 : vector<16x16xf32>
    %cst_20 = arith.constant dense<0.000000e+00> : vector<16xf32>
    %48 = vector.multi_reduction <add>, %47, %cst_20 [1] : vector<16x16xf32> to vector<16xf32>
    %49 = vector.shape_cast %48 : vector<16xf32> to vector<16x1xf32>
    %50 = tpu.reciprocal %49 {approx = true} : vector<16x1xf32> -> vector<16x1xf32>
    %51 = vector.broadcast %50 : vector<16x1xf32> to vector<16x16xf32>
    %52 = arith.mulf %47, %51 : vector<16x16xf32>
    %cst_21 = arith.constant dense<0.000000e+00> : vector<16x64xf32>
    %53 = tpu.matmul %52, %39, %cst_21 {dimension_numbers = #tpu.dot_dimension_numbers<[1], [0], [0], [1], [0, 0, 1, 1], [], []>} : vector<16x16xf32>, vector<16x64xf32>, vector<16x64xf32> -> vector<16x64xf32>
    %54 = arith.truncf %53 : vector<16x64xf32> to vector<16x64xbf16>
    %55 = vector.extract_strided_slice %35 {offsets = [0, 0], sizes = [64, 384], strides = [1, 1]} : vector<384x384xbf16> to vector<64x384xbf16>
    %cst_22 = arith.constant dense<0.000000e+00> : vector<16x384xf32>
    %56 = tpu.matmul %54, %55, %cst_22 {dimension_numbers = #tpu.dot_dimension_numbers<[1], [0], [0], [1], [0, 0, 1, 1], [], []>} : vector<16x64xbf16>, vector<64x384xbf16>, vector<16x384xf32> -> vector<16x384xf32>
    %57 = arith.addf %36, %56 : vector<16x384xf32>
    %58 = vector.extract_strided_slice %29 {offsets = [0, 64], sizes = [16, 64], strides = [1, 1]} : vector<32x384xf32> to vector<16x64xf32>
    %59 = vector.extract_strided_slice %30 {offsets = [0, 64], sizes = [16, 64], strides = [1, 1]} : vector<32x384xf32> to vector<16x64xf32>
    %60 = vector.extract_strided_slice %31 {offsets = [0, 64], sizes = [16, 64], strides = [1, 1]} : vector<32x384xf32> to vector<16x64xf32>
    %cst_23 = arith.constant dense<0.000000e+00> : vector<16x16xf32>
    %61 = tpu.matmul %58, %59, %cst_23 {dimension_numbers = #tpu.dot_dimension_numbers<[1], [1], [0], [0], [0, 0, 1, 0], [], []>} : vector<16x64xf32>, vector<16x64xf32>, vector<16x16xf32> -> vector<16x16xf32>
    %cst_24 = arith.constant 0xFF800000 : f32
    %62 = vector.broadcast %cst_24 : f32 to vector<16x16xf32>
    %63 = arith.select %34, %61, %62 : vector<16x16xi1>, vector<16x16xf32>
    %cst_25 = arith.constant dense<0xFF800000> : vector<16xf32>
    %64 = vector.multi_reduction <maximumf>, %63, %cst_25 [1] : vector<16x16xf32> to vector<16xf32>
    %65 = vector.shape_cast %64 : vector<16xf32> to vector<16x1xf32>
    %66 = vector.broadcast %65 : vector<16x1xf32> to vector<16x16xf32>
    %67 = arith.subf %63, %66 : vector<16x16xf32>
    %68 = math.exp %67 : vector<16x16xf32>
    %cst_26 = arith.constant dense<0.000000e+00> : vector<16xf32>
    %69 = vector.multi_reduction <add>, %68, %cst_26 [1] : vector<16x16xf32> to vector<16xf32>
    %70 = vector.shape_cast %69 : vector<16xf32> to vector<16x1xf32>
    %71 = tpu.reciprocal %70 {approx = true} : vector<16x1xf32> -> vector<16x1xf32>
    %72 = vector.broadcast %71 : vector<16x1xf32> to vector<16x16xf32>
    %73 = arith.mulf %68, %72 : vector<16x16xf32>
    %cst_27 = arith.constant dense<0.000000e+00> : vector<16x64xf32>
    %74 = tpu.matmul %73, %60, %cst_27 {dimension_numbers = #tpu.dot_dimension_numbers<[1], [0], [0], [1], [0, 0, 1, 1], [], []>} : vector<16x16xf32>, vector<16x64xf32>, vector<16x64xf32> -> vector<16x64xf32>
    %75 = arith.truncf %74 : vector<16x64xf32> to vector<16x64xbf16>
    %76 = vector.extract_strided_slice %35 {offsets = [64, 0], sizes = [64, 384], strides = [1, 1]} : vector<384x384xbf16> to vector<64x384xbf16>
    %cst_28 = arith.constant dense<0.000000e+00> : vector<16x384xf32>
    %77 = tpu.matmul %75, %76, %cst_28 {dimension_numbers = #tpu.dot_dimension_numbers<[1], [0], [0], [1], [0, 0, 1, 1], [], []>} : vector<16x64xbf16>, vector<64x384xbf16>, vector<16x384xf32> -> vector<16x384xf32>
    %78 = arith.addf %57, %77 : vector<16x384xf32>
    %79 = vector.extract_strided_slice %29 {offsets = [0, 128], sizes = [16, 64], strides = [1, 1]} : vector<32x384xf32> to vector<16x64xf32>
    %80 = vector.extract_strided_slice %30 {offsets = [0, 128], sizes = [16, 64], strides = [1, 1]} : vector<32x384xf32> to vector<16x64xf32>
    %81 = vector.extract_strided_slice %31 {offsets = [0, 128], sizes = [16, 64], strides = [1, 1]} : vector<32x384xf32> to vector<16x64xf32>
    %cst_29 = arith.constant dense<0.000000e+00> : vector<16x16xf32>
    %82 = tpu.matmul %79, %80, %cst_29 {dimension_numbers = #tpu.dot_dimension_numbers<[1], [1], [0], [0], [0, 0, 1, 0], [], []>} : vector<16x64xf32>, vector<16x64xf32>, vector<16x16xf32> -> vector<16x16xf32>
    %cst_30 = arith.constant 0xFF800000 : f32
    %83 = vector.broadcast %cst_30 : f32 to vector<16x16xf32>
    %84 = arith.select %34, %82, %83 : vector<16x16xi1>, vector<16x16xf32>
    %cst_31 = arith.constant dense<0xFF800000> : vector<16xf32>
    %85 = vector.multi_reduction <maximumf>, %84, %cst_31 [1] : vector<16x16xf32> to vector<16xf32>
    %86 = vector.shape_cast %85 : vector<16xf32> to vector<16x1xf32>
    %87 = vector.broadcast %86 : vector<16x1xf32> to vector<16x16xf32>
    %88 = arith.subf %84, %87 : vector<16x16xf32>
    %89 = math.exp %88 : vector<16x16xf32>
    %cst_32 = arith.constant dense<0.000000e+00> : vector<16xf32>
    %90 = vector.multi_reduction <add>, %89, %cst_32 [1] : vector<16x16xf32> to vector<16xf32>
    %91 = vector.shape_cast %90 : vector<16xf32> to vector<16x1xf32>
    %92 = tpu.reciprocal %91 {approx = true} : vector<16x1xf32> -> vector<16x1xf32>
    %93 = vector.broadcast %92 : vector<16x1xf32> to vector<16x16xf32>
    %94 = arith.mulf %89, %93 : vector<16x16xf32>
    %cst_33 = arith.constant dense<0.000000e+00> : vector<16x64xf32>
    %95 = tpu.matmul %94, %81, %cst_33 {dimension_numbers = #tpu.dot_dimension_numbers<[1], [0], [0], [1], [0, 0, 1, 1], [], []>} : vector<16x16xf32>, vector<16x64xf32>, vector<16x64xf32> -> vector<16x64xf32>
    %96 = arith.truncf %95 : vector<16x64xf32> to vector<16x64xbf16>
    %97 = vector.extract_strided_slice %35 {offsets = [128, 0], sizes = [64, 384], strides = [1, 1]} : vector<384x384xbf16> to vector<64x384xbf16>
    %cst_34 = arith.constant dense<0.000000e+00> : vector<16x384xf32>
    %98 = tpu.matmul %96, %97, %cst_34 {dimension_numbers = #tpu.dot_dimension_numbers<[1], [0], [0], [1], [0, 0, 1, 1], [], []>} : vector<16x64xbf16>, vector<64x384xbf16>, vector<16x384xf32> -> vector<16x384xf32>
    %99 = arith.addf %78, %98 : vector<16x384xf32>
    %100 = vector.extract_strided_slice %29 {offsets = [0, 192], sizes = [16, 64], strides = [1, 1]} : vector<32x384xf32> to vector<16x64xf32>
    %101 = vector.extract_strided_slice %30 {offsets = [0, 192], sizes = [16, 64], strides = [1, 1]} : vector<32x384xf32> to vector<16x64xf32>
    %102 = vector.extract_strided_slice %31 {offsets = [0, 192], sizes = [16, 64], strides = [1, 1]} : vector<32x384xf32> to vector<16x64xf32>
    %cst_35 = arith.constant dense<0.000000e+00> : vector<16x16xf32>
    %103 = tpu.matmul %100, %101, %cst_35 {dimension_numbers = #tpu.dot_dimension_numbers<[1], [1], [0], [0], [0, 0, 1, 0], [], []>} : vector<16x64xf32>, vector<16x64xf32>, vector<16x16xf32> -> vector<16x16xf32>
    %cst_36 = arith.constant 0xFF800000 : f32
    %104 = vector.broadcast %cst_36 : f32 to vector<16x16xf32>
    %105 = arith.select %34, %103, %104 : vector<16x16xi1>, vector<16x16xf32>
    %cst_37 = arith.constant dense<0xFF800000> : vector<16xf32>
    %106 = vector.multi_reduction <maximumf>, %105, %cst_37 [1] : vector<16x16xf32> to vector<16xf32>
    %107 = vector.shape_cast %106 : vector<16xf32> to vector<16x1xf32>
    %108 = vector.broadcast %107 : vector<16x1xf32> to vector<16x16xf32>
    %109 = arith.subf %105, %108 : vector<16x16xf32>
    %110 = math.exp %109 : vector<16x16xf32>
    %cst_38 = arith.constant dense<0.000000e+00> : vector<16xf32>
    %111 = vector.multi_reduction <add>, %110, %cst_38 [1] : vector<16x16xf32> to vector<16xf32>
    %112 = vector.shape_cast %111 : vector<16xf32> to vector<16x1xf32>
    %113 = tpu.reciprocal %112 {approx = true} : vector<16x1xf32> -> vector<16x1xf32>
    %114 = vector.broadcast %113 : vector<16x1xf32> to vector<16x16xf32>
    %115 = arith.mulf %110, %114 : vector<16x16xf32>
    %cst_39 = arith.constant dense<0.000000e+00> : vector<16x64xf32>
    %116 = tpu.matmul %115, %102, %cst_39 {dimension_numbers = #tpu.dot_dimension_numbers<[1], [0], [0], [1], [0, 0, 1, 1], [], []>} : vector<16x16xf32>, vector<16x64xf32>, vector<16x64xf32> -> vector<16x64xf32>
    %117 = arith.truncf %116 : vector<16x64xf32> to vector<16x64xbf16>
    %118 = vector.extract_strided_slice %35 {offsets = [192, 0], sizes = [64, 384], strides = [1, 1]} : vector<384x384xbf16> to vector<64x384xbf16>
    %cst_40 = arith.constant dense<0.000000e+00> : vector<16x384xf32>
    %119 = tpu.matmul %117, %118, %cst_40 {dimension_numbers = #tpu.dot_dimension_numbers<[1], [0], [0], [1], [0, 0, 1, 1], [], []>} : vector<16x64xbf16>, vector<64x384xbf16>, vector<16x384xf32> -> vector<16x384xf32>
    %120 = arith.addf %99, %119 : vector<16x384xf32>
    %121 = vector.extract_strided_slice %29 {offsets = [0, 256], sizes = [16, 64], strides = [1, 1]} : vector<32x384xf32> to vector<16x64xf32>
    %122 = vector.extract_strided_slice %30 {offsets = [0, 256], sizes = [16, 64], strides = [1, 1]} : vector<32x384xf32> to vector<16x64xf32>
    %123 = vector.extract_strided_slice %31 {offsets = [0, 256], sizes = [16, 64], strides = [1, 1]} : vector<32x384xf32> to vector<16x64xf32>
    %cst_41 = arith.constant dense<0.000000e+00> : vector<16x16xf32>
    %124 = tpu.matmul %121, %122, %cst_41 {dimension_numbers = #tpu.dot_dimension_numbers<[1], [1], [0], [0], [0, 0, 1, 0], [], []>} : vector<16x64xf32>, vector<16x64xf32>, vector<16x16xf32> -> vector<16x16xf32>
    %cst_42 = arith.constant 0xFF800000 : f32
    %125 = vector.broadcast %cst_42 : f32 to vector<16x16xf32>
    %126 = arith.select %34, %124, %125 : vector<16x16xi1>, vector<16x16xf32>
    %cst_43 = arith.constant dense<0xFF800000> : vector<16xf32>
    %127 = vector.multi_reduction <maximumf>, %126, %cst_43 [1] : vector<16x16xf32> to vector<16xf32>
    %128 = vector.shape_cast %127 : vector<16xf32> to vector<16x1xf32>
    %129 = vector.broadcast %128 : vector<16x1xf32> to vector<16x16xf32>
    %130 = arith.subf %126, %129 : vector<16x16xf32>
    %131 = math.exp %130 : vector<16x16xf32>
    %cst_44 = arith.constant dense<0.000000e+00> : vector<16xf32>
    %132 = vector.multi_reduction <add>, %131, %cst_44 [1] : vector<16x16xf32> to vector<16xf32>
    %133 = vector.shape_cast %132 : vector<16xf32> to vector<16x1xf32>
    %134 = tpu.reciprocal %133 {approx = true} : vector<16x1xf32> -> vector<16x1xf32>
    %135 = vector.broadcast %134 : vector<16x1xf32> to vector<16x16xf32>
    %136 = arith.mulf %131, %135 : vector<16x16xf32>
    %cst_45 = arith.constant dense<0.000000e+00> : vector<16x64xf32>
    %137 = tpu.matmul %136, %123, %cst_45 {dimension_numbers = #tpu.dot_dimension_numbers<[1], [0], [0], [1], [0, 0, 1, 1], [], []>} : vector<16x16xf32>, vector<16x64xf32>, vector<16x64xf32> -> vector<16x64xf32>
    %138 = arith.truncf %137 : vector<16x64xf32> to vector<16x64xbf16>
    %139 = vector.extract_strided_slice %35 {offsets = [256, 0], sizes = [64, 384], strides = [1, 1]} : vector<384x384xbf16> to vector<64x384xbf16>
    %cst_46 = arith.constant dense<0.000000e+00> : vector<16x384xf32>
    %140 = tpu.matmul %138, %139, %cst_46 {dimension_numbers = #tpu.dot_dimension_numbers<[1], [0], [0], [1], [0, 0, 1, 1], [], []>} : vector<16x64xbf16>, vector<64x384xbf16>, vector<16x384xf32> -> vector<16x384xf32>
    %141 = arith.addf %120, %140 : vector<16x384xf32>
    %142 = vector.extract_strided_slice %29 {offsets = [0, 320], sizes = [16, 64], strides = [1, 1]} : vector<32x384xf32> to vector<16x64xf32>
    %143 = vector.extract_strided_slice %30 {offsets = [0, 320], sizes = [16, 64], strides = [1, 1]} : vector<32x384xf32> to vector<16x64xf32>
    %144 = vector.extract_strided_slice %31 {offsets = [0, 320], sizes = [16, 64], strides = [1, 1]} : vector<32x384xf32> to vector<16x64xf32>
    %cst_47 = arith.constant dense<0.000000e+00> : vector<16x16xf32>
    %145 = tpu.matmul %142, %143, %cst_47 {dimension_numbers = #tpu.dot_dimension_numbers<[1], [1], [0], [0], [0, 0, 1, 0], [], []>} : vector<16x64xf32>, vector<16x64xf32>, vector<16x16xf32> -> vector<16x16xf32>
    %cst_48 = arith.constant 0xFF800000 : f32
    %146 = vector.broadcast %cst_48 : f32 to vector<16x16xf32>
    %147 = arith.select %34, %145, %146 : vector<16x16xi1>, vector<16x16xf32>
    %cst_49 = arith.constant dense<0xFF800000> : vector<16xf32>
    %148 = vector.multi_reduction <maximumf>, %147, %cst_49 [1] : vector<16x16xf32> to vector<16xf32>
    %149 = vector.shape_cast %148 : vector<16xf32> to vector<16x1xf32>
    %150 = vector.broadcast %149 : vector<16x1xf32> to vector<16x16xf32>
    %151 = arith.subf %147, %150 : vector<16x16xf32>
    %152 = math.exp %151 : vector<16x16xf32>
    %cst_50 = arith.constant dense<0.000000e+00> : vector<16xf32>
    %153 = vector.multi_reduction <add>, %152, %cst_50 [1] : vector<16x16xf32> to vector<16xf32>
    %154 = vector.shape_cast %153 : vector<16xf32> to vector<16x1xf32>
    %155 = tpu.reciprocal %154 {approx = true} : vector<16x1xf32> -> vector<16x1xf32>
    %156 = vector.broadcast %155 : vector<16x1xf32> to vector<16x16xf32>
    %157 = arith.mulf %152, %156 : vector<16x16xf32>
    %cst_51 = arith.constant dense<0.000000e+00> : vector<16x64xf32>
    %158 = tpu.matmul %157, %144, %cst_51 {dimension_numbers = #tpu.dot_dimension_numbers<[1], [0], [0], [1], [0, 0, 1, 1], [], []>} : vector<16x16xf32>, vector<16x64xf32>, vector<16x64xf32> -> vector<16x64xf32>
    %159 = arith.truncf %158 : vector<16x64xf32> to vector<16x64xbf16>
    %160 = vector.extract_strided_slice %35 {offsets = [320, 0], sizes = [64, 384], strides = [1, 1]} : vector<384x384xbf16> to vector<64x384xbf16>
    %cst_52 = arith.constant dense<0.000000e+00> : vector<16x384xf32>
    %161 = tpu.matmul %159, %160, %cst_52 {dimension_numbers = #tpu.dot_dimension_numbers<[1], [0], [0], [1], [0, 0, 1, 1], [], []>} : vector<16x64xbf16>, vector<64x384xbf16>, vector<16x384xf32> -> vector<16x384xf32>
    %162 = arith.addf %141, %161 : vector<16x384xf32>
    %cst_53 = arith.constant 0.000000e+00 : f32
    %163 = vector.broadcast %cst_53 : f32 to vector<16x384xf32>
    %164 = vector.extract_strided_slice %29 {offsets = [16, 0], sizes = [16, 64], strides = [1, 1]} : vector<32x384xf32> to vector<16x64xf32>
    %165 = vector.extract_strided_slice %30 {offsets = [16, 0], sizes = [16, 64], strides = [1, 1]} : vector<32x384xf32> to vector<16x64xf32>
    %166 = vector.extract_strided_slice %31 {offsets = [16, 0], sizes = [16, 64], strides = [1, 1]} : vector<32x384xf32> to vector<16x64xf32>
    %cst_54 = arith.constant dense<0.000000e+00> : vector<16x16xf32>
    %167 = tpu.matmul %164, %165, %cst_54 {dimension_numbers = #tpu.dot_dimension_numbers<[1], [1], [0], [0], [0, 0, 1, 0], [], []>} : vector<16x64xf32>, vector<16x64xf32>, vector<16x16xf32> -> vector<16x16xf32>
    %cst_55 = arith.constant 0xFF800000 : f32
    %168 = vector.broadcast %cst_55 : f32 to vector<16x16xf32>
    %169 = arith.select %34, %167, %168 : vector<16x16xi1>, vector<16x16xf32>
    %cst_56 = arith.constant dense<0xFF800000> : vector<16xf32>
    %170 = vector.multi_reduction <maximumf>, %169, %cst_56 [1] : vector<16x16xf32> to vector<16xf32>
    %171 = vector.shape_cast %170 : vector<16xf32> to vector<16x1xf32>
    %172 = vector.broadcast %171 : vector<16x1xf32> to vector<16x16xf32>
    %173 = arith.subf %169, %172 : vector<16x16xf32>
    %174 = math.exp %173 : vector<16x16xf32>
    %cst_57 = arith.constant dense<0.000000e+00> : vector<16xf32>
    %175 = vector.multi_reduction <add>, %174, %cst_57 [1] : vector<16x16xf32> to vector<16xf32>
    %176 = vector.shape_cast %175 : vector<16xf32> to vector<16x1xf32>
    %177 = tpu.reciprocal %176 {approx = true} : vector<16x1xf32> -> vector<16x1xf32>
    %178 = vector.broadcast %177 : vector<16x1xf32> to vector<16x16xf32>
    %179 = arith.mulf %174, %178 : vector<16x16xf32>
    %cst_58 = arith.constant dense<0.000000e+00> : vector<16x64xf32>
    %180 = tpu.matmul %179, %166, %cst_58 {dimension_numbers = #tpu.dot_dimension_numbers<[1], [0], [0], [1], [0, 0, 1, 1], [], []>} : vector<16x16xf32>, vector<16x64xf32>, vector<16x64xf32> -> vector<16x64xf32>
    %181 = arith.truncf %180 : vector<16x64xf32> to vector<16x64xbf16>
    %182 = vector.extract_strided_slice %35 {offsets = [0, 0], sizes = [64, 384], strides = [1, 1]} : vector<384x384xbf16> to vector<64x384xbf16>
    %cst_59 = arith.constant dense<0.000000e+00> : vector<16x384xf32>
    %183 = tpu.matmul %181, %182, %cst_59 {dimension_numbers = #tpu.dot_dimension_numbers<[1], [0], [0], [1], [0, 0, 1, 1], [], []>} : vector<16x64xbf16>, vector<64x384xbf16>, vector<16x384xf32> -> vector<16x384xf32>
    %184 = arith.addf %163, %183 : vector<16x384xf32>
    %185 = vector.extract_strided_slice %29 {offsets = [16, 64], sizes = [16, 64], strides = [1, 1]} : vector<32x384xf32> to vector<16x64xf32>
    %186 = vector.extract_strided_slice %30 {offsets = [16, 64], sizes = [16, 64], strides = [1, 1]} : vector<32x384xf32> to vector<16x64xf32>
    %187 = vector.extract_strided_slice %31 {offsets = [16, 64], sizes = [16, 64], strides = [1, 1]} : vector<32x384xf32> to vector<16x64xf32>
    %cst_60 = arith.constant dense<0.000000e+00> : vector<16x16xf32>
    %188 = tpu.matmul %185, %186, %cst_60 {dimension_numbers = #tpu.dot_dimension_numbers<[1], [1], [0], [0], [0, 0, 1, 0], [], []>} : vector<16x64xf32>, vector<16x64xf32>, vector<16x16xf32> -> vector<16x16xf32>
    %cst_61 = arith.constant 0xFF800000 : f32
    %189 = vector.broadcast %cst_61 : f32 to vector<16x16xf32>
    %190 = arith.select %34, %188, %189 : vector<16x16xi1>, vector<16x16xf32>
    %cst_62 = arith.constant dense<0xFF800000> : vector<16xf32>
    %191 = vector.multi_reduction <maximumf>, %190, %cst_62 [1] : vector<16x16xf32> to vector<16xf32>
    %192 = vector.shape_cast %191 : vector<16xf32> to vector<16x1xf32>
    %193 = vector.broadcast %192 : vector<16x1xf32> to vector<16x16xf32>
    %194 = arith.subf %190, %193 : vector<16x16xf32>
    %195 = math.exp %194 : vector<16x16xf32>
    %cst_63 = arith.constant dense<0.000000e+00> : vector<16xf32>
    %196 = vector.multi_reduction <add>, %195, %cst_63 [1] : vector<16x16xf32> to vector<16xf32>
    %197 = vector.shape_cast %196 : vector<16xf32> to vector<16x1xf32>
    %198 = tpu.reciprocal %197 {approx = true} : vector<16x1xf32> -> vector<16x1xf32>
    %199 = vector.broadcast %198 : vector<16x1xf32> to vector<16x16xf32>
    %200 = arith.mulf %195, %199 : vector<16x16xf32>
    %cst_64 = arith.constant dense<0.000000e+00> : vector<16x64xf32>
    %201 = tpu.matmul %200, %187, %cst_64 {dimension_numbers = #tpu.dot_dimension_numbers<[1], [0], [0], [1], [0, 0, 1, 1], [], []>} : vector<16x16xf32>, vector<16x64xf32>, vector<16x64xf32> -> vector<16x64xf32>
    %202 = arith.truncf %201 : vector<16x64xf32> to vector<16x64xbf16>
    %203 = vector.extract_strided_slice %35 {offsets = [64, 0], sizes = [64, 384], strides = [1, 1]} : vector<384x384xbf16> to vector<64x384xbf16>
    %cst_65 = arith.constant dense<0.000000e+00> : vector<16x384xf32>
    %204 = tpu.matmul %202, %203, %cst_65 {dimension_numbers = #tpu.dot_dimension_numbers<[1], [0], [0], [1], [0, 0, 1, 1], [], []>} : vector<16x64xbf16>, vector<64x384xbf16>, vector<16x384xf32> -> vector<16x384xf32>
    %205 = arith.addf %184, %204 : vector<16x384xf32>
    %206 = vector.extract_strided_slice %29 {offsets = [16, 128], sizes = [16, 64], strides = [1, 1]} : vector<32x384xf32> to vector<16x64xf32>
    %207 = vector.extract_strided_slice %30 {offsets = [16, 128], sizes = [16, 64], strides = [1, 1]} : vector<32x384xf32> to vector<16x64xf32>
    %208 = vector.extract_strided_slice %31 {offsets = [16, 128], sizes = [16, 64], strides = [1, 1]} : vector<32x384xf32> to vector<16x64xf32>
    %cst_66 = arith.constant dense<0.000000e+00> : vector<16x16xf32>
    %209 = tpu.matmul %206, %207, %cst_66 {dimension_numbers = #tpu.dot_dimension_numbers<[1], [1], [0], [0], [0, 0, 1, 0], [], []>} : vector<16x64xf32>, vector<16x64xf32>, vector<16x16xf32> -> vector<16x16xf32>
    %cst_67 = arith.constant 0xFF800000 : f32
    %210 = vector.broadcast %cst_67 : f32 to vector<16x16xf32>
    %211 = arith.select %34, %209, %210 : vector<16x16xi1>, vector<16x16xf32>
    %cst_68 = arith.constant dense<0xFF800000> : vector<16xf32>
    %212 = vector.multi_reduction <maximumf>, %211, %cst_68 [1] : vector<16x16xf32> to vector<16xf32>
    %213 = vector.shape_cast %212 : vector<16xf32> to vector<16x1xf32>
    %214 = vector.broadcast %213 : vector<16x1xf32> to vector<16x16xf32>
    %215 = arith.subf %211, %214 : vector<16x16xf32>
    %216 = math.exp %215 : vector<16x16xf32>
    %cst_69 = arith.constant dense<0.000000e+00> : vector<16xf32>
    %217 = vector.multi_reduction <add>, %216, %cst_69 [1] : vector<16x16xf32> to vector<16xf32>
    %218 = vector.shape_cast %217 : vector<16xf32> to vector<16x1xf32>
    %219 = tpu.reciprocal %218 {approx = true} : vector<16x1xf32> -> vector<16x1xf32>
    %220 = vector.broadcast %219 : vector<16x1xf32> to vector<16x16xf32>
    %221 = arith.mulf %216, %220 : vector<16x16xf32>
    %cst_70 = arith.constant dense<0.000000e+00> : vector<16x64xf32>
    %222 = tpu.matmul %221, %208, %cst_70 {dimension_numbers = #tpu.dot_dimension_numbers<[1], [0], [0], [1], [0, 0, 1, 1], [], []>} : vector<16x16xf32>, vector<16x64xf32>, vector<16x64xf32> -> vector<16x64xf32>
    %223 = arith.truncf %222 : vector<16x64xf32> to vector<16x64xbf16>
    %224 = vector.extract_strided_slice %35 {offsets = [128, 0], sizes = [64, 384], strides = [1, 1]} : vector<384x384xbf16> to vector<64x384xbf16>
    %cst_71 = arith.constant dense<0.000000e+00> : vector<16x384xf32>
    %225 = tpu.matmul %223, %224, %cst_71 {dimension_numbers = #tpu.dot_dimension_numbers<[1], [0], [0], [1], [0, 0, 1, 1], [], []>} : vector<16x64xbf16>, vector<64x384xbf16>, vector<16x384xf32> -> vector<16x384xf32>
    %226 = arith.addf %205, %225 : vector<16x384xf32>
    %227 = vector.extract_strided_slice %29 {offsets = [16, 192], sizes = [16, 64], strides = [1, 1]} : vector<32x384xf32> to vector<16x64xf32>
    %228 = vector.extract_strided_slice %30 {offsets = [16, 192], sizes = [16, 64], strides = [1, 1]} : vector<32x384xf32> to vector<16x64xf32>
    %229 = vector.extract_strided_slice %31 {offsets = [16, 192], sizes = [16, 64], strides = [1, 1]} : vector<32x384xf32> to vector<16x64xf32>
    %cst_72 = arith.constant dense<0.000000e+00> : vector<16x16xf32>
    %230 = tpu.matmul %227, %228, %cst_72 {dimension_numbers = #tpu.dot_dimension_numbers<[1], [1], [0], [0], [0, 0, 1, 0], [], []>} : vector<16x64xf32>, vector<16x64xf32>, vector<16x16xf32> -> vector<16x16xf32>
    %cst_73 = arith.constant 0xFF800000 : f32
    %231 = vector.broadcast %cst_73 : f32 to vector<16x16xf32>
    %232 = arith.select %34, %230, %231 : vector<16x16xi1>, vector<16x16xf32>
    %cst_74 = arith.constant dense<0xFF800000> : vector<16xf32>
    %233 = vector.multi_reduction <maximumf>, %232, %cst_74 [1] : vector<16x16xf32> to vector<16xf32>
    %234 = vector.shape_cast %233 : vector<16xf32> to vector<16x1xf32>
    %235 = vector.broadcast %234 : vector<16x1xf32> to vector<16x16xf32>
    %236 = arith.subf %232, %235 : vector<16x16xf32>
    %237 = math.exp %236 : vector<16x16xf32>
    %cst_75 = arith.constant dense<0.000000e+00> : vector<16xf32>
    %238 = vector.multi_reduction <add>, %237, %cst_75 [1] : vector<16x16xf32> to vector<16xf32>
    %239 = vector.shape_cast %238 : vector<16xf32> to vector<16x1xf32>
    %240 = tpu.reciprocal %239 {approx = true} : vector<16x1xf32> -> vector<16x1xf32>
    %241 = vector.broadcast %240 : vector<16x1xf32> to vector<16x16xf32>
    %242 = arith.mulf %237, %241 : vector<16x16xf32>
    %cst_76 = arith.constant dense<0.000000e+00> : vector<16x64xf32>
    %243 = tpu.matmul %242, %229, %cst_76 {dimension_numbers = #tpu.dot_dimension_numbers<[1], [0], [0], [1], [0, 0, 1, 1], [], []>} : vector<16x16xf32>, vector<16x64xf32>, vector<16x64xf32> -> vector<16x64xf32>
    %244 = arith.truncf %243 : vector<16x64xf32> to vector<16x64xbf16>
    %245 = vector.extract_strided_slice %35 {offsets = [192, 0], sizes = [64, 384], strides = [1, 1]} : vector<384x384xbf16> to vector<64x384xbf16>
    %cst_77 = arith.constant dense<0.000000e+00> : vector<16x384xf32>
    %246 = tpu.matmul %244, %245, %cst_77 {dimension_numbers = #tpu.dot_dimension_numbers<[1], [0], [0], [1], [0, 0, 1, 1], [], []>} : vector<16x64xbf16>, vector<64x384xbf16>, vector<16x384xf32> -> vector<16x384xf32>
    %247 = arith.addf %226, %246 : vector<16x384xf32>
    %248 = vector.extract_strided_slice %29 {offsets = [16, 256], sizes = [16, 64], strides = [1, 1]} : vector<32x384xf32> to vector<16x64xf32>
    %249 = vector.extract_strided_slice %30 {offsets = [16, 256], sizes = [16, 64], strides = [1, 1]} : vector<32x384xf32> to vector<16x64xf32>
    %250 = vector.extract_strided_slice %31 {offsets = [16, 256], sizes = [16, 64], strides = [1, 1]} : vector<32x384xf32> to vector<16x64xf32>
    %cst_78 = arith.constant dense<0.000000e+00> : vector<16x16xf32>
    %251 = tpu.matmul %248, %249, %cst_78 {dimension_numbers = #tpu.dot_dimension_numbers<[1], [1], [0], [0], [0, 0, 1, 0], [], []>} : vector<16x64xf32>, vector<16x64xf32>, vector<16x16xf32> -> vector<16x16xf32>
    %cst_79 = arith.constant 0xFF800000 : f32
    %252 = vector.broadcast %cst_79 : f32 to vector<16x16xf32>
    %253 = arith.select %34, %251, %252 : vector<16x16xi1>, vector<16x16xf32>
    %cst_80 = arith.constant dense<0xFF800000> : vector<16xf32>
    %254 = vector.multi_reduction <maximumf>, %253, %cst_80 [1] : vector<16x16xf32> to vector<16xf32>
    %255 = vector.shape_cast %254 : vector<16xf32> to vector<16x1xf32>
    %256 = vector.broadcast %255 : vector<16x1xf32> to vector<16x16xf32>
    %257 = arith.subf %253, %256 : vector<16x16xf32>
    %258 = math.exp %257 : vector<16x16xf32>
    %cst_81 = arith.constant dense<0.000000e+00> : vector<16xf32>
    %259 = vector.multi_reduction <add>, %258, %cst_81 [1] : vector<16x16xf32> to vector<16xf32>
    %260 = vector.shape_cast %259 : vector<16xf32> to vector<16x1xf32>
    %261 = tpu.reciprocal %260 {approx = true} : vector<16x1xf32> -> vector<16x1xf32>
    %262 = vector.broadcast %261 : vector<16x1xf32> to vector<16x16xf32>
    %263 = arith.mulf %258, %262 : vector<16x16xf32>
    %cst_82 = arith.constant dense<0.000000e+00> : vector<16x64xf32>
    %264 = tpu.matmul %263, %250, %cst_82 {dimension_numbers = #tpu.dot_dimension_numbers<[1], [0], [0], [1], [0, 0, 1, 1], [], []>} : vector<16x16xf32>, vector<16x64xf32>, vector<16x64xf32> -> vector<16x64xf32>
    %265 = arith.truncf %264 : vector<16x64xf32> to vector<16x64xbf16>
    %266 = vector.extract_strided_slice %35 {offsets = [256, 0], sizes = [64, 384], strides = [1, 1]} : vector<384x384xbf16> to vector<64x384xbf16>
    %cst_83 = arith.constant dense<0.000000e+00> : vector<16x384xf32>
    %267 = tpu.matmul %265, %266, %cst_83 {dimension_numbers = #tpu.dot_dimension_numbers<[1], [0], [0], [1], [0, 0, 1, 1], [], []>} : vector<16x64xbf16>, vector<64x384xbf16>, vector<16x384xf32> -> vector<16x384xf32>
    %268 = arith.addf %247, %267 : vector<16x384xf32>
    %269 = vector.extract_strided_slice %29 {offsets = [16, 320], sizes = [16, 64], strides = [1, 1]} : vector<32x384xf32> to vector<16x64xf32>
    %270 = vector.extract_strided_slice %30 {offsets = [16, 320], sizes = [16, 64], strides = [1, 1]} : vector<32x384xf32> to vector<16x64xf32>
    %271 = vector.extract_strided_slice %31 {offsets = [16, 320], sizes = [16, 64], strides = [1, 1]} : vector<32x384xf32> to vector<16x64xf32>
    %cst_84 = arith.constant dense<0.000000e+00> : vector<16x16xf32>
    %272 = tpu.matmul %269, %270, %cst_84 {dimension_numbers = #tpu.dot_dimension_numbers<[1], [1], [0], [0], [0, 0, 1, 0], [], []>} : vector<16x64xf32>, vector<16x64xf32>, vector<16x16xf32> -> vector<16x16xf32>
    %cst_85 = arith.constant 0xFF800000 : f32
    %273 = vector.broadcast %cst_85 : f32 to vector<16x16xf32>
    %274 = arith.select %34, %272, %273 : vector<16x16xi1>, vector<16x16xf32>
    %cst_86 = arith.constant dense<0xFF800000> : vector<16xf32>
    %275 = vector.multi_reduction <maximumf>, %274, %cst_86 [1] : vector<16x16xf32> to vector<16xf32>
    %276 = vector.shape_cast %275 : vector<16xf32> to vector<16x1xf32>
    %277 = vector.broadcast %276 : vector<16x1xf32> to vector<16x16xf32>
    %278 = arith.subf %274, %277 : vector<16x16xf32>
    %279 = math.exp %278 : vector<16x16xf32>
    %cst_87 = arith.constant dense<0.000000e+00> : vector<16xf32>
    %280 = vector.multi_reduction <add>, %279, %cst_87 [1] : vector<16x16xf32> to vector<16xf32>
    %281 = vector.shape_cast %280 : vector<16xf32> to vector<16x1xf32>
    %282 = tpu.reciprocal %281 {approx = true} : vector<16x1xf32> -> vector<16x1xf32>
    %283 = vector.broadcast %282 : vector<16x1xf32> to vector<16x16xf32>
    %284 = arith.mulf %279, %283 : vector<16x16xf32>
    %cst_88 = arith.constant dense<0.000000e+00> : vector<16x64xf32>
    %285 = tpu.matmul %284, %271, %cst_88 {dimension_numbers = #tpu.dot_dimension_numbers<[1], [0], [0], [1], [0, 0, 1, 1], [], []>} : vector<16x16xf32>, vector<16x64xf32>, vector<16x64xf32> -> vector<16x64xf32>
    %286 = arith.truncf %285 : vector<16x64xf32> to vector<16x64xbf16>
    %287 = vector.extract_strided_slice %35 {offsets = [320, 0], sizes = [64, 384], strides = [1, 1]} : vector<384x384xbf16> to vector<64x384xbf16>
    %cst_89 = arith.constant dense<0.000000e+00> : vector<16x384xf32>
    %288 = tpu.matmul %286, %287, %cst_89 {dimension_numbers = #tpu.dot_dimension_numbers<[1], [0], [0], [1], [0, 0, 1, 1], [], []>} : vector<16x64xbf16>, vector<64x384xbf16>, vector<16x384xf32> -> vector<16x384xf32>
    %289 = arith.addf %268, %288 : vector<16x384xf32>
    %290 = tpu.concatenate %162, %289 in 0 : vector<16x384xf32>, vector<16x384xf32> -> vector<32x384xf32>
    %291 = arith.addf %1, %290 : vector<32x384xf32>
    %c0_90 = arith.constant 0 : index
    %c0_91 = arith.constant 0 : index
    %292 = vector.load %arg5[%c0_90, %c0_91] : memref<1x384xf32, #tpu.memory_space<vmem>>, vector<1x384xf32>
    %293 = vector.broadcast %292 : vector<1x384xf32> to vector<32x384xf32>
    %294 = arith.addf %291, %293 : vector<32x384xf32>
    %c0_92 = arith.constant 0 : index
    %c0_93 = arith.constant 0 : index
    %295 = vector.load %arg6[%c0_92, %c0_93] : memref<1x384xf32, #tpu.memory_space<vmem>>, vector<1x384xf32>
    %c0_94 = arith.constant 0 : index
    %c0_95 = arith.constant 0 : index
    %296 = vector.load %arg7[%c0_94, %c0_95] : memref<1x384xf32, #tpu.memory_space<vmem>>, vector<1x384xf32>
    %cst_96 = arith.constant dense<0.000000e+00> : vector<32xf32>
    %297 = vector.multi_reduction <add>, %294, %cst_96 [1] : vector<32x384xf32> to vector<32xf32>
    %298 = vector.shape_cast %297 : vector<32xf32> to vector<32x1xf32>
    %cst_97 = arith.constant 3.840000e+02 : f32
    %299 = vector.broadcast %cst_97 : f32 to vector<32x1xf32>
    %300 = arith.divf %298, %299 : vector<32x1xf32>
    %301 = vector.broadcast %300 : vector<32x1xf32> to vector<32x384xf32>
    %302 = arith.subf %294, %301 : vector<32x384xf32>
    %303 = arith.mulf %302, %302 : vector<32x384xf32>
    %cst_98 = arith.constant dense<0.000000e+00> : vector<32xf32>
    %304 = vector.multi_reduction <add>, %303, %cst_98 [1] : vector<32x384xf32> to vector<32xf32>
    %305 = vector.shape_cast %304 : vector<32xf32> to vector<32x1xf32>
    %cst_99 = arith.constant 3.840000e+02 : f32
    %306 = vector.broadcast %cst_99 : f32 to vector<32x1xf32>
    %307 = arith.divf %305, %306 : vector<32x1xf32>
    %cst_100 = arith.constant 9.99999974E-6 : f32
    %308 = vector.broadcast %cst_100 : f32 to vector<32x1xf32>
    %309 = arith.addf %307, %308 : vector<32x1xf32>
    %310 = math.rsqrt %309 : vector<32x1xf32>
    %311 = vector.broadcast %310 : vector<32x1xf32> to vector<32x384xf32>
    %312 = arith.mulf %302, %311 : vector<32x384xf32>
    %313 = vector.broadcast %295 : vector<1x384xf32> to vector<32x384xf32>
    %314 = arith.mulf %312, %313 : vector<32x384xf32>
    %315 = vector.broadcast %296 : vector<1x384xf32> to vector<32x384xf32>
    %316 = arith.addf %314, %315 : vector<32x384xf32>
    %317 = arith.truncf %316 : vector<32x384xf32> to vector<32x384xbf16>
    %c0_101 = arith.constant 0 : index
    %c0_102 = arith.constant 0 : index
    %318 = vector.load %arg8[%c0_101, %c0_102] : memref<384x1536xbf16, #tpu.memory_space<vmem>>, vector<384x1536xbf16>
    %cst_103 = arith.constant dense<0.000000e+00> : vector<32x1536xf32>
    %319 = tpu.matmul %317, %318, %cst_103 {dimension_numbers = #tpu.dot_dimension_numbers<[1], [0], [0], [1], [0, 0, 1, 1], [], []>} : vector<32x384xbf16>, vector<384x1536xbf16>, vector<32x1536xf32> -> vector<32x1536xf32>
    %c0_104 = arith.constant 0 : index
    %c0_105 = arith.constant 0 : index
    %320 = vector.load %arg9[%c0_104, %c0_105] : memref<1x1536xf32, #tpu.memory_space<vmem>>, vector<1x1536xf32>
    %321 = vector.broadcast %320 : vector<1x1536xf32> to vector<32x1536xf32>
    %322 = arith.addf %319, %321 : vector<32x1536xf32>
    %cst_106 = arith.constant 0.000000e+00 : f32
    %323 = vector.broadcast %cst_106 : f32 to vector<32x1536xf32>
    %324 = arith.maximumf %322, %323 : vector<32x1536xf32>
    %325 = arith.truncf %324 : vector<32x1536xf32> to vector<32x1536xbf16>
    %c0_107 = arith.constant 0 : index
    %c0_108 = arith.constant 0 : index
    %326 = vector.load %arg10[%c0_107, %c0_108] : memref<1536x384xbf16, #tpu.memory_space<vmem>>, vector<1536x384xbf16>
    %cst_109 = arith.constant dense<0.000000e+00> : vector<32x384xf32>
    %327 = tpu.matmul %325, %326, %cst_109 {dimension_numbers = #tpu.dot_dimension_numbers<[1], [0], [0], [1], [0, 0, 1, 1], [], []>} : vector<32x1536xbf16>, vector<1536x384xbf16>, vector<32x384xf32> -> vector<32x384xf32>
    %c0_110 = arith.constant 0 : index
    %c0_111 = arith.constant 0 : index
    %328 = vector.load %arg11[%c0_110, %c0_111] : memref<1x384xf32, #tpu.memory_space<vmem>>, vector<1x384xf32>
    %329 = vector.broadcast %328 : vector<1x384xf32> to vector<32x384xf32>
    %330 = arith.addf %327, %329 : vector<32x384xf32>
    %331 = arith.addf %294, %330 : vector<32x384xf32>
    %332 = vector.shape_cast %331 : vector<32x384xf32> to vector<2x16x384xf32>
    %c0_112 = arith.constant 0 : index
    %c0_113 = arith.constant 0 : index
    %c0_114 = arith.constant 0 : index
    %333 = vector.load %arg12[%c0_112, %c0_113, %c0_114] : memref<2x16x384xf32, #tpu.memory_space<vmem>>, vector<2x16x384xf32>
    tpu.vector_store %arg12[%c0_112, %c0_113, %c0_114], %332 {strides = array<i32>} : memref<2x16x384xf32, #tpu.memory_space<vmem>>, vector<2x16x384xf32>,
    return
  }
}

</mosaic_0001>

<bundles_post_ra>
// kernel: tpu_custom_call.1
= control target key start
LH: loop header
LB: loop body
LE: loop exit
PB: predicated region body
PF: predicated region fallthrough
CT: control target
= control target key end

     0   :  { %17 = vsyncpa [#allocation3], 0  ;;  %s17032_s0 = inlined_call_operand.hbm [shape: f32[2,16,384], index: 0, kind: input, shape index: {}]   ;;  %s17033_s1 = inlined_call_operand.hbm [shape: f32[1,384], index: 1, kind: input, shape index: {}]   ;;  %s17034_s2 = inlined_call_operand.hbm [shape: f32[1,384], index: 2, kind: input, shape index: {}]   ;;  %s17035_s3 = inlined_call_operand.hbm [shape: bf16[384,1152], index: 3, kind: input, shape index: {}]   ;;  %s17036_s4 = inlined_call_operand.hbm [shape: bf16[384,384], index: 4, kind: input, shape index: {}]   ;;  %s17037_s5 = inlined_call_operand.hbm [shape: f32[1,384], index: 5, kind: input, shape index: {}]   ;;  %s17038_s6 = inlined_call_operand.hbm [shape: f32[1,384], index: 6, kind: input, shape index: {}]   ;;  %s17039_s7 = inlined_call_operand.hbm [shape: f32[1,384], index: 7, kind: input, shape index: {}]   ;;  %s17040_s8 = inlined_call_operand.hbm [shape: bf16[384,1536], index: 8, kind: input, shape index: {}]   ;;  %s17041_s9 = inlined_call_operand.hbm [shape: f32[1,1536], index: 9, kind: input, shape index: {}]   ;;  %s17042_s10 = inlined_call_operand.hbm [shape: bf16[1536,384], index: 10, kind: input, shape index: {}]   ;;  %s17043_s11 = inlined_call_operand.hbm [shape: f32[1,384], index: 11, kind: input, shape index: {}]   ;;  %s17044_s12 = inlined_call_operand.hbm [shape: f32[2,16,384], index: 12, kind: output, shape index: {}]  }
   0x1   :  { %18 = vsyncpa [#allocation6], 0 }
   0x2   :  { %19 = vsyncpa [#allocation9], 0 }
   0x3   :  { %20 = vsyncpa [#allocation12], 0 }
   0x4   :  { %21 = vsyncpa [#allocation15], 0 }
   0x5   :  { %22 = vsyncpa [#allocation18], 0 }
   0x6   :  { %23 = vsyncpa [#allocation21], 0  ;;  %s43_s23 = sshll.u32 %s17033_s1, 4  ;;  %s44_s23 = int_to_ptr.hbm [resolvable:$true] %s43_s23 }
   0x7   :  { %24 = vsyncpa [#allocation4], 0  ;;  %s14795_s24 = smov [#allocation5]   ;;  %s64_s28 = sshll.u32 %s17035_s3, 4  ;;  %s65_s28 = int_to_ptr.hbm [resolvable:$true] %s64_s28 }
   0x8   :  { %s45_s25 = sshll.u32 %s14795_s24, 4  ;;  %s14796_s29 = smov [#allocation8]   ;;  %s46_s25 = int_to_ptr.vmem [resolvable:$true] %s45_s25 }
   0x9   :  { %48 = dma.hbm_to_vmem [thread:$0]  %s44_s23, 48, %s46_s25, [#allocation6]  }
   0xa   :  { %s66_s30 = sshll.u32 %s14796_s29, 4  ;;  %s14797_s13 = smov 576   ;;  %s67_s30 = int_to_ptr.vmem [resolvable:$true] %s66_s30 }
   0xb   :  { %s14798_s14 = smov 36   ;;  %s91_s1 = sshll.u32 %s17037_s5, 4  ;;  %s92_s1 = int_to_ptr.hbm [resolvable:$true] %s91_s1 }
   0xc   :  { %72 = dma.hbm_to_vmem [thread:$0]  %s65_s28, 27648, %s67_s30, [#allocation9], %s14797_s13, %s14797_s13, %s14798_s14  }
   0xd   :  { %s14799_s17 = smov [#allocation11]   ;;  %s113_s3 = sshll.u32 %s17039_s7, 4  ;;  %s114_s3 = int_to_ptr.hbm [resolvable:$true] %s113_s3 }
   0xe   :  { %s93_s18 = sshll.u32 %s14799_s17, 4  ;;  %s14800_s21 = smov [#allocation14]   ;;  %s94_s18 = int_to_ptr.vmem [resolvable:$true] %s93_s18 }
   0xf   :  { %96 = dma.hbm_to_vmem [thread:$0]  %s92_s1, 48, %s94_s18, [#allocation12]  }
  0x10   :  { %s115_s22 = sshll.u32 %s14800_s21, 4  ;;  %s137_s25 = sshll.u32 %s17041_s9, 4  ;;  %s116_s22 = int_to_ptr.vmem [resolvable:$true] %s115_s22  ;;  %s138_s25 = int_to_ptr.hbm [resolvable:$true] %s137_s25 }
  0x11   :  { %118 = dma.hbm_to_vmem [thread:$0]  %s114_s3, 48, %s116_s22, [#allocation15]  }
  0x12   :  { %s29_s27 = sshll.u32 %s17032_s0, 4  ;;  %s14801_s28 = smov [#allocation17]   ;;  %s30_s27 = int_to_ptr.hbm [resolvable:$true] %s29_s27 }
  0x13   :  { %s139_s29 = sshll.u32 %s14801_s28, 4  ;;  %s14802_s7 = smov [#allocation2]   ;;  %s140_s29 = int_to_ptr.vmem [resolvable:$true] %s139_s29 }
  0x14   :  { %142 = dma.hbm_to_vmem [thread:$0]  %s138_s25, 192, %s140_s29, [#allocation18]  }
  0x15   :  { %s31_s30 = sshll.u32 %s14802_s7, 4  ;;  %s14803_s13 = smov 384   ;;  %s32_s30 = int_to_ptr.vmem [resolvable:$true] %s31_s30 }
  0x16   :  { %s14804_s14 = smov 24   ;;  %s54_s16 = sshll.u32 %s17034_s2, 4  ;;  %s55_s16 = int_to_ptr.hbm [resolvable:$true] %s54_s16 }
  0x17   :  { %37 = dma.hbm_to_vmem [thread:$0]  %s30_s27, 1536, %s32_s30, [#allocation3], %s14803_s13, %s14803_s13, %s14804_s14  }
  0x18   :  { %s14805_s0 = smov [#allocation7]   ;;  %s77_s19 = sshll.u32 %s17036_s4, 4  ;;  %s78_s19 = int_to_ptr.hbm [resolvable:$true] %s77_s19 }
  0x19   :  { %s56_s1 = sshll.u32 %s14805_s0, 4  ;;  %s14806_s20 = smov [#allocation10]   ;;  %s57_s1 = int_to_ptr.vmem [resolvable:$true] %s56_s1 }
  0x1a   :  { %59 = dma.hbm_to_vmem [thread:$0]  %s55_s16, 48, %s57_s1, [#allocation6]  }
  0x1b   :  { %s79_s3 = sshll.u32 %s14806_s20, 4  ;;  %s14807_s21 = smov 192   ;;  %s80_s3 = int_to_ptr.vmem [resolvable:$true] %s79_s3 }
  0x1c   :  { %s14808_s22 = smov 12   ;;  %s102_s2 = sshll.u32 %s17038_s6, 4  ;;  %s103_s2 = int_to_ptr.hbm [resolvable:$true] %s102_s2 }
  0x1d   :  { %85 = dma.hbm_to_vmem [thread:$0]  %s78_s19, 9216, %s80_s3, [#allocation9], %s14807_s21, %s14807_s21, %s14808_s22  }
  0x1e   :  { %s14809_s25 = smov [#allocation13]   ;;  %s123_s4 = sshll.u32 %s17040_s8, 4  ;;  %s124_s4 = int_to_ptr.hbm [resolvable:$true] %s123_s4 }
  0x1f   :  { %s104_s5 = sshll.u32 %s14809_s25, 4  ;;  %s14810_s28 = smov [#allocation16]   ;;  %s105_s5 = int_to_ptr.vmem [resolvable:$true] %s104_s5 }
  0x20   :  { %107 = dma.hbm_to_vmem [thread:$0]  %s103_s2, 48, %s105_s5, [#allocation12]  }
  0x21   :  { %s125_s29 = sshll.u32 %s14810_s28, 4  ;;  %s14811_s7 = smov 768   ;;  %s126_s29 = int_to_ptr.vmem [resolvable:$true] %s125_s29 }
  0x22   :  { %s14812_s30 = smov 48   ;;  %s147_s6 = sshll.u32 %s17042_s10, 4  ;;  %s148_s6 = int_to_ptr.hbm [resolvable:$true] %s147_s6 }
  0x23   :  { %131 = dma.hbm_to_vmem [thread:$0]  %s124_s4, 36864, %s126_s29, [#allocation15], %s14811_s7, %s14811_s7, %s14812_s30  }
  0x24   :  { %s14813_s16 = smov [#allocation19]   ;;  %s161_s8 = sshll.u32 %s17043_s11, 4  ;;  %s162_s8 = int_to_ptr.hbm [resolvable:$true] %s161_s8 }
  0x25   :  { %s149_s0 = sshll.u32 %s14813_s16, 4  ;;  %s14814_s18 = smov [#allocation20]   ;;  %s150_s0 = int_to_ptr.vmem [resolvable:$true] %s149_s0 }
  0x26   :  { %155 = dma.hbm_to_vmem [thread:$0]  %s148_s6, 36864, %s150_s0, [#allocation18], %s14807_s21, %s14807_s21, %s14808_s22  }
  0x27   :  { %s163_s19 = sshll.u32 %s14814_s18, 4  ;;  %s164_s19 = int_to_ptr.vmem [resolvable:$true] %s163_s19 }
  0x28   :  { %166 = dma.hbm_to_vmem [thread:$0]  %s162_s8, 48, %s164_s19, [#allocation21]  }
  0x29   :  { %14779 = dma.done.wait [#allocation3], 1536  }
  0x2a   :  { %14780 = vsyncadd [#allocation3], 4294965760 }
  0x2b   :  { %14781 = dma.done.wait [#allocation6], 96  }
  0x2c   :  { %14782 = vsyncadd [#allocation6], 4294967200 }
  0x2d   :  { %14783 = dma.done.wait [#allocation9], 36864  }
  0x2e   :  { %14784 = vsyncadd [#allocation9], 4294930432 }
  0x2f   :  { %14785 = dma.done.wait [#allocation12], 96  }
  0x30   :  { %14786 = vsyncadd [#allocation12], 4294967200 }
  0x31   :  { %14787 = dma.done.wait [#allocation15], 36912  }
  0x32   :  { %14788 = vsyncadd [#allocation15], 4294930384 }
  0x33   :  { %14789 = dma.done.wait [#allocation18], 37056  }
  0x34   :  { %14790 = vsyncadd [#allocation18], 4294930240 }
  0x35   :  { %14791 = dma.done.wait [#allocation21], 48  }
  0x36   :  { %14792 = vsyncadd [#allocation21], 4294967248  ;;  %v222_v0 = vld [vmem:[#allocation2 + $0x30] sm:$0xff]  ;;  %v223_v1 = vld [vmem:[#allocation2 + $0x38] sm:$0xff]  ;;  %v14815_v20 = vmov 384.0   ;;  %s14816_s10 = smov 64  }
  0x37   :  { %v224_v2 = vld [vmem:[#allocation2 + $0x40] sm:$0xff]  ;;  %v238_v3 = vadd.f32 %v223_v1, %v222_v0  ;;  %v217_v5 = vld [vmem:[#allocation2 + $0x8] sm:$0xff]  ;;  %v218_v6 = vld [vmem:[#allocation2 + $0x10] sm:$0xff]  ;;  %14339 = vrcp.f32 %v14815_v20  ;;  %vm2373_vm13 = vcmask 523264   ;;  %vm2411_vm15 = vcmask 130048   ;;  %s14817_s11 = smov [#allocation22]  }
  0x38   :  { %v216_v4 = vld [vmem:[#allocation2] sm:$0xff]  ;;  %v225_v8 = vld [vmem:[#allocation2 + $0x48] sm:$0xff]  ;;  %v226_v9 = vld [vmem:[#allocation2 + $0x50] sm:$0xff]  ;;  %s9837_s20 = sshll.u32 %s14817_s11, 4  ;;  %s9839_s22 = sshll.u32 %s17044_s12, 4  ;;  %s9838_s20 = int_to_ptr.vmem [resolvable:$true] %s9837_s20  ;;  %s9840_s22 = int_to_ptr.hbm [resolvable:$true] %s9839_s22 }
  0x39   :  { %v230_v7 = vadd.f32 %v217_v5, %v216_v4  ;;  %v239_v10 = vadd.f32 %v238_v3, %v224_v2  ;;  %v219_v11 = vld [vmem:[#allocation2 + $0x18] sm:$0xff]  ;;  %v220_v12 = vld [vmem:[#allocation2 + $0x20] sm:$0xff]  ;;  %v242_v14 = vadd.f32 %v226_v9, %v225_v8  ;;  %v221_v17 = vld [vmem:[#allocation2 + $0x28] sm:$0xff] }
  0x3a   :  { %v227_v15 = vld [vmem:[#allocation2 + $0x58] sm:$0xff]  ;;  %v234_v16 = vadd.f32 %v220_v12, %v219_v11  ;;  %v10112_v3 = vld [vmem:[#allocation8 + $0x1f8] sm:$0xf] }
  0x3b   :  { %v231_v13 = vadd.f32 %v230_v7, %v218_v6  ;;  %240 = vadd.xlane.f32.xlu1 %v239_v10  ;;  %v243_v18 = vadd.f32 %v242_v14, %v227_v15  ;;  %v13561_v7 = vld [vmem:[#allocation8 + $0x458] sm:$0xf0]  ;;  %v10652_v20 = vld [vmem:[#allocation8 + $0x630] sm:$0xf] }
  0x3c   :  { %v235_v19 = vadd.f32 %v234_v16, %v221_v17  ;;  %v13480_v16 = vld [vmem:[#allocation8 + $0x1d0] sm:$0xf0] }
  0x3d   :  { %232 = vadd.xlane.f32.xlu0 %v231_v13  ;;  %v14340_v21 = vpop.eup %14339  ;;  %v10114_v13 = vld [vmem:[#allocation8 + $0x21c] sm:$0xf0] }
  0x3e   :  { %v247_v22 = vmul.f32 384.0, %v14340_v21  ;;  %vm251_vm0 = vweird.f32 %v14340_v21 }
  0x40   :  { %v248_v23 = vsub.f32 1.0, %v247_v22 }
  0x42   :  { %v249_v24 = vmul.f32 %v14340_v21, %v248_v23 }
  0x43   :  { %244 = vadd.xlane.f32.xlu1 %v243_v18 }
  0x44   :  { %v250_v25 = vadd.f32 %v14340_v21, %v249_v24  ;;  %v13476_v24 = vld [vmem:[#allocation8 + $0x1b4] sm:$0xf] }
  0x45   :  { %236 = vadd.xlane.f32.xlu0 %v235_v19  ;;  %v13552_v19 = vld [vmem:[#allocation8 + $0x410] sm:$0xf0] }
  0x46   :  { %v14922_v26 = vsel %vm251_vm0, %v14340_v21, %v250_v25  ;;  %v13624_v21 = vld [vmem:[#allocation8 + $0x650] sm:$0xf0]  ;;  %v10078_v25 = vld [vmem:[#allocation8 + $0x1d4] sm:$0xf0] }
  0x47   :  { %17100 = vst [vmem:[#allocation31_spill] sm:$0xff] %v14922_v26  ;;  %v10653_v23 = vor.u32 %v13624_v21, %v10652_v20  ;;  %v13440_v21 = vld [vmem:[#allocation8 + $0x94] sm:$0xf] }
  0xae   :  { %v241_v27 = vpop.xlane.xlu1 %240 }
  0xaf   :  { %v255_v28 = vmul.f32 %v14922_v26, %v241_v27  ;;  %v10081_v27 = vor.u32 %v13476_v24, %v10078_v25  ;;  %v9896_v25 = vld [vmem:[#allocation8 + $0x48] sm:$0xf] }
  0xb0   :  { %v233_v29 = vpop.xlane.xlu0 %232 }
  0xb1   :  { %v253_v30 = vmul.f32 %v14922_v26, %v233_v29  ;;  %v14926_v31 = vsub.f32 %v222_v0, %v255_v28  ;;  %v14928_v32 = vsub.f32 %v223_v1, %v255_v28  ;;  %v14930_v33 = vsub.f32 %v224_v2, %v255_v28  ;;  %v10040_v28 = vld [vmem:[#allocation8 + $0x168] sm:$0xf]  ;;  %v13471_v29 = vld [vmem:[#allocation8 + $0x188] sm:$0xf0] }
  0xb3   :  { %v14932_v34 = vsub.f32 %v216_v4, %v253_v30  ;;  %v14934_v35 = vsub.f32 %v217_v5, %v253_v30  ;;  %v14936_v36 = vsub.f32 %v218_v6, %v253_v30  ;;  %v275_v37 = vmul.f32 %v14926_v31, %v14926_v31  ;;  %v13489_v4 = vld [vmem:[#allocation8 + $0x218] sm:$0xf0]  ;;  %v10400_v5 = vld [vmem:[#allocation8 + $0x438] sm:$0xf]  ;;  %v10328_v30 = vld [vmem:[#allocation8 + $0x3a8] sm:$0xf] }
  0xb4   :  { %v276_v38 = vmul.f32 %v14928_v32, %v14928_v32  ;;  %v277_v39 = vmul.f32 %v14930_v33, %v14930_v33  ;;  %v10113_v6 = vor.u32 %v13489_v4, %v10112_v3  ;;  %v10401_v10 = vor.u32 %v13561_v7, %v10400_v5  ;;  %v13525_v4 = vld [vmem:[#allocation8 + $0x338] sm:$0xf0]  ;;  %v10544_v5 = vld [vmem:[#allocation8 + $0x558] sm:$0xf] }
  0xb5   :  { %v269_v40 = vmul.f32 %v14932_v34, %v14932_v34  ;;  %v270_v41 = vmul.f32 %v14934_v35, %v14934_v35  ;;  %v271_v44 = vmul.f32 %v14936_v36, %v14936_v36 }
  0xb6   :  { %v289_v42 = vadd.f32 %v276_v38, %v275_v37  ;;  %v245_v43 = vpop.xlane.xlu1 %244  ;;  %1745 = vmatpush.bf16.msra.mxu0 %v10113_v6  ;;  %1764 = vmatpush.bf16.msra.mxu1 %v10401_v10  ;;  %v10041_v37 = vor.u32 %v13471_v29, %v10040_v28  ;;  %v13543_v38 = vld [vmem:[#allocation8 + $0x3c8] sm:$0xf0]  ;;  %v13597_v6 = vld [vmem:[#allocation8 + $0x578] sm:$0xf0]  ;;  %v9970_v10 = vld [vmem:[#allocation8 + $0xfc] sm:$0xf0] }
  0xb7   :  { %v281_v45 = vadd.f32 %v270_v41, %v269_v40  ;;  %v256_v46 = vmul.f32 %v14922_v26, %v245_v43  ;;  %v13615_v40 = vld [vmem:[#allocation8 + $0x608] sm:$0xf0]  ;;  %v10329_v41 = vor.u32 %v13543_v38, %v10328_v30  ;;  %v10184_v28 = vld [vmem:[#allocation8 + $0x288] sm:$0xf] }
  0xb8   :  { %v237_v47 = vpop.xlane.xlu0 %236  ;;  %v290_v48 = vadd.f32 %v289_v42, %v277_v39  ;;  %v10616_v39 = vld [vmem:[#allocation8 + $0x5e8] sm:$0xf]  ;;  %v13467_v43 = vld [vmem:[#allocation8 + $0x16c] sm:$0xf] }
  0xb9   :  { %v254_v49 = vmul.f32 %v14922_v26, %v237_v47  ;;  %v282_v50 = vadd.f32 %v281_v45, %v271_v44  ;;  %v14952_v51 = vsub.f32 %v225_v8, %v256_v46  ;;  %v14954_v52 = vsub.f32 %v226_v9, %v256_v46  ;;  %v10688_v8 = vld [vmem:[#allocation8 + $0x678] sm:$0xf]  ;;  %v13633_v9 = vld [vmem:[#allocation8 + $0x698] sm:$0xf0]  ;;  %v10042_v44 = vld [vmem:[#allocation8 + $0x18c] sm:$0xf0] }
  0xba   :  { %v14956_v53 = vsub.f32 %v227_v15, %v256_v46  ;;  %291 = vadd.xlane.f32.xlu0 %v290_v48  ;;  %v10076_v15 = vld [vmem:[#allocation8 + $0x1b0] sm:$0xf]  ;;  %v10617_v42 = vor.u32 %v13615_v40, %v10616_v39  ;;  %v10045_v45 = vor.u32 %v13467_v43, %v10042_v44  ;;  %v10004_v46 = vld [vmem:[#allocation8 + $0x120] sm:$0xf]  ;;  %v13462_v47 = vld [vmem:[#allocation8 + $0x140] sm:$0xf0] }
  0xbb   :  { %v14958_v54 = vsub.f32 %v219_v11, %v254_v49  ;;  %v14960_v55 = vsub.f32 %v220_v12, %v254_v49  ;;  %v14962_v56 = vsub.f32 %v221_v17, %v254_v49  ;;  %283 = vadd.xlane.f32.xlu2 %v282_v50  ;;  %v278_v57 = vmul.f32 %v14952_v51, %v14952_v51  ;;  %v13485_v12 = vld [vmem:[#allocation8 + $0x1fc] sm:$0xf]  ;;  %v10364_v17 = vld [vmem:[#allocation8 + $0x3f0] sm:$0xf]  ;;  %v10292_v48 = vld [vmem:[#allocation8 + $0x360] sm:$0xf] }
  0xbc   :  { %v279_v58 = vmul.f32 %v14954_v52, %v14954_v52  ;;  %v280_v59 = vmul.f32 %v14956_v53, %v14956_v53  ;;  %v10689_v11 = vor.u32 %v13633_v9, %v10688_v8  ;;  %v10117_v14 = vor.u32 %v13485_v12, %v10114_v13  ;;  %v13534_v50 = vld [vmem:[#allocation8 + $0x380] sm:$0xf0]  ;;  %v13449_v9 = vld [vmem:[#allocation8 + $0xdc] sm:$0xf]  ;;  %v9932_v12 = vld [vmem:[#allocation8 + $0x90] sm:$0xf] }
  0xbd   :  { %v272_v60 = vmul.f32 %v14958_v54, %v14958_v54  ;;  %v273_v61 = vmul.f32 %v14960_v55, %v14960_v55  ;;  %v274_v63 = vmul.f32 %v14962_v56, %v14962_v56  ;;  %v10077_v18 = vor.u32 %v13480_v16, %v10076_v15  ;;  %v13444_v13 = vld [vmem:[#allocation8 + $0xb0] sm:$0xf0]  ;;  %v13507_v38 = vld [vmem:[#allocation8 + $0x2a8] sm:$0xf0]  ;;  %v10472_v39 = vld [vmem:[#allocation8 + $0x4c8] sm:$0xf] }
  0xbe   :  { %v293_v62 = vadd.f32 %v279_v58, %v278_v57  ;;  %1783 = vmatpush.bf16.msra.mxu2 %v10689_v11  ;;  %1802 = vmatpush.bf16.msra.mxu3 %v10117_v14  ;;  %v10365_v22 = vor.u32 %v13552_v19, %v10364_v17  ;;  %v10005_v49 = vor.u32 %v13462_v47, %v10004_v46  ;;  %v10580_v57 = vld [vmem:[#allocation8 + $0x5a0] sm:$0xf]  ;;  %v13606_v58 = vld [vmem:[#allocation8 + $0x5c0] sm:$0xf0]  ;;  %v10220_v14 = vld [vmem:[#allocation8 + $0x2d0] sm:$0xf] }
  0xbf   :  { %v285_v0 = vadd.f32 %v273_v61, %v272_v60  ;;  %1746 = vmatpush.bf16.msra.mxu0 %v10077_v18  ;;  %v10581_v60 = vor.u32 %v13606_v58, %v10580_v57  ;;  %v13458_v61 = vld [vmem:[#allocation8 + $0x124] sm:$0xf]  ;;  %v10545_v8 = vor.u32 %v13597_v6, %v10544_v5  ;;  %v9973_v11 = vor.u32 %v13449_v9, %v9970_v10  ;;  %v13516_v16 = vld [vmem:[#allocation8 + $0x2f0] sm:$0xf0]  ;;  %v10508_v17 = vld [vmem:[#allocation8 + $0x510] sm:$0xf] }
  0xc0   :  { %v294_v1 = vadd.f32 %v293_v62, %v280_v59  ;;  %1765 = vmatpush.bf16.msra.mxu1 %v10365_v22  ;;  %v10293_v59 = vor.u32 %v13534_v50, %v10292_v48  ;;  %v10006_v62 = vld [vmem:[#allocation8 + $0x144] sm:$0xf0]  ;;  %v9933_v15 = vor.u32 %v13444_v13, %v9932_v12  ;;  %v13588_v18 = vld [vmem:[#allocation8 + $0x530] sm:$0xf0]  ;;  %v10221_v19 = vor.u32 %v13516_v16, %v10220_v14  ;;  %v9934_v22 = vld [vmem:[#allocation8 + $0xb4] sm:$0xf0] }
  0xc1   :  { %v286_v2 = vadd.f32 %v285_v0, %v274_v63  ;;  %v10009_v63 = vor.u32 %v13458_v61, %v10006_v62  ;;  %v9968_v0 = vld [vmem:[#allocation8 + $0xd8] sm:$0xf]  ;;  %v10509_v20 = vor.u32 %v13588_v18, %v10508_v17  ;;  %v13579_v40 = vld [vmem:[#allocation8 + $0x4e8] sm:$0xf0]  ;;  %v13426_v50 = vld [vmem:[#allocation8 + $0x20] sm:$0xf0] }
  0xc2   :  { %295 = vadd.xlane.f32.xlu1 %v294_v1  ;;  %1784 = vmatpush.bf16.msra.mxu2 %v10653_v23  ;;  %v13453_v1 = vld [vmem:[#allocation8 + $0xf8] sm:$0xf0]  ;;  %v9937_v23 = vor.u32 %v13440_v21, %v9934_v22  ;;  %v10473_v43 = vor.u32 %v13579_v40, %v10472_v39  ;;  %v13431_v44 = vld [vmem:[#allocation8 + $0x4c] sm:$0xf]  ;;  %v10148_v58 = vld [vmem:[#allocation8 + $0x240] sm:$0xf] }
  0xc3   :  { %287 = vadd.xlane.f32.xlu2 %v286_v2  ;;  %1803 = vmatpush.bf16.msra.mxu3 %v10081_v27  ;;  %v10256_v2 = vld [vmem:[#allocation8 + $0x318] sm:$0xf]  ;;  %v9969_v3 = vor.u32 %v13453_v1, %v9968_v0  ;;  %v13435_v27 = vld [vmem:[#allocation8 + $0x68] sm:$0xf0]  ;;  %v13570_v62 = vld [vmem:[#allocation8 + $0x4a0] sm:$0xf0] }
  0xc4   :  { %1747 = vmatpush.bf16.msra.mxu0 %v10041_v37  ;;  %1766 = vmatpush.bf16.msra.mxu1 %v10329_v41  ;;  %v10257_v7 = vor.u32 %v13525_v4, %v10256_v2  ;;  %v9897_v37 = vor.u32 %v13435_v27, %v9896_v25  ;;  %v9862_v0 = vld [vmem:[#allocation8 + $0x24] sm:$0xf0]  ;;  %v13557_v6 = vld [vmem:[#allocation8 + $0x43c] sm:$0xf]  ;;  %v10120_v12 = vld [vmem:[#allocation8 + $0x200] sm:$0xf] }
  0xc5   :  { %v13490_v13 = vld [vmem:[#allocation8 + $0x220] sm:$0xf0]  ;;  %v10408_v17 = vld [vmem:[#allocation8 + $0x440] sm:$0xf]  ;;  %v13548_v22 = vld [vmem:[#allocation8 + $0x3f4] sm:$0xf] }
  0xc6   :  { %1785 = vmatpush.bf16.msra.mxu2 %v10617_v42  ;;  %v10185_v42 = vor.u32 %v13507_v38, %v10184_v28  ;;  %v10121_v16 = vor.u32 %v13490_v13, %v10120_v12  ;;  %v13562_v18 = vld [vmem:[#allocation8 + $0x460] sm:$0xf0]  ;;  %v13620_v27 = vld [vmem:[#allocation8 + $0x634] sm:$0xf]  ;;  %v10654_v28 = vld [vmem:[#allocation8 + $0x654] sm:$0xf0] }
  0xc7   :  { %1804 = vmatpush.bf16.msra.mxu3 %v10045_v45  ;;  %v9898_v45 = vld [vmem:[#allocation8 + $0x6c] sm:$0xf0]  ;;  %v10409_v21 = vor.u32 %v13562_v18, %v10408_v17  ;;  %v10657_v39 = vor.u32 %v13620_v27, %v10654_v28  ;;  %v229_v12 = vld [vmem:[#allocation7] sm:$0x7]  ;;  %v10012_v17 = vld [vmem:[#allocation8 + $0x128] sm:$0xf] }
  0xc8   :  { %1748 = vmatpush.bf16.msra.mxu0 %v10005_v49  ;;  %1767 = vmatpush.bf16.msra.mxu1 %v10293_v59  ;;  %v9901_v47 = vor.u32 %v13431_v44, %v9898_v45  ;;  %v9860_v49 = vld [vmem:[#allocation8] sm:$0xf]  ;;  %v13498_v59 = vld [vmem:[#allocation8 + $0x260] sm:$0xf0]  ;;  %v13463_v18 = vld [vmem:[#allocation8 + $0x148] sm:$0xf0] }
  0xc9   :  { %v9861_v57 = vor.u32 %v13426_v50, %v9860_v49  ;;  %v10149_v61 = vor.u32 %v13498_v59, %v10148_v58  ;;  %v13611_v49 = vld [vmem:[#allocation8 + $0x5ec] sm:$0xf]  ;;  %v10618_v58 = vld [vmem:[#allocation8 + $0x60c] sm:$0xf0] }
  0xca   :  { %1786 = vmatpush.bf16.msra.mxu2 %v10581_v60  ;;  %v10436_v60 = vld [vmem:[#allocation8 + $0x480] sm:$0xf]  ;;  %v10048_v59 = vld [vmem:[#allocation8 + $0x170] sm:$0xf] }
  0xcb   :  { %1805 = vmatpush.bf16.msra.mxu3 %v10009_v63  ;;  %v13422_v63 = vld [vmem:[#allocation8 + $0x4] sm:$0xf]  ;;  %v10437_v1 = vor.u32 %v13570_v62, %v10436_v60  ;;  %v228_v60 = vld [vmem:[#allocation5] sm:$0x7]  ;;  %v13472_v62 = vld [vmem:[#allocation8 + $0x190] sm:$0xf0] }
  0xcc   :  { %1749 = vmatpush.bf16.msra.mxu0 %v9969_v3  ;;  %1768 = vmatpush.bf16.msra.mxu1 %v10257_v7  ;;  %v9865_v2 = vor.u32 %v13422_v63, %v9862_v0  ;;  %v10402_v7 = vld [vmem:[#allocation8 + $0x45c] sm:$0xf0]  ;;  %v10336_v63 = vld [vmem:[#allocation8 + $0x3b0] sm:$0xf]  ;;  %v15018_v28 = vperm.slane %v228_v60, 2 }
  0xcd   :  { %v10405_v10 = vor.u32 %v13557_v6, %v10402_v7 }
  0xce   :  { %1787 = vmatpush.bf16.msra.mxu2 %v10545_v8  ;;  %v13629_v8 = vld [vmem:[#allocation8 + $0x67c] sm:$0xf] }
  0xcf   :  { %1806 = vmatpush.bf16.msra.mxu3 %v9973_v11  ;;  %v10690_v11 = vld [vmem:[#allocation8 + $0x69c] sm:$0xf0] }
  0xd0   :  { %1750 = vmatpush.bf16.msra.mxu0 %v9933_v15  ;;  %1769 = vmatpush.bf16.msra.mxu1 %v10221_v19  ;;  %v10693_v15 = vor.u32 %v13629_v8, %v10690_v11  ;;  %v10582_v11 = vld [vmem:[#allocation8 + $0x5c4] sm:$0xf0] }
  0xd2   :  { %1788 = vmatpush.bf16.msra.mxu2 %v10509_v20 }
  0xd3   :  { %1807 = vmatpush.bf16.msra.mxu3 %v9937_v23  ;;  %v10366_v23 = vld [vmem:[#allocation8 + $0x414] sm:$0xf0] }
  0xd4   :  { %1751 = vmatpush.bf16.msra.mxu0 %v9897_v37  ;;  %1770 = vmatpush.bf16.msra.mxu1 %v10185_v42  ;;  %v13481_v37 = vld [vmem:[#allocation8 + $0x1d8] sm:$0xf0] }
  0xd5   :  { %v13553_v42 = vld [vmem:[#allocation8 + $0x418] sm:$0xf0] }
  0xd6   :  { %1789 = vmatpush.bf16.msra.mxu2 %v10473_v43  ;;  %v13539_v43 = vld [vmem:[#allocation8 + $0x3ac] sm:$0xf] }
  0xd7   :  { %1808 = vmatpush.bf16.msra.mxu3 %v9901_v47  ;;  %v10330_v47 = vld [vmem:[#allocation8 + $0x3cc] sm:$0xf0] }
  0xd8   :  { %1752 = vmatpush.bf16.msra.mxu0 %v9861_v57  ;;  %1771 = vmatpush.bf16.msra.mxu1 %v10149_v61  ;;  %v10333_v57 = vor.u32 %v13539_v43, %v10330_v47  ;;  %v10621_v61 = vor.u32 %v13611_v49, %v10618_v58  ;;  %v13593_v43 = vld [vmem:[#allocation8 + $0x55c] sm:$0xf] }
  0xda   :  { %1790 = vmatpush.bf16.msra.mxu2 %v10437_v1 }
  0xdb   :  { %1809 = vmatpush.bf16.msra.mxu3 %v9865_v2  ;;  %v10049_v2 = vor.u32 %v13472_v62, %v10048_v59  ;;  %v13526_v59 = vld [vmem:[#allocation8 + $0x340] sm:$0xf0] }
  0xdc   :  { %1821 = vmatpush.bf16.msrb.mxu0 %v10405_v10  ;;  %1840 = vmatpush.bf16.msrb.mxu1 %v10693_v15  ;;  %v13602_v10 = vld [vmem:[#allocation8 + $0x5a4] sm:$0xf] }
  0xde   :  { %1859 = vmatpush.bf16.msrb.mxu2 %v10121_v16 }
  0xdf   :  { %1878 = vmatpush.bf16.msrb.mxu3 %v10409_v21  ;;  %v10585_v21 = vor.u32 %v13602_v10, %v10582_v11 }
  0xe0   :  { %1841 = vmatpush.bf16.msrb.mxu1 %v10657_v39 }
  0xe4   :  { %1842 = vmatpush.bf16.msrb.mxu1 %v10621_v61  ;;  %v10222_v61 = vld [vmem:[#allocation8 + $0x2f4] sm:$0xf0] }
  0xe8   :  { %1843 = vmatpush.bf16.msrb.mxu1 %v10585_v21  ;;  %v13575_v21 = vld [vmem:[#allocation8 + $0x4cc] sm:$0xf] }
 0x12d   :  { %v292_v24 = vpop.xlane.xlu0 %291 }
 0x12e   :  { %v284_v29 = vpop.xlane.xlu2 %283  ;;  %v299_v30 = vmul.f32 %v292_v24, %v14922_v26 }
 0x12f   :  { %v297_v41 = vmul.f32 %v284_v29, %v14922_v26  ;;  %v10369_v29 = vor.u32 %v13548_v22, %v10366_v23  ;;  %v10013_v22 = vor.u32 %v13463_v18, %v10012_v17  ;;  %v15012_v23 = vperm.slane %v228_v60, 0  ;;  %v10186_v18 = vld [vmem:[#allocation8 + $0x2ac] sm:$0xf0] }
 0x130   :  { %v14978_v46 = vadd.f32 1e-05, %v299_v30  ;;  %v10084_v30 = vld [vmem:[#allocation8 + $0x1b8] sm:$0xf] }
 0x131   :  { %v14980_v48 = vadd.f32 1e-05, %v297_v41  ;;  %v10085_v40 = vor.u32 %v13481_v37, %v10084_v30  ;;  %v10372_v41 = vld [vmem:[#allocation8 + $0x3f8] sm:$0xf]  ;;  %1822 = vmatpush.bf16.msrb.mxu0 %v10369_v29  ;;  %v15020_v29 = vperm.slane %v229_v12, 0  ;;  %v15022_v30 = vperm.slane %v229_v12, 1 }
 0x132   :  { %v10373_v45 = vor.u32 %v13553_v42, %v10372_v41  ;;  %v13521_v41 = vld [vmem:[#allocation8 + $0x31c] sm:$0xf]  ;;  %v10258_v42 = vld [vmem:[#allocation8 + $0x33c] sm:$0xf0]  ;;  %vm331_vm7 = vweird.f32 %v14978_v46 }
 0x133   :  { %14341 = vrsqrt.f32 %v14980_v48  ;;  %1860 = vmatpush.bf16.msrb.mxu2 %v10085_v40  ;;  %vm311_vm2 = vweird.f32 %v14980_v48 }
 0x134   :  { %14343 = vrsqrt.f32 %v14978_v46  ;;  %1879 = vmatpush.bf16.msrb.mxu3 %v10373_v45  ;;  %v9976_v45 = vld [vmem:[#allocation8 + $0xe0] sm:$0xf] }
 0x135   :  { %v296_v3 = vpop.xlane.xlu1 %295  ;;  %1823 = vmatpush.bf16.msrb.mxu0 %v10333_v57  ;;  %v10264_v57 = vld [vmem:[#allocation8 + $0x320] sm:$0xf] }
 0x136   :  { %v300_v4 = vmul.f32 %v296_v3, %v14922_v26  ;;  %v288_v5 = vpop.xlane.xlu2 %287  ;;  %v13544_v3 = vld [vmem:[#allocation8 + $0x3d0] sm:$0xf0]  ;;  %v10265_v11 = vor.u32 %v13526_v59, %v10264_v57  ;;  %v10192_v57 = vld [vmem:[#allocation8 + $0x290] sm:$0xf] }
 0x137   :  { %v298_v9 = vmul.f32 %v288_v5, %v14922_v26  ;;  %v10337_v8 = vor.u32 %v13544_v3, %v10336_v63  ;;  %1861 = vmatpush.bf16.msrb.mxu2 %v10049_v2  ;;  %v13584_v3 = vld [vmem:[#allocation8 + $0x514] sm:$0xf] }
 0x138   :  { %v14986_v14 = vadd.f32 1e-05, %v300_v4  ;;  %v13530_v4 = vld [vmem:[#allocation8 + $0x364] sm:$0xf] }
 0x139   :  { %v14988_v19 = vpop.eup %14341  ;;  %v14990_v20 = vadd.f32 1e-05, %v298_v9  ;;  %v10294_v9 = vld [vmem:[#allocation8 + $0x384] sm:$0xf0]  ;;  %1880 = vmatpush.bf16.msrb.mxu3 %v10337_v8 }
 0x13a   :  { %v14992_v24 = vpop.eup %14343  ;;  %v306_v25 = vmul.f32 %v14988_v19, %v14980_v48  ;;  %14345 = vrsqrt.f32 %v14986_v14  ;;  %vm312_vm1 = vweird.f32 %v14988_v19  ;;  %v10297_v16 = vor.u32 %v13530_v4, %v10294_v9  ;;  %v13535_v48 = vld [vmem:[#allocation8 + $0x388] sm:$0xf0]  ;;  %v10510_v4 = vld [vmem:[#allocation8 + $0x534] sm:$0xf0]  ;;  %v13445_v9 = vld [vmem:[#allocation8 + $0xb8] sm:$0xf0] }
 0x13b   :  { %14347 = vrsqrt.f32 %v14990_v20  ;;  %v326_v44 = vmul.f32 %v14992_v24, %v14978_v46  ;;  %vm313_vm3 = vmor %vm311_vm2, %vm312_vm1  ;;  %1862 = vmatpush.bf16.msrb.mxu2 %v10013_v22  ;;  %vm321_vm5 = vweird.f32 %v14990_v20  ;;  %vm341_vm8 = vweird.f32 %v14986_v14  ;;  %v10474_v22 = vld [vmem:[#allocation8 + $0x4ec] sm:$0xf0] }
 0x13c   :  { %v307_v38 = vmul.f32 %v14988_v19, %v306_v25  ;;  %v15014_v25 = vperm.slane %v228_v60, 1  ;;  %1824 = vmatpush.bf16.msrb.mxu0 %v10297_v16  ;;  %v13512_v60 = vld [vmem:[#allocation8 + $0x2d4] sm:$0xf]  ;;  %v10513_v17 = vor.u32 %v13584_v3, %v10510_v4  ;;  %vm332_vm10 = vweird.f32 %v14992_v24 }
 0x13d   :  { %v327_v6 = vmul.f32 %v14992_v24, %v326_v44  ;;  %v10546_v44 = vld [vmem:[#allocation8 + $0x57c] sm:$0xf0]  ;;  %v10225_v16 = vor.u32 %v13512_v60, %v10222_v61  ;;  %vm15084_vm12 = vmor %vm331_vm7, %vm332_vm10 }
 0x13e   :  { %v308_v50 = vmul.f32 0.5, %v307_v38  ;;  %v10300_v38 = vld [vmem:[#allocation8 + $0x368] sm:$0xf]  ;;  %v10549_v2 = vor.u32 %v13593_v43, %v10546_v44  ;;  %v9904_v43 = vld [vmem:[#allocation8 + $0x50] sm:$0xf] }
 0x13f   :  { %v15026_v37 = vmul.f32 0.5, %v327_v6  ;;  %v10301_v63 = vor.u32 %v13535_v48, %v10300_v38  ;;  %v15036_v6 = vperm.slane %v229_v12, 2  ;;  %v13517_v12 = vld [vmem:[#allocation8 + $0x2f8] sm:$0xf0]  ;;  %v13436_v44 = vld [vmem:[#allocation8 + $0x70] sm:$0xf0] }
 0x140   :  { %v15001_v0 = vpop.eup %14345  ;;  %v309_v1 = vsub.f32 1.5, %v308_v50  ;;  %v13454_v50 = vld [vmem:[#allocation8 + $0x100] sm:$0xf0]  ;;  %1844 = vmatpush.bf16.msrb.mxu1 %v10549_v2 }
 0x141   :  { %v15003_v5 = vpop.eup %14347  ;;  %v336_v7 = vmul.f32 %v15001_v0, %v14986_v14  ;;  %v329_v8 = vsub.f32 1.5, %v15026_v37  ;;  %1881 = vmatpush.bf16.msrb.mxu3 %v10301_v63  ;;  %vm342_vm9 = vweird.f32 %v15001_v0  ;;  %v9905_v63 = vor.u32 %v13436_v44, %v9904_v43  ;;  %v10626_v14 = vld [vmem:[#allocation8 + $0x614] sm:$0xf0] }
 0x142   :  { %v310_v13 = vmul.f32 %v14988_v19, %v309_v1  ;;  %v316_v15 = vmul.f32 %v15003_v5, %v14990_v20  ;;  %vm322_vm4 = vweird.f32 %v15003_v5  ;;  %v10261_v1 = vor.u32 %v13521_v41, %v10258_v42  ;;  %v9940_v20 = vld [vmem:[#allocation8 + $0x98] sm:$0xf]  ;;  %vm15072_vm11 = vmor %vm341_vm8, %vm342_vm9 }
 0x143   :  { %v337_v27 = vmul.f32 %v15001_v0, %v336_v7  ;;  %vm15042_vm6 = vmor %vm321_vm5, %vm322_vm4 }
 0x144   :  { %v314_v39 = vsel %vm313_vm3, %v14988_v19, %v310_v13  ;;  %v317_v40 = vmul.f32 %v15003_v5, %v316_v15  ;;  %v13503_v13 = vld [vmem:[#allocation8 + $0x28c] sm:$0xf]  ;;  %1825 = vmatpush.bf16.msrb.mxu0 %v10261_v1  ;;  %1845 = vmatpush.bf16.msrb.mxu1 %v10513_v17  ;;  %v13566_v1 = vld [vmem:[#allocation8 + $0x484] sm:$0xf]  ;;  %v10696_v17 = vld [vmem:[#allocation8 + $0x680] sm:$0xf] }
 0x145   :  { %v15030_v47 = vmul.f32 0.5, %v337_v27  ;;  %v345_v58 = vmul.f32 %v314_v39, %v14932_v34  ;;  %v346_v19 = vmul.f32 %v314_v39, %v14934_v35  ;;  %v347_v7 = vmul.f32 %v314_v39, %v14936_v36  ;;  %v10228_v36 = vld [vmem:[#allocation8 + $0x2d8] sm:$0xf]  ;;  %1882 = vmatpush.bf16.msrb.mxu3 %v10265_v11  ;;  %v9868_v34 = vld [vmem:[#allocation8 + $0x8] sm:$0xf] }
 0x146   :  { %v318_v49 = vmul.f32 0.5, %v317_v40  ;;  %v9977_v35 = vor.u32 %v13454_v50, %v9976_v45  ;;  %v9941_v39 = vor.u32 %v13445_v9, %v9940_v20  ;;  %v330_v45 = vmul.f32 %v14992_v24, %v329_v8  ;;  %v10438_v8 = vld [vmem:[#allocation8 + $0x4a4] sm:$0xf0] }
 0x147   :  { %v364_v15 = vmul.f32 %v15012_v23, %v345_v58  ;;  %v365_v27 = vmul.f32 %v15014_v25, %v346_v19  ;;  %v339_v37 = vsub.f32 1.5, %v15030_v47  ;;  %v366_v40 = vmul.f32 %v15018_v28, %v347_v7  ;;  %v10150_v19 = vld [vmem:[#allocation8 + $0x264] sm:$0xf0] }
 0x148   :  { %v319_v62 = vsub.f32 1.5, %v318_v49  ;;  %1863 = vmatpush.bf16.msrb.mxu2 %v9977_v35  ;;  %v10229_v47 = vor.u32 %v13517_v12, %v10228_v36  ;;  %v10189_v49 = vor.u32 %v13503_v13, %v10186_v18  ;;  %v10477_v50 = vor.u32 %v13575_v21, %v10474_v22  ;;  %1826 = vmatpush.bf16.msrb.mxu0 %v10225_v16  ;;  %v13427_v35 = vld [vmem:[#allocation8 + $0x28] sm:$0xf0]  ;;  %v10156_v12 = vld [vmem:[#allocation8 + $0x248] sm:$0xf] }
 0x149   :  { %v383_v59 = vadd.f32 %v15020_v29, %v364_v15  ;;  %v384_v60 = vadd.f32 %v15022_v30, %v365_v27  ;;  %v340_v61 = vmul.f32 %v15001_v0, %v339_v37  ;;  %v385_v2 = vadd.f32 %v15036_v6, %v366_v40  ;;  %v13499_v13 = vld [vmem:[#allocation8 + $0x268] sm:$0xf0]  ;;  %v13634_v18 = vld [vmem:[#allocation8 + $0x6a0] sm:$0xf0]  ;;  %v10122_v37 = vld [vmem:[#allocation8 + $0x224] sm:$0xf0] }
 0x14a   :  { %v320_v10 = vmul.f32 %v15003_v5, %v319_v62  ;;  %1883 = vmatpush.bf16.msrb.mxu3 %v10229_v47  ;;  %1846 = vmatpush.bf16.msrb.mxu1 %v10477_v50  ;;  %v10441_v15 = vor.u32 %v13566_v1, %v10438_v8  ;;  %v9869_v16 = vor.u32 %v13427_v35, %v9868_v34  ;;  %v13486_v21 = vld [vmem:[#allocation8 + $0x204] sm:$0xf]  ;;  %v13477_v47 = vld [vmem:[#allocation8 + $0x1bc] sm:$0xf]  ;;  %v10050_v62 = vld [vmem:[#allocation8 + $0x194] sm:$0xf0] }
 0x14b   :  { %v344_v46 = vsel %vm15072_vm11, %v15001_v0, %v340_v61  ;;  %v334_v22 = vsel %vm15084_vm12, %v14992_v24, %v330_v45  ;;  %v10697_v27 = vor.u32 %v13634_v18, %v10696_v17  ;;  %v10125_v0 = vor.u32 %v13486_v21, %v10122_v37  ;;  %v13625_v45 = vld [vmem:[#allocation8 + $0x658] sm:$0xf0]  ;;  %v13616_v61 = vld [vmem:[#allocation8 + $0x610] sm:$0xf0]  ;;  %v10014_v17 = vld [vmem:[#allocation8 + $0x14c] sm:$0xf0] }
 0x14c   :  { %v324_v38 = vsel %vm15042_vm6, %v15003_v5, %v320_v10  ;;  %1864 = vmatpush.bf16.msrb.mxu2 %v9941_v39  ;;  %1827 = vmatpush.bf16.msrb.mxu0 %v10189_v49  ;;  %v10410_v39 = vld [vmem:[#allocation8 + $0x464] sm:$0xf0]  ;;  %v354_v43 = vmul.f32 %v344_v46, %v14952_v51  ;;  %v355_v24 = vmul.f32 %v344_v46, %v14954_v52  ;;  %v10086_v49 = vld [vmem:[#allocation8 + $0x1dc] sm:$0xf0]  ;;  %v13612_v35 = vld [vmem:[#allocation8 + $0x5f4] sm:$0xf] }
 0x14d   :  { %v348_v48 = vmul.f32 %v324_v38, %v14958_v54  ;;  %v349_v41 = vmul.f32 %v324_v38, %v14960_v55  ;;  %v350_v42 = vmul.f32 %v324_v38, %v14962_v56  ;;  %v13508_v55 = vld [vmem:[#allocation8 + $0x2b0] sm:$0xf0]  ;;  %v13494_v56 = vld [vmem:[#allocation8 + $0x244] sm:$0xf]  ;;  %v10157_v44 = vor.u32 %v13499_v13, %v10156_v12  ;;  %v10588_v13 = vld [vmem:[#allocation8 + $0x5a8] sm:$0xf] }
 0x14e   :  { %v10193_v20 = vor.u32 %v13508_v55, %v10192_v57  ;;  %v10153_v9 = vor.u32 %v13494_v56, %v10150_v19  ;;  %v13558_v38 = vld [vmem:[#allocation8 + $0x444] sm:$0xf]  ;;  %v351_v50 = vmul.f32 %v334_v22, %v14926_v31  ;;  %v356_v57 = vmul.f32 %v344_v46, %v14956_v53  ;;  %1847 = vmatpush.bf16.msrb.mxu1 %v10441_v15  ;;  %v13621_v56 = vld [vmem:[#allocation8 + $0x63c] sm:$0xf]  ;;  %v10662_v19 = vld [vmem:[#allocation8 + $0x65c] sm:$0xf0] }
 0x14f   :  { %v367_v5 = vmul.f32 %v15012_v23, %v348_v48  ;;  %v368_v58 = vmul.f32 %v15014_v25, %v349_v41  ;;  %v369_v54 = vmul.f32 %v15018_v28, %v350_v42  ;;  %v10413_v40 = vor.u32 %v13558_v38, %v10410_v39  ;;  %v13630_v48 = vld [vmem:[#allocation8 + $0x684] sm:$0xf]  ;;  %v10698_v41 = vld [vmem:[#allocation8 + $0x6a4] sm:$0xf0]  ;;  %v10660_v42 = vld [vmem:[#allocation8 + $0x638] sm:$0xf] }
 0x150   :  { %1865 = vmatpush.bf16.msrb.mxu2 %v9905_v63  ;;  %1884 = vmatpush.bf16.msrb.mxu3 %v10193_v20  ;;  %v352_v55 = vmul.f32 %v334_v22, %v14928_v32  ;;  %v10661_v51 = vor.u32 %v13625_v45, %v10660_v42  ;;  %v10089_v52 = vor.u32 %v13477_v47, %v10086_v49  ;;  %v13468_v53 = vld [vmem:[#allocation8 + $0x174] sm:$0xf]  ;;  %v13607_v46 = vld [vmem:[#allocation8 + $0x5c8] sm:$0xf0]  ;;  %v10590_v37 = vld [vmem:[#allocation8 + $0x5cc] sm:$0xf0] }
 0x151   :  { %v386_v3 = vadd.f32 %v15020_v29, %v367_v5  ;;  %v387_v4 = vadd.f32 %v15022_v30, %v368_v58  ;;  %v388_v7 = vadd.f32 %v15036_v6, %v369_v54  ;;  %1828 = vmatpush.bf16.msrb.mxu0 %v10153_v9  ;;  %v10701_v5 = vor.u32 %v13630_v48, %v10698_v41  ;;  %v13549_v58 = vld [vmem:[#allocation8 + $0x3fc] sm:$0xf]  ;;  %v10374_v54 = vld [vmem:[#allocation8 + $0x41c] sm:$0xf0]  ;;  %v13540_v32 = vld [vmem:[#allocation8 + $0x3b4] sm:$0xf] }
 0x152   :  { %v10377_v31 = vor.u32 %v13549_v58, %v10374_v54  ;;  %v373_v63 = vmul.f32 %v15012_v23, %v354_v43  ;;  %v374_v1 = vmul.f32 %v15014_v25, %v355_v24  ;;  %v10053_v34 = vor.u32 %v13468_v53, %v10050_v62  ;;  %v13531_v18 = vld [vmem:[#allocation8 + $0x36c] sm:$0xf]  ;;  %v13598_v43 = vld [vmem:[#allocation8 + $0x580] sm:$0xf0]  ;;  %v10266_v45 = vld [vmem:[#allocation8 + $0x344] sm:$0xf0] }
 0x153   :  { %v15088_v10 = vpack.c.bf16 %v386_v3, %v383_v59  ;;  %v15090_v11 = vpack.c.bf16 %v387_v4, %v384_v60  ;;  %v15092_v36 = vpack.c.bf16 %v388_v7, %v385_v2  ;;  %v10624_v59 = vld [vmem:[#allocation8 + $0x5f0] sm:$0xf]  ;;  %v353_v60 = vmul.f32 %v334_v22, %v14930_v33  ;;  %v10338_v2 = vld [vmem:[#allocation8 + $0x3d4] sm:$0xf0]  ;;  %v13450_v24 = vld [vmem:[#allocation8 + $0xe4] sm:$0xf] }
 0x154   :  { %1866 = vmatpush.bf16.msrb.mxu2 %v9869_v16  ;;  %1885 = vmatpush.bf16.msrb.mxu3 %v10157_v44  ;;  %v370_v3 = vmul.f32 %v15012_v23, %v351_v50  ;;  %v375_v4 = vmul.f32 %v15018_v28, %v356_v57  ;;  %v10665_v7 = vor.u32 %v13621_v56, %v10662_v19  ;;  %v13459_v16 = vld [vmem:[#allocation8 + $0x12c] sm:$0xf]  ;;  %v13522_v44 = vld [vmem:[#allocation8 + $0x324] sm:$0xf]  ;;  %v10554_v49 = vld [vmem:[#allocation8 + $0x584] sm:$0xf0] }
 0x155   :  { %1753 = vmatmul.bf16.vlgmr.msra.gmra.mxu0 %v15088_v10  ;;  %1772 = vmatmul.bf16.vlgmr.msra.gmra.mxu1 %v15090_v11  ;;  %v371_v33 = vmul.f32 %v15014_v25, %v352_v55  ;;  %v10625_v8 = vor.u32 %v13616_v61, %v10624_v59  ;;  %v372_v20 = vmul.f32 %v15018_v28, %v353_v60  ;;  %v10302_v28 = vld [vmem:[#allocation8 + $0x38c] sm:$0xf0]  ;;  %v13594_v47 = vld [vmem:[#allocation8 + $0x564] sm:$0xf]  ;;  %v13589_v58 = vld [vmem:[#allocation8 + $0x538] sm:$0xf0] }
 0x156   :  { %1791 = vmatmul.bf16.vlgmr.msra.gmra.mxu2 %v15092_v36  ;;  %1810 = vmatmul.bf16.vlgmr.msra.gmra.mxu3 %v15088_v10  ;;  %v10341_v9 = vor.u32 %v13540_v32, %v10338_v2  ;;  %v392_v12 = vadd.f32 %v15020_v29, %v373_v63  ;;  %v393_v23 = vadd.f32 %v15022_v30, %v374_v1  ;;  %v13513_v56 = vld [vmem:[#allocation8 + $0x2dc] sm:$0xf]  ;;  %v10230_v19 = vld [vmem:[#allocation8 + $0x2fc] sm:$0xf0]  ;;  %v10480_v53 = vld [vmem:[#allocation8 + $0x4d0] sm:$0xf] }
 0x157   :  { %1897 = vmatpush.bf16.msra.mxu0 %v10697_v27  ;;  %1916 = vmatpush.bf16.msra.mxu1 %v10125_v0  ;;  %v394_v15 = vadd.f32 %v15036_v6, %v375_v4  ;;  %v10629_v25 = vor.u32 %v13612_v35, %v10626_v14  ;;  %v389_v21 = vadd.f32 %v15020_v29, %v370_v3  ;;  %v13603_v27 = vld [vmem:[#allocation8 + $0x5ac] sm:$0xf]  ;;  %v13585_v59 = vld [vmem:[#allocation8 + $0x51c] sm:$0xf]  ;;  %v10518_v60 = vld [vmem:[#allocation8 + $0x53c] sm:$0xf0] }
 0x158   :  { %1935 = vmatpush.bf16.msra.mxu2 %v10413_v40  ;;  %1954 = vmatpush.bf16.msra.mxu3 %v10701_v5  ;;  %v390_v22 = vadd.f32 %v15022_v30, %v371_v33  ;;  %v391_v38 = vadd.f32 %v15036_v6, %v372_v20  ;;  %v10589_v40 = vor.u32 %v13607_v46, %v10588_v13  ;;  %v10552_v30 = vld [vmem:[#allocation8 + $0x560] sm:$0xf]  ;;  %v9978_v6 = vld [vmem:[#allocation8 + $0x104] sm:$0xf0]  ;;  %v10516_v5 = vld [vmem:[#allocation8 + $0x518] sm:$0xf] }
 0x159   :  { %v15122_v39 = vpack.c.bf16 %v392_v12, %v389_v21  ;;  %v10017_v48 = vor.u32 %v13459_v16, %v10014_v17  ;;  %v10305_v29 = vor.u32 %v13531_v18, %v10302_v28  ;;  %v10593_v42 = vor.u32 %v13603_v27, %v10590_v37  ;;  %v13580_v62 = vld [vmem:[#allocation8 + $0x4f0] sm:$0xf0]  ;;  %v9906_v2 = vld [vmem:[#allocation8 + $0x74] sm:$0xf0]  ;;  %v10444_v35 = vld [vmem:[#allocation8 + $0x488] sm:$0xf] }
 0x15a   :  { %v15124_v0 = vpack.c.bf16 %v393_v23, %v390_v22  ;;  %v15126_v41 = vpack.c.bf16 %v394_v15, %v391_v38  ;;  %v10553_v50 = vor.u32 %v13598_v43, %v10552_v30  ;;  %v9981_v57 = vor.u32 %v13450_v24, %v9978_v6  ;;  %v13432_v32 = vld [vmem:[#allocation8 + $0x54] sm:$0xf]  ;;  %v10194_v4 = vld [vmem:[#allocation8 + $0x2b4] sm:$0xf0]  ;;  %v13571_v14 = vld [vmem:[#allocation8 + $0x4a8] sm:$0xf0] }
 0x15b   :  { %1898 = vmatpush.bf16.msra.mxu0 %v10661_v51  ;;  %1917 = vmatpush.bf16.msra.mxu1 %v10089_v52  ;;  %v10269_v54 = vor.u32 %v13522_v44, %v10266_v45  ;;  %v10557_v55 = vor.u32 %v13594_v47, %v10554_v49  ;;  %v13441_v51 = vld [vmem:[#allocation8 + $0x9c] sm:$0xf]  ;;  %v9942_v52 = vld [vmem:[#allocation8 + $0xbc] sm:$0xf0]  ;;  %v10233_v63 = vor.u32 %v13513_v56, %v10230_v19  ;;  %v13504_v3 = vld [vmem:[#allocation8 + $0x294] sm:$0xf] }
 0x15c   :  { %1936 = vmatpush.bf16.msra.mxu2 %v10377_v31  ;;  %1955 = vmatpush.bf16.msra.mxu3 %v10665_v7  ;;  %v10517_v31 = vor.u32 %v13589_v58, %v10516_v5  ;;  %v9945_v61 = vor.u32 %v13441_v51, %v9942_v52  ;;  %v10521_v1 = vor.u32 %v13585_v59, %v10518_v60  ;;  %v13576_v7 = vld [vmem:[#allocation8 + $0x4d4] sm:$0xf]  ;;  %v10482_v33 = vld [vmem:[#allocation8 + $0x4f4] sm:$0xf0]  ;;  %v13423_v12 = vld [vmem:[#allocation8 + $0xc] sm:$0xf] }
 0x15d   :  { %v10197_v20 = vor.u32 %v13504_v3, %v10194_v4  ;;  %v9870_v23 = vld [vmem:[#allocation8 + $0x2c] sm:$0xf0]  ;;  %v13495_v13 = vld [vmem:[#allocation8 + $0x24c] sm:$0xf]  ;;  %v10445_v16 = vor.u32 %v13571_v14, %v10444_v35  ;;  %v10128_v22 = vld [vmem:[#allocation8 + $0x208] sm:$0xf] }
 0x15e   :  { %v10158_v46 = vld [vmem:[#allocation8 + $0x26c] sm:$0xf0]  ;;  %v13567_v15 = vld [vmem:[#allocation8 + $0x48c] sm:$0xf]  ;;  %v9873_v17 = vor.u32 %v13423_v12, %v9870_v23  ;;  %v10416_v27 = vld [vmem:[#allocation8 + $0x448] sm:$0xf] }
 0x15f   :  { %1899 = vmatpush.bf16.msra.mxu0 %v10625_v8  ;;  %1918 = vmatpush.bf16.msra.mxu1 %v10053_v34  ;;  %v10481_v8 = vor.u32 %v13580_v62, %v10480_v53  ;;  %v9909_v34 = vor.u32 %v13432_v32, %v9906_v2  ;;  %v10161_v18 = vor.u32 %v13495_v13, %v10158_v46  ;;  %v13491_v28 = vld [vmem:[#allocation8 + $0x228] sm:$0xf0]  ;;  %v10130_v43 = vld [vmem:[#allocation8 + $0x22c] sm:$0xf0]  ;;  %v10092_v24 = vld [vmem:[#allocation8 + $0x1c0] sm:$0xf] }
 0x160   :  { %1937 = vmatpush.bf16.msra.mxu2 %v10341_v9  ;;  %1956 = vmatpush.bf16.msra.mxu3 %v10629_v25  ;;  %v10485_v9 = vor.u32 %v13576_v7, %v10482_v33  ;;  %v10446_v25 = vld [vmem:[#allocation8 + $0x4ac] sm:$0xf0]  ;;  %v10129_v37 = vor.u32 %v13491_v28, %v10128_v22  ;;  %v13563_v38 = vld [vmem:[#allocation8 + $0x468] sm:$0xf0]  ;;  %v13482_v44 = vld [vmem:[#allocation8 + $0x1e0] sm:$0xf0] }
 0x161   :  { %v10449_v21 = vor.u32 %v13567_v15, %v10446_v25  ;;  %v13487_v30 = vld [vmem:[#allocation8 + $0x20c] sm:$0xf]  ;;  %v10380_v45 = vld [vmem:[#allocation8 + $0x400] sm:$0xf]  ;;  %v13554_v47 = vld [vmem:[#allocation8 + $0x420] sm:$0xf0]  ;;  %v10093_v5 = vor.u32 %v13482_v44, %v10092_v24 }
 0x162   :  { %v10133_v6 = vor.u32 %v13487_v30, %v10130_v43  ;;  %v10668_v49 = vld [vmem:[#allocation8 + $0x640] sm:$0xf]  ;;  %v10381_v58 = vor.u32 %v13554_v47, %v10380_v45  ;;  %v13473_v51 = vld [vmem:[#allocation8 + $0x198] sm:$0xf0]  ;;  %v10344_v19 = vld [vmem:[#allocation8 + $0x3b8] sm:$0xf] }
 0x163   :  { %1900 = vmatpush.bf16.msra.mxu0 %v10589_v40  ;;  %1919 = vmatpush.bf16.msra.mxu1 %v10017_v48  ;;  %v10704_v40 = vld [vmem:[#allocation8 + $0x688] sm:$0xf]  ;;  %v13635_v48 = vld [vmem:[#allocation8 + $0x6a8] sm:$0xf0]  ;;  %v13545_v59 = vld [vmem:[#allocation8 + $0x3d8] sm:$0xf0] }
 0x164   :  { %1938 = vmatpush.bf16.msra.mxu2 %v10305_v29  ;;  %1957 = vmatpush.bf16.msra.mxu3 %v10593_v42  ;;  %v10417_v29 = vor.u32 %v13563_v38, %v10416_v27  ;;  %v10705_v42 = vor.u32 %v13635_v48, %v10704_v40  ;;  %v10632_v60 = vld [vmem:[#allocation8 + $0x5f8] sm:$0xf]  ;;  %v10058_v53 = vld [vmem:[#allocation8 + $0x19c] sm:$0xf0]  ;;  %v10020_v2 = vld [vmem:[#allocation8 + $0x130] sm:$0xf] }
 0x165   :  { %1758 = vmatmul.bf16.gmra.mxu0 %v15122_v39  ;;  %1777 = vmatmul.bf16.gmra.mxu1 %v15124_v0  ;;  %v13464_v3 = vld [vmem:[#allocation8 + $0x150] sm:$0xf0]  ;;  %v10308_v4 = vld [vmem:[#allocation8 + $0x370] sm:$0xf]  ;;  %v10022_v35 = vld [vmem:[#allocation8 + $0x154] sm:$0xf0] }
 0x166   :  { %1796 = vmatmul.bf16.gmra.mxu2 %v15126_v41  ;;  %1815 = vmatmul.bf16.gmra.mxu3 %v15122_v39  ;;  %v13536_v7 = vld [vmem:[#allocation8 + $0x390] sm:$0xf0]  ;;  %v10596_v33 = vld [vmem:[#allocation8 + $0x5b0] sm:$0xf]  ;;  %v10021_v14 = vor.u32 %v13464_v3, %v10020_v2  ;;  %v9984_v23 = vld [vmem:[#allocation8 + $0xe8] sm:$0xf] }
 0x167   :  { %1901 = vmatpush.bf16.msra.mxu0 %v10553_v50  ;;  %1920 = vmatpush.bf16.msra.mxu1 %v9981_v57  ;;  %v13626_v50 = vld [vmem:[#allocation8 + $0x660] sm:$0xf0]  ;;  %v13455_v13 = vld [vmem:[#allocation8 + $0x108] sm:$0xf0]  ;;  %v10272_v46 = vld [vmem:[#allocation8 + $0x328] sm:$0xf] }
 0x168   :  { %1939 = vmatpush.bf16.msra.mxu2 %v10269_v54  ;;  %1958 = vmatpush.bf16.msra.mxu3 %v10557_v55  ;;  %v13478_v57 = vld [vmem:[#allocation8 + $0x1c4] sm:$0xf]  ;;  %v10094_v54 = vld [vmem:[#allocation8 + $0x1e4] sm:$0xf0]  ;;  %v10056_v55 = vld [vmem:[#allocation8 + $0x178] sm:$0xf]  ;;  %v10669_v52 = vor.u32 %v13626_v50, %v10668_v49 }
 0x169   :  { %v10097_v56 = vor.u32 %v13478_v57, %v10094_v54  ;;  %v10057_v62 = vor.u32 %v13473_v51, %v10056_v55  ;;  %v13527_v15 = vld [vmem:[#allocation8 + $0x348] sm:$0xf0]  ;;  %v10560_v25 = vld [vmem:[#allocation8 + $0x568] sm:$0xf]  ;;  %v9948_v28 = vld [vmem:[#allocation8 + $0xa0] sm:$0xf] }
 0x16a   :  { %v10273_v22 = vor.u32 %v13527_v15, %v10272_v46  ;;  %v13446_v27 = vld [vmem:[#allocation8 + $0xc0] sm:$0xf0]  ;;  %v10236_v40 = vld [vmem:[#allocation8 + $0x2e0] sm:$0xf]  ;;  %v9950_v43 = vld [vmem:[#allocation8 + $0xc4] sm:$0xf0] }
 0x16b   :  { %1902 = vmatpush.bf16.msra.mxu0 %v10517_v31  ;;  %1921 = vmatpush.bf16.msra.mxu1 %v9945_v61  ;;  %v13617_v31 = vld [vmem:[#allocation8 + $0x618] sm:$0xf0]  ;;  %v13518_v48 = vld [vmem:[#allocation8 + $0x300] sm:$0xf0]  ;;  %v9949_v24 = vor.u32 %v13446_v27, %v9948_v28  ;;  %v9912_v44 = vld [vmem:[#allocation8 + $0x58] sm:$0xf] }
 0x16c   :  { %1940 = vmatpush.bf16.msra.mxu2 %v10233_v63  ;;  %1959 = vmatpush.bf16.msra.mxu3 %v10521_v1  ;;  %v13469_v61 = vld [vmem:[#allocation8 + $0x17c] sm:$0xf]  ;;  %v10345_v63 = vor.u32 %v13545_v59, %v10344_v19  ;;  %v10633_v1 = vor.u32 %v13617_v31, %v10632_v60  ;;  %v13442_v30 = vld [vmem:[#allocation8 + $0xa4] sm:$0xf]  ;;  %v10200_v50 = vld [vmem:[#allocation8 + $0x298] sm:$0xf] }
 0x16d   :  { %v10061_v32 = vor.u32 %v13469_v61, %v10058_v53  ;;  %v13437_v45 = vld [vmem:[#allocation8 + $0x78] sm:$0xf0]  ;;  %v9953_v49 = vor.u32 %v13442_v30, %v9950_v43  ;;  %v9914_v55 = vld [vmem:[#allocation8 + $0x7c] sm:$0xf0]  ;;  %v13428_v19 = vld [vmem:[#allocation8 + $0x30] sm:$0xf0] }
 0x16e   :  { %v13509_v57 = vld [vmem:[#allocation8 + $0x2b8] sm:$0xf0]  ;;  %v9913_v51 = vor.u32 %v13437_v45, %v9912_v44  ;;  %v10164_v31 = vld [vmem:[#allocation8 + $0x250] sm:$0xf]  ;;  %v13500_v61 = vld [vmem:[#allocation8 + $0x270] sm:$0xf0] }
 0x16f   :  { %1903 = vmatpush.bf16.msra.mxu0 %v10481_v8  ;;  %1922 = vmatpush.bf16.msra.mxu1 %v9909_v34  ;;  %v13608_v8 = vld [vmem:[#allocation8 + $0x5d0] sm:$0xf0]  ;;  %v13433_v54 = vld [vmem:[#allocation8 + $0x5c] sm:$0xf]  ;;  %v10452_v53 = vld [vmem:[#allocation8 + $0x490] sm:$0xf]  ;;  %v10165_v2 = vor.u32 %v13500_v61, %v10164_v31 }
 0x170   :  { %1941 = vmatpush.bf16.msra.mxu2 %v10197_v20  ;;  %1960 = vmatpush.bf16.msra.mxu3 %v10485_v9  ;;  %v13460_v34 = vld [vmem:[#allocation8 + $0x134] sm:$0xf]  ;;  %v10309_v20 = vor.u32 %v13536_v7, %v10308_v4  ;;  %v10597_v9 = vor.u32 %v13608_v8, %v10596_v33  ;;  %v9917_v60 = vor.u32 %v13433_v54, %v9914_v55  ;;  %v13559_v7 = vld [vmem:[#allocation8 + $0x44c] sm:$0xf]  ;;  %v10418_v33 = vld [vmem:[#allocation8 + $0x46c] sm:$0xf0] }
 0x171   :  { %v10025_v12 = vor.u32 %v13460_v34, %v10022_v35  ;;  %v13631_v8 = vld [vmem:[#allocation8 + $0x68c] sm:$0xf]  ;;  %v10421_v34 = vor.u32 %v13559_v7, %v10418_v33  ;;  %v10706_v35 = vld [vmem:[#allocation8 + $0x6ac] sm:$0xf0]  ;;  %v13550_v46 = vld [vmem:[#allocation8 + $0x404] sm:$0xf] }
 0x172   :  { %v10634_v30 = vld [vmem:[#allocation8 + $0x61c] sm:$0xf0]  ;;  %v13546_v44 = vld [vmem:[#allocation8 + $0x3e0] sm:$0xf0]  ;;  %v10598_v54 = vld [vmem:[#allocation8 + $0x5d4] sm:$0xf0] }
 0x173   :  { %1904 = vmatpush.bf16.msra.mxu0 %v10445_v16  ;;  %1923 = vmatpush.bf16.msra.mxu1 %v9873_v17  ;;  %v13599_v16 = vld [vmem:[#allocation8 + $0x588] sm:$0xf0]  ;;  %v10064_v43 = vld [vmem:[#allocation8 + $0x180] sm:$0xf]  ;;  %v10028_v55 = vld [vmem:[#allocation8 + $0x138] sm:$0xf] }
 0x174   :  { %1942 = vmatpush.bf16.msra.mxu2 %v10161_v18  ;;  %1961 = vmatpush.bf16.msra.mxu3 %v10449_v21  ;;  %v13451_v17 = vld [vmem:[#allocation8 + $0xec] sm:$0xf]  ;;  %v9986_v18 = vld [vmem:[#allocation8 + $0x10c] sm:$0xf0]  ;;  %v9985_v21 = vor.u32 %v13455_v13, %v9984_v23  ;;  %v13564_v13 = vld [vmem:[#allocation8 + $0x470] sm:$0xf0] }
 0x175   :  { %1829 = vmatmul.bf16.vlgmr.msrb.gmra.mxu0 %v15090_v11  ;;  %1848 = vmatmul.bf16.vlgmr.msrb.gmra.mxu1 %v15092_v36  ;;  %v9989_v38 = vor.u32 %v13451_v17, %v9986_v18  ;;  %v10424_v23 = vld [vmem:[#allocation8 + $0x450] sm:$0xf]  ;;  %v10670_v17 = vld [vmem:[#allocation8 + $0x664] sm:$0xf0]  ;;  %v13523_v61 = vld [vmem:[#allocation8 + $0x32c] sm:$0xf] }
 0x176   :  { %1867 = vmatmul.bf16.vlgmr.msrb.gmra.mxu2 %v15088_v10  ;;  %1886 = vmatmul.bf16.vlgmr.msrb.gmra.mxu3 %v15090_v11  ;;  %v10425_v15 = vor.u32 %v13564_v13, %v10424_v23  ;;  %v10100_v18 = vld [vmem:[#allocation8 + $0x1c8] sm:$0xf]  ;;  %v13514_v33 = vld [vmem:[#allocation8 + $0x2e4] sm:$0xf]  ;;  %v13519_v13 = vld [vmem:[#allocation8 + $0x308] sm:$0xf0] }
 0x177   :  { %1973 = vmatpush.bf16.msrb.mxu0 %v10129_v37  ;;  %1992 = vmatpush.bf16.msrb.mxu1 %v10417_v29  ;;  %v10561_v37 = vor.u32 %v13599_v16, %v10560_v25  ;;  %v10524_v29 = vld [vmem:[#allocation8 + $0x520] sm:$0xf]  ;;  %v10382_v25 = vld [vmem:[#allocation8 + $0x424] sm:$0xf0]  ;;  %v13622_v16 = vld [vmem:[#allocation8 + $0x644] sm:$0xf] }
 0x178   :  { %2011 = vmatpush.bf16.msrb.mxu2 %v10705_v42  ;;  %2030 = vmatpush.bf16.msrb.mxu3 %v10133_v6  ;;  %v13590_v42 = vld [vmem:[#allocation8 + $0x540] sm:$0xf0]  ;;  %v10237_v6 = vor.u32 %v13518_v48, %v10236_v40  ;;  %v10385_v28 = vor.u32 %v13550_v46, %v10382_v25  ;;  %v10673_v27 = vor.u32 %v13622_v16, %v10670_v17  ;;  %v10346_v40 = vld [vmem:[#allocation8 + $0x3dc] sm:$0xf0]  ;;  %v10244_v23 = vld [vmem:[#allocation8 + $0x2e8] sm:$0xf] }
 0x179   :  { %v10525_v47 = vor.u32 %v13590_v42, %v10524_v29  ;;  %v13613_v42 = vld [vmem:[#allocation8 + $0x5fc] sm:$0xf]  ;;  %v10202_v16 = vld [vmem:[#allocation8 + $0x2bc] sm:$0xf0] }
 0x17a   :  { %v13505_v25 = vld [vmem:[#allocation8 + $0x29c] sm:$0xf] }
 0x17b   :  { %1974 = vmatpush.bf16.msrb.mxu0 %v10093_v5  ;;  %1993 = vmatpush.bf16.msrb.mxu1 %v10381_v58  ;;  %v10488_v5 = vld [vmem:[#allocation8 + $0x4d8] sm:$0xf]  ;;  %v13581_v58 = vld [vmem:[#allocation8 + $0x4f8] sm:$0xf0] }
 0x17c   :  { %2012 = vmatpush.bf16.msrb.mxu2 %v10669_v52  ;;  %2031 = vmatpush.bf16.msrb.mxu3 %v10097_v56  ;;  %v10201_v52 = vor.u32 %v13509_v57, %v10200_v50  ;;  %v9876_v56 = vld [vmem:[#allocation8 + $0x10] sm:$0xf]  ;;  %v10489_v59 = vor.u32 %v13581_v58, %v10488_v5  ;;  %v13532_v57 = vld [vmem:[#allocation8 + $0x374] sm:$0xf]  ;;  %v10310_v5 = vld [vmem:[#allocation8 + $0x394] sm:$0xf0] }
 0x17d   :  { %v13604_v58 = vld [vmem:[#allocation8 + $0x5b4] sm:$0xf] }
 0x17f   :  { %1975 = vmatpush.bf16.msrb.mxu0 %v10057_v62  ;;  %1994 = vmatpush.bf16.msrb.mxu1 %v10345_v63  ;;  %v13572_v62 = vld [vmem:[#allocation8 + $0x4b0] sm:$0xf0] }
 0x180   :  { %2013 = vmatpush.bf16.msrb.mxu2 %v10633_v1  ;;  %2032 = vmatpush.bf16.msrb.mxu3 %v10061_v32  ;;  %v13424_v63 = vld [vmem:[#allocation8 + $0x14] sm:$0xf]  ;;  %v9878_v1 = vld [vmem:[#allocation8 + $0x34] sm:$0xf0]  ;;  %v9877_v32 = vor.u32 %v13428_v19, %v9876_v56  ;;  %v10453_v3 = vor.u32 %v13572_v62, %v10452_v53  ;;  %v13537_v56 = vld [vmem:[#allocation8 + $0x398] sm:$0xf0]  ;;  %v10313_v19 = vor.u32 %v13532_v57, %v10310_v5 }
 0x181   :  { %v9881_v4 = vor.u32 %v13424_v63, %v9878_v1  ;;  %v10274_v53 = vld [vmem:[#allocation8 + $0x34c] sm:$0xf0]  ;;  %v13595_v62 = vld [vmem:[#allocation8 + $0x56c] sm:$0xf] }
 0x182   :  { %v10562_v63 = vld [vmem:[#allocation8 + $0x58c] sm:$0xf0] }
 0x183   :  { %1976 = vmatpush.bf16.msrb.mxu0 %v10021_v14  ;;  %1995 = vmatpush.bf16.msrb.mxu1 %v10309_v20  ;;  %v10136_v14 = vld [vmem:[#allocation8 + $0x210] sm:$0xf]  ;;  %v13492_v20 = vld [vmem:[#allocation8 + $0x230] sm:$0xf0]  ;;  %v10565_v7 = vor.u32 %v13595_v62, %v10562_v63  ;;  %v10676_v63 = vld [vmem:[#allocation8 + $0x648] sm:$0xf] }
 0x184   :  { %2014 = vmatpush.bf16.msrb.mxu2 %v10597_v9  ;;  %2033 = vmatpush.bf16.msrb.mxu3 %v10025_v12  ;;  %v10709_v9 = vor.u32 %v13631_v8, %v10706_v35  ;;  %v10137_v12 = vor.u32 %v13492_v20, %v10136_v14  ;;  %v9992_v1 = vld [vmem:[#allocation8 + $0xf0] sm:$0xf]  ;;  %v10238_v8 = vld [vmem:[#allocation8 + $0x304] sm:$0xf0]  ;;  %v13586_v14 = vld [vmem:[#allocation8 + $0x524] sm:$0xf] }
 0x185   :  { %1834 = vmatmul.bf16.gmra.mxu0 %v15124_v0  ;;  %1853 = vmatmul.bf16.gmra.mxu1 %v15126_v41  ;;  %v10526_v20 = vld [vmem:[#allocation8 + $0x544] sm:$0xf0]  ;;  %v10241_v46 = vor.u32 %v13514_v33, %v10238_v8 }
 0x186   :  { %1872 = vmatmul.bf16.gmra.mxu2 %v15122_v39  ;;  %1891 = vmatmul.bf16.gmra.mxu3 %v15124_v0 }
 0x187   :  { %1977 = vmatpush.bf16.msrb.mxu0 %v9985_v21  ;;  %1996 = vmatpush.bf16.msrb.mxu1 %v10273_v22  ;;  %v13483_v21 = vld [vmem:[#allocation8 + $0x1e8] sm:$0xf0]  ;;  %v10388_v22 = vld [vmem:[#allocation8 + $0x408] sm:$0xf] }
 0x188   :  { %2015 = vmatpush.bf16.msrb.mxu2 %v10561_v37  ;;  %2034 = vmatpush.bf16.msrb.mxu3 %v9989_v38  ;;  %v13555_v37 = vld [vmem:[#allocation8 + $0x428] sm:$0xf0]  ;;  %v13541_v38 = vld [vmem:[#allocation8 + $0x3bc] sm:$0xf]  ;;  %v10101_v48 = vor.u32 %v13483_v21, %v10100_v18  ;;  %v10245_v18 = vor.u32 %v13519_v13, %v10244_v23  ;;  %v10066_v13 = vld [vmem:[#allocation8 + $0x1a4] sm:$0xf0] }
 0x189   :  { %v10389_v29 = vor.u32 %v13555_v37, %v10388_v22  ;;  %v10349_v45 = vor.u32 %v13541_v38, %v10346_v40  ;;  %v13577_v21 = vld [vmem:[#allocation8 + $0x4dc] sm:$0xf]  ;;  %v10490_v22 = vld [vmem:[#allocation8 + $0x4fc] sm:$0xf0]  ;;  %v13510_v38 = vld [vmem:[#allocation8 + $0x2c0] sm:$0xf0]  ;;  %v10205_v40 = vor.u32 %v13505_v25, %v10202_v16 }
 0x18a   :  { %v10208_v37 = vld [vmem:[#allocation8 + $0x2a0] sm:$0xf] }
 0x18b   :  { %1978 = vmatpush.bf16.msrb.mxu0 %v9949_v24  ;;  %1997 = vmatpush.bf16.msrb.mxu1 %v10237_v6  ;;  %v13474_v24 = vld [vmem:[#allocation8 + $0x1a0] sm:$0xf0]  ;;  %v10352_v6 = vld [vmem:[#allocation8 + $0x3c0] sm:$0xf] }
 0x18c   :  { %2016 = vmatpush.bf16.msrb.mxu2 %v10525_v47  ;;  %2035 = vmatpush.bf16.msrb.mxu3 %v9953_v49  ;;  %v10637_v47 = vor.u32 %v13613_v42, %v10634_v30  ;;  %v10065_v49 = vor.u32 %v13474_v24, %v10064_v43  ;;  %v10353_v50 = vor.u32 %v13546_v44, %v10352_v6  ;;  %v13496_v30 = vld [vmem:[#allocation8 + $0x254] sm:$0xf]  ;;  %v10166_v43 = vld [vmem:[#allocation8 + $0x274] sm:$0xf0] }
 0x18d   :  { %v10209_v42 = vor.u32 %v13510_v38, %v10208_v37  ;;  %v13568_v24 = vld [vmem:[#allocation8 + $0x494] sm:$0xf]  ;;  %v10454_v6 = vld [vmem:[#allocation8 + $0x4b4] sm:$0xf0]  ;;  %v10030_v37 = vld [vmem:[#allocation8 + $0x15c] sm:$0xf0] }
 0x18e   :  { %v9884_v44 = vld [vmem:[#allocation8 + $0x18] sm:$0xf]  ;;  %v10457_v57 = vor.u32 %v13568_v24, %v10454_v6  ;;  %v13533_v38 = vld [vmem:[#allocation8 + $0x37c] sm:$0xf]  ;;  %v10568_v6 = vld [vmem:[#allocation8 + $0x570] sm:$0xf] }
 0x18f   :  { %1979 = vmatpush.bf16.msrb.mxu0 %v9913_v51  ;;  %1998 = vmatpush.bf16.msrb.mxu1 %v10201_v52  ;;  %v13465_v51 = vld [vmem:[#allocation8 + $0x158] sm:$0xf0]  ;;  %v10316_v52 = vld [vmem:[#allocation8 + $0x378] sm:$0xf] }
 0x190   :  { %2017 = vmatpush.bf16.msrb.mxu2 %v10489_v59  ;;  %2036 = vmatpush.bf16.msrb.mxu3 %v9917_v60  ;;  %v10601_v59 = vor.u32 %v13604_v58, %v10598_v54  ;;  %v10029_v60 = vor.u32 %v13465_v51, %v10028_v55  ;;  %v10317_v31 = vor.u32 %v13537_v56, %v10316_v52  ;;  %v10712_v54 = vld [vmem:[#allocation8 + $0x690] sm:$0xf]  ;;  %v13636_v55 = vld [vmem:[#allocation8 + $0x6b0] sm:$0xf0]  ;;  %v10138_v56 = vld [vmem:[#allocation8 + $0x234] sm:$0xf0] }
 0x191   :  { %v13488_v51 = vld [vmem:[#allocation8 + $0x214] sm:$0xf]  ;;  %v10713_v52 = vor.u32 %v13636_v55, %v10712_v54 }
 0x193   :  { %1980 = vmatpush.bf16.msrb.mxu0 %v9877_v32  ;;  %1999 = vmatpush.bf16.msrb.mxu1 %v10165_v2  ;;  %v13456_v32 = vld [vmem:[#allocation8 + $0x110] sm:$0xf0]  ;;  %v10280_v2 = vld [vmem:[#allocation8 + $0x330] sm:$0xf] }
 0x194   :  { %2018 = vmatpush.bf16.msrb.mxu2 %v10453_v3  ;;  %2037 = vmatpush.bf16.msrb.mxu3 %v9881_v4  ;;  %v13528_v3 = vld [vmem:[#allocation8 + $0x350] sm:$0xf0]  ;;  %v10277_v4 = vor.u32 %v13523_v61, %v10274_v53  ;;  %v10714_v53 = vld [vmem:[#allocation8 + $0x6b4] sm:$0xf0] }
 0x195   :  { %1905 = vmatmul.bf16.vlgmr.msra.gmra.mxu0 %v15092_v36  ;;  %1924 = vmatmul.bf16.vlgmr.msra.gmra.mxu1 %v15088_v10  ;;  %v10281_v35 = vor.u32 %v13528_v3, %v10280_v2  ;;  %v13632_v61 = vld [vmem:[#allocation8 + $0x694] sm:$0xf]  ;;  %v10102_v3 = vld [vmem:[#allocation8 + $0x1ec] sm:$0xf0] }
 0x196   :  { %1943 = vmatmul.bf16.vlgmr.msra.gmra.mxu2 %v15090_v11  ;;  %1962 = vmatmul.bf16.vlgmr.msra.gmra.mxu3 %v15092_v36  ;;  %v10717_v62 = vor.u32 %v13632_v61, %v10714_v53  ;;  %v13587_v61 = vld [vmem:[#allocation8 + $0x52c] sm:$0xf]  ;;  %v10534_v53 = vld [vmem:[#allocation8 + $0x54c] sm:$0xf0] }
 0x197   :  { %2049 = vmatpush.bf16.msra.mxu0 %v10421_v34  ;;  %2068 = vmatpush.bf16.msra.mxu1 %v10709_v9  ;;  %v9993_v34 = vor.u32 %v13456_v32, %v9992_v1  ;;  %v9956_v9 = vld [vmem:[#allocation8 + $0xa8] sm:$0xf]  ;;  %v13627_v1 = vld [vmem:[#allocation8 + $0x668] sm:$0xf0] }
 0x198   :  { %2087 = vmatpush.bf16.msra.mxu2 %v10137_v12  ;;  %2106 = vmatpush.bf16.msra.mxu3 %v10425_v15  ;;  %v13447_v12 = vld [vmem:[#allocation8 + $0xc8] sm:$0xf0]  ;;  %v10529_v15 = vor.u32 %v13586_v14, %v10526_v20  ;;  %v10677_v2 = vor.u32 %v13627_v1, %v10676_v63  ;;  %v10640_v20 = vld [vmem:[#allocation8 + $0x600] sm:$0xf] }
 0x199   :  { %v9957_v17 = vor.u32 %v13447_v12, %v9956_v9  ;;  %v13479_v32 = vld [vmem:[#allocation8 + $0x1cc] sm:$0xf]  ;;  %v13618_v9 = vld [vmem:[#allocation8 + $0x620] sm:$0xf0] }
 0x19a   :  { %v10105_v33 = vor.u32 %v13479_v32, %v10102_v3  ;;  %v13470_v12 = vld [vmem:[#allocation8 + $0x184] sm:$0xf]  ;;  %v10641_v23 = vor.u32 %v13618_v9, %v10640_v20  ;;  %v10537_v32 = vor.u32 %v13587_v61, %v10534_v53  ;;  %v10072_v53 = vld [vmem:[#allocation8 + $0x188] sm:$0xf] }
 0x19b   :  { %2050 = vmatpush.bf16.msra.mxu0 %v10385_v28  ;;  %2069 = vmatpush.bf16.msra.mxu1 %v10673_v27  ;;  %v9920_v28 = vld [vmem:[#allocation8 + $0x60] sm:$0xf]  ;;  %v13438_v27 = vld [vmem:[#allocation8 + $0x80] sm:$0xf0]  ;;  %v10069_v25 = vor.u32 %v13470_v12, %v10066_v13  ;;  %v13573_v13 = vld [vmem:[#allocation8 + $0x4b8] sm:$0xf0] }
 0x19c   :  { %2088 = vmatpush.bf16.msra.mxu2 %v10101_v48  ;;  %2107 = vmatpush.bf16.msra.mxu3 %v10389_v29  ;;  %v10493_v48 = vor.u32 %v13577_v21, %v10490_v22  ;;  %v9921_v29 = vor.u32 %v13438_v27, %v9920_v28  ;;  %v10604_v22 = vld [vmem:[#allocation8 + $0x5b8] sm:$0xf]  ;;  %v13609_v28 = vld [vmem:[#allocation8 + $0x5d8] sm:$0xf0]  ;;  %v13582_v3 = vld [vmem:[#allocation8 + $0x500] sm:$0xf0] }
 0x19d   :  { %v13461_v27 = vld [vmem:[#allocation8 + $0x13c] sm:$0xf] }
 0x19f   :  { %2051 = vmatpush.bf16.msra.mxu0 %v10349_v45  ;;  %2070 = vmatpush.bf16.msra.mxu1 %v10637_v47  ;;  %v13429_v45 = vld [vmem:[#allocation8 + $0x38] sm:$0xf0]  ;;  %v10172_v47 = vld [vmem:[#allocation8 + $0x258] sm:$0xf] }
 0x1a0   :  { %2089 = vmatpush.bf16.msra.mxu2 %v10065_v49  ;;  %2108 = vmatpush.bf16.msra.mxu3 %v10353_v50  ;;  %v13501_v49 = vld [vmem:[#allocation8 + $0x278] sm:$0xf0]  ;;  %v10169_v50 = vor.u32 %v13496_v30, %v10166_v43  ;;  %v9885_v5 = vor.u32 %v13429_v45, %v9884_v44  ;;  %v10033_v30 = vor.u32 %v13461_v27, %v10030_v37  ;;  %v13600_v44 = vld [vmem:[#allocation8 + $0x590] sm:$0xf0] }
 0x1a1   :  { %v10173_v58 = vor.u32 %v13501_v49, %v10172_v47  ;;  %v13452_v45 = vld [vmem:[#allocation8 + $0xf4] sm:$0xf]  ;;  %v9994_v47 = vld [vmem:[#allocation8 + $0x114] sm:$0xf0] }
 0x1a2   :  { %v13524_v49 = vld [vmem:[#allocation8 + $0x334] sm:$0xf]  ;;  %v9997_v54 = vor.u32 %v13452_v45, %v9994_v47  ;;  %v10108_v47 = vld [vmem:[#allocation8 + $0x1d0] sm:$0xf] }
 0x1a3   :  { %2052 = vmatpush.bf16.msra.mxu0 %v10313_v19  ;;  %2071 = vmatpush.bf16.msra.mxu1 %v10601_v59  ;;  %v13560_v19 = vld [vmem:[#allocation8 + $0x454] sm:$0xf]  ;;  %v10426_v59 = vld [vmem:[#allocation8 + $0x474] sm:$0xf0] }
 0x1a4   :  { %2090 = vmatpush.bf16.msra.mxu2 %v10029_v60  ;;  %2109 = vmatpush.bf16.msra.mxu3 %v10317_v31  ;;  %v10141_v60 = vor.u32 %v13488_v51, %v10138_v56  ;;  %v10429_v31 = vor.u32 %v13560_v19, %v10426_v59  ;;  %v13591_v56 = vld [vmem:[#allocation8 + $0x548] sm:$0xf0]  ;;  %v9958_v59 = vld [vmem:[#allocation8 + $0xcc] sm:$0xf0] }
 0x1a5   :  { %1910 = vmatmul.bf16.gmra.mxu0 %v15126_v41  ;;  %1929 = vmatmul.bf16.gmra.mxu1 %v15122_v39  ;;  %v13443_v19 = vld [vmem:[#allocation8 + $0xac] sm:$0xf] }
 0x1a6   :  { %1948 = vmatmul.bf16.gmra.mxu2 %v15124_v0  ;;  %1967 = vmatmul.bf16.gmra.mxu3 %v15126_v41  ;;  %v9961_v63 = vor.u32 %v13443_v19, %v9958_v59 }
 0x1a7   :  { %2053 = vmatpush.bf16.msra.mxu0 %v10277_v4  ;;  %2072 = vmatpush.bf16.msra.mxu1 %v10565_v7  ;;  %v13551_v4 = vld [vmem:[#allocation8 + $0x40c] sm:$0xf]  ;;  %v10390_v7 = vld [vmem:[#allocation8 + $0x42c] sm:$0xf0] }
 0x1a8   :  { %2091 = vmatpush.bf16.msra.mxu2 %v9993_v34  ;;  %2110 = vmatpush.bf16.msra.mxu3 %v10281_v35  ;;  %v10393_v8 = vor.u32 %v13551_v4, %v10390_v7  ;;  %v13623_v34 = vld [vmem:[#allocation8 + $0x64c] sm:$0xf]  ;;  %v10678_v35 = vld [vmem:[#allocation8 + $0x66c] sm:$0xf0]  ;;  %v13434_v4 = vld [vmem:[#allocation8 + $0x64] sm:$0xf] }
 0x1a9   :  { %v10681_v14 = vor.u32 %v13623_v34, %v10678_v35  ;;  %v9922_v7 = vld [vmem:[#allocation8 + $0x84] sm:$0xf0]  ;;  %v13578_v34 = vld [vmem:[#allocation8 + $0x4e4] sm:$0xf] }
 0x1aa   :  { %v10498_v35 = vld [vmem:[#allocation8 + $0x504] sm:$0xf0]  ;;  %v9925_v20 = vor.u32 %v13434_v4, %v9922_v7  ;;  %v13619_v4 = vld [vmem:[#allocation8 + $0x628] sm:$0xf0] }
 0x1ab   :  { %2054 = vmatpush.bf16.msra.mxu0 %v10241_v46  ;;  %2073 = vmatpush.bf16.msra.mxu1 %v10529_v15  ;;  %v13542_v46 = vld [vmem:[#allocation8 + $0x3c4] sm:$0xf]  ;;  %v10354_v15 = vld [vmem:[#allocation8 + $0x3e4] sm:$0xf0]  ;;  %v10501_v12 = vor.u32 %v13578_v34, %v10498_v35  ;;  %v10324_v34 = vld [vmem:[#allocation8 + $0x380] sm:$0xf] }
 0x1ac   :  { %2092 = vmatpush.bf16.msra.mxu2 %v9957_v17  ;;  %2111 = vmatpush.bf16.msra.mxu3 %v10245_v18  ;;  %v10357_v16 = vor.u32 %v13542_v46, %v10354_v15  ;;  %v13614_v17 = vld [vmem:[#allocation8 + $0x604] sm:$0xf]  ;;  %v10642_v18 = vld [vmem:[#allocation8 + $0x624] sm:$0xf0]  ;;  %v13425_v46 = vld [vmem:[#allocation8 + $0x1c] sm:$0xf] }
 0x1ad   :  { %v10645_v21 = vor.u32 %v13614_v17, %v10642_v18  ;;  %v9886_v15 = vld [vmem:[#allocation8 + $0x3c] sm:$0xf0] }
 0x1ae   :  { %v9889_v27 = vor.u32 %v13425_v46, %v9886_v15 }
 0x1af   :  { %2055 = vmatpush.bf16.msra.mxu0 %v10205_v40  ;;  %2074 = vmatpush.bf16.msra.mxu1 %v10493_v48  ;;  %v10318_v40 = vld [vmem:[#allocation8 + $0x39c] sm:$0xf0]  ;;  %v13605_v48 = vld [vmem:[#allocation8 + $0x5bc] sm:$0xf] }
 0x1b0   :  { %2093 = vmatpush.bf16.msra.mxu2 %v9921_v29  ;;  %2112 = vmatpush.bf16.msra.mxu3 %v10209_v42  ;;  %v10606_v29 = vld [vmem:[#allocation8 + $0x5dc] sm:$0xf0]  ;;  %v10605_v42 = vor.u32 %v13609_v28, %v10604_v22  ;;  %v10321_v43 = vor.u32 %v13533_v38, %v10318_v40  ;;  %v10144_v40 = vld [vmem:[#allocation8 + $0x218] sm:$0xf] }
 0x1b1   :  { %v10609_v24 = vor.u32 %v13605_v48, %v10606_v29  ;;  %v10462_v22 = vld [vmem:[#allocation8 + $0x4bc] sm:$0xf0]  ;;  %v13493_v48 = vld [vmem:[#allocation8 + $0x238] sm:$0xf0]  ;;  %v10432_v29 = vld [vmem:[#allocation8 + $0x458] sm:$0xf] }
 0x1b3   :  { %2056 = vmatpush.bf16.msra.mxu0 %v10169_v50  ;;  %2075 = vmatpush.bf16.msra.mxu1 %v10457_v57  ;;  %v10282_v50 = vld [vmem:[#allocation8 + $0x354] sm:$0xf0]  ;;  %v13596_v57 = vld [vmem:[#allocation8 + $0x574] sm:$0xf] }
 0x1b4   :  { %2094 = vmatpush.bf16.msra.mxu2 %v9885_v5  ;;  %2113 = vmatpush.bf16.msra.mxu3 %v10173_v58  ;;  %v10570_v5 = vld [vmem:[#allocation8 + $0x594] sm:$0xf0]  ;;  %v10569_v58 = vor.u32 %v13600_v44, %v10568_v6  ;;  %v10285_v55 = vor.u32 %v13524_v49, %v10282_v50  ;;  %v13484_v49 = vld [vmem:[#allocation8 + $0x1f0] sm:$0xf0]  ;;  %v10396_v50 = vld [vmem:[#allocation8 + $0x410] sm:$0xf] }
 0x1b5   :  { %1981 = vmatmul.bf16.vlgmr.msrb.gmra.mxu0 %v15088_v10  ;;  %2000 = vmatmul.bf16.vlgmr.msrb.gmra.mxu1 %v15090_v11  ;;  %v10573_v51 = vor.u32 %v13596_v57, %v10570_v5 }
 0x1b6   :  { %2019 = vmatmul.bf16.vlgmr.msrb.gmra.mxu2 %v15092_v36  ;;  %2038 = vmatmul.bf16.vlgmr.msrb.gmra.mxu3 %v15088_v10 }
 0x1b7   :  { %2125 = vmatpush.bf16.msrb.mxu0 %v10713_v52  ;;  %2144 = vmatpush.bf16.msrb.mxu1 %v10141_v60  ;;  %v10532_v52 = vld [vmem:[#allocation8 + $0x528] sm:$0xf]  ;;  %v13515_v60 = vld [vmem:[#allocation8 + $0x2ec] sm:$0xf] }
 0x1b8   :  { %2163 = vmatpush.bf16.msrb.mxu2 %v10429_v31  ;;  %2182 = vmatpush.bf16.msrb.mxu3 %v10717_v62  ;;  %v10246_v31 = vld [vmem:[#allocation8 + $0x30c] sm:$0xf0]  ;;  %v10533_v62 = vor.u32 %v13591_v56, %v10532_v52 }
 0x1b9   :  { %v10249_v1 = vor.u32 %v13515_v60, %v10246_v31 }
 0x1bb   :  { %2126 = vmatpush.bf16.msrb.mxu0 %v10677_v2  ;;  %2145 = vmatpush.bf16.msrb.mxu1 %v10105_v33  ;;  %v10496_v2 = vld [vmem:[#allocation8 + $0x4e0] sm:$0xf]  ;;  %v13506_v33 = vld [vmem:[#allocation8 + $0x2a4] sm:$0xf] }
 0x1bc   :  { %2164 = vmatpush.bf16.msrb.mxu2 %v10393_v8  ;;  %2183 = vmatpush.bf16.msrb.mxu3 %v10681_v14  ;;  %v10210_v8 = vld [vmem:[#allocation8 + $0x2c4] sm:$0xf0]  ;;  %v10497_v14 = vor.u32 %v13582_v3, %v10496_v2 }
 0x1bd   :  { %v10213_v9 = vor.u32 %v13506_v33, %v10210_v8  ;;  %v10648_v2 = vld [vmem:[#allocation8 + $0x608] sm:$0xf]  ;;  %v10036_v33 = vld [vmem:[#allocation8 + $0x140] sm:$0xf]  ;;  %v13466_v8 = vld [vmem:[#allocation8 + $0x160] sm:$0xf0] }
 0x1be   :  { %v10649_v7 = vor.u32 %v13619_v4, %v10648_v2  ;;  %v13502_v4 = vld [vmem:[#allocation8 + $0x280] sm:$0xf0] }
 0x1bf   :  { %2127 = vmatpush.bf16.msrb.mxu0 %v10641_v23  ;;  %2146 = vmatpush.bf16.msrb.mxu1 %v10069_v25  ;;  %v10460_v23 = vld [vmem:[#allocation8 + $0x498] sm:$0xf]  ;;  %v13497_v25 = vld [vmem:[#allocation8 + $0x25c] sm:$0xf] }
 0x1c0   :  { %2165 = vmatpush.bf16.msrb.mxu2 %v10357_v16  ;;  %2184 = vmatpush.bf16.msrb.mxu3 %v10645_v21  ;;  %v10174_v16 = vld [vmem:[#allocation8 + $0x27c] sm:$0xf0]  ;;  %v13569_v21 = vld [vmem:[#allocation8 + $0x49c] sm:$0xf]  ;;  %v10461_v28 = vor.u32 %v13573_v13, %v10460_v23 }
 0x1c1   :  { %v10177_v37 = vor.u32 %v13497_v25, %v10174_v16  ;;  %v10465_v38 = vor.u32 %v13569_v21, %v10462_v22  ;;  %v10037_v25 = vor.u32 %v13466_v8, %v10036_v33  ;;  %v13457_v21 = vld [vmem:[#allocation8 + $0x118] sm:$0xf0]  ;;  %v10288_v22 = vld [vmem:[#allocation8 + $0x338] sm:$0xf]  ;;  %v13574_v33 = vld [vmem:[#allocation8 + $0x4c0] sm:$0xf0] }
 0x1c3   :  { %2128 = vmatpush.bf16.msrb.mxu0 %v10605_v42  ;;  %2147 = vmatpush.bf16.msrb.mxu1 %v10033_v30  ;;  %v10145_v42 = vor.u32 %v13493_v48, %v10144_v40  ;;  %v13565_v30 = vld [vmem:[#allocation8 + $0x478] sm:$0xf0] }
 0x1c4   :  { %2166 = vmatpush.bf16.msrb.mxu2 %v10321_v43  ;;  %2185 = vmatpush.bf16.msrb.mxu3 %v10609_v24  ;;  %v10720_v43 = vld [vmem:[#allocation8 + $0x698] sm:$0xf]  ;;  %v13637_v24 = vld [vmem:[#allocation8 + $0x6b8] sm:$0xf0]  ;;  %v10433_v6 = vor.u32 %v13565_v30, %v10432_v29  ;;  %v9964_v29 = vld [vmem:[#allocation8 + $0xb0] sm:$0xf] }
 0x1c5   :  { %1986 = vmatmul.bf16.gmra.mxu0 %v15122_v39  ;;  %2005 = vmatmul.bf16.gmra.mxu1 %v15124_v0  ;;  %v10721_v44 = vor.u32 %v13637_v24, %v10720_v43  ;;  %v10252_v30 = vld [vmem:[#allocation8 + $0x2f0] sm:$0xf] }
 0x1c6   :  { %2024 = vmatmul.bf16.gmra.mxu2 %v15126_v41  ;;  %2043 = vmatmul.bf16.gmra.mxu3 %v15122_v39 }
 0x1c7   :  { %2129 = vmatpush.bf16.msrb.mxu0 %v10569_v58  ;;  %2148 = vmatpush.bf16.msrb.mxu1 %v9997_v54  ;;  %v10109_v58 = vor.u32 %v13484_v49, %v10108_v47  ;;  %v13556_v54 = vld [vmem:[#allocation8 + $0x430] sm:$0xf0] }
 0x1c8   :  { %2167 = vmatpush.bf16.msrb.mxu2 %v10285_v55  ;;  %2186 = vmatpush.bf16.msrb.mxu3 %v10573_v51  ;;  %v10684_v55 = vld [vmem:[#allocation8 + $0x650] sm:$0xf]  ;;  %v13628_v51 = vld [vmem:[#allocation8 + $0x670] sm:$0xf0]  ;;  %v10397_v59 = vor.u32 %v13556_v54, %v10396_v50 }
 0x1c9   :  { %v10685_v60 = vor.u32 %v13628_v51, %v10684_v55  ;;  %v9928_v51 = vld [vmem:[#allocation8 + $0x68] sm:$0xf] }
 0x1cb   :  { %2130 = vmatpush.bf16.msrb.mxu0 %v10533_v62  ;;  %2149 = vmatpush.bf16.msrb.mxu1 %v9961_v63  ;;  %v13475_v62 = vld [vmem:[#allocation8 + $0x1a8] sm:$0xf0] }
 0x1cc   :  { %2168 = vmatpush.bf16.msrb.mxu2 %v10249_v1  ;;  %2187 = vmatpush.bf16.msrb.mxu3 %v10537_v32  ;;  %v10073_v63 = vor.u32 %v13475_v62, %v10072_v53  ;;  %v10360_v1 = vld [vmem:[#allocation8 + $0x3c8] sm:$0xf]  ;;  %v13547_v32 = vld [vmem:[#allocation8 + $0x3e8] sm:$0xf0] }
 0x1cd   :  { %v10361_v3 = vor.u32 %v13547_v32, %v10360_v1  ;;  %v13430_v1 = vld [vmem:[#allocation8 + $0x40] sm:$0xf0]  ;;  %v10180_v32 = vld [vmem:[#allocation8 + $0x260] sm:$0xf] }
 0x1cf   :  { %2131 = vmatpush.bf16.msrb.mxu0 %v10497_v14  ;;  %2150 = vmatpush.bf16.msrb.mxu1 %v9925_v20  ;;  %v13538_v20 = vld [vmem:[#allocation8 + $0x3a0] sm:$0xf0] }
 0x1d0   :  { %2169 = vmatpush.bf16.msrb.mxu2 %v10213_v9  ;;  %2188 = vmatpush.bf16.msrb.mxu3 %v10501_v12  ;;  %v10612_v9 = vld [vmem:[#allocation8 + $0x5c0] sm:$0xf]  ;;  %v13610_v12 = vld [vmem:[#allocation8 + $0x5e0] sm:$0xf0]  ;;  %v10325_v16 = vor.u32 %v13538_v20, %v10324_v34 }
 0x1d2   :  { %v1754_v17 = vpop.f32.mrf.mxu0  ;;  %v1773_v18 = vpop.f32.mrf.mxu1 }
 0x1d3   :  { %2132 = vmatpush.bf16.msrb.mxu0 %v10461_v28  ;;  %2151 = vmatpush.bf16.msrb.mxu1 %v9889_v27  ;;  %v1774_v45 = vadd.f32 %v1773_v18, %v1754_v17  ;;  %v10613_v17 = vor.u32 %v13610_v12, %v10612_v9  ;;  %v10000_v18 = vld [vmem:[#allocation8 + $0xf8] sm:$0xf]  ;;  %v13529_v28 = vld [vmem:[#allocation8 + $0x358] sm:$0xf0]  ;;  %v10181_v9 = vor.u32 %v13502_v4, %v10180_v32 }
 0x1d4   :  { %2170 = vmatpush.bf16.msrb.mxu2 %v10177_v37  ;;  %2189 = vmatpush.bf16.msrb.mxu3 %v10465_v38  ;;  %v10576_v27 = vld [vmem:[#allocation8 + $0x578] sm:$0xf]  ;;  %v13601_v37 = vld [vmem:[#allocation8 + $0x598] sm:$0xf0]  ;;  %v10001_v38 = vor.u32 %v13457_v21, %v10000_v18  ;;  %v10289_v40 = vor.u32 %v13529_v28, %v10288_v22 }
 0x1d5   :  { %2057 = vmatmul.bf16.vlgmr.msra.gmra.mxu0 %v15090_v11  ;;  %2076 = vmatmul.bf16.vlgmr.msra.gmra.mxu1 %v15092_v36  ;;  %v10577_v48 = vor.u32 %v13601_v37, %v10576_v27 }
 0x1d6   :  { %2095 = vmatmul.bf16.vlgmr.msra.gmra.mxu2 %v15088_v10  ;;  %2114 = vmatmul.bf16.vlgmr.msra.gmra.mxu3 %v15090_v11 }
 0x1d7   :  { %2201 = vmatpush.bf16.msra.mxu0 %v10145_v42  ;;  %2220 = vmatpush.bf16.msra.mxu1 %v10433_v6  ;;  %v13448_v42 = vld [vmem:[#allocation8 + $0xd0] sm:$0xf0] }
 0x1d8   :  { %2239 = vmatpush.bf16.msra.mxu2 %v10721_v44  ;;  %v13520_v6 = vld [vmem:[#allocation8 + $0x310] sm:$0xf0]  ;;  %v10540_v44 = vld [vmem:[#allocation8 + $0x530] sm:$0xf] }
 0x1d9   :  { %v1792_v57 = vpop.f32.mrf.mxu2  ;;  %v15160_v5 = vpop.f32.mrf.mxu3  ;;  %v10253_v54 = vor.u32 %v13520_v6, %v10252_v30 }
 0x1da   :  { %v1793_v52 = vadd.f32 %v1792_v57, %v1774_v45  ;;  %v1756_v56 = vpop.f32.mrf.mxu0  ;;  %v1775_v19 = vpop.f32.mrf.mxu1  ;;  %v13592_v45 = vld [vmem:[#allocation8 + $0x550] sm:$0xf0] }
 0x1db   :  { %v1776_v31 = vadd.f32 %v1775_v19, %v1756_v56  ;;  %2202 = vmatpush.bf16.msra.mxu0 %v10109_v58  ;;  %2221 = vmatpush.bf16.msra.mxu1 %v10397_v59  ;;  %v9965_v58 = vor.u32 %v13448_v42, %v9964_v29  ;;  %v10541_v55 = vor.u32 %v13592_v45, %v10540_v44  ;;  %v10216_v56 = vld [vmem:[#allocation8 + $0x2a8] sm:$0xf]  ;;  %v13511_v19 = vld [vmem:[#allocation8 + $0x2c8] sm:$0xf0] }
 0x1dc   :  { %v15162_v61 = vmul.f32 0.05103104, %v1793_v52  ;;  %2240 = vmatpush.bf16.msra.mxu2 %v10685_v60  ;;  %v13439_v52 = vld [vmem:[#allocation8 + $0x88] sm:$0xf0]  ;;  %v10504_v59 = vld [vmem:[#allocation8 + $0x4e8] sm:$0xf]  ;;  %v10217_v53 = vor.u32 %v13511_v19, %v10216_v56 }
 0x1dd   :  { %v13583_v60 = vld [vmem:[#allocation8 + $0x508] sm:$0xf0] }
 0x1de   :  { %2464 = vrot.lane.b32.xlu1 %v15162_v61, %s14816_s10  ;;  %v10505_v62 = vor.u32 %v13583_v60, %v10504_v59 }
 0x1df   :  { %2203 = vmatpush.bf16.msra.mxu0 %v10073_v63  ;;  %2222 = vmatpush.bf16.msra.mxu1 %v10361_v3  ;;  %v9892_v63 = vld [vmem:[#allocation8 + $0x20] sm:$0xf] }
 0x1e0   :  { %2241 = vmatpush.bf16.msra.mxu2 %v10649_v7  ;;  %v10468_v7 = vld [vmem:[#allocation8 + $0x4a0] sm:$0xf]  ;;  %v9893_v20 = vor.u32 %v13430_v1, %v9892_v63 }
 0x1e1   :  { %v1794_v35 = vpop.f32.mrf.mxu2  ;;  %v15166_v14 = vpop.f32.mrf.mxu3  ;;  %v10469_v12 = vor.u32 %v13574_v33, %v10468_v7 }
 0x1e2   :  { %v15168_v23 = vadd.f32 %v1794_v35, %v1776_v31  ;;  %v1759_v13 = vpop.f32.mrf.mxu0  ;;  %v1778_v46 = vpop.f32.mrf.mxu1  ;;  %v9929_v31 = vor.u32 %v13439_v52, %v9928_v51 }
 0x1e3   :  { %v1779_v15 = vadd.f32 %v1778_v46, %v1759_v13  ;;  %2204 = vmatpush.bf16.msra.mxu0 %v10037_v25  ;;  %2223 = vmatpush.bf16.msra.mxu1 %v10325_v16 }
 0x1e4   :  { %2242 = vmatpush.bf16.msra.mxu2 %v10613_v17  ;;  %v2261_v59 = vmul.f32 0.05103104, %v15168_v23 }
 0x1e5   :  { %2062 = vmatmul.bf16.gmra.mxu0 %v15124_v0  ;;  %2081 = vmatmul.bf16.gmra.mxu1 %v15126_v41 }
 0x1e6   :  { %2100 = vmatmul.bf16.gmra.mxu2 %v15122_v39  ;;  %2119 = vmatmul.bf16.gmra.mxu3 %v15124_v0 }
 0x1e7   :  { %2205 = vmatpush.bf16.msra.mxu0 %v10001_v38  ;;  %2224 = vmatpush.bf16.msra.mxu1 %v10289_v40 }
 0x1e8   :  { %2243 = vmatpush.bf16.msra.mxu2 %v10577_v48 }
 0x1e9   :  { %v1797_v43 = vpop.f32.mrf.mxu2  ;;  %v1816_v24 = vpop.f32.mrf.mxu3 }
 0x1ea   :  { %v15174_v47 = vadd.f32 %v1797_v43, %v1779_v15  ;;  %v1761_v49 = vpop.f32.mrf.mxu0  ;;  %v1780_v50 = vpop.f32.mrf.mxu1 }
 0x1eb   :  { %v1781_v57 = vadd.f32 %v1780_v50, %v1761_v49  ;;  %2206 = vmatpush.bf16.msra.mxu0 %v9965_v58  ;;  %2225 = vmatpush.bf16.msra.mxu1 %v10253_v54 }
 0x1ec   :  { %2244 = vmatpush.bf16.msra.mxu2 %v10541_v55 }
 0x1ef   :  { %2207 = vmatpush.bf16.msra.mxu0 %v9929_v31  ;;  %2226 = vmatpush.bf16.msra.mxu1 %v10217_v53 }
 0x1f0   :  { %2245 = vmatpush.bf16.msra.mxu2 %v10505_v62 }
 0x1f1   :  { %v1799_v2 = vpop.f32.mrf.mxu2  ;;  %v15176_v3 = vpop.f32.mrf.mxu3 }
 0x1f2   :  { %17107 = vst [vmem:[#allocation32_spill] sm:$0xff] %v15176_v3  ;;  %v15178_v8 = vadd.f32 %v1799_v2, %v1781_v57  ;;  %v15180_v34 = vpop.f32.mrf.mxu0  ;;  %v15182_v35 = vpop.f32.mrf.mxu1  ;;  %v13652_v3 = vld [vmem:[#allocation10 + $0x70] sm:$0xf0] }
 0x1f3   :  { %2208 = vmatpush.bf16.msra.mxu0 %v9893_v20  ;;  %2227 = vmatpush.bf16.msra.mxu1 %v10181_v9 }
 0x1f4   :  { %2246 = vmatpush.bf16.msra.mxu2 %v10469_v12 }
 0x1f5   :  { %2133 = vmatmul.bf16.vlgmr.msrb.gmra.mxu0 %v15092_v36  ;;  %2152 = vmatmul.bf16.vlgmr.msrb.gmra.mxu1 %v15088_v10 }
 0x1f6   :  { %2171 = vmatmul.bf16.vlgmr.msrb.gmra.mxu2 %v15090_v11  ;;  %2190 = vmatmul.bf16.vlgmr.msrb.gmra.mxu3 %v15092_v36 }
 0x1f9   :  { %v1868_v13 = vpop.f32.mrf.mxu2  ;;  %v1887_v46 = vpop.f32.mrf.mxu3 }
 0x1fa   :  { %v15188_v15 = vadd.f32 %v1887_v46, %v1868_v13  ;;  %v15190_v25 = vpop.f32.mrf.mxu0  ;;  %v15192_v16 = vpop.f32.mrf.mxu1 }
 0x201   :  { %v15194_v17 = vpop.f32.mrf.mxu2  ;;  %v15196_v18 = vpop.f32.mrf.mxu3 }
 0x202   :  { %v1835_v21 = vpop.f32.mrf.mxu0  ;;  %v1854_v22 = vpop.f32.mrf.mxu1 }
 0x203   :  { %v1836_v28 = vadd.f32 %v1835_v21, %v1816_v24 }
 0x205   :  { %v15198_v27 = vadd.f32 %v1854_v22, %v1836_v28  ;;  %2138 = vmatmul.bf16.gmra.mxu0 %v15126_v41  ;;  %2157 = vmatmul.bf16.gmra.mxu1 %v15122_v39 }
 0x206   :  { %2176 = vmatmul.bf16.gmra.mxu2 %v15124_v0  ;;  %2195 = vmatmul.bf16.gmra.mxu3 %v15126_v41 }
 0x207   :  { %17108 = vst [vmem:[#allocation33_spill] sm:$0xff] %v15198_v27 }
 0x209   :  { %v1873_v37 = vpop.f32.mrf.mxu2  ;;  %v1892_v38 = vpop.f32.mrf.mxu3 }
 0x20a   :  { %v1893_v40 = vadd.f32 %v1892_v38, %v1873_v37  ;;  %v15204_v48 = vpop.f32.mrf.mxu0  ;;  %v15206_v29 = vpop.f32.mrf.mxu1 }
 0x20b   :  { %17109 = vst [vmem:[#allocation34_spill] sm:$0xff] %v15204_v48  ;;  %v13655_v48 = vld [vmem:[#allocation10 + $0x88] sm:$0xf0] }
 0x20c   :  { %17110 = vst [vmem:[#allocation35_spill] sm:$0xff] %v15206_v29  ;;  %v10756_v29 = vld [vmem:[#allocation10 + $0x80] sm:$0xf] }
 0x211   :  { %v15208_v42 = vpop.f32.mrf.mxu2  ;;  %v15210_v30 = vpop.f32.mrf.mxu3 }
 0x212   :  { %17111 = vst [vmem:[#allocation36_spill] sm:$0xff] %v15208_v42  ;;  %v15212_v43 = vpop.f32.mrf.mxu0  ;;  %v1925_v24 = vpop.f32.mrf.mxu1 }
 0x213   :  { %17112 = vst [vmem:[#allocation37_spill] sm:$0xff] %v15210_v30 }
 0x215   :  { %2209 = vmatmul.bf16.vlgmr.msra.gmra.mxu0 %v15088_v10  ;;  %2228 = vmatmul.bf16.vlgmr.msra.gmra.mxu1 %v15090_v11 }
 0x216   :  { %2247 = vmatmul.bf16.vlgmr.msra.gmra.mxu2 %v15092_v36 }
 0x219   :  { %v1944_v6 = vpop.f32.mrf.mxu2  ;;  %v1963_v44 = vpop.f32.mrf.mxu3 }
 0x21a   :  { %v1945_v45 = vadd.f32 %v1944_v6, %v1925_v24  ;;  %v15217_v49 = vpop.f32.mrf.mxu0  ;;  %v1927_v50 = vpop.f32.mrf.mxu1 }
 0x21c   :  { %v1964_v57 = vadd.f32 %v1963_v44, %v1945_v45 }
 0x21e   :  { %2468 = vrot.lane.b32.xlu0 %v1964_v57, %s14816_s10 }
 0x221   :  { %v1946_v58 = vpop.f32.mrf.mxu2  ;;  %v1965_v52 = vpop.f32.mrf.mxu3 }
 0x222   :  { %v1947_v54 = vadd.f32 %v1946_v58, %v1927_v50  ;;  %v1911_v55 = vpop.f32.mrf.mxu0  ;;  %v15220_v51 = vpop.f32.mrf.mxu1 }
 0x223   :  { %v15222_v10 = vadd.f32 %v1911_v55, %v1893_v40 }
 0x224   :  { %v1966_v11 = vadd.f32 %v1965_v52, %v1947_v54 }
 0x225   :  { %17113 = vst [vmem:[#allocation38_spill] sm:$0xff] %v15222_v10  ;;  %2233 = vmatmul.bf16.gmra.mxu1 %v15124_v0  ;;  %2214 = vmatmul.bf16.gmra.mxu0 %v15122_v39  ;;  %v13658_v10 = vld [vmem:[#allocation10 + $0xa0] sm:$0xf0] }
 0x226   :  { %2252 = vmatmul.bf16.gmra.mxu2 %v15126_v41  ;;  %2470 = vrot.lane.b32.xlu2 %v1966_v11, %s14816_s10 }
 0x227   :  { %10722 = vmatpush.xpose.msk.msra.mxu3 %vm2373_vm13, %v1966_v11 }
 0x229   :  { %v15229_v36 = vpop.f32.mrf.mxu2  ;;  %v15240_v39 = vpop.f32.mrf.mxu3 }
 0x22a   :  { %v15231_v56 = vpop.f32.mrf.mxu0  ;;  %v15233_v19 = vpop.f32.mrf.mxu1 }
 0x22b   :  { %17114 = vst [vmem:[#allocation39_spill] sm:$0xff] %v15231_v56  ;;  %10723 = vmatpush.xpose.msk.msra.mxu3 %vm2373_vm13, %v1964_v57  ;;  %v10768_v56 = vld [vmem:[#allocation10 + $0x98] sm:$0xf] }
 0x22e   :  { %10724 = vmatmul.msk.f32.vlgmr.msra.gmra.mxu3 %vm2373_vm13, %v15162_v61  ;;  %2466 = vrot.lane.b32.xlu2 %v2261_v59, %s14816_s10 }
 0x231   :  { %v15242_v0 = vpop.f32.mrf.mxu2  ;;  %v15249_v31 = vpop.f32.mrf.mxu3 }
 0x232   :  { %v15244_v41 = vpop.f32.mrf.mxu0  ;;  %v15246_v60 = vpop.f32.mrf.mxu1 }
 0x236   :  { %10725 = vmatmul.msk.f32.gmra.mxu3 %vm2373_vm13, %v2261_v59 }
 0x239   :  { %v15251_v53 = vpop.f32.mrf.mxu2  ;;  %v15259_v32 = vpop.f32.mrf.mxu3 }
 0x23a   :  { %v15253_v23 = vpop.f32.mrf.mxu0  ;;  %v15255_v62 = vpop.f32.mrf.mxu1 }
 0x241   :  { %v15257_v61 = vpop.f32.mrf.mxu2  ;;  %v15267_v9 = vpop.f32.mrf.mxu3 }
 0x242   :  { %v1987_v63 = vpop.f32.mrf.mxu0  ;;  %v2006_v1 = vpop.f32.mrf.mxu1 }
 0x243   :  { %v2007_v2 = vadd.f32 %v2006_v1, %v1987_v63 }
 0x249   :  { %v2025_v4 = vpop.f32.mrf.mxu2  ;;  %v15275_v21 = vpop.f32.mrf.mxu3 }
 0x24a   :  { %v15261_v7 = vadd.f32 %v2025_v4, %v2007_v2  ;;  %v15263_v33 = vpop.f32.mrf.mxu0  ;;  %v15265_v20 = vpop.f32.mrf.mxu1  ;;  %17119 = vst [vmem:[#allocation44_spill] sm:$0xff] %v15275_v21  ;;  %v15328_v21 = vor.u32 %v13658_v10, %v10768_v56  ;;  %v2004_v56 = vadd.f32 %v15255_v62, %v15253_v23 }
 0x24b   :  { %17116 = vst [vmem:[#allocation41_spill] sm:$0xff] %v15263_v33  ;;  %v10823_v33 = vld [vmem:[#allocation10 + $0x48] sm:$0xf] }
 0x24c   :  { %17115 = vst [vmem:[#allocation40_spill] sm:$0xff] %v15261_v7 }
 0x24d   :  { %17117 = vst [vmem:[#allocation42_spill] sm:$0xff] %v15265_v20 }
 0x24e   :  { %17129 = vst [vmem:[#allocation54_spill] sm:$0xff] %v15328_v21 }
 0x251   :  { %v15269_v12 = vpop.f32.mrf.mxu2  ;;  %v15281_v38 = vpop.f32.mrf.mxu3 }
 0x252   :  { %17118 = vst [vmem:[#allocation43_spill] sm:$0xff] %v15269_v12  ;;  %v15271_v13 = vpop.f32.mrf.mxu0  ;;  %v15273_v46 = vpop.f32.mrf.mxu1 }
 0x253   :  { %17120 = vst [vmem:[#allocation45_spill] sm:$0xff] %v15281_v38 }
 0x259   :  { %v2096_v22 = vpop.f32.mrf.mxu2  ;;  %v2115_v57 = vpop.f32.mrf.mxu3 }
 0x25a   :  { %v15277_v28 = vpop.f32.mrf.mxu0  ;;  %v15279_v37 = vpop.f32.mrf.mxu1  ;;  %v2116_v11 = vadd.f32 %v2115_v57, %v2096_v22 }
 0x261   :  { %v2098_v40 = vpop.f32.mrf.mxu2  ;;  %v2117_v52 = vpop.f32.mrf.mxu3 }
 0x262   :  { %v15283_v24 = vpop.f32.mrf.mxu0  ;;  %v15285_v6 = vpop.f32.mrf.mxu1  ;;  %v2118_v59 = vadd.f32 %v2117_v52, %v2098_v40 }
 0x263   :  { %17121 = vst [vmem:[#allocation46_spill] sm:$0xff] %v15283_v24 }
 0x264   :  { %17122 = vst [vmem:[#allocation47_spill] sm:$0xff] %v15285_v6 }
 0x269   :  { %v15287_v44 = vpop.f32.mrf.mxu2 }
 0x26a   :  { %v15289_v45 = vpop.f32.mrf.mxu0  ;;  %v15291_v50 = vpop.f32.mrf.mxu1 }
 0x26b   :  { %17123 = vst [vmem:[#allocation48_spill] sm:$0xff] %v15289_v45  ;;  %v2465_v45 = vpop.permute.xlu1 %2464 }
 0x26c   :  { %17124 = vst [vmem:[#allocation49_spill] sm:$0xff] %v15291_v50 }
 0x271   :  { %v15293_v58 = vpop.f32.mrf.mxu2 }
 0x272   :  { %v2134_v54 = vpop.f32.mrf.mxu0  ;;  %v15295_v55 = vpop.f32.mrf.mxu1 }
 0x273   :  { %v15301_v4 = vadd.f32 %v2134_v54, %v2116_v11  ;;  %v10780_v11 = vld [vmem:[#allocation10 + $0xb0] sm:$0xf] }
 0x279   :  { %v15297_v63 = vpop.f32.mrf.mxu2 }
 0x27a   :  { %v2136_v1 = vpop.f32.mrf.mxu0  ;;  %v15299_v2 = vpop.f32.mrf.mxu1 }
 0x27b   :  { %v15303_v26 = vadd.f32 %v2136_v1, %v2118_v59  ;;  %v13661_v59 = vld [vmem:[#allocation10 + $0xb8] sm:$0xf0] }
 0x27c   :  { %v15322_v1 = vor.u32 %v13661_v59, %v10780_v11  ;;  %v15334_v11 = vor.u32 %v13655_v48, %v10756_v29  ;;  %v10744_v59 = vld [vmem:[#allocation10 + $0x68] sm:$0xf]  ;;  %v15349_v48 = vadd.f32 %v15257_v61, %v2004_v56  ;;  %v2002_v29 = vadd.f32 %v15246_v60, %v15244_v41 }
 0x27d   :  { %2454 = vmatpush.msrb.mxu3 %v15303_v26  ;;  %v15339_v10 = vor.u32 %v13652_v3, %v10744_v59  ;;  %v2270_v41 = vlaneseq }
 0x27e   :  { %17130 = vst [vmem:[#allocation55_spill] sm:$0xff] %v15334_v11  ;;  %v15357_v3 = vadd.f32 %v15251_v53, %v2002_v29 }
 0x27f   :  { %2455 = vmatpush.msrb.mxu3 %v15301_v4  ;;  %17131 = vst [vmem:[#allocation56_spill] sm:$0xff] %v15339_v10  ;;  %v2271_v60 = vshrl.u32 %v2270_v41, 7 }
 0x280   :  { %v2471_v30 = vpop.permute.xlu2 %2470 }
 0x281   :  { %v15309_v42 = vpop.f32.mrf.mxu2  ;;  %10728 = vmatpush.xpose.msk.msrb.mxu0 %vm2373_vm13, %v2471_v30 }
 0x282   :  { %v15312_v22 = vpop.f32.mrf.mxu0  ;;  %v15314_v40 = vpop.f32.mrf.mxu1 }
 0x283   :  { %17125 = vst [vmem:[#allocation50_spill] sm:$0xff] %v15314_v40 }
 0x288   :  { %v2467_v27 = vpop.permute.xlu2 %2466 }
 0x289   :  { %v15316_v57 = vpop.f32.mrf.mxu2 }
 0x28a   :  { %17126 = vst [vmem:[#allocation51_spill] sm:$0xff] %v15316_v57  ;;  %v15318_v54 = vpop.f32.mrf.mxu0  ;;  %v15320_v52 = vpop.f32.mrf.mxu1  ;;  %v2274_v57 = vand.u32 127, %v2270_v41 }
 0x28b   :  { %17127 = vst [vmem:[#allocation52_spill] sm:$0xff] %v15320_v52 }
 0x28c   :  { %vm15367_vm14 = vcmp.le.s32.totalorder %v2274_v57, %v2271_v60 }
 0x290   :  { %v2469_v6 = vpop.permute.xlu0 %2468 }
 0x291   :  { %v15324_v50 = vpop.f32.mrf.mxu2  ;;  %10729 = vmatpush.xpose.msk.msrb.mxu0 %vm2373_vm13, %v2469_v6 }
 0x292   :  { %17128 = vst [vmem:[#allocation53_spill] sm:$0xff] %v15324_v50  ;;  %v2210_v30 = vpop.f32.mrf.mxu0  ;;  %v2229_v24 = vpop.f32.mrf.mxu1 }
 0x293   :  { %v15330_v38 = vadd.f32 %v2229_v24, %v2210_v30 }
 0x294   :  { %10730 = vmatmul.msk.f32.vlgmr.msrb.gmra.mxu0 %vm2373_vm13, %v2465_v45 }
 0x295   :  { %2664 = vmatpush.bf16.msra.mxu0 %v15322_v1 }
 0x299   :  { %2665 = vmatpush.bf16.msra.mxu0 %v15328_v21  ;;  %v15336_v6 = vpop.f32.mrf.mxu2 }
 0x29a   :  { %v15343_v24 = vpop.f32.mrf.mxu0  ;;  %v15345_v30 = vpop.f32.mrf.mxu1 }
 0x29c   :  { %10731 = vmatmul.msk.f32.gmra.mxu0 %vm2373_vm13, %v2467_v27 }
 0x29d   :  { %2666 = vmatpush.bf16.msra.mxu0 %v15334_v11 }
 0x2a1   :  { %2667 = vmatpush.bf16.msra.mxu0 %v15339_v10  ;;  %v15359_v23 = vpop.f32.mrf.mxu2 }
 0x2a2   :  { %v2215_v27 = vpop.f32.mrf.mxu0  ;;  %v2234_v62 = vpop.f32.mrf.mxu1 }
 0x2a3   :  { %v2235_v61 = vadd.f32 %v2234_v62, %v2215_v27  ;;  %v2272_v27 = vadd.s32 8, %v2271_v60 }
 0x2a5   :  { %10836 = vmatpush.xpose.msk.msrb.mxu0 %vm2373_vm13, %v15349_v48  ;;  %vm15374_vm0 = vcmp.le.s32.totalorder %v2274_v57, %v2272_v27 }
 0x2a9   :  { %10837 = vmatpush.xpose.msk.msrb.mxu0 %vm2373_vm13, %v15357_v3  ;;  %v2253_v45 = vpop.f32.mrf.mxu2 }
 0x2aa   :  { %v15363_v59 = vadd.f32 %v2253_v45, %v2235_v61  ;;  %v15365_v56 = vpop.f32.mrf.mxu0 }
 0x2ab   :  { %17133 = vst [vmem:[#allocation58_spill] sm:$0xff] %v15365_v56 }
 0x2ac   :  { %17132 = vst [vmem:[#allocation57_spill] sm:$0xff] %v15363_v59  ;;  %v17138_v59 = vpack.i.bf16 %v15301_v4, %v15303_v26 }
 0x311   :  { %v2497_v40 = vpop.f32.mrf.mxu0 }
 0x312   :  { %v2503_v29 = vsel %vm15367_vm14, %v2497_v40, -inf  ;;  %v15385_v40 = vpop.f32.mrf.mxu3 }
 0x313   :  { %v2505_v50 = vsel %vm2411_vm15, %v2503_v29, -inf }
 0x314   :  { %2506 = vmax.xlane.f32.xlu0 %v2505_v50 }
 0x319   :  { %v2500_v62 = vpop.f32.mrf.mxu0 }
 0x31a   :  { %v2504_v45 = vsel %vm15374_vm0, %v2500_v62, -inf  ;;  %v15387_v50 = vpop.f32.mrf.mxu3 }
 0x31b   :  { %v2508_v41 = vsel %vm2411_vm15, %v2504_v45, -inf }
 0x31c   :  { %2509 = vmax.xlane.f32.xlu2 %v2508_v41 }
 0x322   :  { %v2191_v60 = vpop.f32.mrf.mxu3 }
 0x328   :  { %14310 = vrot.lane.b32.xlu0 %v17138_v59, %s14816_s10 }
 0x32a   :  { %v2193_v57 = vpop.f32.mrf.mxu3 }
 0x332   :  { %v15389_v27 = vpop.f32.mrf.mxu3 }
 0x333   :  { %17139 = vst [vmem:[#allocation59_spill] sm:$0xff] %v15389_v27  ;;  %v13648_v27 = vld [vmem:[#allocation10 + $0x50] sm:$0xf0] }
 0x33a   :  { %v15391_v62 = vpop.f32.mrf.mxu3 }
 0x33b   :  { %17140 = vst [vmem:[#allocation60_spill] sm:$0xff] %v15391_v62  ;;  %v13645_v62 = vld [vmem:[#allocation10 + $0x38] sm:$0xf0] }
 0x342   :  { %v2403_v26 = vpop.f32.mrf.mxu3 }
 0x343   :  { %v2409_v59 = vsel %vm15367_vm14, %v2403_v26, -inf }
 0x387   :  { %v2507_v56 = vpop.xlane.xlu0 %2506 }
 0x388   :  { %v2511_v52 = vsub.f32 %v2503_v29, %v2507_v56  ;;  %v2412_v29 = vsel %vm2411_vm15, %v2409_v59, -inf }
 0x38a   :  { %v2513_v7 = vmul.f32 1.442695, %v2511_v52 }
 0x38c   :  { %14349 = vpow2.f32 %v2513_v7 }
 0x38f   :  { %v2510_v41 = vpop.xlane.xlu2 %2509 }
 0x390   :  { %v2512_v12 = vsub.f32 %v2504_v45, %v2510_v41  ;;  %v2406_v45 = vpop.f32.mrf.mxu3 }
 0x392   :  { %v14350_v10 = vpop.eup %14349  ;;  %v2515_v20 = vmul.f32 1.442695, %v2512_v12  ;;  %v15398_v12 = vor.u32 %v13648_v27, %v10823_v33  ;;  %v10799_v33 = vld [vmem:[#allocation10 + $0x18] sm:$0xf]  ;;  %v13642_v27 = vld [vmem:[#allocation10 + $0x20] sm:$0xf0] }
 0x393   :  { %v2517_v4 = vsel %vm2411_vm15, %v14350_v10, 0.0 }
 0x394   :  { %14351 = vpow2.f32 %v2515_v20  ;;  %2518 = vadd.xlane.f32.xlu1 %v2517_v4  ;;  %17141 = vst [vmem:[#allocation61_spill] sm:$0xff] %v15398_v12  ;;  %v2410_v20 = vsel %vm15374_vm0, %v2406_v45, -inf  ;;  %v10811_v4 = vld [vmem:[#allocation10 + $0x30] sm:$0xf] }
 0x395   :  { %v2415_v26 = vsel %vm2411_vm15, %v2410_v20, -inf  ;;  %v15404_v21 = vor.u32 %v13645_v62, %v10811_v4  ;;  %v2175_v62 = vadd.f32 %v15309_v42, %v15299_v2 }
 0x397   :  { %17142 = vst [vmem:[#allocation62_spill] sm:$0xff] %v15404_v21 }
 0x39a   :  { %v14352_v11 = vpop.eup %14351  ;;  %v14311_v56 = vpop.permute.xlu0 %14310 }
 0x39b   :  { %v14312_v52 = vunpack.i.l.bf16 %v14311_v56  ;;  %v2520_v7 = vsel %vm2411_vm15, %v14352_v11, 0.0  ;;  %v14313_v41 = vunpack.i.h.bf16 %v14311_v56  ;;  %v10787_v56 = vld [vmem:[#allocation10] sm:$0xf] }
 0x39c   :  { %2413 = vmax.xlane.f32.xlu1 %v2412_v29  ;;  %2521 = vadd.xlane.f32.xlu2 %v2520_v7  ;;  %v15407_v29 = vor.u32 %v13642_v27, %v10799_v33 }
 0x39d   :  { %2555 = vmatpush.msrb.mxu1 %v14312_v52  ;;  %v13639_v52 = vld [vmem:[#allocation10 + $0x8] sm:$0xf0] }
 0x39e   :  { %17143 = vst [vmem:[#allocation63_spill] sm:$0xff] %v15407_v29  ;;  %v15410_v7 = vor.u32 %v13639_v52, %v10787_v56 }
 0x39f   :  { %2556 = vmatpush.msrb.mxu1 %v14313_v41 }
 0x3a0   :  { %17144 = vst [vmem:[#allocation64_spill] sm:$0xff] %v15410_v7 }
 0x3a1   :  { %2745 = vmatpush.bf16.msra.mxu1 %v15398_v12 }
 0x3a4   :  { %2416 = vmax.xlane.f32.xlu2 %v2415_v26  ;;  %v2173_v26 = vadd.f32 %v15297_v63, %v15295_v55 }
 0x3a5   :  { %2746 = vmatpush.bf16.msra.mxu1 %v15404_v21  ;;  %v15417_v21 = vadd.f32 %v2193_v57, %v2175_v62 }
 0x3a6   :  { %v15420_v56 = vadd.f32 %v2191_v60, %v2173_v26  ;;  %v10772_v60 = vld [vmem:[#allocation10 + $0xa8] sm:$0xf] }
 0x3a9   :  { %2747 = vmatpush.bf16.msra.mxu1 %v15407_v29 }
 0x3ad   :  { %2748 = vmatpush.bf16.msra.mxu1 %v15410_v7 }
 0x407   :  { %v2519_v45 = vpop.xlane.xlu1 %2518 }
 0x408   :  { %14353 = vrcp.f32 %v2519_v45  ;;  %v13660_v45 = vld [vmem:[#allocation10 + $0xb0] sm:$0xf0] }
 0x40e   :  { %v14354_v41 = vpop.eup %14353 }
 0x40f   :  { %v2525_v4 = vmul.f32 %v14354_v41, %v14350_v10  ;;  %v2414_v33 = vpop.xlane.xlu1 %2413  ;;  %v2522_v27 = vpop.xlane.xlu2 %2521 }
 0x410   :  { %v2418_v29 = vsub.f32 %v2409_v59, %v2414_v33  ;;  %14355 = vrcp.f32 %v2522_v27  ;;  %v13654_v33 = vld [vmem:[#allocation10 + $0x80] sm:$0xf0] }
 0x411   :  { %10732 = vmatmul.msk.f32.vlgmr.msrb.gmra.mxu1 %vm2411_vm15, %v2525_v4  ;;  %v10748_v4 = vld [vmem:[#allocation10 + $0x78] sm:$0xf] }
 0x412   :  { %v2420_v52 = vmul.f32 1.442695, %v2418_v29  ;;  %2862 = vmatpush.msrb.mxu1 %v15417_v21  ;;  %v15426_v29 = vor.u32 %v13660_v45, %v10772_v60  ;;  %v15435_v27 = vor.u32 %v13654_v33, %v10748_v4  ;;  %v13653_v45 = vld [vmem:[#allocation10 + $0x7c] sm:$0xf]  ;;  %v10738_v4 = vld [vmem:[#allocation10 + $0x6c] sm:$0xf0] }
 0x414   :  { %14357 = vpow2.f32 %v2420_v52  ;;  %2863 = vmatpush.msrb.mxu1 %v15420_v56  ;;  %2636 = vmatpush.bf16.msrb.mxu2 %v15426_v29  ;;  %v10736_v52 = vld [vmem:[#allocation10 + $0x60] sm:$0xf] }
 0x416   :  { %v14356_v42 = vpop.eup %14355 }
 0x417   :  { %v2417_v2 = vpop.xlane.xlu2 %2416  ;;  %v2526_v55 = vmul.f32 %v14356_v42, %v14352_v11  ;;  %v10760_v11 = vld [vmem:[#allocation10 + $0x90] sm:$0xf]  ;;  %v13651_v42 = vld [vmem:[#allocation10 + $0x68] sm:$0xf0] }
 0x418   :  { %v2419_v63 = vsub.f32 %v2410_v20, %v2417_v2  ;;  %v13657_v20 = vld [vmem:[#allocation10 + $0x98] sm:$0xf0]  ;;  %v15438_v2 = vor.u32 %v13651_v42, %v10736_v52  ;;  %v15452_v52 = vpop.f32.mrf.mxu1 }
 0x419   :  { %10733 = vmatmul.msk.f32.gmra.mxu1 %vm2411_vm15, %v2526_v55  ;;  %v15432_v26 = vor.u32 %v13657_v20, %v10760_v11  ;;  %v13659_v55 = vld [vmem:[#allocation10 + $0xac] sm:$0xf]  ;;  %v13650_v20 = vld [vmem:[#allocation10 + $0x64] sm:$0xf]  ;;  %17146 = vst [vmem:[#allocation66_spill] sm:$0xff] %v15452_v52 }
 0x41a   :  { %v14358_v10 = vpop.eup %14357  ;;  %v2422_v57 = vmul.f32 1.442695, %v2419_v63  ;;  %v15450_v33 = vor.u32 %v13650_v20, %v10738_v4  ;;  %v1831_v20 = vadd.f32 %v15180_v34, %v15160_v5  ;;  %v13647_v5 = vld [vmem:[#allocation10 + $0x4c] sm:$0xf]  ;;  %v10825_v34 = vld [vmem:[#allocation10 + $0x54] sm:$0xf0] }
 0x41b   :  { %v2424_v59 = vsel %vm2411_vm15, %v14358_v10, 0.0  ;;  %2637 = vmatpush.bf16.msrb.mxu2 %v15432_v26 }
 0x41c   :  { %14359 = vpow2.f32 %v2422_v57  ;;  %2425 = vadd.xlane.f32.xlu1 %v2424_v59  ;;  %v13656_v57 = vld [vmem:[#allocation10 + $0x94] sm:$0xf]  ;;  %v10762_v59 = vld [vmem:[#allocation10 + $0x9c] sm:$0xf0]  ;;  %17145 = vst [vmem:[#allocation65_spill] sm:$0xff] %v15450_v33  ;;  %v1850_v4 = vadd.f32 %v15182_v35, %v1831_v20 }
 0x41d   :  { %v15444_v60 = vor.u32 %v13656_v57, %v10762_v59  ;;  %v13649_v35 = vld [vmem:[#allocation10 + $0x58] sm:$0xf0]  ;;  %v10801_v20 = vld [vmem:[#allocation10 + $0x24] sm:$0xf0] }
 0x41f   :  { %2638 = vmatpush.bf16.msrb.mxu2 %v15435_v27 }
 0x422   :  { %v14360_v62 = vpop.eup %14359 }
 0x423   :  { %v2427_v41 = vsel %vm2411_vm15, %v14360_v62, 0.0  ;;  %2639 = vmatpush.bf16.msrb.mxu2 %v15438_v2 }
 0x424   :  { %2428 = vadd.xlane.f32.xlu2 %v2427_v41  ;;  %v10750_v41 = vld [vmem:[#allocation10 + $0x84] sm:$0xf0] }
 0x425   :  { %v15447_v11 = vor.u32 %v13653_v45, %v10750_v41 }
 0x43c   :  { %2993 = vrot.lane.b32.xlu2 %v15349_v48, %s14816_s10  ;;  %v10774_v48 = vld [vmem:[#allocation10 + $0xb4] sm:$0xf0] }
 0x43d   :  { %v15441_v63 = vor.u32 %v13659_v55, %v10774_v48 }
 0x43f   :  { %2650 = vmatpush.bf16.msra.mxu3 %v15441_v63 }
 0x443   :  { %2651 = vmatpush.bf16.msra.mxu3 %v15444_v60 }
 0x447   :  { %2652 = vmatpush.bf16.msra.mxu3 %v15447_v11 }
 0x44b   :  { %2653 = vmatpush.bf16.msra.mxu3 %v15450_v33 }
 0x48e   :  { %v2558_v42 = vpop.f32.mrf.mxu1 }
 0x48f   :  { %v2426_v55 = vpop.xlane.xlu1 %2425 }
 0x490   :  { %14361 = vrcp.f32 %v2426_v55  ;;  %v15462_v55 = vmul.f32 0.05103104, %v1850_v4  ;;  %v10807_v4 = vld [vmem:[#allocation10 + $0x20] sm:$0xf] }
 0x496   :  { %v14362_v48 = vpop.eup %14361  ;;  %v2561_v57 = vpop.f32.mrf.mxu1 }
 0x497   :  { %v2432_v59 = vmul.f32 %v14362_v48, %v14358_v10  ;;  %v2564_v7 = vpack.c.bf16 %v2561_v57, %v2558_v42  ;;  %v2429_v12 = vpop.xlane.xlu2 %2428  ;;  %v10831_v42 = vld [vmem:[#allocation10 + $0x50] sm:$0xf]  ;;  %v15471_v48 = vor.u32 %v13647_v5, %v10825_v34  ;;  %v13638_v34 = vld [vmem:[#allocation10 + $0x4] sm:$0xf] }
 0x498   :  { %14363 = vrcp.f32 %v2429_v12  ;;  %v1833_v12 = vadd.f32 %v15190_v25, %v15166_v14  ;;  %v15473_v57 = vor.u32 %v13649_v35, %v10831_v42  ;;  %v13644_v14 = vld [vmem:[#allocation10 + $0x34] sm:$0xf]  ;;  %v10813_v25 = vld [vmem:[#allocation10 + $0x3c] sm:$0xf0]  ;;  %v10789_v42 = vld [vmem:[#allocation10 + $0xc] sm:$0xf0] }
 0x499   :  { %10726 = vmatmul.msk.f32.vlgmr.msrb.gmra.mxu3 %vm2411_vm15, %v2432_v59  ;;  %10782 = vmatmul.msk.bf16.vlgmr.msrb.gmra.mxu2 %vm2373_vm13, %v2564_v7  ;;  %v15477_v59 = vor.u32 %v13644_v14, %v10813_v25  ;;  %v10795_v35 = vld [vmem:[#allocation10 + $0x8] sm:$0xf]  ;;  %v15489_v14 = vor.u32 %v13638_v34, %v10789_v42  ;;  %v13640_v25 = vld [vmem:[#allocation10 + $0x10] sm:$0xf0] }
 0x49a   :  { %10784 = vmatmul.msk.bf16.vlgmr.msra.gmra.mxu0 %vm2373_vm13, %v2564_v7  ;;  %v1852_v10 = vadd.f32 %v15192_v16, %v1833_v12  ;;  %17147 = vst [vmem:[#allocation67_spill] sm:$0xff] %v15473_v57  ;;  %2759 = vmatpush.bf16.msra.mxu2 %v15471_v48  ;;  %v13646_v16 = vld [vmem:[#allocation10 + $0x40] sm:$0xf0] }
 0x49b   :  { %2773 = vmatpush.bf16.msrb.mxu3 %v15473_v57 }
 0x49e   :  { %v14364_v45 = vpop.eup %14363  ;;  %2760 = vmatpush.bf16.msra.mxu2 %v15477_v59 }
 0x49f   :  { %v2433_v41 = vmul.f32 %v14364_v45, %v14360_v62  ;;  %v2262_v62 = vmul.f32 0.05103104, %v1852_v10  ;;  %v13643_v10 = vld [vmem:[#allocation10 + $0x28] sm:$0xf0]  ;;  %v2994_v52 = vpop.permute.xlu2 %2993 }
 0x4a0   :  { %v15485_v5 = vor.u32 %v13643_v10, %v10807_v4 }
 0x4a1   :  { %10727 = vmatmul.msk.f32.gmra.mxu3 %vm2411_vm15, %v2433_v41  ;;  %v13641_v41 = vld [vmem:[#allocation10 + $0x1c] sm:$0xf] }
 0x4a2   :  { %v15483_v12 = vor.u32 %v13641_v41, %v10801_v20  ;;  %17149 = vst [vmem:[#allocation69_spill] sm:$0xff] %v15485_v5 }
 0x4a4   :  { %2761 = vmatpush.bf16.msra.mxu2 %v15483_v12 }
 0x4a8   :  { %2762 = vmatpush.bf16.msra.mxu2 %v15489_v14 }
 0x4a9   :  { %10783 = vmatmul.msk.bf16.vlgmr.msra.gmra.mxu3 %vm2373_vm13, %v2564_v7  ;;  %v10819_v7 = vld [vmem:[#allocation10 + $0x38] sm:$0xf] }
 0x4aa   :  { %10838 = vmatmul.msk.f32.vlgmr.msrb.gmra.mxu0 %vm2373_vm13, %v15462_v55  ;;  %v15479_v45 = vor.u32 %v13646_v16, %v10819_v7  ;;  %v15491_v7 = vor.u32 %v13640_v25, %v10795_v35 }
 0x4ac   :  { %17148 = vst [vmem:[#allocation68_spill] sm:$0xff] %v15479_v45  ;;  %2774 = vmatpush.bf16.msrb.mxu3 %v15479_v45 }
 0x4ad   :  { %17150 = vst [vmem:[#allocation70_spill] sm:$0xff] %v15491_v7 }
 0x4b0   :  { %2775 = vmatpush.bf16.msrb.mxu3 %v15485_v5 }
 0x4b2   :  { %10839 = vmatmul.msk.f32.gmra.mxu0 %vm2373_vm13, %v2262_v62 }
 0x4b4   :  { %2776 = vmatpush.bf16.msrb.mxu3 %v15491_v7 }
 0x517   :  { %v15495_v16 = vpop.f32.mrf.mxu0 }
 0x51c   :  { %v2457_v41 = vpop.f32.mrf.mxu3 }
 0x51f   :  { %v15497_v20 = vpop.f32.mrf.mxu0 }
 0x520   :  { %17151 = vst [vmem:[#allocation71_spill] sm:$0xff] %v15497_v20 }
 0x524   :  { %v2460_v4 = vpop.f32.mrf.mxu3 }
 0x525   :  { %v2463_v10 = vpack.c.bf16 %v2460_v4, %v2457_v41 }
 0x527   :  { %v2812_v5 = vpop.f32.mrf.mxu0  ;;  %10833 = vmatmul.msk.bf16.vlgmr.msra.gmra.mxu1 %vm2373_vm13, %v2463_v10  ;;  %10834 = vmatmul.msk.bf16.vlgmr.msra.gmra.mxu2 %vm2373_vm13, %v2463_v10 }
 0x528   :  { %v2818_v34 = vsel %vm15367_vm14, %v2812_v5, -inf  ;;  %10835 = vmatmul.msk.bf16.vlgmr.msrb.gmra.mxu3 %vm2373_vm13, %v2463_v10  ;;  %10893 = vmatpush.xpose.msk.msra.mxu1 %vm2373_vm13, %v2994_v52 }
 0x529   :  { %v2820_v42 = vsel %vm2411_vm15, %v2818_v34, -inf }
 0x52a   :  { %2821 = vmax.xlane.f32.xlu0 %v2820_v42 }
 0x52f   :  { %v2815_v35 = vpop.f32.mrf.mxu0 }
 0x530   :  { %v2819_v25 = vsel %vm15374_vm0, %v2815_v35, -inf }
 0x531   :  { %v2823_v41 = vsel %vm2411_vm15, %v2819_v25, -inf }
 0x532   :  { %2824 = vmax.xlane.f32.xlu1 %v2823_v41  ;;  %v13668_v41 = vld [vmem:[#allocation10 + $0xf4] sm:$0xf] }
 0x53e   :  { %2989 = vrot.lane.b32.xlu0 %v2262_v62, %s14816_s10 }
 0x59d   :  { %v2822_v4 = vpop.xlane.xlu0 %2821 }
 0x59e   :  { %v2826_v20 = vsub.f32 %v2818_v34, %v2822_v4 }
 0x5a0   :  { %v2828_v7 = vmul.f32 1.442695, %v2826_v20 }
 0x5a2   :  { %14365 = vpow2.f32 %v2828_v7 }
 0x5a5   :  { %v2825_v5 = vpop.xlane.xlu1 %2824 }
 0x5a6   :  { %v2827_v10 = vsub.f32 %v2819_v25, %v2825_v5  ;;  %v13671_v25 = vld [vmem:[#allocation10 + $0x10c] sm:$0xf]  ;;  %v10870_v5 = vld [vmem:[#allocation10 + $0xfc] sm:$0xf0] }
 0x5a8   :  { %v14366_v45 = vpop.eup %14365  ;;  %v2830_v52 = vmul.f32 1.442695, %v2827_v10  ;;  %v10880_v10 = vld [vmem:[#allocation10 + $0x108] sm:$0xf] }
 0x5a9   :  { %v2832_v57 = vsel %vm2411_vm15, %v14366_v45, 0.0 }
 0x5aa   :  { %14367 = vpow2.f32 %v2830_v52  ;;  %2833 = vadd.xlane.f32.xlu2 %v2832_v57  ;;  %v10882_v57 = vld [vmem:[#allocation10 + $0x114] sm:$0xf0]  ;;  %v13672_v52 = vld [vmem:[#allocation10 + $0x110] sm:$0xf0] }
 0x5ab   :  { %v15517_v4 = vor.u32 %v13671_v25, %v10882_v57  ;;  %v13662_v57 = vld [vmem:[#allocation10 + $0xc4] sm:$0xf] }
 0x5ad   :  { %17152 = vst [vmem:[#allocation72_spill] sm:$0xff] %v15517_v4  ;;  %2957 = vmatpush.bf16.msra.mxu3 %v15517_v4  ;;  %v10913_v4 = vld [vmem:[#allocation10 + $0x138] sm:$0xf] }
 0x5b0   :  { %v14368_v42 = vpop.eup %14367 }
 0x5b1   :  { %v2835_v35 = vsel %vm2411_vm15, %v14368_v42, 0.0 }
 0x5b2   :  { %2836 = vadd.xlane.f32.xlu1 %v2835_v35 }
 0x5c2   :  { %2987 = vrot.lane.b32.xlu2 %v15462_v55, %s14816_s10  ;;  %v10888_v55 = vld [vmem:[#allocation10 + $0x110] sm:$0xf] }
 0x5cb   :  { %2991 = vrot.lane.b32.xlu1 %v15357_v3, %s14816_s10  ;;  %v15520_v3 = vor.u32 %v13668_v41, %v10870_v5  ;;  %v10846_v41 = vld [vmem:[#allocation10 + $0xcc] sm:$0xf0]  ;;  %v10937_v5 = vld [vmem:[#allocation10 + $0x168] sm:$0xf] }
 0x5cd   :  { %17153 = vst [vmem:[#allocation73_spill] sm:$0xff] %v15520_v3  ;;  %2958 = vmatpush.bf16.msra.mxu3 %v15520_v3  ;;  %v13667_v3 = vld [vmem:[#allocation10 + $0xe8] sm:$0xf0] }
 0x61d   :  { %v2834_v62 = vpop.xlane.xlu2 %2833 }
 0x61e   :  { %14369 = vrcp.f32 %v2834_v62  ;;  %v15522_v62 = vor.u32 %v13672_v52, %v10880_v10  ;;  %v13684_v10 = vld [vmem:[#allocation10 + $0x170] sm:$0xf0] }
 0x61f   :  { %v15535_v52 = vor.u32 %v13684_v10, %v10937_v5  ;;  %v10925_v10 = vld [vmem:[#allocation10 + $0x150] sm:$0xf] }
 0x620   :  { %2943 = vmatpush.bf16.msrb.mxu2 %v15522_v62 }
 0x621   :  { %17156 = vst [vmem:[#allocation76_spill] sm:$0xff] %v15535_v52 }
 0x624   :  { %v14370_v7 = vpop.eup %14369 }
 0x625   :  { %v2840_v20 = vmul.f32 %v14370_v7, %v14366_v45  ;;  %v2837_v34 = vpop.xlane.xlu1 %2836  ;;  %v13673_v45 = vld [vmem:[#allocation10 + $0x118] sm:$0xf0] }
 0x626   :  { %14371 = vrcp.f32 %v2837_v34  ;;  %v13665_v34 = vld [vmem:[#allocation10 + $0xdc] sm:$0xf]  ;;  %v15524_v33 = vor.u32 %v13673_v45, %v10888_v55  ;;  %v2990_v45 = vpop.permute.xlu0 %2989 }
 0x627   :  { %10840 = vmatmul.msk.f32.vlgmr.msrb.gmra.mxu1 %vm2411_vm15, %v2840_v20  ;;  %v10858_v20 = vld [vmem:[#allocation10 + $0xe4] sm:$0xf0] }
 0x628   :  { %2971 = vmatpush.bf16.msra.mxu0 %v15524_v33  ;;  %v15530_v25 = vor.u32 %v13665_v34, %v10858_v20  ;;  %v13669_v34 = vld [vmem:[#allocation10 + $0xf8] sm:$0xf0]  ;;  %v10876_v20 = vld [vmem:[#allocation10 + $0xf8] sm:$0xf] }
 0x62a   :  { %17154 = vst [vmem:[#allocation74_spill] sm:$0xff] %v15530_v25  ;;  %2959 = vmatpush.bf16.msra.mxu3 %v15530_v25  ;;  %v13666_v25 = vld [vmem:[#allocation10 + $0xe0] sm:$0xf0] }
 0x62c   :  { %v14372_v35 = vpop.eup %14371 }
 0x62d   :  { %v2841_v7 = vmul.f32 %v14372_v35, %v14368_v42  ;;  %v15533_v42 = vor.u32 %v13662_v57, %v10846_v41  ;;  %v2988_v35 = vpop.permute.xlu2 %2987  ;;  %v13670_v41 = vld [vmem:[#allocation10 + $0x100] sm:$0xf0] }
 0x62e   :  { %v15544_v5 = vor.u32 %v13670_v41, %v10876_v20  ;;  %v13663_v41 = vld [vmem:[#allocation10 + $0xc8] sm:$0xf0] }
 0x62f   :  { %10841 = vmatmul.msk.f32.gmra.mxu1 %vm2411_vm15, %v2841_v7  ;;  %17155 = vst [vmem:[#allocation75_spill] sm:$0xff] %v15533_v42  ;;  %2960 = vmatpush.bf16.msra.mxu3 %v15533_v42  ;;  %v10868_v7 = vld [vmem:[#allocation10 + $0xf0] sm:$0xf]  ;;  %v13681_v42 = vld [vmem:[#allocation10 + $0x158] sm:$0xf0] }
 0x630   :  { %v15542_v57 = vor.u32 %v13669_v34, %v10868_v7  ;;  %17158 = vst [vmem:[#allocation78_spill] sm:$0xff] %v15544_v5  ;;  %2972 = vmatpush.bf16.msra.mxu0 %v15544_v5  ;;  %v13678_v7 = vld [vmem:[#allocation10 + $0x140] sm:$0xf0] }
 0x631   :  { %v15555_v20 = vor.u32 %v13678_v7, %v10913_v4 }
 0x632   :  { %17157 = vst [vmem:[#allocation77_spill] sm:$0xff] %v15542_v57  ;;  %2944 = vmatpush.bf16.msrb.mxu2 %v15542_v57  ;;  %v10901_v57 = vld [vmem:[#allocation10 + $0x120] sm:$0xf] }
 0x633   :  { %3159 = vmatpush.bf16.msrb.mxu3 %v15535_v52  ;;  %v15547_v52 = vor.u32 %v13681_v42, %v10925_v10  ;;  %17160 = vst [vmem:[#allocation80_spill] sm:$0xff] %v15555_v20  ;;  %v10844_v42 = vld [vmem:[#allocation10 + $0xc0] sm:$0xf]  ;;  %v10852_v10 = vld [vmem:[#allocation10 + $0xc8] sm:$0xf] }
 0x635   :  { %17159 = vst [vmem:[#allocation79_spill] sm:$0xff] %v15547_v52 }
 0x637   :  { %3160 = vmatpush.bf16.msrb.mxu3 %v15547_v52  ;;  %v13675_v52 = vld [vmem:[#allocation10 + $0x128] sm:$0xf0] }
 0x638   :  { %v15565_v4 = vor.u32 %v13675_v52, %v10901_v57  ;;  %v15582_v52 = vadd.f32 %v15336_v6, %v15330_v38  ;;  %v14314_v6 = vpack.i.bf16 %v15420_v56, %v15417_v21 }
 0x63a   :  { %17163 = vst [vmem:[#allocation83_spill] sm:$0xff] %v15565_v4 }
 0x63b   :  { %3161 = vmatpush.bf16.msrb.mxu3 %v15555_v20 }
 0x63d   :  { %v2992_v55 = vpop.permute.xlu1 %2991 }
 0x63e   :  { %10894 = vmatpush.xpose.msk.msra.mxu1 %vm2373_vm13, %v2992_v55  ;;  %v10856_v55 = vld [vmem:[#allocation10 + $0xd8] sm:$0xf] }
 0x63f   :  { %3162 = vmatpush.bf16.msrb.mxu3 %v15565_v4 }
 0x641   :  { %10895 = vmatmul.msk.f32.vlgmr.msra.gmra.mxu1 %vm2373_vm13, %v2988_v35  ;;  %v10864_v35 = vld [vmem:[#allocation10 + $0xe0] sm:$0xf] }
 0x642   :  { %v15553_v34 = vor.u32 %v13667_v3, %v10864_v35  ;;  %v15569_v3 = vpop.f32.mrf.mxu1 }
 0x644   :  { %2973 = vmatpush.bf16.msra.mxu0 %v15553_v34 }
 0x649   :  { %10896 = vmatmul.msk.f32.gmra.mxu1 %vm2373_vm13, %v2990_v45  ;;  %v15550_v45 = vor.u32 %v13666_v25, %v10856_v55  ;;  %v15560_v25 = vor.u32 %v13663_v41, %v10844_v42  ;;  %v13664_v55 = vld [vmem:[#allocation10 + $0xd0] sm:$0xf0]  ;;  %v2232_v42 = vadd.f32 %v15345_v30, %v15343_v24 }
 0x64a   :  { %v15562_v5 = vor.u32 %v13664_v55, %v10852_v10  ;;  %v15571_v35 = vpop.f32.mrf.mxu1 }
 0x64b   :  { %2945 = vmatpush.bf16.msrb.mxu2 %v15550_v45  ;;  %17161 = vst [vmem:[#allocation81_spill] sm:$0xff] %v15560_v25  ;;  %v15576_v55 = vadd.f32 %v15359_v23, %v2232_v42  ;;  %v15596_v42 = vpop.f32.mrf.mxu3 }
 0x64c   :  { %17162 = vst [vmem:[#allocation82_spill] sm:$0xff] %v15562_v5  ;;  %2974 = vmatpush.bf16.msra.mxu0 %v15562_v5 }
 0x64d   :  { %17164 = vst [vmem:[#allocation84_spill] sm:$0xff] %v15571_v35 }
 0x64f   :  { %2946 = vmatpush.bf16.msrb.mxu2 %v15560_v25 }
 0x6a4   :  { %v2865_v7 = vpop.f32.mrf.mxu1 }
 0x6ac   :  { %v2868_v41 = vpop.f32.mrf.mxu1 }
 0x6ad   :  { %v2871_v10 = vpack.c.bf16 %v2868_v41, %v2865_v7  ;;  %v15598_v41 = vpop.f32.mrf.mxu3 }
 0x6ae   :  { %17165 = vst [vmem:[#allocation85_spill] sm:$0xff] %v15598_v41 }
 0x6af   :  { %10890 = vmatmul.msk.bf16.vlgmr.msrb.gmra.mxu2 %vm2373_vm13, %v2871_v10  ;;  %10891 = vmatmul.msk.bf16.vlgmr.msra.gmra.mxu3 %vm2373_vm13, %v2871_v10 }
 0x6b0   :  { %10892 = vmatmul.msk.bf16.vlgmr.msra.gmra.mxu0 %vm2373_vm13, %v2871_v10  ;;  %3282 = vmatpush.msra.mxu3 %v15576_v55 }
 0x6b2   :  { %3283 = vmatpush.msra.mxu3 %v15582_v52 }
 0x6b5   :  { %v2778_v10 = vpop.f32.mrf.mxu3 }
 0x6be   :  { %v3020_v24 = vpop.f32.mrf.mxu1 }
 0x6bf   :  { %v3026_v30 = vsel %vm15367_vm14, %v3020_v24, -inf  ;;  %v2779_v24 = vadd.f32 %v2778_v10, %v15495_v16  ;;  %v2061_v16 = vadd.f32 %v15277_v28, %v15267_v9  ;;  %v13683_v28 = vld [vmem:[#allocation10 + $0x16c] sm:$0xf] }
 0x6c0   :  { %v3028_v23 = vsel %vm2411_vm15, %v3026_v30, -inf }
 0x6c1   :  { %3029 = vmax.xlane.f32.xlu1 %v3028_v23 }
 0x6c6   :  { %v3023_v57 = vpop.f32.mrf.mxu1 }
 0x6c7   :  { %v3027_v7 = vsel %vm15374_vm0, %v3023_v57, -inf }
 0x6c8   :  { %v3031_v38 = vsel %vm2411_vm15, %v3027_v7, -inf }
 0x6c9   :  { %3032 = vmax.xlane.f32.xlu2 %v3031_v38 }
 0x6da   :  { %14315 = vrot.lane.b32.xlu1 %v14314_v6, %s14816_s10 }
 0x72d   :  { %v2976_v23 = vpop.f32.mrf.mxu0 }
 0x72e   :  { %v15601_v35 = vadd.f32 %v2976_v23, %v2779_v24 }
 0x734   :  { %v3030_v4 = vpop.xlane.xlu1 %3029 }
 0x735   :  { %v3034_v57 = vsub.f32 %v3026_v30, %v3030_v4 }
 0x737   :  { %v3036_v20 = vmul.f32 1.442695, %v3034_v57 }
 0x739   :  { %14373 = vpow2.f32 %v3036_v20  ;;  %v2059_v20 = vadd.f32 %v15271_v13, %v15259_v32  ;;  %v13685_v32 = vld [vmem:[#allocation10 + $0x178] sm:$0xf0] }
 0x73b   :  { %v15615_v30 = vadd.f32 %v15273_v46, %v2059_v20 }
 0x73c   :  { %v3033_v38 = vpop.xlane.xlu2 %3032 }
 0x73d   :  { %v3035_v5 = vsub.f32 %v3027_v7, %v3033_v38  ;;  %v10939_v7 = vld [vmem:[#allocation10 + $0x174] sm:$0xf0] }
 0x73e   :  { %v15619_v23 = vor.u32 %v13683_v28, %v10939_v7  ;;  %v10933_v28 = vld [vmem:[#allocation10 + $0x158] sm:$0xf] }
 0x73f   :  { %v14374_v25 = vpop.eup %14373  ;;  %v3038_v21 = vmul.f32 1.442695, %v3035_v5  ;;  %v15610_v5 = vadd.f32 %v15279_v37, %v2061_v16 }
 0x740   :  { %v3040_v56 = vsel %vm2411_vm15, %v14374_v25, 0.0  ;;  %3173 = vmatpush.bf16.msrb.mxu0 %v15619_v23 }
 0x741   :  { %14375 = vpow2.f32 %v3038_v21  ;;  %3041 = vadd.xlane.f32.xlu0 %v3040_v56  ;;  %v1907_v56 = vadd.f32 %v15212_v43, %v15188_v15  ;;  %v13680_v15 = vld [vmem:[#allocation10 + $0x154] sm:$0xf]  ;;  %v10927_v43 = vld [vmem:[#allocation10 + $0x15c] sm:$0xf0] }
 0x742   :  { %v15641_v7 = vor.u32 %v13680_v15, %v10927_v43  ;;  %v13676_v15 = vld [vmem:[#allocation10 + $0x130] sm:$0xf0] }
 0x743   :  { %v2260_v16 = vmul.f32 0.05103104, %v1907_v56  ;;  %v10903_v56 = vld [vmem:[#allocation10 + $0x12c] sm:$0xf0] }
 0x744   :  { %3174 = vmatpush.bf16.msrb.mxu0 %v15641_v7 }
 0x747   :  { %v14376_v6 = vpop.eup %14375 }
 0x748   :  { %v3043_v41 = vsel %vm2411_vm15, %v14376_v6, 0.0 }
 0x749   :  { %3044 = vadd.xlane.f32.xlu2 %v3043_v41  ;;  %v10945_v41 = vld [vmem:[#allocation10 + $0x170] sm:$0xf] }
 0x74a   :  { %v15621_v13 = vor.u32 %v13685_v32, %v10945_v41  ;;  %v10915_v41 = vld [vmem:[#allocation10 + $0x144] sm:$0xf0]  ;;  %v10921_v32 = vld [vmem:[#allocation10 + $0x140] sm:$0xf] }
 0x74c   :  { %v14316_v10 = vpop.permute.xlu1 %14315  ;;  %3187 = vmatpush.bf16.msrb.mxu1 %v15621_v13 }
 0x74d   :  { %v14317_v24 = vunpack.i.l.bf16 %v14316_v10  ;;  %v14318_v4 = vunpack.i.h.bf16 %v14316_v10  ;;  %v1890_v10 = vadd.f32 %v15196_v18, %v15194_v17  ;;  %v13682_v17 = vld [vmem:[#allocation10 + $0x160] sm:$0xf0] }
 0x74e   :  { %v15643_v18 = vor.u32 %v13682_v17, %v10933_v28 }
 0x74f   :  { %3078 = vmatpush.msra.mxu2 %v14317_v24  ;;  %v1909_v24 = vadd.f32 %v15217_v49, %v1890_v10  ;;  %v13677_v49 = vld [vmem:[#allocation10 + $0x13c] sm:$0xf]  ;;  %v10909_v10 = vld [vmem:[#allocation10 + $0x128] sm:$0xf] }
 0x750   :  { %17168 = vst [vmem:[#allocation88_spill] sm:$0xff] %v15643_v18  ;;  %3188 = vmatpush.bf16.msrb.mxu1 %v15643_v18  ;;  %v15657_v43 = vor.u32 %v13676_v15, %v10909_v10 }
 0x751   :  { %3079 = vmatpush.msra.mxu2 %v14318_v4  ;;  %v15637_v4 = vpop.f32.mrf.mxu2 }
 0x752   :  { %17166 = vst [vmem:[#allocation86_spill] sm:$0xff] %v15637_v4 }
 0x753   :  { %10950 = vmatpush.xpose.msk.msrb.mxu2 %vm2373_vm13, %v15610_v5  ;;  %17171 = vst [vmem:[#allocation91_spill] sm:$0xff] %v15657_v43 }
 0x757   :  { %10951 = vmatpush.xpose.msk.msrb.mxu2 %vm2373_vm13, %v15615_v30 }
 0x7b4   :  { %v3042_v9 = vpop.xlane.xlu0 %3041 }
 0x7b5   :  { %14377 = vrcp.f32 %v3042_v9 }
 0x7bb   :  { %v14378_v37 = vpop.eup %14377 }
 0x7bc   :  { %v3048_v46 = vmul.f32 %v14378_v37, %v14374_v25  ;;  %v3045_v57 = vpop.xlane.xlu2 %3044  ;;  %v15633_v25 = vmul.f32 0.05103104, %v1909_v24  ;;  %v15646_v37 = vor.u32 %v13677_v49, %v10915_v41 }
 0x7bd   :  { %14379 = vrcp.f32 %v3045_v57 }
 0x7be   :  { %10897 = vmatmul.msk.f32.vlgmr.msra.gmra.mxu2 %vm2411_vm15, %v3048_v46  ;;  %v13679_v46 = vld [vmem:[#allocation10 + $0x148] sm:$0xf0]  ;;  %3175 = vmatpush.bf16.msrb.mxu0 %v15646_v37 }
 0x7bf   :  { %v15649_v57 = vor.u32 %v13679_v46, %v10921_v32 }
 0x7c1   :  { %17169 = vst [vmem:[#allocation89_spill] sm:$0xff] %v15649_v57  ;;  %3189 = vmatpush.bf16.msrb.mxu1 %v15649_v57 }
 0x7c3   :  { %v14380_v38 = vpop.eup %14379 }
 0x7c4   :  { %v3049_v21 = vmul.f32 %v14380_v38, %v14376_v6  ;;  %v2641_v6 = vpop.f32.mrf.mxu2 }
 0x7c5   :  { %3190 = vmatpush.bf16.msrb.mxu1 %v15657_v43 }
 0x7c6   :  { %10898 = vmatmul.msk.f32.gmra.mxu2 %vm2411_vm15, %v3049_v21  ;;  %v13674_v21 = vld [vmem:[#allocation10 + $0x124] sm:$0xf] }
 0x7c7   :  { %v15655_v24 = vor.u32 %v13674_v21, %v10903_v56 }
 0x7c9   :  { %3176 = vmatpush.bf16.msrb.mxu0 %v15655_v24 }
 0x7cc   :  { %v15639_v20 = vpop.f32.mrf.mxu2 }
 0x7cd   :  { %17167 = vst [vmem:[#allocation87_spill] sm:$0xff] %v15639_v20 }
 0x7ce   :  { %10952 = vmatmul.msk.f32.vlgmr.msrb.gmra.mxu2 %vm2373_vm13, %v2260_v16 }
 0x7d4   :  { %v2764_v9 = vpop.f32.mrf.mxu2  ;;  %v17242_v53 = vld [vmem:[#allocation87_spill] sm:$0xff] }
 0x7d6   :  { %10953 = vmatmul.msk.f32.gmra.mxu2 %vm2373_vm13, %v15633_v25 }
 0x7dc   :  { %v15652_v38 = vpop.f32.mrf.mxu2 }
 0x7dd   :  { %17170 = vst [vmem:[#allocation90_spill] sm:$0xff] %v15652_v38 }
 0x7e4   :  { %v2948_v28 = vpop.f32.mrf.mxu2 }
 0x7ec   :  { %v15661_v17 = vpop.f32.mrf.mxu2 }
 0x7ed   :  { %17172 = vst [vmem:[#allocation92_spill] sm:$0xff] %v15661_v17 }
 0x841   :  { %v3081_v49 = vpop.f32.mrf.mxu2 }
 0x849   :  { %v3084_v41 = vpop.f32.mrf.mxu2 }
 0x84a   :  { %v3087_v32 = vpack.c.bf16 %v3084_v41, %v3081_v49  ;;  %v15675_v49 = vpop.f32.mrf.mxu3 }
 0x84b   :  { %17173 = vst [vmem:[#allocation93_spill] sm:$0xff] %v15675_v49 }
 0x84c   :  { %10947 = vmatmul.msk.bf16.vlgmr.msrb.gmra.mxu3 %vm2373_vm13, %v3087_v32  ;;  %10948 = vmatmul.msk.bf16.vlgmr.msrb.gmra.mxu0 %vm2373_vm13, %v3087_v32 }
 0x84d   :  { %10949 = vmatmul.msk.bf16.vlgmr.msrb.gmra.mxu1 %vm2373_vm13, %v3087_v32  ;;  %v15677_v32 = vpop.f32.mrf.mxu0 }
 0x84e   :  { %17174 = vst [vmem:[#allocation94_spill] sm:$0xff] %v15677_v32 }
 0x851   :  { %v3232_v46 = vpop.f32.mrf.mxu2 }
 0x852   :  { %v3238_v21 = vsel %vm15367_vm14, %v3232_v46, -inf  ;;  %v2962_v41 = vpop.f32.mrf.mxu3  ;;  %v2765_v46 = vadd.f32 %v2764_v9, %v15596_v42 }
 0x853   :  { %v3240_v56 = vsel %vm2411_vm15, %v3238_v21, -inf }
 0x854   :  { %3241 = vmax.xlane.f32.xlu2 %v3240_v56  ;;  %v2982_v38 = vadd.f32 %v2962_v41, %v2765_v46 }
 0x859   :  { %v3235_v10 = vpop.f32.mrf.mxu2 }
 0x85a   :  { %v3239_v15 = vsel %vm15374_vm0, %v3235_v10, -inf  ;;  %v15680_v56 = vpop.f32.mrf.mxu3 }
 0x85b   :  { %v3243_v17 = vsel %vm2411_vm15, %v3239_v15, -inf  ;;  %17175 = vst [vmem:[#allocation95_spill] sm:$0xff] %v15680_v56 }
 0x85c   :  { %3244 = vmax.xlane.f32.xlu0 %v3243_v17 }
 0x870   :  { %3413 = vrot.lane.b32.xlu0 %v15610_v5, %s14816_s10 }
 0x878   :  { %3407 = vrot.lane.b32.xlu0 %v2260_v16, %s14816_s10  ;;  %v2751_v16 = vadd.f32 %v15569_v3, %v2641_v6  ;;  %v13695_v6 = vld [vmem:[#allocation10 + $0x1cc] sm:$0xf] }
 0x87a   :  { %v2981_v49 = vadd.f32 %v2948_v28, %v2751_v16  ;;  %v10984_v28 = vld [vmem:[#allocation10 + $0x1bc] sm:$0xf0] }
 0x8c7   :  { %v3242_v20 = vpop.xlane.xlu2 %3241 }
 0x8c8   :  { %v3246_v10 = vsub.f32 %v3238_v21, %v3242_v20  ;;  %v10994_v21 = vld [vmem:[#allocation10 + $0x1c8] sm:$0xf] }
 0x8c9   :  { %v3178_v4 = vpop.f32.mrf.mxu0 }
 0x8ca   :  { %v3248_v43 = vmul.f32 1.442695, %v3246_v10  ;;  %v15682_v17 = vadd.f32 %v3178_v4, %v2982_v38  ;;  %v3192_v57 = vpop.f32.mrf.mxu1  ;;  %v13689_v10 = vld [vmem:[#allocation10 + $0x19c] sm:$0xf] }
 0x8cb   :  { %v15685_v5 = vadd.f32 %v3192_v57, %v15601_v35  ;;  %v13692_v57 = vld [vmem:[#allocation10 + $0x1b4] sm:$0xf] }
 0x8cc   :  { %14381 = vpow2.f32 %v3248_v43 }
 0x8cf   :  { %v3245_v32 = vpop.xlane.xlu0 %3244  ;;  %v3164_v18 = vpop.f32.mrf.mxu3 }
 0x8d0   :  { %v3247_v42 = vsub.f32 %v3239_v15, %v3245_v32  ;;  %v15688_v9 = vadd.f32 %v3164_v18, %v2981_v49  ;;  %v10996_v18 = vld [vmem:[#allocation10 + $0x1d4] sm:$0xf0]  ;;  %v13696_v15 = vld [vmem:[#allocation10 + $0x1d0] sm:$0xf0]  ;;  %v11002_v49 = vld [vmem:[#allocation10 + $0x1d0] sm:$0xf]  ;;  %v15700_v32 = vor.u32 %v13692_v57, %v10984_v28 }
 0x8d1   :  { %v15697_v43 = vor.u32 %v13695_v6, %v10996_v18  ;;  %v15702_v46 = vor.u32 %v13696_v15, %v10994_v21  ;;  %v10960_v6 = vld [vmem:[#allocation10 + $0x18c] sm:$0xf0]  ;;  %v11051_v18 = vld [vmem:[#allocation10 + $0x228] sm:$0xf]  ;;  %v13708_v57 = vld [vmem:[#allocation10 + $0x230] sm:$0xf0] }
 0x8d2   :  { %v14382_v56 = vpop.eup %14381  ;;  %v3250_v41 = vmul.f32 1.442695, %v3247_v42  ;;  %v15716_v28 = vor.u32 %v13708_v57, %v11051_v18  ;;  %v13690_v57 = vld [vmem:[#allocation10 + $0x1a0] sm:$0xf0] }
 0x8d3   :  { %v3252_v20 = vsel %vm2411_vm15, %v14382_v56, 0.0  ;;  %3377 = vmatpush.bf16.msra.mxu1 %v15697_v43  ;;  %3363 = vmatpush.bf16.msra.mxu0 %v15702_v46 }
 0x8d4   :  { %14383 = vpow2.f32 %v3250_v41  ;;  %3253 = vadd.xlane.f32.xlu2 %v3252_v20  ;;  %17176 = vst [vmem:[#allocation96_spill] sm:$0xff] %v15716_v28 }
 0x8d7   :  { %3378 = vmatpush.bf16.msra.mxu1 %v15700_v32 }
 0x8da   :  { %v14384_v4 = vpop.eup %14383 }
 0x8db   :  { %v3255_v38 = vsel %vm2411_vm15, %v14384_v4, 0.0 }
 0x8dc   :  { %3256 = vadd.xlane.f32.xlu1 %v3255_v38 }
 0x8e2   :  { %v3414_v35 = vpop.permute.xlu0 %3413 }
 0x8e3   :  { %11007 = vmatpush.xpose.msk.msrb.mxu3 %vm2373_vm13, %v3414_v35 }
 0x8ec   :  { %3411 = vrot.lane.b32.xlu2 %v15615_v30, %s14816_s10  ;;  %v13697_v30 = vld [vmem:[#allocation10 + $0x1d8] sm:$0xf0] }
 0x8ed   :  { %v15704_v16 = vor.u32 %v13697_v30, %v11002_v49  ;;  %v3408_v49 = vpop.permute.xlu0 %3407 }
 0x8ef   :  { %3391 = vmatpush.bf16.msra.mxu2 %v15704_v16 }
 0x8f4   :  { %3409 = vrot.lane.b32.xlu2 %v15633_v25, %s14816_s10  ;;  %v10972_v25 = vld [vmem:[#allocation10 + $0x1a4] sm:$0xf0] }
 0x8f5   :  { %v15710_v35 = vor.u32 %v13689_v10, %v10972_v25  ;;  %v10982_v10 = vld [vmem:[#allocation10 + $0x1b0] sm:$0xf]  ;;  %v13693_v25 = vld [vmem:[#allocation10 + $0x1b8] sm:$0xf0] }
 0x8f7   :  { %3379 = vmatpush.bf16.msra.mxu1 %v15710_v35 }
 0x947   :  { %v3254_v3 = vpop.xlane.xlu2 %3253 }
 0x948   :  { %14385 = vrcp.f32 %v3254_v3  ;;  %v13686_v3 = vld [vmem:[#allocation10 + $0x184] sm:$0xf] }
 0x94e   :  { %v14386_v42 = vpop.eup %14385 }
 0x94f   :  { %v3260_v41 = vmul.f32 %v14386_v42, %v14382_v56  ;;  %v3412_v20 = vpop.permute.xlu2 %3411  ;;  %v3257_v38 = vpop.xlane.xlu1 %3256  ;;  %v15714_v56 = vor.u32 %v13686_v3, %v10960_v6  ;;  %v10990_v42 = vld [vmem:[#allocation10 + $0x1b8] sm:$0xf]  ;;  %v13705_v3 = vld [vmem:[#allocation10 + $0x218] sm:$0xf0] }
 0x950   :  { %14387 = vrcp.f32 %v3257_v38  ;;  %11008 = vmatpush.xpose.msk.msrb.mxu3 %vm2373_vm13, %v3412_v20  ;;  %v13694_v20 = vld [vmem:[#allocation10 + $0x1c0] sm:$0xf0]  ;;  %v10970_v6 = vld [vmem:[#allocation10 + $0x198] sm:$0xf] }
 0x951   :  { %10954 = vmatmul.msk.f32.vlgmr.msra.gmra.mxu3 %vm2411_vm15, %v3260_v41  ;;  %3380 = vmatpush.bf16.msra.mxu1 %v15714_v56  ;;  %v15723_v41 = vor.u32 %v13693_v25, %v10982_v10  ;;  %v15725_v38 = vor.u32 %v13694_v20, %v10990_v42  ;;  %v11027_v10 = vld [vmem:[#allocation10 + $0x1f8] sm:$0xf]  ;;  %v13702_v25 = vld [vmem:[#allocation10 + $0x200] sm:$0xf0]  ;;  %v10958_v20 = vld [vmem:[#allocation10 + $0x180] sm:$0xf] }
 0x952   :  { %v15736_v42 = vor.u32 %v13702_v25, %v11027_v10  ;;  %v15750_v25 = vpop.f32.mrf.mxu3 }
 0x953   :  { %3364 = vmatpush.bf16.msra.mxu0 %v15723_v41  ;;  %3392 = vmatpush.bf16.msra.mxu2 %v15725_v38  ;;  %17179 = vst [vmem:[#allocation99_spill] sm:$0xff] %v15750_v25 }
 0x954   :  { %17178 = vst [vmem:[#allocation98_spill] sm:$0xff] %v15736_v42 }
 0x955   :  { %3579 = vmatpush.bf16.msrb.mxu1 %v15716_v28 }
 0x956   :  { %v14388_v21 = vpop.eup %14387 }
 0x957   :  { %v3261_v15 = vmul.f32 %v14388_v21, %v14384_v4  ;;  %v3410_v30 = vpop.permute.xlu2 %3409  ;;  %v11039_v4 = vld [vmem:[#allocation10 + $0x210] sm:$0xf]  ;;  %v10978_v21 = vld [vmem:[#allocation10 + $0x1a0] sm:$0xf] }
 0x958   :  { %v15728_v18 = vor.u32 %v13705_v3, %v11039_v4  ;;  %v13687_v4 = vld [vmem:[#allocation10 + $0x188] sm:$0xf0]  ;;  %v10966_v3 = vld [vmem:[#allocation10 + $0x188] sm:$0xf] }
 0x959   :  { %10955 = vmatmul.msk.f32.gmra.mxu3 %vm2411_vm15, %v3261_v15  ;;  %v13691_v15 = vld [vmem:[#allocation10 + $0x1a8] sm:$0xf0]  ;;  %v15741_v28 = vor.u32 %v13687_v4, %v10958_v20  ;;  %v2123_v20 = vadd.f32 %v15387_v50, %v15293_v58 }
 0x95a   :  { %17177 = vst [vmem:[#allocation97_spill] sm:$0xff] %v15728_v18  ;;  %3580 = vmatpush.bf16.msrb.mxu1 %v15728_v18 }
 0x95e   :  { %3581 = vmatpush.bf16.msrb.mxu1 %v15736_v42 }
 0x961   :  { %11009 = vmatmul.msk.f32.vlgmr.msrb.gmra.mxu3 %vm2373_vm13, %v3408_v49  ;;  %v15731_v49 = vor.u32 %v13690_v57, %v10970_v6  ;;  %v13688_v6 = vld [vmem:[#allocation10 + $0x190] sm:$0xf0] }
 0x962   :  { %v15743_v57 = vor.u32 %v13688_v6, %v10966_v3  ;;  %v2121_v3 = vadd.f32 %v15385_v40, %v15287_v44  ;;  %v15757_v6 = vadd.f32 %v15318_v54, %v2123_v20  ;;  %v15782_v20 = vpop.f32.mrf.mxu1 }
 0x963   :  { %3365 = vmatpush.bf16.msra.mxu0 %v15731_v49  ;;  %17181 = vst [vmem:[#allocation101_spill] sm:$0xff] %v15782_v20 }
 0x967   :  { %3366 = vmatpush.bf16.msra.mxu0 %v15741_v28 }
 0x969   :  { %11010 = vmatmul.msk.f32.gmra.mxu3 %vm2373_vm13, %v3410_v30  ;;  %v15733_v30 = vor.u32 %v13691_v15, %v10978_v21  ;;  %v11015_v21 = vld [vmem:[#allocation10 + $0x1e0] sm:$0xf]  ;;  %v13699_v15 = vld [vmem:[#allocation10 + $0x1e8] sm:$0xf0] }
 0x96a   :  { %v15746_v10 = vor.u32 %v13699_v15, %v11015_v21  ;;  %v15762_v21 = vadd.f32 %v15312_v22, %v2121_v3  ;;  %v15780_v15 = vpop.f32.mrf.mxu0 }
 0x96b   :  { %3393 = vmatpush.bf16.msra.mxu2 %v15733_v30  ;;  %17180 = vst [vmem:[#allocation100_spill] sm:$0xff] %v15780_v15 }
 0x96c   :  { %3582 = vmatpush.bf16.msrb.mxu1 %v15746_v10 }
 0x96f   :  { %3394 = vmatpush.bf16.msra.mxu2 %v15743_v57 }
 0x972   :  { %v17246_v61 = vld [vmem:[#allocation100_spill] sm:$0xff] }
 0x9d4   :  { %v3285_v18 = vpop.f32.mrf.mxu3 }
 0x9dc   :  { %v3288_v4 = vpop.f32.mrf.mxu3 }
 0x9dd   :  { %v3291_v42 = vpack.c.bf16 %v3288_v4, %v3285_v18  ;;  %v1950_v18 = vadd.f32 %v15229_v36, %v15220_v51 }
 0x9df   :  { %11004 = vmatmul.msk.bf16.vlgmr.msra.gmra.mxu0 %vm2373_vm13, %v3291_v42  ;;  %11005 = vmatmul.msk.bf16.vlgmr.msra.gmra.mxu1 %vm2373_vm13, %v3291_v42 }
 0x9e0   :  { %11006 = vmatmul.msk.bf16.vlgmr.msra.gmra.mxu2 %vm2373_vm13, %v3291_v42  ;;  %3702 = vmatpush.msra.mxu1 %v15757_v6  ;;  %v15776_v42 = vadd.f32 %v15240_v39, %v1950_v18 }
 0x9e2   :  { %3703 = vmatpush.msra.mxu1 %v15762_v21 }
 0x9e4   :  { %v3440_v58 = vpop.f32.mrf.mxu3 }
 0x9e5   :  { %v3446_v44 = vsel %vm15367_vm14, %v3440_v58, -inf }
 0x9e6   :  { %v3448_v54 = vsel %vm2411_vm15, %v3446_v44, -inf }
 0x9e7   :  { %3449 = vmax.xlane.f32.xlu0 %v3448_v54 }
 0x9ec   :  { %v3443_v40 = vpop.f32.mrf.mxu3 }
 0x9ed   :  { %v3447_v50 = vsel %vm15374_vm0, %v3443_v40, -inf }
 0x9ee   :  { %v3451_v22 = vsel %vm2411_vm15, %v3447_v50, -inf }
 0x9ef   :  { %3452 = vmax.xlane.f32.xlu2 %v3451_v22 }
 0xa07   :  { %3716 = vrot.lane.b32.xlu2 %v15776_v42, %s14816_s10 }
 0xa5a   :  { %v3450_v4 = vpop.xlane.xlu0 %3449 }
 0xa5b   :  { %v3454_v3 = vsub.f32 %v3446_v44, %v3450_v4 }
 0xa5c   :  { %v3368_v58 = vpop.f32.mrf.mxu0  ;;  %v3382_v54 = vpop.f32.mrf.mxu1 }
 0xa5d   :  { %v3456_v40 = vmul.f32 1.442695, %v3454_v3  ;;  %v15785_v22 = vadd.f32 %v3368_v58, %v15688_v9  ;;  %v15788_v51 = vadd.f32 %v3382_v54, %v15682_v17  ;;  %v14319_v17 = vpack.i.bf16 %v15582_v52, %v15576_v55  ;;  %v13707_v58 = vld [vmem:[#allocation10 + $0x22c] sm:$0xf]  ;;  %v11053_v54 = vld [vmem:[#allocation10 + $0x234] sm:$0xf0] }
 0xa5e   :  { %v13704_v55 = vld [vmem:[#allocation10 + $0x214] sm:$0xf]  ;;  %v15806_v52 = vor.u32 %v13707_v58, %v11053_v54 }
 0xa5f   :  { %14389 = vpow2.f32 %v3456_v40  ;;  %v11041_v40 = vld [vmem:[#allocation10 + $0x21c] sm:$0xf0] }
 0xa60   :  { %3593 = vmatpush.bf16.msrb.mxu2 %v15806_v52 }
 0xa62   :  { %v3453_v36 = vpop.xlane.xlu2 %3452 }
 0xa63   :  { %v3455_v39 = vsub.f32 %v3447_v50, %v3453_v36  ;;  %v3396_v18 = vpop.f32.mrf.mxu2  ;;  %v2264_v50 = vmul.f32 0.05103104, %v15174_v47  ;;  %v15809_v47 = vor.u32 %v13704_v55, %v11041_v40  ;;  %v11017_v36 = vld [vmem:[#allocation10 + $0x1ec] sm:$0xf0] }
 0xa64   :  { %v15791_v25 = vadd.f32 %v3396_v18, %v15685_v5  ;;  %v1952_v5 = vadd.f32 %v15242_v0, %v15233_v19  ;;  %v13701_v19 = vld [vmem:[#allocation10 + $0x1fc] sm:$0xf]  ;;  %v11029_v0 = vld [vmem:[#allocation10 + $0x204] sm:$0xf0] }
 0xa65   :  { %v14390_v15 = vpop.eup %14389  ;;  %v3458_v20 = vmul.f32 1.442695, %v3455_v39  ;;  %3594 = vmatpush.bf16.msrb.mxu2 %v15809_v47 }
 0xa66   :  { %v3460_v44 = vsel %vm2411_vm15, %v14390_v15, 0.0  ;;  %v1971_v3 = vadd.f32 %v15249_v31, %v1952_v5  ;;  %v15812_v31 = vor.u32 %v13701_v19, %v11029_v0 }
 0xa67   :  { %14391 = vpow2.f32 %v3458_v20  ;;  %3461 = vadd.xlane.f32.xlu1 %v3460_v44  ;;  %v2267_v20 = vmul.f32 0.05103104, %v15178_v8  ;;  %v13698_v8 = vld [vmem:[#allocation10 + $0x1e4] sm:$0xf]  ;;  %v11059_v44 = vld [vmem:[#allocation10 + $0x230] sm:$0xf] }
 0xa68   :  { %v15815_v39 = vor.u32 %v13698_v8, %v11017_v36 }
 0xa69   :  { %3595 = vmatpush.bf16.msrb.mxu2 %v15812_v31 }
 0xa6a   :  { %v3717_v36 = vpop.permute.xlu2 %3716 }
 0xa6d   :  { %v14392_v4 = vpop.eup %14391  ;;  %3596 = vmatpush.bf16.msrb.mxu2 %v15815_v39 }
 0xa6e   :  { %v3463_v9 = vsel %vm2411_vm15, %v14392_v4, 0.0 }
 0xa6f   :  { %3464 = vadd.xlane.f32.xlu0 %v3463_v9  ;;  %v13709_v9 = vld [vmem:[#allocation10 + $0x238] sm:$0xf0] }
 0xa80   :  { %14320 = vrot.lane.b32.xlu1 %v14319_v17, %s14816_s10  ;;  %v15818_v17 = vor.u32 %v13709_v9, %v11059_v44  ;;  %v17183_v44 = vld [vmem:[#allocation55_spill] sm:$0xff]  ;;  %v17184_v9 = vld [vmem:[#allocation41_spill] sm:$0xff] }
 0xa82   :  { %3607 = vmatpush.bf16.msra.mxu3 %v15818_v17 }
 0xa83   :  { %3712 = vrot.lane.b32.xlu0 %v2264_v50, %s14816_s10 }
 0xa88   :  { %3718 = vrot.lane.b32.xlu1 %v1971_v3, %s14816_s10 }
 0xa90   :  { %3714 = vrot.lane.b32.xlu1 %v2267_v20, %s14816_s10 }
 0xada   :  { %v3462_v18 = vpop.xlane.xlu1 %3461 }
 0xadb   :  { %14393 = vrcp.f32 %v3462_v18 }
 0xae1   :  { %v14394_v54 = vpop.eup %14393 }
 0xae2   :  { %v3465_v5 = vpop.xlane.xlu0 %3464  ;;  %v3468_v19 = vmul.f32 %v14394_v54, %v14390_v15  ;;  %v17186_v54 = vld [vmem:[#allocation56_spill] sm:$0xff] }
 0xae3   :  { %14395 = vrcp.f32 %v3465_v5  ;;  %v17185_v5 = vld [vmem:[#allocation42_spill] sm:$0xff] }
 0xae9   :  { %v14396_v8 = vpop.eup %14395 }
 0xaea   :  { %v3469_v18 = vmul.f32 %v14396_v8, %v14392_v4 }
 0xaf2   :  { %v14321_v58 = vpop.permute.xlu1 %14320 }
 0xaf3   :  { %v14322_v55 = vunpack.i.l.bf16 %v14321_v58  ;;  %v14323_v40 = vunpack.i.h.bf16 %v14321_v58  ;;  %v2009_v58 = vadd.f32 %v17185_v5, %v17184_v9 }
 0xaf5   :  { %3498 = vmatpush.msrb.mxu0 %v14322_v55  ;;  %v17187_v55 = vld [vmem:[#allocation65_spill] sm:$0xff] }
 0xaf7   :  { %3499 = vmatpush.msrb.mxu0 %v14323_v40  ;;  %v17188_v40 = vld [vmem:[#allocation43_spill] sm:$0xff] }
 0xaf8   :  { %11011 = vmatmul.msk.f32.vlgmr.msrb.gmra.mxu0 %vm2411_vm15, %v3468_v19  ;;  %v15863_v19 = vadd.f32 %v17188_v40, %v2009_v58 }
 0xaf9   :  { %11064 = vmatpush.xpose.msk.msra.mxu0 %vm2373_vm13, %v1971_v3 }
 0xafa   :  { %v3719_v0 = vpop.permute.xlu1 %3718 }
 0xafb   :  { %11070 = vmatpush.xpose.msk.msra.mxu2 %vm2373_vm13, %v3719_v0  ;;  %v15873_v0 = vpop.f32.mrf.mxu2 }
 0xafd   :  { %11065 = vmatpush.xpose.msk.msra.mxu0 %vm2373_vm13, %v15776_v42  ;;  %v13706_v42 = vld [vmem:[#allocation10 + $0x220] sm:$0xf0] }
 0xaff   :  { %11071 = vmatpush.xpose.msk.msra.mxu2 %vm2373_vm13, %v3717_v36 }
 0xb00   :  { %11012 = vmatmul.msk.f32.gmra.mxu0 %vm2411_vm15, %v3469_v18 }
 0xb01   :  { %3820 = vmatpush.bf16.msrb.mxu0 %v15426_v29  ;;  %v11047_v29 = vld [vmem:[#allocation10 + $0x218] sm:$0xf] }
 0xb02   :  { %v15838_v15 = vor.u32 %v13706_v42, %v11047_v29 }
 0xb04   :  { %3608 = vmatpush.bf16.msra.mxu3 %v15838_v15 }
 0xb05   :  { %3821 = vmatpush.bf16.msrb.mxu0 %v15432_v26  ;;  %v11035_v26 = vld [vmem:[#allocation10 + $0x200] sm:$0xf] }
 0xb08   :  { %11066 = vmatmul.msk.f32.vlgmr.msra.gmra.mxu0 %vm2373_vm13, %v2264_v50 }
 0xb09   :  { %3822 = vmatpush.bf16.msrb.mxu0 %v15435_v27  ;;  %v13703_v27 = vld [vmem:[#allocation10 + $0x208] sm:$0xf0] }
 0xb0a   :  { %v15841_v4 = vor.u32 %v13703_v27, %v11035_v26 }
 0xb0c   :  { %3609 = vmatpush.bf16.msra.mxu3 %v15841_v4 }
 0xb0d   :  { %3823 = vmatpush.bf16.msrb.mxu0 %v15438_v2  ;;  %v11023_v2 = vld [vmem:[#allocation10 + $0x1e8] sm:$0xf] }
 0xb10   :  { %11067 = vmatmul.msk.f32.gmra.mxu0 %vm2373_vm13, %v2267_v20  ;;  %v17182_v20 = vld [vmem:[#allocation54_spill] sm:$0xff] }
 0xb11   :  { %3879 = vmatpush.bf16.msra.mxu0 %v15471_v48  ;;  %v13700_v48 = vld [vmem:[#allocation10 + $0x1f0] sm:$0xf0] }
 0xb15   :  { %3880 = vmatpush.bf16.msra.mxu0 %v15477_v59  ;;  %v15844_v59 = vor.u32 %v13700_v48, %v11023_v2 }
 0xb17   :  { %3610 = vmatpush.bf16.msra.mxu3 %v15844_v59 }
 0xb19   :  { %3881 = vmatpush.bf16.msra.mxu0 %v15483_v12  ;;  %v15847_v12 = vpop.f32.mrf.mxu0 }
 0xb1d   :  { %3882 = vmatpush.bf16.msra.mxu0 %v15489_v14 }
 0xb75   :  { %v3501_v14 = vpop.f32.mrf.mxu0 }
 0xb7d   :  { %v3504_v50 = vpop.f32.mrf.mxu0 }
 0xb7e   :  { %v3507_v3 = vpack.c.bf16 %v3504_v50, %v3501_v14 }
 0xb80   :  { %11061 = vmatmul.msk.bf16.vlgmr.msrb.gmra.mxu1 %vm2373_vm13, %v3507_v3  ;;  %11062 = vmatmul.msk.bf16.vlgmr.msrb.gmra.mxu2 %vm2373_vm13, %v3507_v3 }
 0xb81   :  { %11063 = vmatmul.msk.bf16.vlgmr.msra.gmra.mxu3 %vm2373_vm13, %v3507_v3  ;;  %3848 = vmatpush.bf16.msrb.mxu2 %v15322_v1  ;;  %v3713_v1 = vpop.permute.xlu0 %3712 }
 0xb82   :  { %3834 = vmatpush.bf16.msrb.mxu1 %v15441_v63  ;;  %v17189_v63 = vld [vmem:[#allocation40_spill] sm:$0xff] }
 0xb85   :  { %3849 = vmatpush.bf16.msrb.mxu2 %v17182_v20 }
 0xb86   :  { %3835 = vmatpush.bf16.msrb.mxu1 %v15444_v60  ;;  %v3715_v60 = vpop.permute.xlu1 %3714 }
 0xb89   :  { %3850 = vmatpush.bf16.msrb.mxu2 %v17183_v44 }
 0xb8a   :  { %3836 = vmatpush.bf16.msrb.mxu1 %v15447_v11  ;;  %v15871_v11 = vpop.f32.mrf.mxu1 }
 0xb8d   :  { %3851 = vmatpush.bf16.msrb.mxu2 %v17186_v54 }
 0xb8e   :  { %3837 = vmatpush.bf16.msrb.mxu1 %v17187_v55  ;;  %v3652_v55 = vpop.f32.mrf.mxu0 }
 0xb90   :  { %11072 = vmatmul.msk.f32.vlgmr.msra.gmra.mxu2 %vm2373_vm13, %v3713_v1  ;;  %v3658_v1 = vsel %vm15367_vm14, %v3652_v55, -inf  ;;  %v17197_v55 = vld [vmem:[#allocation51_spill] sm:$0xff] }
 0xb91   :  { %11082 = vmatpush.xpose.msk.msra.mxu2 %vm2373_vm13, %v15863_v19 }
 0xb95   :  { %11083 = vmatpush.xpose.msk.msra.mxu2 %vm2373_vm13, %v17189_v63 }
 0xb98   :  { %11073 = vmatmul.msk.f32.gmra.mxu2 %vm2373_vm13, %v3715_v60 }
 0xbfd   :  { %v3584_v8 = vpop.f32.mrf.mxu1 }
 0xbfe   :  { %v15876_v36 = vadd.f32 %v3584_v8, %v15785_v22  ;;  %v3655_v8 = vpop.f32.mrf.mxu0 }
 0xc03   :  { %v3598_v18 = vpop.f32.mrf.mxu2 }
 0xc04   :  { %v15879_v29 = vadd.f32 %v3598_v18, %v15788_v51  ;;  %v3612_v42 = vpop.f32.mrf.mxu3 }
 0xc05   :  { %v15882_v26 = vadd.f32 %v3612_v42, %v15791_v25  ;;  %v14324_v25 = vpack.i.bf16 %v15762_v21, %v15757_v6  ;;  %v3660_v21 = vsel %vm2411_vm15, %v3658_v1, -inf }
 0xc0b   :  { %v15884_v27 = vpop.f32.mrf.mxu2 }
 0xc13   :  { %v3745_v2 = vpop.f32.mrf.mxu2 }
 0xc14   :  { %v3751_v48 = vsel %vm15367_vm14, %v3745_v2, -inf  ;;  %v3659_v2 = vsel %vm15374_vm0, %v3655_v8, -inf }
 0xc15   :  { %v3753_v14 = vsel %vm2411_vm15, %v3751_v48, -inf }
 0xc16   :  { %3754 = vmax.xlane.f32.xlu1 %v3753_v14  ;;  %v3663_v14 = vsel %vm2411_vm15, %v3659_v2, -inf }
 0xc1b   :  { %v3748_v50 = vpop.f32.mrf.mxu2 }
 0xc1c   :  { %v3752_v22 = vsel %vm15374_vm0, %v3748_v50, -inf  ;;  %v17190_v50 = vld [vmem:[#allocation61_spill] sm:$0xff] }
 0xc1d   :  { %v3756_v51 = vsel %vm2411_vm15, %v3752_v22, -inf }
 0xc1e   :  { %3757 = vmax.xlane.f32.xlu2 %v3756_v51  ;;  %v17192_v51 = vld [vmem:[#allocation63_spill] sm:$0xff] }
 0xc2f   :  { %14325 = vrot.lane.b32.xlu1 %v14324_v25, %s14816_s10  ;;  %v17193_v25 = vld [vmem:[#allocation64_spill] sm:$0xff] }
 0xc89   :  { %v3755_v3 = vpop.xlane.xlu1 %3754 }
 0xc8a   :  { %v3759_v20 = vsub.f32 %v3751_v48, %v3755_v3 }
 0xc8c   :  { %v3761_v44 = vmul.f32 1.442695, %v3759_v20  ;;  %v17194_v20 = vld [vmem:[#allocation52_spill] sm:$0xff] }
 0xc8e   :  { %14397 = vpow2.f32 %v3761_v44  ;;  %v17195_v44 = vld [vmem:[#allocation53_spill] sm:$0xff] }
 0xc91   :  { %v3758_v9 = vpop.xlane.xlu2 %3757 }
 0xc92   :  { %v3760_v5 = vsub.f32 %v3752_v22, %v3758_v9  ;;  %v17191_v22 = vld [vmem:[#allocation62_spill] sm:$0xff]  ;;  %v2180_v9 = vadd.f32 %v17195_v44, %v17194_v20 }
 0xc94   :  { %v14398_v58 = vpop.eup %14397  ;;  %v3763_v54 = vmul.f32 1.442695, %v3760_v5 }
 0xc95   :  { %v3765_v40 = vsel %vm2411_vm15, %v14398_v58, 0.0 }
 0xc96   :  { %14399 = vpow2.f32 %v3763_v54  ;;  %3766 = vadd.xlane.f32.xlu0 %v3765_v40  ;;  %v17196_v54 = vld [vmem:[#allocation50_spill] sm:$0xff] }
 0xc97   :  { %v2178_v40 = vadd.f32 %v17197_v55, %v17196_v54  ;;  %v15925_v54 = vpop.f32.mrf.mxu3 }
 0xc9c   :  { %v14400_v60 = vpop.eup %14399 }
 0xc9d   :  { %v3768_v6 = vsel %vm2411_vm15, %v14400_v60, 0.0 }
 0xc9e   :  { %3769 = vadd.xlane.f32.xlu2 %v3768_v6  ;;  %3661 = vmax.xlane.f32.xlu0 %v3660_v21 }
 0xca1   :  { %v14326_v18 = vpop.permute.xlu1 %14325 }
 0xca2   :  { %v14327_v42 = vunpack.i.l.bf16 %v14326_v18  ;;  %v14328_v48 = vunpack.i.h.bf16 %v14326_v18  ;;  %v17198_v18 = vld [vmem:[#allocation60_spill] sm:$0xff] }
 0xca4   :  { %3803 = vmatpush.msrb.mxu3 %v14327_v42  ;;  %v15912_v42 = vadd.f32 %v17198_v18, %v2180_v9 }
 0xca6   :  { %3804 = vmatpush.msrb.mxu3 %v14328_v48  ;;  %3664 = vmax.xlane.f32.xlu2 %v3663_v14  ;;  %v17199_v14 = vld [vmem:[#allocation59_spill] sm:$0xff] }
 0xca8   :  { %3865 = vmatpush.bf16.msra.mxu3 %v17190_v50  ;;  %v15916_v50 = vadd.f32 %v17199_v14, %v2178_v40  ;;  %v17201_v14 = vld [vmem:[#allocation68_spill] sm:$0xff] }
 0xcac   :  { %3866 = vmatpush.bf16.msra.mxu3 %v17191_v22 }
 0xcb0   :  { %3867 = vmatpush.bf16.msra.mxu3 %v17192_v51 }
 0xcb4   :  { %3868 = vmatpush.bf16.msra.mxu3 %v17193_v25 }
 0xd09   :  { %v3767_v3 = vpop.xlane.xlu0 %3766 }
 0xd0a   :  { %14401 = vrcp.f32 %v3767_v3 }
 0xd10   :  { %v14402_v5 = vpop.eup %14401 }
 0xd11   :  { %v3773_v6 = vmul.f32 %v14402_v5, %v14398_v58  ;;  %v3770_v21 = vpop.xlane.xlu2 %3769  ;;  %v3662_v8 = vpop.xlane.xlu0 %3661 }
 0xd12   :  { %14403 = vrcp.f32 %v3770_v21  ;;  %v3666_v48 = vsub.f32 %v3658_v1, %v3662_v8  ;;  %v17200_v21 = vld [vmem:[#allocation67_spill] sm:$0xff] }
 0xd13   :  { %11074 = vmatmul.msk.f32.vlgmr.msrb.gmra.mxu3 %vm2411_vm15, %v3773_v6 }
 0xd14   :  { %v3668_v22 = vmul.f32 1.442695, %v3666_v48  ;;  %3982 = vmatpush.msrb.mxu3 %v15912_v42 }
 0xd16   :  { %14405 = vpow2.f32 %v3668_v22  ;;  %3983 = vmatpush.msrb.mxu3 %v15916_v50  ;;  %v17202_v22 = vld [vmem:[#allocation69_spill] sm:$0xff] }
 0xd18   :  { %v14404_v51 = vpop.eup %14403 }
 0xd19   :  { %v3665_v58 = vpop.xlane.xlu2 %3664  ;;  %v3774_v25 = vmul.f32 %v14404_v51, %v14400_v60  ;;  %v17203_v51 = vld [vmem:[#allocation77_spill] sm:$0xff] }
 0xd1a   :  { %v3667_v3 = vsub.f32 %v3659_v2, %v3665_v58  ;;  %v17204_v58 = vld [vmem:[#allocation78_spill] sm:$0xff] }
 0xd1b   :  { %11075 = vmatmul.msk.f32.gmra.mxu3 %vm2411_vm15, %v3774_v25  ;;  %v17205_v25 = vld [vmem:[#allocation70_spill] sm:$0xff] }
 0xd1c   :  { %v14406_v20 = vpop.eup %14405  ;;  %v3670_v44 = vmul.f32 1.442695, %v3667_v3  ;;  %v17206_v3 = vld [vmem:[#allocation72_spill] sm:$0xff] }
 0xd1d   :  { %v3672_v1 = vsel %vm2411_vm15, %v14406_v20, 0.0 }
 0xd1e   :  { %14407 = vpow2.f32 %v3670_v44  ;;  %3673 = vadd.xlane.f32.xlu0 %v3672_v1  ;;  %v17210_v1 = vld [vmem:[#allocation32_spill] sm:$0xff] }
 0xd24   :  { %v14408_v9 = vpop.eup %14407 }
 0xd25   :  { %v3675_v5 = vsel %vm2411_vm15, %v14408_v9, 0.0 }
 0xd26   :  { %3676 = vadd.xlane.f32.xlu2 %v3675_v5 }
 0xd3e   :  { %4049 = vrot.lane.b32.xlu2 %v15863_v19, %s14816_s10 }
 0xd91   :  { %v3674_v55 = vpop.xlane.xlu0 %3673 }
 0xd92   :  { %14409 = vrcp.f32 %v3674_v55  ;;  %v17212_v55 = vld [vmem:[#allocation73_spill] sm:$0xff] }
 0xd96   :  { %v3806_v60 = vpop.f32.mrf.mxu3 }
 0xd98   :  { %v14410_v2 = vpop.eup %14409 }
 0xd99   :  { %v3680_v40 = vmul.f32 %v14410_v2, %v14406_v20  ;;  %v3677_v6 = vpop.xlane.xlu2 %3676  ;;  %v17209_v20 = vld [vmem:[#allocation33_spill] sm:$0xff] }
 0xd9a   :  { %14411 = vrcp.f32 %v3677_v6  ;;  %v2265_v44 = vmul.f32 0.05103104, %v17209_v20  ;;  %v15958_v6 = vpop.f32.mrf.mxu1 }
 0xd9b   :  { %11068 = vmatmul.msk.f32.vlgmr.msra.gmra.mxu1 %vm2411_vm15, %v3680_v40  ;;  %v17215_v40 = vld [vmem:[#allocation75_spill] sm:$0xff] }
 0xd9c   :  { %3893 = vmatpush.bf16.msra.mxu1 %v17200_v21 }
 0xd9e   :  { %v3809_v8 = vpop.f32.mrf.mxu3 }
 0xd9f   :  { %v3812_v18 = vpack.c.bf16 %v3809_v8, %v3806_v60  ;;  %v17214_v60 = vld [vmem:[#allocation74_spill] sm:$0xff] }
 0xda0   :  { %v14412_v48 = vpop.eup %14411  ;;  %3894 = vmatpush.bf16.msra.mxu1 %v17201_v14  ;;  %v17218_v14 = vld [vmem:[#allocation80_spill] sm:$0xff] }
 0xda1   :  { %11076 = vmatmul.msk.bf16.vlgmr.msrb.gmra.mxu0 %vm2373_vm13, %v3812_v18  ;;  %11078 = vmatmul.msk.bf16.vlgmr.msrb.gmra.mxu2 %vm2373_vm13, %v3812_v18  ;;  %v3681_v19 = vmul.f32 %v14412_v48, %v14408_v9  ;;  %v17211_v9 = vld [vmem:[#allocation34_spill] sm:$0xff]  ;;  %v17216_v48 = vld [vmem:[#allocation76_spill] sm:$0xff] }
 0xda2   :  { %3999 = vmatpush.bf16.msrb.mxu0 %v15522_v62  ;;  %4027 = vmatpush.bf16.msrb.mxu2 %v15524_v33  ;;  %v17207_v62 = vld [vmem:[#allocation81_spill] sm:$0xff]  ;;  %v17208_v33 = vld [vmem:[#allocation82_spill] sm:$0xff]  ;;  %v1838_v5 = vadd.f32 %v17211_v9, %v17210_v1 }
 0xda3   :  { %11069 = vmatmul.msk.f32.gmra.mxu1 %vm2411_vm15, %v3681_v19  ;;  %v17219_v19 = vld [vmem:[#allocation83_spill] sm:$0xff] }
 0xda4   :  { %3895 = vmatpush.bf16.msra.mxu1 %v17202_v22 }
 0xda6   :  { %4000 = vmatpush.bf16.msrb.mxu0 %v17203_v51  ;;  %4028 = vmatpush.bf16.msrb.mxu2 %v17204_v58 }
 0xda8   :  { %3896 = vmatpush.bf16.msra.mxu1 %v17205_v25 }
 0xdaa   :  { %4001 = vmatpush.bf16.msrb.mxu0 %v15550_v45  ;;  %4029 = vmatpush.bf16.msrb.mxu2 %v15553_v34  ;;  %v17213_v45 = vld [vmem:[#allocation35_spill] sm:$0xff] }
 0xdab   :  { %11077 = vmatmul.msk.bf16.vlgmr.msrb.gmra.mxu1 %vm2373_vm13, %v3812_v18  ;;  %v1857_v34 = vadd.f32 %v17213_v45, %v1838_v5  ;;  %v4050_v18 = vpop.permute.xlu2 %4049 }
 0xdac   :  { %4013 = vmatpush.bf16.msrb.mxu1 %v17206_v3 }
 0xdad   :  { %v2268_v2 = vmul.f32 0.05103104, %v1857_v34 }
 0xdae   :  { %4002 = vmatpush.bf16.msrb.mxu0 %v17207_v62  ;;  %4030 = vmatpush.bf16.msrb.mxu2 %v17208_v33 }
 0xdb0   :  { %4014 = vmatpush.bf16.msrb.mxu1 %v17212_v55 }
 0xdb1   :  { %11084 = vmatmul.msk.f32.vlgmr.msra.gmra.mxu2 %vm2373_vm13, %v2265_v44 }
 0xdb2   :  { %4165 = vmatpush.bf16.msra.mxu2 %v15619_v23 }
 0xdb4   :  { %4015 = vmatpush.bf16.msrb.mxu1 %v17214_v60 }
 0xdb6   :  { %4166 = vmatpush.bf16.msra.mxu2 %v15641_v7 }
 0xdb8   :  { %4016 = vmatpush.bf16.msrb.mxu1 %v17215_v40 }
 0xdb9   :  { %11085 = vmatmul.msk.f32.gmra.mxu2 %vm2373_vm13, %v2268_v2 }
 0xdba   :  { %4167 = vmatpush.bf16.msra.mxu2 %v15646_v37  ;;  %v17217_v37 = vld [vmem:[#allocation79_spill] sm:$0xff] }
 0xdbe   :  { %4168 = vmatpush.bf16.msra.mxu2 %v15655_v24 }
 0xe18   :  { %v3705_v21 = vpop.f32.mrf.mxu1 }
 0xe20   :  { %v3708_v8 = vpop.f32.mrf.mxu1 }
 0xe21   :  { %v3711_v23 = vpack.c.bf16 %v3708_v8, %v3705_v21 }
 0xe23   :  { %11079 = vmatmul.msk.bf16.vlgmr.msra.gmra.mxu3 %vm2373_vm13, %v3711_v23  ;;  %11080 = vmatmul.msk.bf16.vlgmr.msra.gmra.mxu0 %vm2373_vm13, %v3711_v23 }
 0xe24   :  { %11081 = vmatmul.msk.bf16.vlgmr.msra.gmra.mxu1 %vm2373_vm13, %v3711_v23  ;;  %11091 = vmatpush.xpose.msk.msra.mxu3 %vm2373_vm13, %v4050_v18  ;;  %v15964_v7 = vpop.f32.mrf.mxu2 }
 0xe25   :  { %4151 = vmatpush.bf16.msra.mxu1 %v17216_v48 }
 0xe29   :  { %4152 = vmatpush.bf16.msra.mxu1 %v17217_v37  ;;  %v17220_v37 = vld [vmem:[#allocation88_spill] sm:$0xff] }
 0xe2c   :  { %v15968_v24 = vpop.f32.mrf.mxu2 }
 0xe2d   :  { %4153 = vmatpush.bf16.msra.mxu1 %v17218_v14 }
 0xe31   :  { %4154 = vmatpush.bf16.msra.mxu1 %v17219_v19  ;;  %v17221_v19 = vld [vmem:[#allocation89_spill] sm:$0xff] }
 0xe34   :  { %v3932_v22 = vpop.f32.mrf.mxu2 }
 0xe35   :  { %v3938_v51 = vsel %vm15367_vm14, %v3932_v22, -inf }
 0xe36   :  { %v3940_v58 = vsel %vm2411_vm15, %v3938_v51, -inf }
 0xe37   :  { %3941 = vmax.xlane.f32.xlu1 %v3940_v58 }
 0xe3c   :  { %v3935_v25 = vpop.f32.mrf.mxu2 }
 0xe3d   :  { %v3939_v3 = vsel %vm15374_vm0, %v3935_v25, -inf  ;;  %v17223_v25 = vld [vmem:[#allocation58_spill] sm:$0xff] }
 0xe3e   :  { %v3943_v62 = vsel %vm2411_vm15, %v3939_v3, -inf }
 0xe3f   :  { %3944 = vmax.xlane.f32.xlu0 %v3943_v62 }
 0xe53   :  { %4047 = vrot.lane.b32.xlu0 %v17189_v63, %s14816_s10 }
 0xeaa   :  { %v3942_v33 = vpop.xlane.xlu1 %3941 }
 0xeab   :  { %v3946_v20 = vsub.f32 %v3938_v51, %v3942_v33 }
 0xead   :  { %v3948_v1 = vmul.f32 1.442695, %v3946_v20 }
 0xeaf   :  { %14413 = vpow2.f32 %v3948_v1  ;;  %v17225_v1 = vld [vmem:[#allocation86_spill] sm:$0xff] }
 0xeb2   :  { %v3945_v9 = vpop.xlane.xlu0 %3944 }
 0xeb3   :  { %v3947_v5 = vsub.f32 %v3939_v3, %v3945_v9  ;;  %v17224_v3 = vld [vmem:[#allocation66_spill] sm:$0xff] }
 0xeb4   :  { %v2237_v62 = vadd.f32 %v17224_v3, %v17223_v25 }
 0xeb5   :  { %v14414_v55 = vpop.eup %14413  ;;  %v3950_v45 = vmul.f32 1.442695, %v3947_v5 }
 0xeb6   :  { %v3952_v34 = vsel %vm2411_vm15, %v14414_v55, 0.0 }
 0xeb7   :  { %14415 = vpow2.f32 %v3950_v45  ;;  %3953 = vadd.xlane.f32.xlu2 %v3952_v34  ;;  %v3825_v45 = vpop.f32.mrf.mxu0  ;;  %v3839_v34 = vpop.f32.mrf.mxu1 }
 0xebd   :  { %v14416_v60 = vpop.eup %14415 }
 0xebe   :  { %v3955_v40 = vsel %vm2411_vm15, %v14416_v60, 0.0 }
 0xebf   :  { %3956 = vadd.xlane.f32.xlu0 %v3955_v40  ;;  %v16024_v40 = vpop.f32.mrf.mxu1 }
 0xec5   :  { %v4048_v21 = vpop.permute.xlu0 %4047 }
 0xec6   :  { %11092 = vmatpush.xpose.msk.msra.mxu3 %vm2373_vm13, %v4048_v21 }
 0xecf   :  { %4045 = vrot.lane.b32.xlu2 %v2268_v2, %s14816_s10  ;;  %v17222_v2 = vld [vmem:[#allocation91_spill] sm:$0xff] }
 0xed3   :  { %4043 = vrot.lane.b32.xlu0 %v2265_v44, %s14816_s10 }
 0xf2a   :  { %v3954_v63 = vpop.xlane.xlu2 %3953 }
 0xf2b   :  { %14417 = vrcp.f32 %v3954_v63 }
 0xf31   :  { %v14418_v8 = vpop.eup %14417 }
 0xf32   :  { %v3960_v23 = vmul.f32 %v14418_v8, %v14414_v55  ;;  %v3957_v18 = vpop.xlane.xlu0 %3956  ;;  %v4046_v22 = vpop.permute.xlu2 %4045 }
 0xf33   :  { %14419 = vrcp.f32 %v3957_v18 }
 0xf34   :  { %11086 = vmatmul.msk.f32.vlgmr.msrb.gmra.mxu3 %vm2411_vm15, %v3960_v23 }
 0xf35   :  { %4179 = vmatpush.bf16.msrb.mxu3 %v15621_v13  ;;  %v3870_v13 = vpop.f32.mrf.mxu3 }
 0xf36   :  { %v3871_v8 = vadd.f32 %v3870_v13, %v3825_v45  ;;  %v17231_v45 = vld [vmem:[#allocation49_spill] sm:$0xff] }
 0xf39   :  { %v14420_v48 = vpop.eup %14419  ;;  %4180 = vmatpush.bf16.msrb.mxu3 %v17220_v37 }
 0xf3a   :  { %v3961_v14 = vmul.f32 %v14420_v48, %v14416_v60  ;;  %v16022_v60 = vpop.f32.mrf.mxu0 }
 0xf3c   :  { %11087 = vmatmul.msk.f32.gmra.mxu3 %vm2411_vm15, %v3961_v14 }
 0xf3d   :  { %4181 = vmatpush.bf16.msrb.mxu3 %v17221_v19  ;;  %v15997_v51 = vpop.f32.mrf.mxu3 }
 0xf41   :  { %4182 = vmatpush.bf16.msrb.mxu3 %v17222_v2 }
 0xf45   :  { %v4044_v44 = vpop.permute.xlu0 %4043 }
 0xf46   :  { %11093 = vmatmul.msk.f32.vlgmr.msra.gmra.mxu3 %vm2373_vm13, %v4044_v44 }
 0xf47   :  { %4305 = vmatpush.bf16.msra.mxu3 %v15697_v43  ;;  %v16002_v43 = vadd.f32 %v17225_v1, %v2237_v62  ;;  %v17227_v1 = vld [vmem:[#allocation45_spill] sm:$0xff] }
 0xf4b   :  { %4306 = vmatpush.bf16.msra.mxu3 %v15700_v32  ;;  %v17226_v32 = vld [vmem:[#allocation57_spill] sm:$0xff] }
 0xf4e   :  { %11094 = vmatmul.msk.f32.gmra.mxu3 %vm2373_vm13, %v4046_v22 }
 0xf4f   :  { %4307 = vmatpush.bf16.msra.mxu3 %v15710_v35 }
 0xf53   :  { %4308 = vmatpush.bf16.msra.mxu3 %v15714_v56 }
 0xfb7   :  { %v3985_v58 = vpop.f32.mrf.mxu3 }
 0xfbf   :  { %v3988_v33 = vpop.f32.mrf.mxu3 }
 0xfc0   :  { %v3991_v20 = vpack.c.bf16 %v3988_v33, %v3985_v58 }
 0xfc2   :  { %11088 = vmatmul.msk.bf16.vlgmr.msrb.gmra.mxu0 %vm2373_vm13, %v3991_v20  ;;  %11089 = vmatmul.msk.bf16.vlgmr.msrb.gmra.mxu1 %vm2373_vm13, %v3991_v20 }
 0xfc3   :  { %11090 = vmatmul.msk.bf16.vlgmr.msrb.gmra.mxu2 %vm2373_vm13, %v3991_v20  ;;  %4274 = vmatpush.msrb.mxu1 %v16002_v43 }
 0xfc4   :  { %4291 = vmatpush.bf16.msrb.mxu2 %v15702_v46 }
 0xfc5   :  { %4275 = vmatpush.msrb.mxu1 %v17226_v32 }
 0xfc8   :  { %4292 = vmatpush.bf16.msrb.mxu2 %v15723_v41  ;;  %v14329_v41 = vpack.i.bf16 %v15916_v50, %v15912_v42 }
 0xfc9   :  { %v4076_v35 = vpop.f32.mrf.mxu3 }
 0xfca   :  { %v4082_v56 = vsel %vm15367_vm14, %v4076_v35, -inf  ;;  %v17228_v35 = vld [vmem:[#allocation48_spill] sm:$0xff] }
 0xfcb   :  { %v4084_v9 = vsel %vm2411_vm15, %v4082_v56, -inf }
 0xfcc   :  { %4085 = vmax.xlane.f32.xlu1 %v4084_v9  ;;  %4293 = vmatpush.bf16.msrb.mxu2 %v15731_v49  ;;  %v3884_v49 = vpop.f32.mrf.mxu0 }
 0xfcd   :  { %v3885_v23 = vadd.f32 %v3884_v49, %v3839_v34  ;;  %v17232_v49 = vld [vmem:[#allocation47_spill] sm:$0xff] }
 0xfd0   :  { %4294 = vmatpush.bf16.msrb.mxu2 %v15741_v28  ;;  %v3898_v28 = vpop.f32.mrf.mxu1 }
 0xfd1   :  { %v4079_v5 = vpop.f32.mrf.mxu3  ;;  %v3899_v2 = vadd.f32 %v3898_v28, %v15964_v7 }
 0xfd2   :  { %v4083_v55 = vsel %vm15374_vm0, %v4079_v5, -inf }
 0xfd3   :  { %v4087_v46 = vsel %vm2411_vm15, %v4083_v55, -inf }
 0xfd4   :  { %4088 = vmax.xlane.f32.xlu0 %v4087_v46  ;;  %v16026_v21 = vpop.f32.mrf.mxu0  ;;  %v17229_v46 = vld [vmem:[#allocation44_spill] sm:$0xff] }
 0xfd8   :  { %v16028_v63 = vpop.f32.mrf.mxu1 }
 0xfe5   :  { %14330 = vrot.lane.b32.xlu1 %v14329_v41, %s14816_s10  ;;  %v17230_v41 = vld [vmem:[#allocation46_spill] sm:$0xff] }
0x103f   :  { %v4086_v18 = vpop.xlane.xlu1 %4085  ;;  %v4004_v48 = vpop.f32.mrf.mxu0 }
0x1040   :  { %v4090_v37 = vsub.f32 %v4082_v56, %v4086_v18  ;;  %v16030_v42 = vadd.f32 %v4004_v48, %v3871_v8  ;;  %v4018_v50 = vpop.f32.mrf.mxu1  ;;  %v2066_v56 = vadd.f32 %v17228_v35, %v17227_v1  ;;  %v17233_v8 = vld [vmem:[#allocation38_spill] sm:$0xff] }
0x1041   :  { %v16032_v14 = vadd.f32 %v4018_v50, %v3885_v23  ;;  %v2266_v23 = vmul.f32 0.05103104, %v17233_v8 }
0x1042   :  { %v4092_v19 = vmul.f32 1.442695, %v4090_v37  ;;  %v2085_v34 = vadd.f32 %v17231_v45, %v2066_v56 }
0x1044   :  { %14421 = vpow2.f32 %v4092_v19 }
0x1046   :  { %v4032_v44 = vpop.f32.mrf.mxu2 }
0x1047   :  { %v16035_v22 = vadd.f32 %v4032_v44, %v3899_v2  ;;  %v4089_v58 = vpop.xlane.xlu0 %4088  ;;  %v17234_v44 = vld [vmem:[#allocation36_spill] sm:$0xff] }
0x1048   :  { %v4091_v25 = vsub.f32 %v4083_v55, %v4089_v58  ;;  %v2064_v55 = vadd.f32 %v17230_v41, %v17229_v46  ;;  %v17235_v58 = vld [vmem:[#allocation37_spill] sm:$0xff] }
0x104a   :  { %v14422_v3 = vpop.eup %14421  ;;  %v4094_v13 = vmul.f32 1.442695, %v4091_v25  ;;  %v16046_v28 = vadd.f32 %v17232_v49, %v2064_v55  ;;  %v1895_v25 = vadd.f32 %v17235_v58, %v17234_v44 }
0x104b   :  { %v4096_v62 = vsel %vm2411_vm15, %v14422_v3, 0.0 }
0x104c   :  { %14423 = vpow2.f32 %v4094_v13  ;;  %4097 = vadd.xlane.f32.xlu2 %v4096_v62 }
0x1052   :  { %v14424_v33 = vpop.eup %14423 }
0x1053   :  { %v4099_v20 = vsel %vm2411_vm15, %v14424_v33, 0.0 }
0x1054   :  { %4100 = vadd.xlane.f32.xlu1 %v4099_v20  ;;  %v17239_v20 = vld [vmem:[#allocation98_spill] sm:$0xff] }
0x1057   :  { %v14331_v9 = vpop.permute.xlu1 %14330 }
0x1058   :  { %v14332_v7 = vunpack.i.l.bf16 %v14331_v9  ;;  %v14333_v5 = vunpack.i.h.bf16 %v14331_v9  ;;  %v16083_v9 = vpop.f32.mrf.mxu1 }
0x105a   :  { %4134 = vmatpush.msra.mxu0 %v14332_v7  ;;  %v16085_v7 = vpop.f32.mrf.mxu2 }
0x105c   :  { %4135 = vmatpush.msra.mxu0 %v14333_v5 }
0x105e   :  { %11100 = vmatpush.xpose.msk.msrb.mxu0 %vm2373_vm13, %v2085_v34 }
0x1062   :  { %11101 = vmatpush.xpose.msk.msrb.mxu0 %vm2373_vm13, %v16046_v28 }
0x106d   :  { %4335 = vrot.lane.b32.xlu1 %v2266_v23, %s14816_s10 }
0x10bf   :  { %v4098_v18 = vpop.xlane.xlu2 %4097 }
0x10c0   :  { %14425 = vrcp.f32 %v4098_v18 }
0x10c6   :  { %v14426_v48 = vpop.eup %14425 }
0x10c7   :  { %v4104_v37 = vmul.f32 %v14426_v48, %v14422_v3  ;;  %v4101_v50 = vpop.xlane.xlu1 %4100  ;;  %v17236_v3 = vld [vmem:[#allocation39_spill] sm:$0xff] }
0x10c8   :  { %14427 = vrcp.f32 %v4101_v50  ;;  %v1914_v13 = vadd.f32 %v17236_v3, %v1895_v25 }
0x10c9   :  { %11095 = vmatmul.msk.f32.vlgmr.msra.gmra.mxu0 %vm2411_vm15, %v4104_v37 }
0x10ca   :  { %4319 = vmatpush.bf16.msra.mxu0 %v15704_v16  ;;  %v2269_v16 = vmul.f32 0.05103104, %v1914_v13 }
0x10ce   :  { %v14428_v19 = vpop.eup %14427  ;;  %4320 = vmatpush.bf16.msra.mxu0 %v15725_v38  ;;  %v16067_v38 = vpop.f32.mrf.mxu0 }
0x10cf   :  { %v4105_v2 = vmul.f32 %v14428_v19, %v14424_v33 }
0x10d1   :  { %11096 = vmatmul.msk.f32.gmra.mxu0 %vm2411_vm15, %v4105_v2 }
0x10d2   :  { %4321 = vmatpush.bf16.msra.mxu0 %v15733_v30 }
0x10d6   :  { %4322 = vmatpush.bf16.msra.mxu0 %v15743_v57 }
0x10d9   :  { %11102 = vmatmul.msk.f32.vlgmr.msrb.gmra.mxu0 %vm2373_vm13, %v2266_v23 }
0x10da   :  { %4457 = vmatpush.bf16.msrb.mxu0 %v15806_v52  ;;  %v17237_v52 = vld [vmem:[#allocation96_spill] sm:$0xff] }
0x10de   :  { %4458 = vmatpush.bf16.msrb.mxu0 %v15809_v47 }
0x10e1   :  { %11103 = vmatmul.msk.f32.gmra.mxu0 %vm2373_vm13, %v2269_v16 }
0x10e2   :  { %4459 = vmatpush.bf16.msrb.mxu0 %v15812_v31  ;;  %v17238_v31 = vld [vmem:[#allocation97_spill] sm:$0xff] }
0x10e6   :  { %4460 = vmatpush.bf16.msrb.mxu0 %v15815_v39 }
0x1146   :  { %v4137_v30 = vpop.f32.mrf.mxu0 }
0x114e   :  { %v4140_v57 = vpop.f32.mrf.mxu0 }
0x114f   :  { %v4143_v62 = vpack.c.bf16 %v4140_v57, %v4137_v30 }
0x1151   :  { %11097 = vmatmul.msk.bf16.vlgmr.msra.gmra.mxu1 %vm2373_vm13, %v4143_v62  ;;  %11098 = vmatmul.msk.bf16.vlgmr.msra.gmra.mxu2 %vm2373_vm13, %v4143_v62 }
0x1152   :  { %11099 = vmatmul.msk.bf16.vlgmr.msrb.gmra.mxu3 %vm2373_vm13, %v4143_v62 }
0x1153   :  { %4443 = vmatpush.bf16.msrb.mxu3 %v17237_v52 }
0x1156   :  { %v4224_v47 = vpop.f32.mrf.mxu0 }
0x1157   :  { %v4230_v33 = vsel %vm15367_vm14, %v4224_v47, -inf  ;;  %4444 = vmatpush.bf16.msrb.mxu3 %v17238_v31  ;;  %v17240_v31 = vld [vmem:[#allocation85_spill] sm:$0xff] }
0x1158   :  { %v4232_v39 = vsel %vm2411_vm15, %v4230_v33, -inf }
0x1159   :  { %4233 = vmax.xlane.f32.xlu0 %v4232_v39  ;;  %v17241_v39 = vld [vmem:[#allocation90_spill] sm:$0xff] }
0x115b   :  { %4445 = vmatpush.bf16.msrb.mxu3 %v17239_v20  ;;  %v2767_v20 = vadd.f32 %v17241_v39, %v17240_v31 }
0x115e   :  { %v4227_v1 = vpop.f32.mrf.mxu0 }
0x115f   :  { %v4231_v35 = vsel %vm15374_vm0, %v4227_v1, -inf  ;;  %4446 = vmatpush.bf16.msrb.mxu3 %v15746_v10  ;;  %v17243_v1 = vld [vmem:[#allocation84_spill] sm:$0xff] }
0x1160   :  { %v4235_v56 = vsel %vm2411_vm15, %v4231_v35, -inf }
0x1161   :  { %4236 = vmax.xlane.f32.xlu2 %v4235_v56  ;;  %v17244_v56 = vld [vmem:[#allocation95_spill] sm:$0xff] }
0x116d   :  { %4341 = vrot.lane.b32.xlu0 %v2085_v34, %s14816_s10 }
0x11cc   :  { %v4234_v5 = vpop.xlane.xlu0 %4233 }
0x11cd   :  { %v4238_v46 = vsub.f32 %v4230_v33, %v4234_v5  ;;  %v14334_v33 = vpack.i.bf16 %v17226_v32, %v16002_v43  ;;  %v2985_v5 = vadd.f32 %v17244_v56, %v2767_v20 }
0x11ce   :  { %v4156_v41 = vpop.f32.mrf.mxu1 }
0x11cf   :  { %v4240_v55 = vmul.f32 1.442695, %v4238_v46  ;;  %v16088_v45 = vadd.f32 %v4156_v41, %v16030_v42  ;;  %v17245_v46 = vld [vmem:[#allocation92_spill] sm:$0xff] }
0x11d1   :  { %14429 = vpow2.f32 %v4240_v55  ;;  %v3201_v55 = vadd.f32 %v17246_v61, %v2985_v5  ;;  %v14457_v5 = vld [vmem:[#allocation2] sm:$0xff] }
0x11d3   :  { %v3405_v32 = vadd.f32 %v15871_v11, %v3201_v55 }
0x11d4   :  { %v4237_v49 = vpop.xlane.xlu2 %4236  ;;  %v4170_v8 = vpop.f32.mrf.mxu2 }
0x11d5   :  { %v4239_v10 = vsub.f32 %v4231_v35, %v4237_v49  ;;  %v16091_v23 = vadd.f32 %v4170_v8, %v16032_v14  ;;  %v2753_v35 = vadd.f32 %v17243_v1, %v17242_v53  ;;  %v17247_v8 = vld [vmem:[#allocation71_spill] sm:$0xff] }
0x11d7   :  { %v14430_v18 = vpop.eup %14429  ;;  %v4242_v34 = vmul.f32 1.442695, %v4239_v10  ;;  %v2984_v41 = vadd.f32 %v17245_v46, %v2753_v35  ;;  %v17248_v10 = vld [vmem:[#allocation93_spill] sm:$0xff]  ;;  %v4487_v46 = vadd.f32 %v14457_v5, %v15876_v36 }
0x11d8   :  { %v4244_v48 = vsel %vm2411_vm15, %v14430_v18, 0.0 }
0x11d9   :  { %14431 = vpow2.f32 %v4242_v34  ;;  %4245 = vadd.xlane.f32.xlu0 %v4244_v48  ;;  %v17249_v34 = vld [vmem:[#allocation99_spill] sm:$0xff] }
0x11da   :  { %v3200_v43 = vadd.f32 %v17249_v34, %v2984_v41 }
0x11dc   :  { %v16133_v48 = vpop.f32.mrf.mxu2 }
0x11df   :  { %v14432_v37 = vpop.eup %14431  ;;  %v4342_v50 = vpop.permute.xlu0 %4341 }
0x11e0   :  { %11109 = vmatpush.xpose.msk.msra.mxu1 %vm2373_vm13, %v4342_v50  ;;  %v4247_v42 = vsel %vm2411_vm15, %v14432_v37, 0.0  ;;  %v17250_v50 = vld [vmem:[#allocation94_spill] sm:$0xff] }
0x11e1   :  { %4248 = vadd.xlane.f32.xlu2 %v4247_v42 }
0x11ed   :  { %4337 = vrot.lane.b32.xlu0 %v2269_v16, %s14816_s10  ;;  %v16108_v16 = vpop.f32.mrf.mxu1 }
0x11f9   :  { %4339 = vrot.lane.b32.xlu2 %v16046_v28, %s14816_s10  ;;  %v4336_v28 = vpop.permute.xlu1 %4335 }
0x124c   :  { %v4246_v14 = vpop.xlane.xlu0 %4245 }
0x124d   :  { %14433 = vrcp.f32 %v4246_v14  ;;  %v3404_v14 = vadd.f32 %v15847_v12, %v3200_v43 }
0x1253   :  { %v14434_v19 = vpop.eup %14433 }
0x1254   :  { %v4252_v2 = vmul.f32 %v14434_v19, %v14430_v18  ;;  %v4249_v44 = vpop.xlane.xlu2 %4248  ;;  %v2781_v18 = vadd.f32 %v17248_v10, %v17247_v8  ;;  %v3621_v19 = vadd.f32 %v15884_v27, %v3405_v32  ;;  %v14458_v10 = vld [vmem:[#allocation2 + $0x10] sm:$0xff] }
0x1255   :  { %14435 = vrcp.f32 %v4249_v44  ;;  %v17251_v44 = vld [vmem:[#allocation101_spill] sm:$0xff] }
0x1256   :  { %11104 = vmatmul.msk.f32.vlgmr.msrb.gmra.mxu1 %vm2411_vm15, %v4252_v2  ;;  %v2986_v42 = vadd.f32 %v17250_v50, %v2781_v18  ;;  %v4489_v18 = vadd.f32 %v14458_v10, %v15882_v26 }
0x125b   :  { %v14436_v58 = vpop.eup %14435 }
0x125c   :  { %v4340_v25 = vpop.permute.xlu2 %4339  ;;  %v4253_v3 = vmul.f32 %v14436_v58, %v14432_v37  ;;  %v3202_v58 = vadd.f32 %v17251_v44, %v2986_v42 }
0x125d   :  { %11110 = vmatpush.xpose.msk.msra.mxu1 %vm2373_vm13, %v4340_v25  ;;  %v3620_v25 = vadd.f32 %v15958_v6, %v3404_v14 }
0x125e   :  { %11105 = vmatmul.msk.f32.gmra.mxu1 %vm2411_vm15, %v4253_v3  ;;  %v3406_v3 = vadd.f32 %v15873_v0, %v3202_v58 }
0x125f   :  { %v4338_v13 = vpop.permute.xlu0 %4337 }
0x1260   :  { %v3622_v12 = vadd.f32 %v15925_v54, %v3406_v3  ;;  %v14455_v54 = vld [vmem:[#allocation2 + $0x28] sm:$0xff] }
0x1261   :  { %4471 = vmatpush.bf16.msrb.mxu1 %v15818_v17 }
0x1265   :  { %4472 = vmatpush.bf16.msrb.mxu1 %v15838_v15 }
0x1266   :  { %11111 = vmatmul.msk.f32.vlgmr.msra.gmra.mxu1 %vm2373_vm13, %v4336_v28  ;;  %v4499_v28 = vld [vmem:[#allocation11] sm:$0x7] }
0x1267   :  { %v16157_v35 = vperm.slane %v4499_v28, 2 }
0x1269   :  { %4473 = vmatpush.bf16.msrb.mxu1 %v15841_v4  ;;  %v16177_v34 = vadd.f32 %v16157_v35, %v4489_v18  ;;  %v3873_v18 = vadd.f32 %v15997_v51, %v16022_v60 }
0x126b   :  { %17255 = vst [vmem:[#allocation42_spill] sm:$0xff] %v16177_v34 }
0x126d   :  { %4474 = vmatpush.bf16.msrb.mxu1 %v15844_v59 }
0x126e   :  { %11112 = vmatmul.msk.f32.gmra.mxu1 %vm2373_vm13, %v4338_v13  ;;  %v14453_v13 = vld [vmem:[#allocation2 + $0x20] sm:$0xff] }
0x126f   :  { %v4491_v11 = vadd.f32 %v14453_v13, %v3621_v19 }
0x12d3   :  { %v4277_v30 = vpop.f32.mrf.mxu1 }
0x12db   :  { %v4280_v57 = vpop.f32.mrf.mxu1 }
0x12dc   :  { %v4283_v62 = vpack.c.bf16 %v4280_v57, %v4277_v30  ;;  %v16141_v30 = vperm.slane %v4499_v28, 1 }
0x12de   :  { %11106 = vmatmul.msk.bf16.vlgmr.msrb.gmra.mxu2 %vm2373_vm13, %v4283_v62  ;;  %11107 = vmatmul.msk.bf16.vlgmr.msra.gmra.mxu3 %vm2373_vm13, %v4283_v62  ;;  %v16150_v0 = vadd.f32 %v16141_v30, %v4491_v11 }
0x12df   :  { %11108 = vmatmul.msk.bf16.vlgmr.msra.gmra.mxu0 %vm2373_vm13, %v4283_v62 }
0x12e0   :  { %17252 = vst [vmem:[#allocation54_spill] sm:$0xff] %v16150_v0 }
0x12e3   :  { %v4368_v17 = vpop.f32.mrf.mxu1 }
0x12e4   :  { %v4374_v15 = vsel %vm15367_vm14, %v4368_v17, -inf  ;;  %v14454_v17 = vld [vmem:[#allocation2 + $0x18] sm:$0xff] }
0x12e5   :  { %v4376_v4 = vsel %vm2411_vm15, %v4374_v15, -inf }
0x12e6   :  { %4377 = vmax.xlane.f32.xlu2 %v4376_v4 }
0x12eb   :  { %v4371_v59 = vpop.f32.mrf.mxu1 }
0x12ec   :  { %v4375_v52 = vsel %vm15374_vm0, %v4371_v59, -inf }
0x12ed   :  { %v4379_v47 = vsel %vm2411_vm15, %v4375_v52, -inf }
0x12ee   :  { %4380 = vmax.xlane.f32.xlu0 %v4379_v47 }
0x12fe   :  { %14335 = vrot.lane.b32.xlu2 %v14334_v33, %s14816_s10  ;;  %v16147_v33 = vperm.slane %v4499_v28, 0 }
0x1359   :  { %v4378_v49 = vpop.xlane.xlu2 %4377 }
0x135a   :  { %v4382_v37 = vsub.f32 %v4374_v15, %v4378_v49  ;;  %v4490_v15 = vadd.f32 %v14454_v17, %v3620_v25 }
0x135c   :  { %v4384_v2 = vmul.f32 1.442695, %v4382_v37  ;;  %v16154_v53 = vadd.f32 %v16147_v33, %v4490_v15 }
0x135e   :  { %14437 = vpow2.f32 %v4384_v2  ;;  %v4525_v56 = vadd.f32 %v16150_v0, %v16154_v53  ;;  %v17256_v2 = vld [vmem:[#allocation31_spill] sm:$0xff] }
0x1361   :  { %v14336_v57 = vpop.permute.xlu2 %14335  ;;  %v4381_v62 = vpop.xlane.xlu0 %4380 }
0x1362   :  { %v14337_v27 = vunpack.i.l.bf16 %v14336_v57  ;;  %v4383_v4 = vsub.f32 %v4375_v52, %v4381_v62  ;;  %v4296_v59 = vpop.f32.mrf.mxu2  ;;  %v14338_v31 = vunpack.i.h.bf16 %v14336_v57  ;;  %v4492_v52 = vadd.f32 %v14455_v54, %v3622_v12 }
0x1363   :  { %v16145_v47 = vadd.f32 %v4296_v59, %v16088_v45  ;;  %v14456_v45 = vld [vmem:[#allocation2 + $0x8] sm:$0xff] }
0x1364   :  { %v14438_v6 = vpop.eup %14437  ;;  %v4386_v39 = vmul.f32 1.442695, %v4383_v4  ;;  %4426 = vmatpush.msra.mxu2 %v14337_v27  ;;  %v4488_v1 = vadd.f32 %v14456_v45, %v15879_v29  ;;  %v16163_v41 = vadd.f32 %v16157_v35, %v4492_v52  ;;  %v16171_v29 = vadd.f32 %v16147_v33, %v4487_v46  ;;  %v4184_v4 = vpop.f32.mrf.mxu3 }
0x1365   :  { %v4388_v20 = vsel %vm2411_vm15, %v14438_v6, 0.0  ;;  %v4191_v52 = vadd.f32 %v4184_v4, %v16035_v22 }
0x1366   :  { %14439 = vpow2.f32 %v4386_v39  ;;  %4389 = vadd.xlane.f32.xlu1 %v4388_v20  ;;  %4427 = vmatpush.msra.mxu2 %v14338_v31  ;;  %17253 = vst [vmem:[#allocation55_spill] sm:$0xff] %v16163_v41  ;;  %v16166_v55 = vadd.f32 %v16141_v30, %v4488_v1  ;;  %v4526_v49 = vadd.f32 %v4525_v56, %v16163_v41 }
0x1367   :  { %v3887_v56 = vadd.f32 %v16026_v21, %v16024_v40  ;;  %v14459_v40 = vld [vmem:[#allocation2 + $0x38] sm:$0xff] }
0x1368   :  { %17254 = vst [vmem:[#allocation41_spill] sm:$0xff] %v16166_v55  ;;  %v4521_v36 = vadd.f32 %v16166_v55, %v16171_v29 }
0x136a   :  { %v4522_v43 = vadd.f32 %v4521_v36, %v16177_v34  ;;  %v4298_v17 = vpop.f32.mrf.mxu2 }
0x136c   :  { %v14440_v61 = vpop.eup %14439  ;;  %v4186_v59 = vpop.f32.mrf.mxu3 }
0x136d   :  { %v4391_v8 = vsel %vm2411_vm15, %v14440_v61, 0.0 }
0x136e   :  { %4527 = vadd.xlane.f32.xlu1 %v4526_v49  ;;  %4392 = vadd.xlane.f32.xlu0 %v4391_v8  ;;  %v3901_v49 = vadd.f32 %v16028_v63, %v15968_v24  ;;  %v4041_v8 = vadd.f32 %v16083_v9, %v3887_v56 }
0x1370   :  { %v4042_v22 = vadd.f32 %v16085_v7, %v3901_v49  ;;  %v13800_v49 = vld [vmem:[#allocation16 + $0x2cc] sm:$0xf0] }
0x1372   :  { %v4194_v24 = vadd.f32 %v4186_v59, %v4042_v22  ;;  %v13992_v22 = vld [vmem:[#allocation16 + $0x8cc] sm:$0xf0] }
0x1374   :  { %v4310_v31 = vpop.f32.mrf.mxu3 }
0x1375   :  { %v4330_v45 = vadd.f32 %v4310_v31, %v16091_v23 }
0x1376   :  { %4523 = vadd.xlane.f32.xlu0 %v4522_v43  ;;  %v4193_v43 = vadd.f32 %v16133_v48, %v4041_v8  ;;  %v11840_v8 = vld [vmem:[#allocation16 + $0x5a0] sm:$0xf] }
0x137c   :  { %v4312_v20 = vpop.f32.mrf.mxu3 }
0x137d   :  { %v4333_v9 = vadd.f32 %v4312_v20, %v4193_v43  ;;  %v11458_v43 = vld [vmem:[#allocation16 + $0x2d0] sm:$0xf0] }
0x13d9   :  { %v4390_v32 = vpop.xlane.xlu1 %4389 }
0x13da   :  { %14441 = vrcp.f32 %v4390_v32 }
0x13e0   :  { %v14442_v37 = vpop.eup %14441 }
0x13e1   :  { %v4396_v50 = vmul.f32 %v14442_v37, %v14438_v6  ;;  %v4393_v42 = vpop.xlane.xlu0 %4392  ;;  %v4324_v6 = vpop.f32.mrf.mxu0  ;;  %v4040_v37 = vadd.f32 %v16067_v38, %v3873_v18  ;;  %v12224_v18 = vld [vmem:[#allocation16 + $0x8a0] sm:$0xf] }
0x13e2   :  { %14443 = vrcp.f32 %v4393_v42  ;;  %v4331_v5 = vadd.f32 %v4324_v6, %v4191_v52  ;;  %v4528_v46 = vpop.xlane.xlu1 %4527  ;;  %v14463_v6 = vld [vmem:[#allocation2 + $0x58] sm:$0xff] }
0x13e3   :  { %11113 = vmatmul.msk.f32.vlgmr.msra.gmra.mxu2 %vm2411_vm15, %v4396_v50  ;;  %v4538_v23 = vmul.f32 %v4528_v46, %v17256_v2  ;;  %v14460_v50 = vld [vmem:[#allocation2 + $0x40] sm:$0xff]  ;;  %v4192_v60 = vadd.f32 %v16108_v16, %v4040_v37  ;;  %v11792_v37 = vld [vmem:[#allocation16 + $0x540] sm:$0xf] }
0x13e8   :  { %v14444_v26 = vpop.eup %14443 }
0x13e9   :  { %v4524_v14 = vpop.xlane.xlu0 %4523  ;;  %v4397_v19 = vmul.f32 %v14444_v26, %v14440_v61  ;;  %v4326_v39 = vpop.f32.mrf.mxu0  ;;  %v14461_v26 = vld [vmem:[#allocation2 + $0x30] sm:$0xff] }
0x13ea   :  { %v4537_v44 = vmul.f32 %v4524_v14, %v17256_v2  ;;  %v4334_v7 = vadd.f32 %v4326_v39, %v4194_v24  ;;  %v16217_v14 = vsub.f32 %v16154_v53, %v4538_v23  ;;  %v14464_v39 = vld [vmem:[#allocation2 + $0x48] sm:$0xff] }
0x13eb   :  { %11114 = vmatmul.msk.f32.gmra.mxu2 %vm2411_vm15, %v4397_v19  ;;  %v16220_v19 = vsub.f32 %v16150_v0, %v4538_v23 }
0x13ec   :  { %v16184_v58 = vsub.f32 %v16171_v29, %v4537_v44  ;;  %v16187_v25 = vsub.f32 %v16166_v55, %v4537_v44  ;;  %v16190_v3 = vsub.f32 %v16177_v34, %v4537_v44 }
0x13ed   :  { %v4557_v59 = vmul.f32 %v16220_v19, %v16220_v19 }
0x13ee   :  { %v4553_v28 = vmul.f32 %v16184_v58, %v16184_v58  ;;  %v4554_v13 = vmul.f32 %v16187_v25, %v16187_v25  ;;  %v4555_v11 = vmul.f32 %v16190_v3, %v16190_v3 }
0x13f0   :  { %v4565_v57 = vadd.f32 %v4554_v13, %v4553_v28  ;;  %v4332_v28 = vadd.f32 %v4298_v17, %v4192_v60  ;;  %v16239_v17 = vsub.f32 %v16163_v41, %v4538_v23  ;;  %v12225_v23 = vor.u32 %v13992_v22, %v12224_v18  ;;  %v11410_v60 = vld [vmem:[#allocation16 + $0x270] sm:$0xf0]  ;;  %v11264_v22 = vld [vmem:[#allocation16 + $0x120] sm:$0xf] }
0x13f2   :  { %v4566_v62 = vadd.f32 %v4565_v57, %v4555_v11  ;;  %v4558_v56 = vmul.f32 %v16239_v17, %v16239_v17  ;;  %6479 = vmatpush.bf16.msra.mxu0 %v12225_v23  ;;  %v11648_v23 = vld [vmem:[#allocation16 + $0x420] sm:$0xf] }
0x13f4   :  { %4567 = vadd.xlane.f32.xlu2 %v4566_v62  ;;  %v4556_v62 = vmul.f32 %v16217_v14, %v16217_v14 }
0x1466   :  { %v4429_v15 = vpop.f32.mrf.mxu2 }
0x146e   :  { %v4432_v12 = vpop.f32.mrf.mxu2 }
0x146f   :  { %v4435_v27 = vpack.c.bf16 %v4432_v12, %v4429_v15  ;;  %v14462_v15 = vld [vmem:[#allocation2 + $0x50] sm:$0xff] }
0x1471   :  { %11115 = vmatmul.msk.bf16.vlgmr.msrb.gmra.mxu3 %vm2373_vm13, %v4435_v27  ;;  %11116 = vmatmul.msk.bf16.vlgmr.msrb.gmra.mxu0 %vm2373_vm13, %v4435_v27 }
0x1472   :  { %11117 = vmatmul.msk.bf16.vlgmr.msrb.gmra.mxu1 %vm2373_vm13, %v4435_v27 }
0x14ee   :  { %v4462_v54 = vpop.f32.mrf.mxu0 }
0x14ef   :  { %v4476_v1 = vpop.f32.mrf.mxu1  ;;  %v4482_v61 = vadd.f32 %v4462_v54, %v4330_v45  ;;  %v4569_v45 = vadd.f32 %v4557_v59, %v4556_v62  ;;  %v12128_v62 = vld [vmem:[#allocation16 + $0x7e0] sm:$0xf]  ;;  %v11362_v59 = vld [vmem:[#allocation16 + $0x210] sm:$0xf0] }
0x14f0   :  { %v4483_v10 = vadd.f32 %v4476_v1, %v4331_v5 }
0x14f1   :  { %v4494_v21 = vadd.f32 %v14459_v40, %v4482_v61  ;;  %v4570_v46 = vadd.f32 %v4569_v45, %v4558_v56  ;;  %v11696_v45 = vld [vmem:[#allocation16 + $0x480] sm:$0xf] }
0x14f2   :  { %v4495_v42 = vadd.f32 %v14460_v50, %v4483_v10  ;;  %v13896_v10 = vld [vmem:[#allocation16 + $0x5cc] sm:$0xf0] }
0x14f3   :  { %v13980_v50 = vld [vmem:[#allocation16 + $0x86c] sm:$0xf0] }
0x14f4   :  { %v4448_v36 = vpop.f32.mrf.mxu3  ;;  %v16229_v13 = vadd.f32 %v16157_v35, %v4495_v42 }
0x14f5   :  { %v4481_v32 = vadd.f32 %v4448_v36, %v16145_v47  ;;  %v16223_v47 = vadd.f32 %v16141_v30, %v4494_v21  ;;  %v13794_v36 = vld [vmem:[#allocation16 + $0x2a4] sm:$0xf]  ;;  %v11408_v21 = vld [vmem:[#allocation16 + $0x240] sm:$0xf] }
0x14f6   :  { %v4464_v63 = vpop.f32.mrf.mxu0  ;;  %17258 = vst [vmem:[#allocation65_spill] sm:$0xff] %v16229_v13  ;;  %v11461_v40 = vor.u32 %v13794_v36, %v11458_v43  ;;  %v13848_v43 = vld [vmem:[#allocation16 + $0x44c] sm:$0xf0] }
0x14f7   :  { %v4493_v51 = vadd.f32 %v14461_v26, %v4481_v32  ;;  %v4478_v48 = vpop.f32.mrf.mxu1  ;;  %17257 = vst [vmem:[#allocation56_spill] sm:$0xff] %v16223_v47  ;;  %v4485_v44 = vadd.f32 %v4464_v63, %v4333_v9  ;;  %v13788_v32 = vld [vmem:[#allocation16 + $0x26c] sm:$0xf0]  ;;  %v12176_v9 = vld [vmem:[#allocation16 + $0x840] sm:$0xf] }
0x14f8   :  { %v4486_v16 = vadd.f32 %v4478_v48, %v4334_v7  ;;  %6498 = vmatpush.bf16.msra.mxu1 %v11461_v40  ;;  %v11409_v24 = vor.u32 %v13788_v32, %v11408_v21  ;;  %v13884_v63 = vld [vmem:[#allocation16 + $0x56c] sm:$0xf0]  ;;  %v12177_v26 = vor.u32 %v13980_v50, %v12176_v9  ;;  %v4568_v48 = vpop.xlane.xlu2 %4567  ;;  %v12032_v40 = vld [vmem:[#allocation16 + $0x720] sm:$0xf]  ;;  %v11649_v32 = vor.u32 %v13848_v43, %v11648_v23 }
0x14f9   :  { %v16226_v38 = vadd.f32 %v16147_v33, %v4493_v51  ;;  %v4497_v12 = vadd.f32 %v14462_v15, %v4485_v44  ;;  %v11793_v42 = vor.u32 %v13884_v63, %v11792_v37  ;;  %v13782_v51 = vld [vmem:[#allocation16 + $0x244] sm:$0xf]  ;;  %v11360_v44 = vld [vmem:[#allocation16 + $0x1e0] sm:$0xf]  ;;  %v13968_v15 = vld [vmem:[#allocation16 + $0x80c] sm:$0xf0] }
0x14fa   :  { %v4498_v31 = vadd.f32 %v14463_v6, %v4486_v16  ;;  %v11413_v7 = vor.u32 %v13782_v51, %v11410_v60  ;;  %6480 = vmatpush.bf16.msra.mxu0 %v12177_v26  ;;  %v11744_v16 = vld [vmem:[#allocation16 + $0x4e0] sm:$0xf]  ;;  %v4581_v6 = vmul.f32 %v4568_v48, %v17256_v2  ;;  %v13944_v21 = vld [vmem:[#allocation16 + $0x74c] sm:$0xf0]  ;;  %v11266_v63 = vld [vmem:[#allocation16 + $0x150] sm:$0xf0] }
0x14fb   :  { %v4529_v11 = vadd.f32 %v16223_v47, %v16226_v38  ;;  %v16242_v54 = vadd.f32 %v16141_v30, %v4497_v12  ;;  %v11456_v30 = vld [vmem:[#allocation16 + $0x2a0] sm:$0xf]  ;;  %v12033_v37 = vor.u32 %v13944_v21, %v12032_v40  ;;  %v13836_v60 = vld [vmem:[#allocation16 + $0x3ec] sm:$0xf0] }
0x14fc   :  { %v4450_v57 = vpop.f32.mrf.mxu3  ;;  %v16248_v1 = vadd.f32 %v16157_v35, %v4498_v31  ;;  %v11841_v35 = vor.u32 %v13896_v10, %v11840_v8  ;;  %6499 = vmatpush.bf16.msra.mxu1 %v11413_v7  ;;  %v13758_v8 = vld [vmem:[#allocation16 + $0x184] sm:$0xf]  ;;  %v16256_v10 = vadd.f32 1e-05, %v4581_v6  ;;  %v11216_v50 = vld [vmem:[#allocation16 + $0xc0] sm:$0xf] }
0x14fd   :  { %v4484_v27 = vadd.f32 %v4450_v57, %v4332_v28  ;;  %v4530_v4 = vadd.f32 %v4529_v11, %v16229_v13  ;;  %17259 = vst [vmem:[#allocation43_spill] sm:$0xff] %v16242_v54  ;;  %v13776_v28 = vld [vmem:[#allocation16 + $0x20c] sm:$0xf0]  ;;  %v11600_v26 = vld [vmem:[#allocation16 + $0x3c0] sm:$0xf] }
0x14fe   :  { %17261 = vst [vmem:[#allocation61_spill] sm:$0xff] %v16248_v1  ;;  %6460 = vmatpush.bf16.msra.mxu3 %v11841_v35  ;;  %v11361_v11 = vor.u32 %v13776_v28, %v11360_v44  ;;  %v13872_v57 = vld [vmem:[#allocation16 + $0x50c] sm:$0xf0]  ;;  %14445 = vrsqrt.f32 %v16256_v10  ;;  %v11984_v7 = vld [vmem:[#allocation16 + $0x6c0] sm:$0xf]  ;;  %v11601_v44 = vor.u32 %v13836_v60, %v11600_v26  ;;  %vm4595_vm2 = vweird.f32 %v16256_v10 }
0x14ff   :  { %v4496_v20 = vadd.f32 %v14464_v39, %v4484_v27  ;;  %4531 = vadd.xlane.f32.xlu0 %v4530_v4  ;;  %v11745_v12 = vor.u32 %v13872_v57, %v11744_v16  ;;  %v12129_v27 = vor.u32 %v13968_v15, %v12128_v62  ;;  %v13770_v4 = vld [vmem:[#allocation16 + $0x1e4] sm:$0xf]  ;;  %v11312_v39 = vld [vmem:[#allocation16 + $0x180] sm:$0xf]  ;;  %v13752_v35 = vld [vmem:[#allocation16 + $0x14c] sm:$0xf0] }
0x1500   :  { %v11365_v31 = vor.u32 %v13770_v4, %v11362_v59  ;;  %v11265_v36 = vor.u32 %v13752_v35, %v11264_v22  ;;  %v13932_v48 = vld [vmem:[#allocation16 + $0x6ec] sm:$0xf0]  ;;  %v13734_v16 = vld [vmem:[#allocation16 + $0xc4] sm:$0xf]  ;;  %v11168_v62 = vld [vmem:[#allocation16 + $0x60] sm:$0xf] }
0x1501   :  { %v16245_v52 = vadd.f32 %v16147_v33, %v4496_v20  ;;  %v11457_v33 = vor.u32 %v13800_v49, %v11456_v30  ;;  %6481 = vmatpush.bf16.msra.mxu0 %v12129_v27  ;;  %v13764_v20 = vld [vmem:[#allocation16 + $0x1ac] sm:$0xf0]  ;;  %v11985_v28 = vor.u32 %v13932_v48, %v11984_v7  ;;  %v11936_v6 = vld [vmem:[#allocation16 + $0x660] sm:$0xf] }
0x1502   :  { %6461 = vmatpush.bf16.msra.mxu3 %v11793_v42  ;;  %6500 = vmatpush.bf16.msra.mxu1 %v11365_v31  ;;  %v11313_v56 = vor.u32 %v13764_v20, %v11312_v39  ;;  %v13740_v42 = vld [vmem:[#allocation16 + $0xec] sm:$0xf0]  ;;  %v11888_v43 = vld [vmem:[#allocation16 + $0x600] sm:$0xf] }
0x1503   :  { %17260 = vst [vmem:[#allocation40_spill] sm:$0xff] %v16245_v52  ;;  %v4533_v5 = vadd.f32 %v16242_v54, %v16245_v52  ;;  %6441 = vmatpush.bf16.msrb.mxu2 %v11457_v33  ;;  %v11314_v33 = vld [vmem:[#allocation16 + $0x1b0] sm:$0xf0]  ;;  %v11217_v51 = vor.u32 %v13740_v42, %v11216_v50  ;;  %v13728_v15 = vld [vmem:[#allocation16 + $0x8c] sm:$0xf0] }
0x1504   :  { %v11317_v18 = vor.u32 %v13758_v8, %v11314_v33  ;;  %v16259_v27 = vpop.eup %14445  ;;  %v11169_v4 = vor.u32 %v13728_v15, %v11168_v62  ;;  %v13824_v59 = vld [vmem:[#allocation16 + $0x38c] sm:$0xf0]  ;;  %v11504_v33 = vld [vmem:[#allocation16 + $0x300] sm:$0xf] }
0x1505   :  { %v4534_v61 = vadd.f32 %v4533_v5, %v16248_v1  ;;  %v13860_v5 = vld [vmem:[#allocation16 + $0x4ac] sm:$0xf0]  ;;  %vm4596_vm1 = vweird.f32 %v16259_v27 }
0x1506   :  { %6462 = vmatpush.bf16.msra.mxu3 %v11745_v12  ;;  %v11697_v30 = vor.u32 %v13860_v5, %v11696_v45  ;;  %6501 = vmatpush.bf16.msra.mxu1 %v11317_v18  ;;  %v11552_v12 = vld [vmem:[#allocation16 + $0x360] sm:$0xf]  ;;  %v13920_v31 = vld [vmem:[#allocation16 + $0x68c] sm:$0xf0]  ;;  %v11170_v5 = vld [vmem:[#allocation16 + $0x90] sm:$0xf0] }
0x1507   :  { %4571 = vadd.xlane.f32.xlu0 %v4570_v46  ;;  %4535 = vadd.xlane.f32.xlu1 %v4534_v61  ;;  %v12080_v46 = vld [vmem:[#allocation16 + $0x780] sm:$0xf]  ;;  %v13956_v61 = vld [vmem:[#allocation16 + $0x7ac] sm:$0xf0]  ;;  %v11553_v20 = vor.u32 %v13824_v59, %v11552_v12  ;;  %v11937_v45 = vor.u32 %v13920_v31, %v11936_v6  ;;  %vm4597_vm3 = vmor %vm4595_vm2, %vm4596_vm1 }
0x1508   :  { %6442 = vmatpush.bf16.msrb.mxu2 %v11409_v24  ;;  %v12081_v49 = vor.u32 %v13956_v61, %v12080_v46  ;;  %v13746_v24 = vld [vmem:[#allocation16 + $0x124] sm:$0xf]  ;;  %v13716_v8 = vld [vmem:[#allocation16 + $0x2c] sm:$0xf0] }
0x1509   :  { %v11269_v9 = vor.u32 %v13746_v24, %v11266_v63  ;;  %v13908_v40 = vld [vmem:[#allocation16 + $0x62c] sm:$0xf0]  ;;  %v11122_v24 = vld [vmem:[#allocation16 + $0x30] sm:$0xf0] }
0x150a   :  { %6463 = vmatpush.bf16.msra.mxu3 %v11697_v30  ;;  %6482 = vmatpush.bf16.msra.mxu0 %v12081_v49  ;;  %v4590_v30 = vmul.f32 %v16259_v27, %v16256_v10  ;;  %v11120_v49 = vld [vmem:[#allocation16] sm:$0xf] }
0x150b   :  { %6502 = vmatpush.bf16.msra.mxu1 %v11269_v9  ;;  %v11121_v23 = vor.u32 %v13716_v8, %v11120_v49 }
0x150c   :  { %6443 = vmatpush.bf16.msrb.mxu2 %v11361_v11  ;;  %v11218_v11 = vld [vmem:[#allocation16 + $0xf0] sm:$0xf0]  ;;  %v4591_v42 = vmul.f32 %v16259_v27, %v4590_v30 }
0x150d   :  { %v11221_v57 = vor.u32 %v13734_v16, %v11218_v11 }
0x150e   :  { %6464 = vmatpush.bf16.msra.mxu3 %v11649_v32  ;;  %6483 = vmatpush.bf16.msra.mxu0 %v12033_v37  ;;  %v11889_v32 = vor.u32 %v13908_v40, %v11888_v43  ;;  %v13710_v37 = vld [vmem:[#allocation16 + $0x4] sm:$0xf]  ;;  %v4592_v16 = vmul.f32 0.5, %v4591_v42 }
0x150f   :  { %6503 = vmatpush.bf16.msra.mxu1 %v11221_v57  ;;  %v11125_v50 = vor.u32 %v13710_v37, %v11122_v24 }
0x1510   :  { %6444 = vmatpush.bf16.msrb.mxu2 %v11313_v56  ;;  %v13722_v56 = vld [vmem:[#allocation16 + $0x64] sm:$0xf]  ;;  %v4593_v59 = vsub.f32 1.5, %v4592_v16 }
0x1511   :  { %v11173_v61 = vor.u32 %v13722_v56, %v11170_v5  ;;  %v4519_v5 = vld [vmem:[#allocation13] sm:$0x7] }
0x1512   :  { %6465 = vmatpush.bf16.msra.mxu3 %v11601_v44  ;;  %6484 = vmatpush.bf16.msra.mxu0 %v11985_v28  ;;  %v16301_v49 = vperm.slane %v4519_v5, 0  ;;  %v16303_v8 = vperm.slane %v4519_v5, 1  ;;  %v16307_v40 = vperm.slane %v4519_v5, 2  ;;  %v13897_v5 = vld [vmem:[#allocation16 + $0x5d4] sm:$0xf0] }
0x1513   :  { %6504 = vmatpush.bf16.msra.mxu1 %v11173_v61 }
0x1514   :  { %6445 = vmatpush.bf16.msrb.mxu2 %v11265_v36  ;;  %v13812_v36 = vld [vmem:[#allocation16 + $0x32c] sm:$0xf0] }
0x1515   :  { %v11505_v21 = vor.u32 %v13812_v36, %v11504_v33  ;;  %v4520_v33 = vld [vmem:[#allocation14] sm:$0x7] }
0x1516   :  { %6466 = vmatpush.bf16.msra.mxu3 %v11553_v20  ;;  %6485 = vmatpush.bf16.msra.mxu0 %v11937_v45  ;;  %v4594_v45 = vmul.f32 %v16259_v27, %v4593_v59  ;;  %v16314_v37 = vperm.slane %v4520_v33, 2 }
0x1517   :  { %6505 = vmatpush.bf16.msra.mxu1 %v11125_v50 }
0x1518   :  { %6446 = vmatpush.bf16.msrb.mxu2 %v11217_v51  ;;  %v4598_v61 = vsel %vm4597_vm3, %v16259_v27, %v4594_v45  ;;  %v16312_v27 = vperm.slane %v4520_v33, 1 }
0x1519   :  { %v4630_v36 = vmul.f32 %v4598_v61, %v16187_v25  ;;  %v4631_v10 = vmul.f32 %v4598_v61, %v16190_v3 }
0x151a   :  { %6467 = vmatpush.bf16.msra.mxu3 %v11505_v21  ;;  %6486 = vmatpush.bf16.msra.mxu0 %v11889_v32  ;;  %v16310_v32 = vperm.slane %v4520_v33, 0  ;;  %v13974_v33 = vld [vmem:[#allocation16 + $0x844] sm:$0xf] }
0x151c   :  { %6447 = vmatpush.bf16.msrb.mxu2 %v11169_v4 }
0x1520   :  { %6448 = vmatpush.bf16.msrb.mxu2 %v11121_v23  ;;  %v4629_v23 = vmul.f32 %v4598_v61, %v16184_v58  ;;  %v4649_v58 = vmul.f32 %v16303_v8, %v4630_v36  ;;  %v13878_v61 = vld [vmem:[#allocation16 + $0x544] sm:$0xf]  ;;  %v12178_v36 = vld [vmem:[#allocation16 + $0x870] sm:$0xf0] }
0x1522   :  { %v4648_v24 = vmul.f32 %v16301_v49, %v4629_v23 }
0x1572   :  { %v4532_v39 = vpop.xlane.xlu0 %4531 }
0x1573   :  { %v4539_v46 = vmul.f32 %v4532_v39, %v17256_v2 }
0x1575   :  { %v16265_v18 = vsub.f32 %v16226_v38, %v4539_v46  ;;  %v16268_v22 = vsub.f32 %v16223_v47, %v4539_v46  ;;  %v16271_v35 = vsub.f32 %v16229_v13, %v4539_v46  ;;  %v13090_v13 = vld [vmem:[#allocation19 + $0x66c] sm:$0xf0]  ;;  %v12832_v47 = vld [vmem:[#allocation19 + $0x458] sm:$0xf] }
0x1577   :  { %v4559_v63 = vmul.f32 %v16265_v18, %v16265_v18  ;;  %v4560_v9 = vmul.f32 %v16268_v22, %v16268_v22  ;;  %v4561_v26 = vmul.f32 %v16271_v35, %v16271_v35 }
0x1579   :  { %v4573_v51 = vadd.f32 %v4560_v9, %v4559_v63  ;;  %v4650_v63 = vmul.f32 %v16307_v40, %v4631_v10  ;;  %v13789_v10 = vld [vmem:[#allocation16 + $0x274] sm:$0xf0] }
0x157a   :  { %v4572_v60 = vpop.xlane.xlu0 %4571  ;;  %v4536_v7 = vpop.xlane.xlu1 %4535 }
0x157b   :  { %v4582_v48 = vmul.f32 %v4572_v60, %v17256_v2  ;;  %v4540_v44 = vmul.f32 %v4536_v7, %v17256_v2  ;;  %v4574_v28 = vadd.f32 %v4573_v51, %v4561_v26  ;;  %v4667_v60 = vadd.f32 %v16310_v32, %v4648_v24 }
0x157c   :  { %v4668_v7 = vadd.f32 %v16312_v27, %v4649_v58  ;;  %v11800_v58 = vld [vmem:[#allocation16 + $0x548] sm:$0xf] }
0x157d   :  { %v4586_v11 = vadd.f32 1e-05, %v4582_v48  ;;  %v16283_v57 = vsub.f32 %v16245_v52, %v4540_v44  ;;  %v16286_v62 = vsub.f32 %v16242_v54, %v4540_v44  ;;  %v16289_v15 = vsub.f32 %v16248_v1, %v4540_v44  ;;  %4575 = vadd.xlane.f32.xlu1 %v4574_v28  ;;  %v12514_v1 = vld [vmem:[#allocation19 + $0x1ec] sm:$0xf0]  ;;  %v14099_v54 = vld [vmem:[#allocation19 + $0x328] sm:$0xf0] }
0x157e   :  { %v4669_v48 = vadd.f32 %v16314_v37, %v4650_v63  ;;  %v12580_v52 = vld [vmem:[#allocation19 + $0x260] sm:$0xf] }
0x157f   :  { %14447 = vrsqrt.f32 %v4586_v11  ;;  %v4562_v12 = vmul.f32 %v16283_v57, %v16283_v57  ;;  %v4563_v4 = vmul.f32 %v16286_v62, %v16286_v62  ;;  %v4564_v6 = vmul.f32 %v16289_v15, %v16289_v15 }
0x1580   :  { %vm4605_vm5 = vweird.f32 %v4586_v11 }
0x1581   :  { %v4577_v31 = vadd.f32 %v4563_v4, %v4562_v12  ;;  %v11842_v12 = vld [vmem:[#allocation16 + $0x5d0] sm:$0xf0]  ;;  %v13986_v4 = vld [vmem:[#allocation16 + $0x8a4] sm:$0xf] }
0x1583   :  { %v4578_v39 = vadd.f32 %v4577_v31, %v4564_v6  ;;  %v12226_v6 = vld [vmem:[#allocation16 + $0x8d0] sm:$0xf0]  ;;  %v11464_v31 = vld [vmem:[#allocation16 + $0x2a8] sm:$0xf] }
0x1585   :  { %v14448_v20 = vpop.eup %14447  ;;  %4579 = vadd.xlane.f32.xlu0 %v4578_v39  ;;  %v13801_v39 = vld [vmem:[#allocation16 + $0x2d4] sm:$0xf0] }
0x1586   :  { %v4600_v56 = vmul.f32 %v14448_v20, %v4586_v11  ;;  %vm4606_vm4 = vweird.f32 %v14448_v20  ;;  %v13890_v11 = vld [vmem:[#allocation16 + $0x5a4] sm:$0xf]  ;;  %v11465_v45 = vor.u32 %v13801_v39, %v11464_v31 }
0x1587   :  { %vm4607_vm6 = vmor %vm4605_vm5, %vm4606_vm4  ;;  %v11845_v59 = vor.u32 %v13890_v11, %v11842_v12 }
0x1588   :  { %v4601_v46 = vmul.f32 %v14448_v20, %v4600_v56  ;;  %v11848_v56 = vld [vmem:[#allocation16 + $0x5a8] sm:$0xf]  ;;  %6555 = vmatpush.bf16.msrb.mxu0 %v11465_v45 }
0x1589   :  { %6517 = vmatpush.bf16.msra.mxu2 %v11845_v59  ;;  %v11698_v59 = vld [vmem:[#allocation16 + $0x4b0] sm:$0xf0]  ;;  %v11320_v45 = vld [vmem:[#allocation16 + $0x188] sm:$0xf] }
0x158a   :  { %v4602_v30 = vmul.f32 0.5, %v4601_v46  ;;  %v11849_v46 = vor.u32 %v13897_v5, %v11848_v56  ;;  %v13765_v5 = vld [vmem:[#allocation16 + $0x1b4] sm:$0xf0] }
0x158c   :  { %v4603_v43 = vsub.f32 1.5, %v4602_v30  ;;  %v11794_v30 = vld [vmem:[#allocation16 + $0x570] sm:$0xf0]  ;;  %6574 = vmatpush.bf16.msrb.mxu1 %v11849_v46  ;;  %v11704_v46 = vld [vmem:[#allocation16 + $0x488] sm:$0xf] }
0x158d   :  { %v11797_v23 = vor.u32 %v13878_v61, %v11794_v30  ;;  %v13861_v61 = vld [vmem:[#allocation16 + $0x4b4] sm:$0xf0]  ;;  %v11321_v30 = vor.u32 %v13765_v5, %v11320_v45  ;;  %v11554_v5 = vld [vmem:[#allocation16 + $0x390] sm:$0xf0] }
0x158e   :  { %v4604_v21 = vmul.f32 %v14448_v20, %v4603_v43  ;;  %v11416_v43 = vld [vmem:[#allocation16 + $0x248] sm:$0xf] }
0x158f   :  { %v11417_v24 = vor.u32 %v13789_v10, %v11416_v43  ;;  %6518 = vmatpush.bf16.msra.mxu2 %v11797_v23  ;;  %v13842_v23 = vld [vmem:[#allocation16 + $0x424] sm:$0xf] }
0x1590   :  { %v4608_v25 = vsel %vm4607_vm6, %v14448_v20, %v4604_v21  ;;  %v12229_v20 = vor.u32 %v13986_v4, %v12226_v6  ;;  %v12181_v21 = vor.u32 %v13974_v33, %v12178_v36  ;;  %v13854_v4 = vld [vmem:[#allocation16 + $0x484] sm:$0xf]  ;;  %v11705_v33 = vor.u32 %v13861_v61, %v11704_v46  ;;  %v11650_v36 = vld [vmem:[#allocation16 + $0x450] sm:$0xf0] }
0x1591   :  { %v4632_v9 = vmul.f32 %v4608_v25, %v16217_v14  ;;  %v4633_v3 = vmul.f32 %v4608_v25, %v16220_v19  ;;  %v4634_v50 = vmul.f32 %v4608_v25, %v16239_v17  ;;  %v13885_v25 = vld [vmem:[#allocation16 + $0x574] sm:$0xf0]  ;;  %6556 = vmatpush.bf16.msrb.mxu0 %v11417_v24  ;;  %v13950_v6 = vld [vmem:[#allocation16 + $0x784] sm:$0xf]  ;;  %v11701_v39 = vor.u32 %v13854_v4, %v11698_v59  ;;  %v11272_v24 = vld [vmem:[#allocation16 + $0x128] sm:$0xf] }
0x1592   :  { %6536 = vmatpush.bf16.msrb.mxu3 %v12229_v20  ;;  %v11801_v63 = vor.u32 %v13885_v25, %v11800_v58  ;;  %v12082_v20 = vld [vmem:[#allocation16 + $0x7b0] sm:$0xf0]  ;;  %v11653_v43 = vor.u32 %v13842_v23, %v11650_v36  ;;  %v13938_v10 = vld [vmem:[#allocation16 + $0x724] sm:$0xf]  ;;  %v13741_v59 = vld [vmem:[#allocation16 + $0xf4] sm:$0xf0] }
0x1593   :  { %v4651_v42 = vmul.f32 %v16301_v49, %v4632_v9  ;;  %v4652_v26 = vmul.f32 %v16303_v8, %v4633_v3  ;;  %v4653_v51 = vmul.f32 %v16307_v40, %v4634_v50  ;;  %v13866_v9 = vld [vmem:[#allocation16 + $0x4e4] sm:$0xf]  ;;  %v11746_v3 = vld [vmem:[#allocation16 + $0x510] sm:$0xf0]  ;;  %v12085_v56 = vor.u32 %v13950_v6, %v12082_v20  ;;  %v13837_v6 = vld [vmem:[#allocation16 + $0x3f4] sm:$0xf0] }
0x1594   :  { %v13962_v50 = vld [vmem:[#allocation16 + $0x7e4] sm:$0xf]  ;;  %6575 = vmatpush.bf16.msrb.mxu1 %v11801_v63  ;;  %v13753_v63 = vld [vmem:[#allocation16 + $0x154] sm:$0xf0] }
0x1595   :  { %v4670_v44 = vadd.f32 %v16310_v32, %v4651_v42  ;;  %v4671_v14 = vadd.f32 %v16312_v27, %v4652_v26  ;;  %v4672_v19 = vadd.f32 %v16314_v37, %v4653_v51  ;;  %v11749_v42 = vor.u32 %v13866_v9, %v11746_v3  ;;  %v12130_v26 = vld [vmem:[#allocation16 + $0x810] sm:$0xf0]  ;;  %v11368_v51 = vld [vmem:[#allocation16 + $0x1e8] sm:$0xf]  ;;  %v13849_v3 = vld [vmem:[#allocation16 + $0x454] sm:$0xf0] }
0x1596   :  { %6537 = vmatpush.bf16.msrb.mxu3 %v12181_v21  ;;  %v12034_v21 = vld [vmem:[#allocation16 + $0x750] sm:$0xf0]  ;;  %v11656_v9 = vld [vmem:[#allocation16 + $0x428] sm:$0xf]  ;;  %v13914_v46 = vld [vmem:[#allocation16 + $0x664] sm:$0xf] }
0x1597   :  { %v16331_v28 = vpack.c.bf16 %v4670_v44, %v4667_v60  ;;  %v16333_v17 = vpack.c.bf16 %v4671_v14, %v4668_v7  ;;  %v16335_v16 = vpack.c.bf16 %v4672_v19, %v4669_v48  ;;  %v13777_v60 = vld [vmem:[#allocation16 + $0x214] sm:$0xf0]  ;;  %v12133_v48 = vor.u32 %v13962_v50, %v12130_v26  ;;  %v11752_v14 = vld [vmem:[#allocation16 + $0x4e8] sm:$0xf]  ;;  %6519 = vmatpush.bf16.msra.mxu2 %v11749_v42 }
0x1598   :  { %v11369_v44 = vor.u32 %v13777_v60, %v11368_v51  ;;  %v13873_v19 = vld [vmem:[#allocation16 + $0x514] sm:$0xf0]  ;;  %v12037_v25 = vor.u32 %v13938_v10, %v12034_v21  ;;  %v11273_v42 = vor.u32 %v13753_v63, %v11272_v24  ;;  %v11657_v26 = vor.u32 %v13849_v3, %v11656_v9  ;;  %v13830_v51 = vld [vmem:[#allocation16 + $0x3c4] sm:$0xf]  ;;  %v11602_v60 = vld [vmem:[#allocation16 + $0x3f0] sm:$0xf0] }
0x1599   :  { %6449 = vmatmul.bf16.vlgmr.msrb.gmra.mxu2 %v16331_v28  ;;  %6468 = vmatmul.bf16.vlgmr.msra.gmra.mxu3 %v16333_v17  ;;  %v11753_v12 = vor.u32 %v13873_v19, %v11752_v14  ;;  %v11605_v14 = vor.u32 %v13830_v51, %v11602_v60  ;;  %v11986_v19 = vld [vmem:[#allocation16 + $0x6f0] sm:$0xf0]  ;;  %v13729_v23 = vld [vmem:[#allocation16 + $0x94] sm:$0xf0]  ;;  %v11560_v21 = vld [vmem:[#allocation16 + $0x368] sm:$0xf] }
0x159a   :  { %6487 = vmatmul.bf16.vlgmr.msra.gmra.mxu0 %v16335_v16  ;;  %6506 = vmatmul.bf16.vlgmr.msra.gmra.mxu1 %v16331_v28  ;;  %v13825_v24 = vld [vmem:[#allocation16 + $0x394] sm:$0xf0]  ;;  %v13806_v63 = vld [vmem:[#allocation16 + $0x304] sm:$0xf]  ;;  %v11506_v9 = vld [vmem:[#allocation16 + $0x330] sm:$0xf0] }
0x159b   :  { %6538 = vmatpush.bf16.msrb.mxu3 %v12133_v48  ;;  %6557 = vmatpush.bf16.msrb.mxu0 %v11369_v44  ;;  %v11128_v51 = vld [vmem:[#allocation16 + $0x8] sm:$0xf] }
0x159c   :  { %6576 = vmatpush.bf16.msrb.mxu1 %v11753_v12  ;;  %6520 = vmatpush.bf16.msra.mxu2 %v11701_v39 }
0x159f   :  { %6539 = vmatpush.bf16.msrb.mxu3 %v12085_v56  ;;  %6558 = vmatpush.bf16.msrb.mxu0 %v11321_v30  ;;  %v13818_v56 = vld [vmem:[#allocation16 + $0x364] sm:$0xf]  ;;  %v11938_v30 = vld [vmem:[#allocation16 + $0x690] sm:$0xf0] }
0x15a0   :  { %6577 = vmatpush.bf16.msrb.mxu1 %v11705_v33  ;;  %6521 = vmatpush.bf16.msra.mxu2 %v11653_v43  ;;  %v11557_v61 = vor.u32 %v13818_v56, %v11554_v5  ;;  %v11176_v33 = vld [vmem:[#allocation16 + $0x68] sm:$0xf]  ;;  %v11941_v43 = vor.u32 %v13914_v46, %v11938_v30  ;;  %v11466_v56 = vld [vmem:[#allocation16 + $0x2d8] sm:$0xf0]  ;;  %v13891_v5 = vld [vmem:[#allocation16 + $0x5ac] sm:$0xf] }
0x15a1   :  { %v11177_v10 = vor.u32 %v13729_v23, %v11176_v33  ;;  %v11850_v46 = vld [vmem:[#allocation16 + $0x5d8] sm:$0xf0] }
0x15a2   :  { %v11853_v23 = vor.u32 %v13891_v5, %v11850_v46  ;;  %v13963_v46 = vld [vmem:[#allocation16 + $0x7ec] sm:$0xf] }
0x15a3   :  { %6540 = vmatpush.bf16.msrb.mxu3 %v12037_v25  ;;  %6559 = vmatpush.bf16.msrb.mxu0 %v11273_v42  ;;  %v13902_v42 = vld [vmem:[#allocation16 + $0x604] sm:$0xf] }
0x15a4   :  { %6578 = vmatpush.bf16.msrb.mxu1 %v11657_v26  ;;  %6522 = vmatpush.bf16.msra.mxu2 %v11605_v14  ;;  %v11890_v26 = vld [vmem:[#allocation16 + $0x630] sm:$0xf0] }
0x15a5   :  { %v11893_v14 = vor.u32 %v13902_v42, %v11890_v26  ;;  %v11802_v26 = vld [vmem:[#allocation16 + $0x578] sm:$0xf0] }
0x15a8   :  { %6523 = vmatpush.bf16.msra.mxu2 %v11557_v61 }
0x15f0   :  { %v4576_v7 = vpop.xlane.xlu1 %4575 }
0x15f1   :  { %v4583_v11 = vmul.f32 %v4576_v7, %v17256_v2  ;;  %v13926_v7 = vld [vmem:[#allocation16 + $0x6c4] sm:$0xf] }
0x15f2   :  { %v11989_v4 = vor.u32 %v13926_v7, %v11986_v19  ;;  %v13717_v19 = vld [vmem:[#allocation16 + $0x34] sm:$0xf0] }
0x15f3   :  { %v16342_v31 = vadd.f32 1e-05, %v4583_v11  ;;  %v11224_v11 = vld [vmem:[#allocation16 + $0xc8] sm:$0xf] }
0x15f4   :  { %v11225_v39 = vor.u32 %v13741_v59, %v11224_v11  ;;  %6541 = vmatpush.bf16.msrb.mxu3 %v11989_v4  ;;  %v11512_v11 = vld [vmem:[#allocation16 + $0x308] sm:$0xf]  ;;  %v11129_v4 = vor.u32 %v13717_v19, %v11128_v51  ;;  %v13975_v51 = vld [vmem:[#allocation16 + $0x84c] sm:$0xf] }
0x15f5   :  { %14449 = vrsqrt.f32 %v16342_v31  ;;  %vm4615_vm8 = vweird.f32 %v16342_v31 }
0x15f6   :  { %6560 = vmatpush.bf16.msrb.mxu0 %v11225_v39  ;;  %v12232_v39 = vld [vmem:[#allocation16 + $0x8a8] sm:$0xf] }
0x15f8   :  { %v4580_v58 = vpop.xlane.xlu0 %4579  ;;  %6542 = vmatpush.bf16.msrb.mxu3 %v11941_v43 }
0x15f9   :  { %v4584_v50 = vmul.f32 %v4580_v58, %v17256_v2  ;;  %v11608_v2 = vld [vmem:[#allocation16 + $0x3c8] sm:$0xf]  ;;  %v11561_v58 = vor.u32 %v13825_v24, %v11560_v21  ;;  %v11706_v24 = vld [vmem:[#allocation16 + $0x4b8] sm:$0xf0] }
0x15fa   :  { %v11609_v20 = vor.u32 %v13837_v6, %v11608_v2  ;;  %6561 = vmatpush.bf16.msrb.mxu0 %v11177_v10 }
0x15fb   :  { %v14450_v48 = vpop.eup %14449  ;;  %v16346_v44 = vadd.f32 1e-05, %v4584_v50  ;;  %v11509_v50 = vor.u32 %v13806_v63, %v11506_v9  ;;  %v13783_v63 = vld [vmem:[#allocation16 + $0x24c] sm:$0xf] }
0x15fc   :  { %v4610_v12 = vmul.f32 %v14450_v48, %v16342_v31  ;;  %6579 = vmatpush.bf16.msrb.mxu1 %v11609_v20  ;;  %vm4616_vm7 = vweird.f32 %v14450_v48  ;;  %6543 = vmatpush.bf16.msrb.mxu3 %v11893_v14  ;;  %v13993_v20 = vld [vmem:[#allocation16 + $0x8d4] sm:$0xf0]  ;;  %v13879_v9 = vld [vmem:[#allocation16 + $0x54c] sm:$0xf] }
0x15fd   :  { %14451 = vrsqrt.f32 %v16346_v44  ;;  %vm4617_vm9 = vmor %vm4615_vm8, %vm4616_vm7  ;;  %6524 = vmatpush.bf16.msra.mxu2 %v11509_v50  ;;  %v12233_v30 = vor.u32 %v13993_v20, %v12232_v39  ;;  %vm4625_vm11 = vweird.f32 %v16346_v44  ;;  %v11805_v14 = vor.u32 %v13879_v9, %v11802_v26  ;;  %v11370_v39 = vld [vmem:[#allocation16 + $0x218] sm:$0xf0]  ;;  %v13867_v20 = vld [vmem:[#allocation16 + $0x4ec] sm:$0xf] }
0x15fe   :  { %v4611_v45 = vmul.f32 %v14450_v48, %v4610_v12  ;;  %v13813_v12 = vld [vmem:[#allocation16 + $0x334] sm:$0xf0]  ;;  %6562 = vmatpush.bf16.msrb.mxu0 %v11129_v4  ;;  %v13771_v4 = vld [vmem:[#allocation16 + $0x1ec] sm:$0xf]  ;;  %v12090_v9 = vld [vmem:[#allocation16 + $0x7b8] sm:$0xf0] }
0x15ff   :  { %v11513_v59 = vor.u32 %v13813_v12, %v11512_v11  ;;  %v12136_v11 = vld [vmem:[#allocation16 + $0x7e8] sm:$0xf]  ;;  %v13969_v12 = vld [vmem:[#allocation16 + $0x814] sm:$0xf0] }
0x1600   :  { %v4612_v36 = vmul.f32 0.5, %v4611_v45  ;;  %6580 = vmatpush.bf16.msrb.mxu1 %v11561_v58  ;;  %v13795_v45 = vld [vmem:[#allocation16 + $0x2ac] sm:$0xf]  ;;  %v12184_v58 = vld [vmem:[#allocation16 + $0x848] sm:$0xf] }
0x1601   :  { %v11469_v33 = vor.u32 %v13795_v45, %v11466_v56  ;;  %6593 = vmatpush.bf16.msrb.mxu2 %v12233_v30  ;;  %v11754_v45 = vld [vmem:[#allocation16 + $0x518] sm:$0xf0]  ;;  %v12088_v30 = vld [vmem:[#allocation16 + $0x788] sm:$0xf] }
0x1602   :  { %v4613_v25 = vsub.f32 1.5, %v4612_v36  ;;  %v12234_v36 = vld [vmem:[#allocation16 + $0x8d8] sm:$0xf0]  ;;  %6631 = vmatpush.bf16.msra.mxu0 %v11853_v23  ;;  %v11757_v23 = vor.u32 %v13867_v20, %v11754_v45  ;;  %v13933_v20 = vld [vmem:[#allocation16 + $0x6f4] sm:$0xf0] }
0x1603   :  { %v16350_v3 = vpop.eup %14451  ;;  %6612 = vmatpush.bf16.msra.mxu3 %v11469_v33  ;;  %v13735_v45 = vld [vmem:[#allocation16 + $0xcc] sm:$0xf] }
0x1604   :  { %v4614_v60 = vmul.f32 %v14450_v48, %v4613_v25  ;;  %v4620_v7 = vmul.f32 %v16350_v3, %v16346_v44  ;;  %vm4626_vm10 = vweird.f32 %v16350_v3  ;;  %6581 = vmatpush.bf16.msrb.mxu1 %v11513_v59  ;;  %v13981_v25 = vld [vmem:[#allocation16 + $0x874] sm:$0xf0] }
0x1605   :  { %vm16364_vm12 = vmor %vm4625_vm11, %vm4626_vm10  ;;  %v12185_v50 = vor.u32 %v13981_v25, %v12184_v58 }
0x1606   :  { %v4618_v2 = vsel %vm4617_vm9, %v14450_v48, %v4614_v60  ;;  %v4621_v6 = vmul.f32 %v16350_v3, %v4620_v7  ;;  %v13987_v48 = vld [vmem:[#allocation16 + $0x8ac] sm:$0xf]  ;;  %v12186_v60 = vld [vmem:[#allocation16 + $0x878] sm:$0xf0]  ;;  %6632 = vmatpush.bf16.msra.mxu0 %v11805_v14 }
0x1607   :  { %v4635_v31 = vmul.f32 %v4618_v2, %v16265_v18  ;;  %v4636_v43 = vmul.f32 %v4618_v2, %v16268_v22  ;;  %v12237_v10 = vor.u32 %v13987_v48, %v12234_v36  ;;  %v4637_v18 = vmul.f32 %v4618_v2, %v16271_v35  ;;  %v11418_v22 = vld [vmem:[#allocation16 + $0x278] sm:$0xf0]  ;;  %6594 = vmatpush.bf16.msrb.mxu2 %v12185_v50  ;;  %v13957_v36 = vld [vmem:[#allocation16 + $0x7b4] sm:$0xf0]  ;;  %v4973_v50 = vld [vmem:[#allocation17] sm:$0xff] }
0x1608   :  { %v4622_v61 = vmul.f32 0.5, %v4621_v6  ;;  %v11421_v42 = vor.u32 %v13783_v63, %v11418_v22  ;;  %v12189_v19 = vor.u32 %v13975_v51, %v12186_v60  ;;  %v12137_v6 = vor.u32 %v13969_v12, %v12136_v11  ;;  %v13951_v22 = vld [vmem:[#allocation16 + $0x78c] sm:$0xf]  ;;  %v11274_v14 = vld [vmem:[#allocation16 + $0x158] sm:$0xf0] }
0x1609   :  { %6650 = vmatpush.bf16.msra.mxu1 %v12237_v10  ;;  %v4654_v44 = vmul.f32 %v16301_v49, %v4635_v31  ;;  %v4655_v7 = vmul.f32 %v16303_v8, %v4636_v43  ;;  %v4656_v59 = vmul.f32 %v16307_v40, %v4637_v18  ;;  %v13759_v43 = vld [vmem:[#allocation16 + $0x18c] sm:$0xf]  ;;  %v11322_v10 = vld [vmem:[#allocation16 + $0x1b8] sm:$0xf0]  ;;  %v12089_v25 = vor.u32 %v13957_v36, %v12088_v30 }
0x160a   :  { %v4623_v21 = vsub.f32 1.5, %v4622_v61  ;;  %6613 = vmatpush.bf16.msra.mxu3 %v11421_v42  ;;  %v12138_v61 = vld [vmem:[#allocation16 + $0x818] sm:$0xf0]  ;;  %v11325_v63 = vor.u32 %v13759_v43, %v11322_v10  ;;  %6633 = vmatpush.bf16.msra.mxu0 %v11757_v23  ;;  %v12093_v60 = vor.u32 %v13951_v22, %v12090_v9  ;;  %v13927_v30 = vld [vmem:[#allocation16 + $0x6cc] sm:$0xf] }
0x160b   :  { %v4673_v33 = vadd.f32 %v16310_v32, %v4654_v44  ;;  %v12141_v48 = vor.u32 %v13963_v46, %v12138_v61  ;;  %v4674_v18 = vadd.f32 %v16312_v27, %v4655_v7  ;;  %v4675_v58 = vadd.f32 %v16314_v37, %v4656_v59  ;;  %6595 = vmatpush.bf16.msrb.mxu2 %v12137_v6  ;;  %v13945_v7 = vld [vmem:[#allocation16 + $0x754] sm:$0xf0]  ;;  %v11658_v11 = vld [vmem:[#allocation16 + $0x458] sm:$0xf0]  ;;  %v13831_v46 = vld [vmem:[#allocation16 + $0x3cc] sm:$0xf] }
0x160c   :  { %v4624_v35 = vmul.f32 %v16350_v3, %v4623_v21  ;;  %v13855_v21 = vld [vmem:[#allocation16 + $0x48c] sm:$0xf]  ;;  %v12042_v59 = vld [vmem:[#allocation16 + $0x758] sm:$0xf0]  ;;  %v13921_v23 = vld [vmem:[#allocation16 + $0x694] sm:$0xf0] }
0x160d   :  { %6651 = vmatpush.bf16.msra.mxu1 %v12189_v19  ;;  %v13843_v19 = vld [vmem:[#allocation16 + $0x42c] sm:$0xf]  ;;  %v11610_v61 = vld [vmem:[#allocation16 + $0x3f8] sm:$0xf0]  ;;  %v11896_v22 = vld [vmem:[#allocation16 + $0x608] sm:$0xf] }
0x160e   :  { %v4628_v2 = vsel %vm16364_vm12, %v16350_v3, %v4624_v35  ;;  %v11373_v3 = vor.u32 %v13771_v4, %v11370_v39  ;;  %v13939_v4 = vld [vmem:[#allocation16 + $0x72c] sm:$0xf]  ;;  %v11661_v6 = vor.u32 %v13843_v19, %v11658_v11  ;;  %v11178_v43 = vld [vmem:[#allocation16 + $0x98] sm:$0xf0] }
0x160f   :  { %v4638_v31 = vmul.f32 %v4628_v2, %v16283_v57  ;;  %v4639_v56 = vmul.f32 %v4628_v2, %v16286_v62  ;;  %v4640_v5 = vmul.f32 %v4628_v2, %v16289_v15  ;;  %6596 = vmatpush.bf16.msrb.mxu2 %v12089_v25  ;;  %v11992_v2 = vld [vmem:[#allocation16 + $0x6c8] sm:$0xf]  ;;  %v12045_v39 = vor.u32 %v13939_v4, %v12042_v59  ;;  %v13723_v36 = vld [vmem:[#allocation16 + $0x6c] sm:$0xf]  ;;  %v11898_v11 = vld [vmem:[#allocation16 + $0x638] sm:$0xf0] }
0x1610   :  { %6614 = vmatpush.bf16.msra.mxu3 %v11373_v3  ;;  %v11944_v3 = vld [vmem:[#allocation16 + $0x668] sm:$0xf]  ;;  %v13915_v25 = vld [vmem:[#allocation16 + $0x66c] sm:$0xf]  ;;  %v11472_v59 = vld [vmem:[#allocation16 + $0x2b0] sm:$0xf] }
0x1611   :  { %v4657_v57 = vmul.f32 %v16301_v49, %v4638_v31  ;;  %v4658_v62 = vmul.f32 %v16303_v8, %v4639_v56  ;;  %v4659_v15 = vmul.f32 %v16307_v40, %v4640_v5  ;;  %6652 = vmatpush.bf16.msra.mxu1 %v12141_v48  ;;  %v16387_v8 = vperm.slane %v4973_v50, 0  ;;  %v11226_v31 = vld [vmem:[#allocation16 + $0xf8] sm:$0xf0]  ;;  %v13903_v19 = vld [vmem:[#allocation16 + $0x60c] sm:$0xf] }
0x1612   :  { %v11709_v40 = vor.u32 %v13855_v21, %v11706_v24  ;;  %v11993_v56 = vor.u32 %v13933_v20, %v11992_v2  ;;  %v11229_v5 = vor.u32 %v13735_v45, %v11226_v31  ;;  %v11945_v24 = vor.u32 %v13921_v23, %v11944_v3  ;;  %v13802_v2 = vld [vmem:[#allocation16 + $0x2dc] sm:$0xf0]  ;;  %v12240_v45 = vld [vmem:[#allocation16 + $0x8b0] sm:$0xf] }
0x1613   :  { %v4676_v44 = vadd.f32 %v16310_v32, %v4657_v57  ;;  %v4677_v35 = vadd.f32 %v16312_v27, %v4658_v62  ;;  %v4678_v49 = vadd.f32 %v16314_v37, %v4659_v15  ;;  %v12040_v32 = vld [vmem:[#allocation16 + $0x728] sm:$0xf]  ;;  %v13747_v27 = vld [vmem:[#allocation16 + $0x12c] sm:$0xf]  ;;  %v11562_v15 = vld [vmem:[#allocation16 + $0x398] sm:$0xf0]  ;;  %v11901_v4 = vor.u32 %v13903_v19, %v11898_v11 }
0x1614   :  { %6615 = vmatpush.bf16.msra.mxu3 %v11325_v63  ;;  %v12041_v37 = vor.u32 %v13945_v7, %v12040_v32  ;;  %v11277_v12 = vor.u32 %v13747_v27, %v11274_v14  ;;  %6634 = vmatpush.bf16.msra.mxu0 %v11709_v40  ;;  %v13819_v62 = vld [vmem:[#allocation16 + $0x36c] sm:$0xf]  ;;  %v11946_v63 = vld [vmem:[#allocation16 + $0x698] sm:$0xf0]  ;;  %v13898_v20 = vld [vmem:[#allocation16 + $0x5dc] sm:$0xf0] }
0x1615   :  { %v16389_v42 = vpack.c.bf16 %v4676_v44, %v4673_v33  ;;  %v16391_v26 = vpack.c.bf16 %v4677_v35, %v4674_v18  ;;  %v16393_v51 = vpack.c.bf16 %v4678_v49, %v4675_v58  ;;  %6653 = vmatpush.bf16.msra.mxu1 %v12093_v60  ;;  %v11994_v33 = vld [vmem:[#allocation16 + $0x6f8] sm:$0xf0]  ;;  %v11613_v18 = vor.u32 %v13831_v46, %v11610_v61  ;;  %v13909_v44 = vld [vmem:[#allocation16 + $0x634] sm:$0xf0]  ;;  %v13711_v35 = vld [vmem:[#allocation16 + $0xc] sm:$0xf] }
0x1616   :  { %6597 = vmatpush.bf16.msrb.mxu2 %v12041_v37  ;;  %v11997_v57 = vor.u32 %v13927_v30, %v11994_v33  ;;  %v11181_v58 = vor.u32 %v13723_v36, %v11178_v43  ;;  %v11130_v49 = vld [vmem:[#allocation16 + $0x38] sm:$0xf0]  ;;  %v11565_v60 = vor.u32 %v13819_v62, %v11562_v15  ;;  %v11949_v32 = vor.u32 %v13915_v25, %v11946_v63  ;;  %v13807_v7 = vld [vmem:[#allocation16 + $0x30c] sm:$0xf]  ;;  %v13994_v31 = vld [vmem:[#allocation16 + $0x8dc] sm:$0xf0] }
0x1617   :  { %6454 = vmatmul.bf16.gmra.mxu2 %v16389_v42  ;;  %6473 = vmatmul.bf16.gmra.mxu3 %v16391_v26  ;;  %v6488_v50 = vpop.f32.mrf.mxu0  ;;  %v11897_v27 = vor.u32 %v13909_v44, %v11896_v22  ;;  %v11133_v37 = vor.u32 %v13711_v35, %v11130_v49  ;;  %v11514_v14 = vld [vmem:[#allocation16 + $0x338] sm:$0xf0]  ;;  %v13796_v46 = vld [vmem:[#allocation16 + $0x2b4] sm:$0xf]  ;;  %v11474_v61 = vld [vmem:[#allocation16 + $0x2e0] sm:$0xf0] }
0x1618   :  { %6492 = vmatmul.bf16.gmra.mxu0 %v16393_v51  ;;  %6511 = vmatmul.bf16.gmra.mxu1 %v16389_v42  ;;  %v11424_v30 = vld [vmem:[#allocation16 + $0x250] sm:$0xf]  ;;  %v11477_v33 = vor.u32 %v13796_v46, %v11474_v61  ;;  %v13790_v3 = vld [vmem:[#allocation16 + $0x27c] sm:$0xf0]  ;;  %v11426_v15 = vld [vmem:[#allocation16 + $0x280] sm:$0xf0] }
0x1619   :  { %6616 = vmatpush.bf16.msra.mxu3 %v11277_v12  ;;  %6635 = vmatpush.bf16.msra.mxu0 %v11661_v6  ;;  %v11517_v12 = vor.u32 %v13807_v7, %v11514_v14  ;;  %v11856_v6 = vld [vmem:[#allocation16 + $0x5b0] sm:$0xf]  ;;  %v11425_v36 = vor.u32 %v13790_v3, %v11424_v30  ;;  %v13874_v63 = vld [vmem:[#allocation16 + $0x51c] sm:$0xf0]  ;;  %v13772_v44 = vld [vmem:[#allocation16 + $0x1f4] sm:$0xf] }
0x161a   :  { %6654 = vmatpush.bf16.msra.mxu1 %v12045_v39  ;;  %6598 = vmatpush.bf16.msrb.mxu2 %v11993_v56  ;;  %v11473_v39 = vor.u32 %v13802_v2, %v11472_v59  ;;  %v11857_v56 = vor.u32 %v13898_v20, %v11856_v6  ;;  %v11808_v23 = vld [vmem:[#allocation16 + $0x550] sm:$0xf]  ;;  %v13862_v14 = vld [vmem:[#allocation16 + $0x4bc] sm:$0xf0]  ;;  %v13760_v59 = vld [vmem:[#allocation16 + $0x194] sm:$0xf] }
0x161b   :  { %v11760_v25 = vld [vmem:[#allocation16 + $0x4f0] sm:$0xf]  ;;  %v11330_v2 = vld [vmem:[#allocation16 + $0x1c0] sm:$0xf0]  ;;  %v13946_v61 = vld [vmem:[#allocation16 + $0x75c] sm:$0xf0] }
0x161c   :  { %v6450_v48 = vpop.f32.mrf.mxu2  ;;  %v6469_v21 = vpop.f32.mrf.mxu3  ;;  %v12144_v22 = vld [vmem:[#allocation16 + $0x7f0] sm:$0xf]  ;;  %v11761_v49 = vor.u32 %v13874_v63, %v11760_v25  ;;  %v11282_v3 = vld [vmem:[#allocation16 + $0x160] sm:$0xf0]  ;;  %v13730_v63 = vld [vmem:[#allocation16 + $0x9c] sm:$0xf0] }
0x161d   :  { %v6451_v10 = vadd.f32 %v6450_v48, %v16387_v8  ;;  %6617 = vmatpush.bf16.msra.mxu3 %v11229_v5  ;;  %6636 = vmatpush.bf16.msra.mxu0 %v11613_v18  ;;  %v12241_v5 = vor.u32 %v13994_v31, %v12240_v45  ;;  %v13886_v48 = vld [vmem:[#allocation16 + $0x57c] sm:$0xf0]  ;;  %v12096_v19 = vld [vmem:[#allocation16 + $0x790] sm:$0xf] }
0x161e   :  { %6655 = vmatpush.bf16.msra.mxu1 %v11997_v57  ;;  %6599 = vmatpush.bf16.msrb.mxu2 %v11945_v24  ;;  %v11809_v43 = vor.u32 %v13886_v48, %v11808_v23  ;;  %v13982_v18 = vld [vmem:[#allocation16 + $0x87c] sm:$0xf0]  ;;  %v13784_v57 = vld [vmem:[#allocation16 + $0x254] sm:$0xf]  ;;  %v11280_v20 = vld [vmem:[#allocation16 + $0x130] sm:$0xf] }
0x161f   :  { %v6470_v9 = vadd.f32 %v6469_v21, %v6451_v10  ;;  %v12192_v10 = vld [vmem:[#allocation16 + $0x850] sm:$0xf]  ;;  %v11429_v24 = vor.u32 %v13784_v57, %v11426_v15  ;;  %v13754_v45 = vld [vmem:[#allocation16 + $0x15c] sm:$0xf0] }
0x1620   :  { %v12193_v62 = vor.u32 %v13982_v18, %v12192_v10  ;;  %v11376_v21 = vld [vmem:[#allocation16 + $0x1f0] sm:$0xf]  ;;  %v13838_v18 = vld [vmem:[#allocation16 + $0x3fc] sm:$0xf0] }
0x1621   :  { %v16400_v40 = vadd.f32 %v6488_v50, %v6470_v9  ;;  %6618 = vmatpush.bf16.msra.mxu3 %v11181_v58  ;;  %6637 = vmatpush.bf16.msra.mxu0 %v11565_v60  ;;  %v13778_v58 = vld [vmem:[#allocation16 + $0x21c] sm:$0xf0]  ;;  %v11378_v50 = vld [vmem:[#allocation16 + $0x220] sm:$0xf0]  ;;  %v11328_v60 = vld [vmem:[#allocation16 + $0x190] sm:$0xf] }
0x1622   :  { %6656 = vmatpush.bf16.msra.mxu1 %v11949_v32  ;;  %6600 = vmatpush.bf16.msrb.mxu2 %v11897_v27  ;;  %v13970_v9 = vld [vmem:[#allocation16 + $0x81c] sm:$0xf0]  ;;  %v11377_v35 = vor.u32 %v13778_v58, %v11376_v21  ;;  %v11381_v7 = vor.u32 %v13772_v44, %v11378_v50  ;;  %v11664_v31 = vld [vmem:[#allocation16 + $0x430] sm:$0xf]  ;;  %v11234_v58 = vld [vmem:[#allocation16 + $0x100] sm:$0xf0] }
0x1623   :  { %v12145_v32 = vor.u32 %v13970_v9, %v12144_v22  ;;  %v13766_v27 = vld [vmem:[#allocation16 + $0x1bc] sm:$0xf0]  ;;  %v12048_v46 = vld [vmem:[#allocation16 + $0x730] sm:$0xf] }
0x1624   :  { %v11329_v11 = vor.u32 %v13766_v27, %v11328_v60  ;;  %v11232_v23 = vld [vmem:[#allocation16 + $0xd0] sm:$0xf]  ;;  %v12049_v48 = vor.u32 %v13946_v61, %v12048_v46  ;;  %v13934_v21 = vld [vmem:[#allocation16 + $0x6fc] sm:$0xf0]  ;;  %v11186_v27 = vld [vmem:[#allocation16 + $0xa0] sm:$0xf0] }
0x1625   :  { %6619 = vmatpush.bf16.msra.mxu3 %v11133_v37  ;;  %6638 = vmatpush.bf16.msra.mxu0 %v11517_v12  ;;  %v11712_v37 = vld [vmem:[#allocation16 + $0x490] sm:$0xf]  ;;  %v13826_v9 = vld [vmem:[#allocation16 + $0x39c] sm:$0xf0]  ;;  %v11858_v46 = vld [vmem:[#allocation16 + $0x5e0] sm:$0xf0] }
0x1626   :  { %6657 = vmatpush.bf16.msra.mxu1 %v11901_v4  ;;  %v11713_v12 = vor.u32 %v13862_v14, %v11712_v37  ;;  %v13958_v4 = vld [vmem:[#allocation16 + $0x7bc] sm:$0xf0]  ;;  %v11616_v10 = vld [vmem:[#allocation16 + $0x3d0] sm:$0xf]  ;;  %v13988_v61 = vld [vmem:[#allocation16 + $0x8b4] sm:$0xf] }
0x1627   :  { %6525 = vmatmul.bf16.vlgmr.msra.gmra.mxu2 %v16333_v17  ;;  %6544 = vmatmul.bf16.vlgmr.msrb.gmra.mxu3 %v16335_v16  ;;  %v12097_v6 = vor.u32 %v13958_v4, %v12096_v19  ;;  %v12000_v15 = vld [vmem:[#allocation16 + $0x6d0] sm:$0xf]  ;;  %v13922_v50 = vld [vmem:[#allocation16 + $0x69c] sm:$0xf0] }
0x1628   :  { %6563 = vmatmul.bf16.vlgmr.msrb.gmra.mxu0 %v16331_v28  ;;  %6582 = vmatmul.bf16.vlgmr.msrb.gmra.mxu1 %v16333_v17  ;;  %v11184_v25 = vld [vmem:[#allocation16 + $0x70] sm:$0xf]  ;;  %v12001_v44 = vor.u32 %v13934_v21, %v12000_v15  ;;  %v13718_v14 = vld [vmem:[#allocation16 + $0x3c] sm:$0xf0]  ;;  %v13976_v15 = vld [vmem:[#allocation16 + $0x854] sm:$0xf] }
0x1629   :  { %6669 = vmatpush.bf16.msra.mxu2 %v11473_v39  ;;  %6688 = vmatpush.bf16.msrb.mxu3 %v11857_v56  ;;  %v11333_v39 = vor.u32 %v13760_v59, %v11330_v2  ;;  %v11281_v56 = vor.u32 %v13754_v45, %v11280_v20  ;;  %v11568_v22 = vld [vmem:[#allocation16 + $0x370] sm:$0xf]  ;;  %v11185_v60 = vor.u32 %v13730_v63, %v11184_v25  ;;  %v13712_v20 = vld [vmem:[#allocation16 + $0x14] sm:$0xf]  ;;  %v11138_v45 = vld [vmem:[#allocation16 + $0x40] sm:$0xf0] }
0x162a   :  { %6707 = vmatpush.bf16.msrb.mxu0 %v12241_v5  ;;  %6726 = vmatpush.bf16.msrb.mxu1 %v11477_v33  ;;  %v13850_v5 = vld [vmem:[#allocation16 + $0x45c] sm:$0xf0]  ;;  %v13748_v33 = vld [vmem:[#allocation16 + $0x134] sm:$0xf]  ;;  %v11136_v37 = vld [vmem:[#allocation16 + $0x10] sm:$0xf] }
0x162b   :  { %v11665_v30 = vor.u32 %v13850_v5, %v11664_v31  ;;  %v11520_v19 = vld [vmem:[#allocation16 + $0x310] sm:$0xf]  ;;  %v11137_v2 = vor.u32 %v13718_v14, %v11136_v37  ;;  %v13892_v5 = vld [vmem:[#allocation16 + $0x5b4] sm:$0xf]  ;;  %v12194_v21 = vld [vmem:[#allocation16 + $0x880] sm:$0xf0] }
0x162c   :  { %v11904_v59 = vld [vmem:[#allocation16 + $0x610] sm:$0xf]  ;;  %v11432_v25 = vld [vmem:[#allocation16 + $0x258] sm:$0xf]  ;;  %v13791_v63 = vld [vmem:[#allocation16 + $0x284] sm:$0xf0] }
0x162d   :  { %6670 = vmatpush.bf16.msra.mxu2 %v11425_v36  ;;  %6689 = vmatpush.bf16.msrb.mxu3 %v11809_v43  ;;  %v11285_v36 = vor.u32 %v13748_v33, %v11282_v3  ;;  %v13742_v43 = vld [vmem:[#allocation16 + $0xfc] sm:$0xf0]  ;;  %v12242_v33 = vld [vmem:[#allocation16 + $0x8e0] sm:$0xf0]  ;;  %v11480_v3 = vld [vmem:[#allocation16 + $0x2b8] sm:$0xf] }
0x162e   :  { %6708 = vmatpush.bf16.msrb.mxu0 %v12193_v62  ;;  %6727 = vmatpush.bf16.msrb.mxu1 %v11429_v24  ;;  %v11233_v57 = vor.u32 %v13742_v43, %v11232_v23  ;;  %v11617_v62 = vor.u32 %v13838_v18, %v11616_v10  ;;  %v13736_v24 = vld [vmem:[#allocation16 + $0xd4] sm:$0xf]  ;;  %v13803_v23 = vld [vmem:[#allocation16 + $0x2e4] sm:$0xf0]  ;;  %v11864_v43 = vld [vmem:[#allocation16 + $0x5b8] sm:$0xf] }
0x162f   :  { %v13899_v10 = vld [vmem:[#allocation16 + $0x5e4] sm:$0xf0]  ;;  %v13880_v18 = vld [vmem:[#allocation16 + $0x554] sm:$0xf]  ;;  %v11768_v37 = vld [vmem:[#allocation16 + $0x4f8] sm:$0xf] }
0x1630   :  { %v13875_v14 = vld [vmem:[#allocation16 + $0x524] sm:$0xf0] }
0x1631   :  { %6671 = vmatpush.bf16.msra.mxu2 %v11377_v35  ;;  %6690 = vmatpush.bf16.msrb.mxu3 %v11761_v49  ;;  %v11237_v35 = vor.u32 %v13736_v24, %v11234_v58  ;;  %v11952_v49 = vld [vmem:[#allocation16 + $0x670] sm:$0xf]  ;;  %v12197_v58 = vor.u32 %v13976_v15, %v12194_v21  ;;  %v13832_v15 = vld [vmem:[#allocation16 + $0x3d4] sm:$0xf] }
0x1632   :  { %6709 = vmatpush.bf16.msrb.mxu0 %v12145_v32  ;;  %6728 = vmatpush.bf16.msrb.mxu1 %v11381_v7  ;;  %v11569_v32 = vor.u32 %v13826_v9, %v11568_v22  ;;  %v13724_v7 = vld [vmem:[#allocation16 + $0x74] sm:$0xf]  ;;  %v11816_v22 = vld [vmem:[#allocation16 + $0x558] sm:$0xf]  ;;  %v11433_v9 = vor.u32 %v13791_v63, %v11432_v25  ;;  %v12002_v63 = vld [vmem:[#allocation16 + $0x700] sm:$0xf0] }
0x1633   :  { %v11189_v4 = vor.u32 %v13724_v7, %v11186_v27  ;;  %v11384_v7 = vld [vmem:[#allocation16 + $0x1f8] sm:$0xf]  ;;  %v13779_v27 = vld [vmem:[#allocation16 + $0x224] sm:$0xf0]  ;;  %v13928_v25 = vld [vmem:[#allocation16 + $0x6d4] sm:$0xf] }
0x1635   :  { %6672 = vmatpush.bf16.msra.mxu2 %v11329_v11  ;;  %6691 = vmatpush.bf16.msrb.mxu3 %v11713_v12  ;;  %v13814_v11 = vld [vmem:[#allocation16 + $0x33c] sm:$0xf0]  ;;  %v11953_v12 = vor.u32 %v13922_v50, %v11952_v49  ;;  %v11762_v49 = vld [vmem:[#allocation16 + $0x520] sm:$0xf0] }
0x1636   :  { %6710 = vmatpush.bf16.msrb.mxu0 %v12097_v6  ;;  %6729 = vmatpush.bf16.msrb.mxu1 %v11333_v39  ;;  %v11521_v6 = vor.u32 %v13814_v11, %v11520_v19  ;;  %v13910_v39 = vld [vmem:[#allocation16 + $0x63c] sm:$0xf0] }
0x1637   :  { %6530 = vmatmul.bf16.gmra.mxu2 %v16391_v26  ;;  %6549 = vmatmul.bf16.gmra.mxu3 %v16393_v51  ;;  %v11905_v31 = vor.u32 %v13910_v39, %v11904_v59  ;;  %v11769_v59 = vor.u32 %v13875_v14, %v11768_v37  ;;  %v12098_v39 = vld [vmem:[#allocation16 + $0x7c0] sm:$0xf0] }
0x1638   :  { %6568 = vmatmul.bf16.gmra.mxu0 %v16389_v42  ;;  %6587 = vmatmul.bf16.gmra.mxu1 %v16391_v26 }
0x1639   :  { %6673 = vmatpush.bf16.msra.mxu2 %v11281_v56  ;;  %6692 = vmatpush.bf16.msrb.mxu3 %v11665_v30  ;;  %v11141_v56 = vor.u32 %v13712_v20, %v11138_v45  ;;  %v11861_v30 = vor.u32 %v13892_v5, %v11858_v46  ;;  %v11336_v20 = vld [vmem:[#allocation16 + $0x198] sm:$0xf]  ;;  %v13863_v46 = vld [vmem:[#allocation16 + $0x4c4] sm:$0xf0] }
0x163a   :  { %6711 = vmatpush.bf16.msrb.mxu0 %v12049_v48  ;;  %6730 = vmatpush.bf16.msrb.mxu1 %v11285_v36  ;;  %v12245_v48 = vor.u32 %v13988_v61, %v12242_v33  ;;  %v11481_v36 = vor.u32 %v13803_v23, %v11480_v3  ;;  %v11720_v5 = vld [vmem:[#allocation16 + $0x498] sm:$0xf]  ;;  %v13844_v33 = vld [vmem:[#allocation16 + $0x434] sm:$0xf]  ;;  %v11666_v3 = vld [vmem:[#allocation16 + $0x460] sm:$0xf0] }
0x163b   :  { %v13940_v23 = vld [vmem:[#allocation16 + $0x734] sm:$0xf] }
0x163d   :  { %6674 = vmatpush.bf16.msra.mxu2 %v11233_v57  ;;  %6693 = vmatpush.bf16.msrb.mxu3 %v11617_v62  ;;  %v11865_v57 = vor.u32 %v13899_v10, %v11864_v43  ;;  %v11810_v62 = vld [vmem:[#allocation16 + $0x580] sm:$0xf0]  ;;  %v11288_v43 = vld [vmem:[#allocation16 + $0x138] sm:$0xf]  ;;  %v13755_v10 = vld [vmem:[#allocation16 + $0x164] sm:$0xf0] }
0x163e   :  { %6712 = vmatpush.bf16.msrb.mxu0 %v12001_v44  ;;  %6731 = vmatpush.bf16.msrb.mxu1 %v11237_v35  ;;  %v11813_v24 = vor.u32 %v13880_v18, %v11810_v62  ;;  %v13887_v44 = vld [vmem:[#allocation16 + $0x584] sm:$0xf0]  ;;  %v13868_v35 = vld [vmem:[#allocation16 + $0x4f4] sm:$0xf]  ;;  %v11289_v21 = vor.u32 %v13755_v10, %v11288_v43  ;;  %v13797_v10 = vld [vmem:[#allocation16 + $0x2bc] sm:$0xf] }
0x163f   :  { %v11817_v50 = vor.u32 %v13887_v44, %v11816_v22  ;;  %v11765_v19 = vor.u32 %v13868_v35, %v11762_v49  ;;  %v13851_v62 = vld [vmem:[#allocation16 + $0x464] sm:$0xf0]  ;;  %v11240_v44 = vld [vmem:[#allocation16 + $0xd8] sm:$0xf] }
0x1640   :  { %v13743_v35 = vld [vmem:[#allocation16 + $0x104] sm:$0xf0]  ;;  %v11624_v49 = vld [vmem:[#allocation16 + $0x3d8] sm:$0xf] }
0x1641   :  { %6675 = vmatpush.bf16.msra.mxu2 %v11185_v60  ;;  %6694 = vmatpush.bf16.msrb.mxu3 %v11569_v32  ;;  %v13964_v60 = vld [vmem:[#allocation16 + $0x7f4] sm:$0xf]  ;;  %v12146_v32 = vld [vmem:[#allocation16 + $0x820] sm:$0xf0]  ;;  %v11241_v37 = vor.u32 %v13743_v35, %v11240_v44  ;;  %v13995_v43 = vld [vmem:[#allocation16 + $0x8e4] sm:$0xf0] }
0x1642   :  { %6713 = vmatpush.bf16.msrb.mxu0 %v11953_v12  ;;  %6732 = vmatpush.bf16.msrb.mxu1 %v11189_v4  ;;  %v12149_v11 = vor.u32 %v13964_v60, %v12146_v32  ;;  %v13856_v12 = vld [vmem:[#allocation16 + $0x494] sm:$0xf]  ;;  %v11385_v4 = vor.u32 %v13779_v27, %v11384_v7  ;;  %v11570_v32 = vld [vmem:[#allocation16 + $0x3a0] sm:$0xf0]  ;;  %v13785_v44 = vld [vmem:[#allocation16 + $0x25c] sm:$0xf] }
0x1643   :  { %v13820_v60 = vld [vmem:[#allocation16 + $0x374] sm:$0xf]  ;;  %v11954_v27 = vld [vmem:[#allocation16 + $0x6a0] sm:$0xf0]  ;;  %v11434_v35 = vld [vmem:[#allocation16 + $0x288] sm:$0xf0] }
0x1644   :  { %v13916_v7 = vld [vmem:[#allocation16 + $0x674] sm:$0xf] }
0x1645   :  { %6676 = vmatpush.bf16.msra.mxu2 %v11137_v2  ;;  %6695 = vmatpush.bf16.msrb.mxu3 %v11521_v6  ;;  %v11714_v2 = vld [vmem:[#allocation16 + $0x4c0] sm:$0xf0]  ;;  %v13952_v6 = vld [vmem:[#allocation16 + $0x794] sm:$0xf] }
0x1646   :  { %6714 = vmatpush.bf16.msrb.mxu0 %v11905_v31  ;;  %6733 = vmatpush.bf16.msrb.mxu1 %v11141_v56  ;;  %v11717_v45 = vor.u32 %v13856_v12, %v11714_v2  ;;  %v12101_v31 = vor.u32 %v13952_v6, %v12098_v39  ;;  %v13767_v56 = vld [vmem:[#allocation16 + $0x1c4] sm:$0xf0]  ;;  %v11573_v12 = vor.u32 %v13820_v60, %v11570_v32  ;;  %v13808_v6 = vld [vmem:[#allocation16 + $0x314] sm:$0xf]  ;;  %v11522_v39 = vld [vmem:[#allocation16 + $0x340] sm:$0xf0] }
0x1647   :  { %6601 = vmatmul.bf16.vlgmr.msrb.gmra.mxu2 %v16335_v16  ;;  %6620 = vmatmul.bf16.vlgmr.msra.gmra.mxu3 %v16331_v28  ;;  %v11337_v61 = vor.u32 %v13767_v56, %v11336_v20  ;;  %v13827_v2 = vld [vmem:[#allocation16 + $0x3a4] sm:$0xf0]  ;;  %v13904_v20 = vld [vmem:[#allocation16 + $0x614] sm:$0xf]  ;;  %v13881_v60 = vld [vmem:[#allocation16 + $0x55c] sm:$0xf] }
0x1648   :  { %6639 = vmatmul.bf16.vlgmr.msra.gmra.mxu0 %v16333_v17  ;;  %6658 = vmatmul.bf16.vlgmr.msra.gmra.mxu1 %v16335_v16  ;;  %v11818_v32 = vld [vmem:[#allocation16 + $0x588] sm:$0xf0] }
0x1649   :  { %6745 = vmatpush.bf16.msrb.mxu2 %v11861_v30  ;;  %6764 = vmatpush.bf16.msra.mxu3 %v12245_v48  ;;  %v11721_v30 = vor.u32 %v13863_v46, %v11720_v5  ;;  %v11669_v48 = vor.u32 %v13844_v33, %v11666_v3  ;;  %v11144_v5 = vld [vmem:[#allocation16 + $0x18] sm:$0xf]  ;;  %v11525_v46 = vor.u32 %v13808_v6, %v11522_v39  ;;  %v13815_v3 = vld [vmem:[#allocation16 + $0x344] sm:$0xf0]  ;;  %v13965_v6 = vld [vmem:[#allocation16 + $0x7fc] sm:$0xf] }
0x164a   :  { %6783 = vmatpush.bf16.msra.mxu0 %v11481_v36  ;;  %6802 = vmatpush.bf16.msra.mxu1 %v11865_v57  ;;  %v12050_v36 = vld [vmem:[#allocation16 + $0x760] sm:$0xf0]  ;;  %v11672_v57 = vld [vmem:[#allocation16 + $0x438] sm:$0xf]  ;;  %v12154_v39 = vld [vmem:[#allocation16 + $0x828] sm:$0xf0] }
0x164b   :  { %v12053_v18 = vor.u32 %v13940_v23, %v12050_v36  ;;  %v11528_v33 = vld [vmem:[#allocation16 + $0x318] sm:$0xf] }
0x164c   :  { %v12248_v36 = vld [vmem:[#allocation16 + $0x8b8] sm:$0xf] }
0x164d   :  { %6746 = vmatpush.bf16.msrb.mxu2 %v11813_v24  ;;  %6765 = vmatpush.bf16.msra.mxu3 %v12197_v58  ;;  %v11673_v24 = vor.u32 %v13851_v62, %v11672_v57  ;;  %v11618_v58 = vld [vmem:[#allocation16 + $0x400] sm:$0xf0]  ;;  %v11482_v57 = vld [vmem:[#allocation16 + $0x2e8] sm:$0xf0]  ;;  %v13893_v62 = vld [vmem:[#allocation16 + $0x5bc] sm:$0xf] }
0x164e   :  { %6784 = vmatpush.bf16.msra.mxu0 %v11433_v9  ;;  %6803 = vmatpush.bf16.msra.mxu1 %v11817_v50  ;;  %v11621_v22 = vor.u32 %v13832_v15, %v11618_v58  ;;  %v12005_v9 = vor.u32 %v13928_v25, %v12002_v63  ;;  %v13839_v50 = vld [vmem:[#allocation16 + $0x404] sm:$0xf0]  ;;  %v11866_v15 = vld [vmem:[#allocation16 + $0x5e8] sm:$0xf0]  ;;  %v13989_v58 = vld [vmem:[#allocation16 + $0x8bc] sm:$0xf] }
0x164f   :  { %v11625_v14 = vor.u32 %v13839_v50, %v11624_v49  ;;  %v12250_v25 = vld [vmem:[#allocation16 + $0x8e8] sm:$0xf0]  ;;  %v12200_v63 = vld [vmem:[#allocation16 + $0x858] sm:$0xf]  ;;  %v11437_v50 = vor.u32 %v13785_v44, %v11434_v35 }
0x1651   :  { %6747 = vmatpush.bf16.msrb.mxu2 %v11765_v19  ;;  %6766 = vmatpush.bf16.msra.mxu3 %v12149_v11  ;;  %v11192_v19 = vld [vmem:[#allocation16 + $0x78] sm:$0xf]  ;;  %v13731_v11 = vld [vmem:[#allocation16 + $0xa4] sm:$0xf0] }
0x1652   :  { %6785 = vmatpush.bf16.msra.mxu0 %v11385_v4  ;;  %6804 = vmatpush.bf16.msra.mxu1 %v11769_v59  ;;  %v11957_v4 = vor.u32 %v13916_v7, %v11954_v27  ;;  %v11576_v59 = vld [vmem:[#allocation16 + $0x378] sm:$0xf]  ;;  %v13977_v7 = vld [vmem:[#allocation16 + $0x85c] sm:$0xf]  ;;  %v11821_v27 = vor.u32 %v13881_v60, %v11818_v32 }
0x1653   :  { %v11577_v56 = vor.u32 %v13827_v2, %v11576_v59  ;;  %v13869_v59 = vld [vmem:[#allocation16 + $0x4fc] sm:$0xf]  ;;  %v11770_v2 = vld [vmem:[#allocation16 + $0x528] sm:$0xf0] }
0x1654   :  { %v13737_v60 = vld [vmem:[#allocation16 + $0xdc] sm:$0xf] }
0x1655   :  { %6748 = vmatpush.bf16.msrb.mxu2 %v11717_v45  ;;  %6767 = vmatpush.bf16.msra.mxu3 %v12101_v31  ;;  %v11906_v45 = vld [vmem:[#allocation16 + $0x640] sm:$0xf0]  ;;  %v11193_v31 = vor.u32 %v13731_v11, %v11192_v19  ;;  %v13971_v19 = vld [vmem:[#allocation16 + $0x824] sm:$0xf0] }
0x1656   :  { %6786 = vmatpush.bf16.msra.mxu0 %v11337_v61  ;;  %6805 = vmatpush.bf16.msra.mxu1 %v11721_v30  ;;  %v11909_v61 = vor.u32 %v13904_v20, %v11906_v45  ;;  %v13719_v30 = vld [vmem:[#allocation16 + $0x44] sm:$0xf0] }
0x1657   :  { %6606 = vmatmul.bf16.gmra.mxu2 %v16393_v51  ;;  %6625 = vmatmul.bf16.gmra.mxu3 %v16389_v42  ;;  %v11145_v23 = vor.u32 %v13719_v30, %v11144_v5  ;;  %v12104_v5 = vld [vmem:[#allocation16 + $0x798] sm:$0xf] }
0x1658   :  { %6644 = vmatmul.bf16.gmra.mxu0 %v16391_v26  ;;  %6663 = vmatmul.bf16.gmra.mxu1 %v16393_v51 }
0x1659   :  { %6749 = vmatpush.bf16.msrb.mxu2 %v11669_v48  ;;  %6768 = vmatpush.bf16.msra.mxu3 %v12053_v18  ;;  %v11529_v48 = vor.u32 %v13815_v3, %v11528_v33  ;;  %v12249_v18 = vor.u32 %v13995_v43, %v12248_v36  ;;  %v11338_v33 = vld [vmem:[#allocation16 + $0x1c8] sm:$0xf0]  ;;  %v13857_v3 = vld [vmem:[#allocation16 + $0x49c] sm:$0xf] }
0x165a   :  { %6787 = vmatpush.bf16.msra.mxu0 %v11289_v21  ;;  %6806 = vmatpush.bf16.msra.mxu1 %v11673_v24  ;;  %v11485_v21 = vor.u32 %v13797_v10, %v11482_v57  ;;  %v11869_v24 = vor.u32 %v13893_v62, %v11866_v15  ;;  %v13953_v36 = vld [vmem:[#allocation16 + $0x79c] sm:$0xf]  ;;  %v12106_v43 = vld [vmem:[#allocation16 + $0x7c8] sm:$0xf0]  ;;  %v12056_v57 = vld [vmem:[#allocation16 + $0x738] sm:$0xf] }
0x165b   :  { %v13947_v62 = vld [vmem:[#allocation16 + $0x764] sm:$0xf0]  ;;  %v13749_v15 = vld [vmem:[#allocation16 + $0x13c] sm:$0xf] }
0x165d   :  { %6750 = vmatpush.bf16.msrb.mxu2 %v11621_v22  ;;  %6769 = vmatpush.bf16.msra.mxu3 %v12005_v9  ;;  %v12253_v22 = vor.u32 %v13989_v58, %v12250_v25  ;;  %v13983_v9 = vld [vmem:[#allocation16 + $0x884] sm:$0xf0]  ;;  %v13845_v58 = vld [vmem:[#allocation16 + $0x43c] sm:$0xf]  ;;  %v11674_v25 = vld [vmem:[#allocation16 + $0x468] sm:$0xf0] }
0x165e   :  { %6788 = vmatpush.bf16.msra.mxu0 %v11241_v37  ;;  %6807 = vmatpush.bf16.msra.mxu1 %v11625_v14  ;;  %v12201_v49 = vor.u32 %v13983_v9, %v12200_v63  ;;  %v12202_v37 = vld [vmem:[#allocation16 + $0x888] sm:$0xf0]  ;;  %v12152_v14 = vld [vmem:[#allocation16 + $0x7f8] sm:$0xf]  ;;  %v11677_v44 = vor.u32 %v13845_v58, %v11674_v25  ;;  %v11488_v58 = vld [vmem:[#allocation16 + $0x2c0] sm:$0xf] }
0x165f   :  { %v12205_v11 = vor.u32 %v13977_v7, %v12202_v37  ;;  %v12153_v20 = vor.u32 %v13971_v19, %v12152_v14  ;;  %v12058_v9 = vld [vmem:[#allocation16 + $0x768] sm:$0xf0]  ;;  %v13929_v19 = vld [vmem:[#allocation16 + $0x6dc] sm:$0xf]  ;;  %v13804_v25 = vld [vmem:[#allocation16 + $0x2ec] sm:$0xf0] }
0x1660   :  { %v11242_v7 = vld [vmem:[#allocation16 + $0x108] sm:$0xf0] }
0x1661   :  { %6751 = vmatpush.bf16.msrb.mxu2 %v11573_v12  ;;  %6770 = vmatpush.bf16.msra.mxu3 %v11957_v4  ;;  %v13773_v12 = vld [vmem:[#allocation16 + $0x1fc] sm:$0xf]  ;;  %v11386_v4 = vld [vmem:[#allocation16 + $0x228] sm:$0xf0]  ;;  %v11245_v14 = vor.u32 %v13737_v60, %v11242_v7  ;;  %v13798_v60 = vld [vmem:[#allocation16 + $0x2c4] sm:$0xf] }
0x1662   :  { %6789 = vmatpush.bf16.msra.mxu0 %v11193_v31  ;;  %6808 = vmatpush.bf16.msra.mxu1 %v11577_v56  ;;  %v11389_v45 = vor.u32 %v13773_v12, %v11386_v4  ;;  %v11773_v31 = vor.u32 %v13869_v59, %v11770_v2  ;;  %v12157_v56 = vor.u32 %v13965_v6, %v12154_v39  ;;  %v11626_v37 = vld [vmem:[#allocation16 + $0x408] sm:$0xf0]  ;;  %v11960_v59 = vld [vmem:[#allocation16 + $0x678] sm:$0xf]  ;;  %v13923_v2 = vld [vmem:[#allocation16 + $0x6a4] sm:$0xf0] }
0x1663   :  { %v13725_v6 = vld [vmem:[#allocation16 + $0x7c] sm:$0xf]  ;;  %v11961_v39 = vor.u32 %v13923_v2, %v11960_v59 }
0x1665   :  { %6752 = vmatpush.bf16.msrb.mxu2 %v11525_v46  ;;  %6771 = vmatpush.bf16.msra.mxu3 %v11909_v61  ;;  %v13959_v46 = vld [vmem:[#allocation16 + $0x7c4] sm:$0xf0]  ;;  %v13761_v61 = vld [vmem:[#allocation16 + $0x19c] sm:$0xf] }
0x1666   :  { %6790 = vmatpush.bf16.msra.mxu0 %v11145_v23  ;;  %6809 = vmatpush.bf16.msra.mxu1 %v11529_v48  ;;  %v12105_v30 = vor.u32 %v13959_v46, %v12104_v5  ;;  %v11722_v23 = vld [vmem:[#allocation16 + $0x4c8] sm:$0xf0]  ;;  %v11341_v48 = vor.u32 %v13761_v61, %v11338_v33  ;;  %v13917_v5 = vld [vmem:[#allocation16 + $0x67c] sm:$0xf]  ;;  %v11912_v33 = vld [vmem:[#allocation16 + $0x618] sm:$0xf] }
0x1667   :  { %6677 = vmatmul.bf16.vlgmr.msra.gmra.mxu2 %v16331_v28  ;;  %6696 = vmatmul.bf16.vlgmr.msrb.gmra.mxu3 %v16333_v17  ;;  %v11725_v10 = vor.u32 %v13857_v3, %v11722_v23  ;;  %v11962_v46 = vld [vmem:[#allocation16 + $0x6a8] sm:$0xf0]  ;;  %v13911_v3 = vld [vmem:[#allocation16 + $0x644] sm:$0xf0]  ;;  %v13713_v23 = vld [vmem:[#allocation16 + $0x1c] sm:$0xf] }
0x1668   :  { %6715 = vmatmul.bf16.vlgmr.msrb.gmra.mxu0 %v16335_v16  ;;  %6734 = vmatmul.bf16.vlgmr.msrb.gmra.mxu1 %v16331_v28 }
0x1669   :  { %6821 = vmatpush.bf16.msra.mxu2 %v12249_v18  ;;  %6840 = vmatpush.bf16.msrb.mxu3 %v11485_v21  ;;  %v12109_v18 = vor.u32 %v13953_v36, %v12106_v43  ;;  %v12057_v21 = vor.u32 %v13947_v62, %v12056_v57  ;;  %v11913_v36 = vor.u32 %v13911_v3, %v11912_v33  ;;  %v11146_v43 = vld [vmem:[#allocation16 + $0x48] sm:$0xf0]  ;;  %v13905_v62 = vld [vmem:[#allocation16 + $0x61c] sm:$0xf]  ;;  %v12160_v33 = vld [vmem:[#allocation16 + $0x800] sm:$0xf] }
0x166a   :  { %6859 = vmatpush.bf16.msrb.mxu0 %v11869_v24  ;;  %6878 = vmatpush.bf16.msrb.mxu1 %v12253_v22  ;;  %v11290_v24 = vld [vmem:[#allocation16 + $0x168] sm:$0xf0]  ;;  %v13941_v22 = vld [vmem:[#allocation16 + $0x73c] sm:$0xf]  ;;  %v11149_v57 = vor.u32 %v13713_v23, %v11146_v43  ;;  %v13972_v3 = vld [vmem:[#allocation16 + $0x82c] sm:$0xf0] }
0x166b   :  { %v11293_v63 = vor.u32 %v13749_v15, %v11290_v24  ;;  %v12061_v35 = vor.u32 %v13941_v22, %v12058_v9  ;;  %v11914_v15 = vld [vmem:[#allocation16 + $0x648] sm:$0xf0]  ;;  %v11489_v22 = vor.u32 %v13804_v25, %v11488_v58  ;;  %v13900_v9 = vld [vmem:[#allocation16 + $0x5ec] sm:$0xf0]  ;;  %v13774_v43 = vld [vmem:[#allocation16 + $0x204] sm:$0xf] }
0x166c   :  { %v11917_v24 = vor.u32 %v13905_v62, %v11914_v15  ;;  %v16438_v62 = vpop.f32.mrf.mxu3  ;;  %v11344_v15 = vld [vmem:[#allocation16 + $0x1a0] sm:$0xf]  ;;  %v13864_v25 = vld [vmem:[#allocation16 + $0x4cc] sm:$0xf0] }
0x166d   :  { %6822 = vmatpush.bf16.msra.mxu2 %v12201_v49  ;;  %6841 = vmatpush.bf16.msrb.mxu3 %v11437_v50  ;;  %v12008_v49 = vld [vmem:[#allocation16 + $0x6d8] sm:$0xf]  ;;  %v13935_v50 = vld [vmem:[#allocation16 + $0x704] sm:$0xf0] }
0x166e   :  { %6860 = vmatpush.bf16.msrb.mxu0 %v11821_v27  ;;  %6879 = vmatpush.bf16.msrb.mxu1 %v12205_v11  ;;  %v12009_v32 = vor.u32 %v13935_v50, %v12008_v49  ;;  %v13833_v27 = vld [vmem:[#allocation16 + $0x3dc] sm:$0xf]  ;;  %v12010_v11 = vld [vmem:[#allocation16 + $0x708] sm:$0xf0] }
0x166f   :  { %v11629_v12 = vor.u32 %v13833_v27, %v11626_v37  ;;  %v12013_v4 = vor.u32 %v13929_v19, %v12010_v11  ;;  %v11440_v27 = vld [vmem:[#allocation16 + $0x260] sm:$0xf]  ;;  %v13792_v37 = vld [vmem:[#allocation16 + $0x28c] sm:$0xf0] }
0x1670   :  { %v11441_v19 = vor.u32 %v13792_v37, %v11440_v27  ;;  %v13888_v11 = vld [vmem:[#allocation16 + $0x58c] sm:$0xf0]  ;;  %v11680_v37 = vld [vmem:[#allocation16 + $0x440] sm:$0xf] }
0x1671   :  { %6823 = vmatpush.bf16.msra.mxu2 %v12153_v20  ;;  %6842 = vmatpush.bf16.msrb.mxu3 %v11389_v45  ;;  %v11194_v20 = vld [vmem:[#allocation16 + $0xa8] sm:$0xf0]  ;;  %v13821_v45 = vld [vmem:[#allocation16 + $0x37c] sm:$0xf]  ;;  %v13756_v27 = vld [vmem:[#allocation16 + $0x16c] sm:$0xf0] }
0x1672   :  { %6861 = vmatpush.bf16.msrb.mxu0 %v11773_v31  ;;  %6880 = vmatpush.bf16.msrb.mxu1 %v12157_v56  ;;  %v11578_v31 = vld [vmem:[#allocation16 + $0x3a8] sm:$0xf0]  ;;  %v11197_v56 = vor.u32 %v13725_v6, %v11194_v20  ;;  %v13786_v6 = vld [vmem:[#allocation16 + $0x264] sm:$0xf]  ;;  %v16432_v20 = vpop.f32.mrf.mxu0 }
0x1673   :  { %v11581_v61 = vor.u32 %v13821_v45, %v11578_v31 }
0x1675   :  { %6824 = vmatpush.bf16.msra.mxu2 %v12105_v30  ;;  %6843 = vmatpush.bf16.msrb.mxu3 %v11341_v48  ;;  %v11965_v30 = vor.u32 %v13917_v5, %v11962_v46  ;;  %v16426_v48 = vpop.f32.mrf.mxu1  ;;  %v13780_v5 = vld [vmem:[#allocation16 + $0x22c] sm:$0xf0]  ;;  %v11776_v46 = vld [vmem:[#allocation16 + $0x500] sm:$0xf] }
0x1676   :  { %6862 = vmatpush.bf16.msrb.mxu0 %v11725_v10  ;;  %6881 = vmatpush.bf16.msrb.mxu1 %v12109_v18  ;;  %v13809_v10 = vld [vmem:[#allocation16 + $0x31c] sm:$0xf]  ;;  %v11530_v18 = vld [vmem:[#allocation16 + $0x348] sm:$0xf0] }
0x1677   :  { %6682 = vmatmul.bf16.gmra.mxu2 %v16389_v42  ;;  %6701 = vmatmul.bf16.gmra.mxu3 %v16391_v26 }
0x1678   :  { %6720 = vmatmul.bf16.gmra.mxu0 %v16393_v51  ;;  %6739 = vmatmul.bf16.gmra.mxu1 %v16389_v42 }
0x1679   :  { %6825 = vmatpush.bf16.msra.mxu2 %v12057_v21  ;;  %6844 = vmatpush.bf16.msrb.mxu3 %v11293_v63  ;;  %v11533_v21 = vor.u32 %v13809_v10, %v11530_v18  ;;  %v11872_v63 = vld [vmem:[#allocation16 + $0x5c0] sm:$0xf]  ;;  %v11394_v10 = vld [vmem:[#allocation16 + $0x230] sm:$0xf0] }
0x167a   :  { %6863 = vmatpush.bf16.msrb.mxu0 %v11677_v44  ;;  %6882 = vmatpush.bf16.msrb.mxu1 %v12061_v35  ;;  %v12256_v44 = vld [vmem:[#allocation16 + $0x8c0] sm:$0xf]  ;;  %v13996_v35 = vld [vmem:[#allocation16 + $0x8ec] sm:$0xf0]  ;;  %v11873_v49 = vor.u32 %v13900_v9, %v11872_v63  ;;  %v11397_v18 = vor.u32 %v13774_v43, %v11394_v10  ;;  %v13738_v10 = vld [vmem:[#allocation16 + $0xe4] sm:$0xf] }
0x167b   :  { %v12257_v50 = vor.u32 %v13996_v35, %v12256_v44  ;;  %v12112_v63 = vld [vmem:[#allocation16 + $0x7a0] sm:$0xf]  ;;  %v13762_v44 = vld [vmem:[#allocation16 + $0x1a4] sm:$0xf]  ;;  %v11346_v35 = vld [vmem:[#allocation16 + $0x1d0] sm:$0xf0] }
0x167d   :  { %6826 = vmatpush.bf16.msra.mxu2 %v12009_v32  ;;  %6845 = vmatpush.bf16.msrb.mxu3 %v11245_v14  ;;  %v11490_v32 = vld [vmem:[#allocation16 + $0x2f0] sm:$0xf0]  ;;  %v11824_v14 = vld [vmem:[#allocation16 + $0x560] sm:$0xf]  ;;  %v16434_v45 = vpop.f32.mrf.mxu1 }
0x167e   :  { %6864 = vmatpush.bf16.msrb.mxu0 %v11629_v12  ;;  %6883 = vmatpush.bf16.msrb.mxu1 %v12013_v4  ;;  %v11493_v7 = vor.u32 %v13798_v60, %v11490_v32  ;;  %v12208_v12 = vld [vmem:[#allocation16 + $0x860] sm:$0xf]  ;;  %v13984_v4 = vld [vmem:[#allocation16 + $0x88c] sm:$0xf0]  ;;  %v11825_v59 = vor.u32 %v13888_v11, %v11824_v14  ;;  %v11349_v32 = vor.u32 %v13762_v44, %v11346_v35 }
0x167f   :  { %v12209_v2 = vor.u32 %v13984_v4, %v12208_v12  ;;  %v12064_v11 = vld [vmem:[#allocation16 + $0x740] sm:$0xf]  ;;  %v13948_v12 = vld [vmem:[#allocation16 + $0x76c] sm:$0xf0] }
0x1681   :  { %6827 = vmatpush.bf16.msra.mxu2 %v11961_v39  ;;  %6846 = vmatpush.bf16.msrb.mxu3 %v11197_v56  ;;  %v11442_v39 = vld [vmem:[#allocation16 + $0x290] sm:$0xf0]  ;;  %v11392_v56 = vld [vmem:[#allocation16 + $0x200] sm:$0xf] }
0x1682   :  { %6865 = vmatpush.bf16.msrb.mxu0 %v11581_v61  ;;  %6884 = vmatpush.bf16.msrb.mxu1 %v11965_v30  ;;  %v11445_v31 = vor.u32 %v13786_v6, %v11442_v39  ;;  %v11393_v61 = vor.u32 %v13780_v5, %v11392_v56  ;;  %v13876_v30 = vld [vmem:[#allocation16 + $0x52c] sm:$0xf0]  ;;  %v12065_v6 = vor.u32 %v13948_v12, %v12064_v11  ;;  %v11248_v5 = vld [vmem:[#allocation16 + $0xe0] sm:$0xf] }
0x1683   :  { %v11777_v23 = vor.u32 %v13876_v30, %v11776_v46  ;;  %v13744_v46 = vld [vmem:[#allocation16 + $0x10c] sm:$0xf0] }
0x1685   :  { %6828 = vmatpush.bf16.msra.mxu2 %v11913_v36  ;;  %6847 = vmatpush.bf16.msrb.mxu3 %v11149_v57  ;;  %v12161_v36 = vor.u32 %v13972_v3, %v12160_v33  ;;  %v16436_v57 = vpop.f32.mrf.mxu2  ;;  %v11249_v33 = vor.u32 %v13744_v46, %v11248_v5  ;;  %v13840_v3 = vld [vmem:[#allocation16 + $0x40c] sm:$0xf0]  ;;  %v11920_v46 = vld [vmem:[#allocation16 + $0x620] sm:$0xf] }
0x1686   :  { %6866 = vmatpush.bf16.msrb.mxu0 %v11533_v21  ;;  %6885 = vmatpush.bf16.msrb.mxu1 %v11917_v24  ;;  %v13768_v21 = vld [vmem:[#allocation16 + $0x1cc] sm:$0xf0]  ;;  %v11728_v24 = vld [vmem:[#allocation16 + $0x4a0] sm:$0xf] }
0x1687   :  { %6753 = vmatmul.bf16.vlgmr.msrb.gmra.mxu2 %v16333_v17  ;;  %6772 = vmatmul.bf16.vlgmr.msra.gmra.mxu3 %v16335_v16  ;;  %v11345_v58 = vor.u32 %v13768_v21, %v11344_v15  ;;  %v11729_v9 = vor.u32 %v13864_v25, %v11728_v24  ;;  %v13816_v5 = vld [vmem:[#allocation16 + $0x34c] sm:$0xf0] }
0x1688   :  { %6791 = vmatmul.bf16.vlgmr.msra.gmra.mxu0 %v16331_v28  ;;  %6810 = vmatmul.bf16.vlgmr.msra.gmra.mxu1 %v16333_v17 }
0x1689   :  { %6897 = vmatpush.bf16.msrb.mxu2 %v11489_v22  ;;  %6916 = vmatpush.bf16.msra.mxu3 %v11873_v49  ;;  %v13960_v22 = vld [vmem:[#allocation16 + $0x7cc] sm:$0xf0] }
0x168a   :  { %6935 = vmatpush.bf16.msra.mxu0 %v12257_v50  ;;  %6954 = vmatpush.bf16.msra.mxu1 %v11493_v7  ;;  %v12113_v60 = vor.u32 %v13960_v22, %v12112_v63  ;;  %v11296_v7 = vld [vmem:[#allocation16 + $0x140] sm:$0xf]  ;;  %v13732_v22 = vld [vmem:[#allocation16 + $0xac] sm:$0xf0] }
0x168b   :  { %v11297_v14 = vor.u32 %v13756_v27, %v11296_v7  ;;  %v11200_v63 = vld [vmem:[#allocation16 + $0x80] sm:$0xf]  ;;  %v13924_v7 = vld [vmem:[#allocation16 + $0x6ac] sm:$0xf0] }
0x168c   :  { %v11201_v35 = vor.u32 %v13732_v22, %v11200_v63  ;;  %v11874_v63 = vld [vmem:[#allocation16 + $0x5f0] sm:$0xf0]  ;;  %v13990_v22 = vld [vmem:[#allocation16 + $0x8c4] sm:$0xf] }
0x168d   :  { %6898 = vmatpush.bf16.msrb.mxu2 %v11441_v19  ;;  %6917 = vmatpush.bf16.msra.mxu3 %v11825_v59  ;;  %v13852_v19 = vld [vmem:[#allocation16 + $0x46c] sm:$0xf0]  ;;  %v13750_v59 = vld [vmem:[#allocation16 + $0x144] sm:$0xf] }
0x168e   :  { %6936 = vmatpush.bf16.msra.mxu0 %v12209_v2  ;;  %6955 = vmatpush.bf16.msra.mxu1 %v11445_v31  ;;  %v11681_v4 = vor.u32 %v13852_v19, %v11680_v37  ;;  %v11298_v2 = vld [vmem:[#allocation16 + $0x170] sm:$0xf0]  ;;  %v13726_v37 = vld [vmem:[#allocation16 + $0x84] sm:$0xf] }
0x168f   :  { %v11301_v39 = vor.u32 %v13750_v59, %v11298_v2  ;;  %v16451_v19 = vld [vmem:[#allocation17] sm:$0xff] }
0x1690   :  { %v16454_v11 = vperm.slane %v16451_v19, 2 }
0x1691   :  { %6899 = vmatpush.bf16.msrb.mxu2 %v11393_v61  ;;  %6918 = vmatpush.bf16.msra.mxu3 %v11777_v23  ;;  %v11632_v61 = vld [vmem:[#allocation16 + $0x3e0] sm:$0xf] }
0x1692   :  { %6937 = vmatpush.bf16.msra.mxu0 %v12161_v36  ;;  %6956 = vmatpush.bf16.msra.mxu1 %v11397_v18  ;;  %v12016_v23 = vld [vmem:[#allocation16 + $0x6e0] sm:$0xf]  ;;  %v13936_v36 = vld [vmem:[#allocation16 + $0x70c] sm:$0xf0]  ;;  %v11633_v43 = vor.u32 %v13840_v3, %v11632_v61  ;;  %v11250_v18 = vld [vmem:[#allocation16 + $0x110] sm:$0xf0] }
0x1693   :  { %v11253_v25 = vor.u32 %v13738_v10, %v11250_v18  ;;  %v13912_v61 = vld [vmem:[#allocation16 + $0x64c] sm:$0xf0]  ;;  %v11154_v3 = vld [vmem:[#allocation16 + $0x50] sm:$0xf0] }
0x1694   :  { %v11921_v18 = vor.u32 %v13912_v61, %v11920_v46  ;;  %v13978_v61 = vld [vmem:[#allocation16 + $0x864] sm:$0xf] }
0x1695   :  { %v6493_v49 = vpop.f32.mrf.mxu0  ;;  %v16440_v50 = vpop.f32.mrf.mxu1  ;;  %6900 = vmatpush.bf16.msrb.mxu2 %v11345_v58  ;;  %6919 = vmatpush.bf16.msra.mxu3 %v11729_v9  ;;  %v12017_v58 = vor.u32 %v13936_v36, %v12016_v23  ;;  %v11584_v9 = vld [vmem:[#allocation16 + $0x380] sm:$0xf]  ;;  %v16458_v23 = vperm.slane %v16451_v19, 1 }
0x1696   :  { %6938 = vmatpush.bf16.msra.mxu0 %v12113_v60  ;;  %6957 = vmatpush.bf16.msra.mxu1 %v11349_v32  ;;  %v13828_v60 = vld [vmem:[#allocation16 + $0x3ac] sm:$0xf0]  ;;  %v11968_v32 = vld [vmem:[#allocation16 + $0x680] sm:$0xf] }
0x1697   :  { %6758 = vmatmul.bf16.gmra.mxu2 %v16391_v26  ;;  %6777 = vmatmul.bf16.gmra.mxu3 %v16393_v51  ;;  %v11585_v27 = vor.u32 %v13828_v60, %v11584_v9  ;;  %v11969_v12 = vor.u32 %v13924_v7, %v11968_v32  ;;  %v12258_v60 = vld [vmem:[#allocation16 + $0x8f0] sm:$0xf0]  ;;  %v11496_v32 = vld [vmem:[#allocation16 + $0x2c8] sm:$0xf]  ;;  %v13805_v7 = vld [vmem:[#allocation16 + $0x2f4] sm:$0xf0] }
0x1698   :  { %6796 = vmatmul.bf16.gmra.mxu0 %v16389_v42  ;;  %6815 = vmatmul.bf16.gmra.mxu1 %v16391_v26 }
0x1699   :  { %6901 = vmatpush.bf16.msrb.mxu2 %v11297_v14  ;;  %6920 = vmatpush.bf16.msra.mxu3 %v11681_v4  ;;  %v11202_v14 = vld [vmem:[#allocation16 + $0xb0] sm:$0xf0] }
0x169a   :  { %v6455_v31 = vpop.f32.mrf.mxu2  ;;  %v6474_v56 = vpop.f32.mrf.mxu3  ;;  %6939 = vmatpush.bf16.msra.mxu0 %v12065_v6  ;;  %6958 = vmatpush.bf16.msra.mxu1 %v11301_v39  ;;  %v11205_v4 = vor.u32 %v13726_v37, %v11202_v14  ;;  %v13720_v6 = vld [vmem:[#allocation16 + $0x4c] sm:$0xf0]  ;;  %v11536_v39 = vld [vmem:[#allocation16 + $0x320] sm:$0xf]  ;;  %v12261_v37 = vor.u32 %v13990_v22, %v12258_v60  ;;  %v11497_v14 = vor.u32 %v13805_v7, %v11496_v32  ;;  %v13870_v22 = vld [vmem:[#allocation16 + $0x504] sm:$0xf] }
0x169b   :  { %v6456_v30 = vadd.f32 %v6455_v31, %v16387_v8  ;;  %v12162_v32 = vld [vmem:[#allocation16 + $0x830] sm:$0xf0]  ;;  %v11400_v7 = vld [vmem:[#allocation16 + $0x208] sm:$0xf] }
0x169d   :  { %v6475_v15 = vadd.f32 %v6474_v56, %v6456_v30  ;;  %v6495_v21 = vpop.f32.mrf.mxu0  ;;  %v16447_v24 = vpop.f32.mrf.mxu1  ;;  %6902 = vmatpush.bf16.msrb.mxu2 %v11249_v33  ;;  %6921 = vmatpush.bf16.msra.mxu3 %v11633_v43  ;;  %v11537_v30 = vor.u32 %v13816_v5, %v11536_v39  ;;  %v13714_v33 = vld [vmem:[#allocation16 + $0x24] sm:$0xf] }
0x169e   :  { %6940 = vmatpush.bf16.msra.mxu0 %v12017_v58  ;;  %6959 = vmatpush.bf16.msra.mxu1 %v11253_v25  ;;  %v13894_v25 = vld [vmem:[#allocation16 + $0x5c4] sm:$0xf] }
0x169f   :  { %v16449_v44 = vadd.f32 %v6493_v49, %v6475_v15  ;;  %v11152_v49 = vld [vmem:[#allocation16 + $0x20] sm:$0xf]  ;;  %v11157_v15 = vor.u32 %v13714_v33, %v11154_v3  ;;  %v11448_v33 = vld [vmem:[#allocation16 + $0x268] sm:$0xf]  ;;  %v13793_v3 = vld [vmem:[#allocation16 + $0x294] sm:$0xf0] }
0x16a0   :  { %v11153_v56 = vor.u32 %v13720_v6, %v11152_v49 }
0x16a1   :  { %6903 = vmatpush.bf16.msrb.mxu2 %v11201_v35  ;;  %6922 = vmatpush.bf16.msra.mxu3 %v11585_v27  ;;  %v11877_v35 = vor.u32 %v13894_v25, %v11874_v63 }
0x16a2   :  { %v6457_v59 = vpop.f32.mrf.mxu2  ;;  %v6476_v2 = vpop.f32.mrf.mxu3  ;;  %6941 = vmatpush.bf16.msra.mxu0 %v11969_v12  ;;  %6960 = vmatpush.bf16.msra.mxu1 %v11205_v4  ;;  %v11880_v12 = vld [vmem:[#allocation16 + $0x5c8] sm:$0xf]  ;;  %v13901_v4 = vld [vmem:[#allocation16 + $0x5f4] sm:$0xf0] }
0x16a3   :  { %v6458_v31 = vadd.f32 %v6457_v59, %v16387_v8  ;;  %v7149_v59 = vmax.f32 %v16449_v44, 0.0  ;;  %v11881_v49 = vor.u32 %v13901_v4, %v11880_v12  ;;  %v13781_v12 = vld [vmem:[#allocation16 + $0x234] sm:$0xf0]  ;;  %v11784_v4 = vld [vmem:[#allocation16 + $0x508] sm:$0xf] }
0x16a5   :  { %v6477_v36 = vadd.f32 %v6476_v2, %v6458_v31  ;;  %v6564_v43 = vpop.f32.mrf.mxu0  ;;  %v6583_v10 = vpop.f32.mrf.mxu1  ;;  %6904 = vmatpush.bf16.msrb.mxu2 %v11153_v56  ;;  %6923 = vmatpush.bf16.msra.mxu3 %v11537_v30  ;;  %v13882_v31 = vld [vmem:[#allocation16 + $0x564] sm:$0xf]  ;;  %v11826_v56 = vld [vmem:[#allocation16 + $0x590] sm:$0xf0] }
0x16a6   :  { %v6565_v58 = vadd.f32 %v6564_v43, %v16454_v11  ;;  %6942 = vmatpush.bf16.msra.mxu0 %v11921_v18  ;;  %6961 = vmatpush.bf16.msra.mxu1 %v11157_v15  ;;  %v11829_v46 = vor.u32 %v13882_v31, %v11826_v56  ;;  %v12210_v30 = vld [vmem:[#allocation16 + $0x890] sm:$0xf0]  ;;  %v13889_v43 = vld [vmem:[#allocation16 + $0x594] sm:$0xf0]  ;;  %v13858_v31 = vld [vmem:[#allocation16 + $0x4a4] sm:$0xf] }
0x16a7   :  { %v6496_v9 = vadd.f32 %v6495_v21, %v6477_v36  ;;  %6829 = vmatmul.bf16.vlgmr.msra.gmra.mxu2 %v16335_v16  ;;  %6848 = vmatmul.bf16.vlgmr.msrb.gmra.mxu3 %v16331_v28  ;;  %v6508_v21 = vadd.f32 %v16426_v48, %v16458_v23  ;;  %v12213_v44 = vor.u32 %v13978_v61, %v12210_v30  ;;  %v11832_v36 = vld [vmem:[#allocation16 + $0x568] sm:$0xf]  ;;  %v11730_v56 = vld [vmem:[#allocation16 + $0x4d0] sm:$0xf0] }
0x16a8   :  { %v16463_v27 = vadd.f32 %v6583_v10, %v6565_v58  ;;  %6867 = vmatmul.bf16.vlgmr.msrb.gmra.mxu0 %v16333_v17  ;;  %6886 = vmatmul.bf16.vlgmr.msrb.gmra.mxu1 %v16335_v16  ;;  %v11449_v58 = vor.u32 %v13793_v3, %v11448_v33  ;;  %v11833_v25 = vor.u32 %v13889_v43, %v11832_v36  ;;  %v12114_v30 = vld [vmem:[#allocation16 + $0x7d0] sm:$0xf0]  ;;  %v11352_v33 = vld [vmem:[#allocation16 + $0x1a8] sm:$0xf]  ;;  %v13865_v43 = vld [vmem:[#allocation16 + $0x4d4] sm:$0xf0] }
0x16a9   :  { %v7161_v2 = vmax.f32 %v6496_v9, 0.0  ;;  %6973 = vmatpush.bf16.msra.mxu2 %v11877_v35  ;;  %6992 = vmatpush.bf16.msrb.mxu3 %v12261_v37  ;;  %v11778_v9 = vld [vmem:[#allocation16 + $0x530] sm:$0xf0]  ;;  %v13966_v35 = vld [vmem:[#allocation16 + $0x804] sm:$0xf]  ;;  %v11733_v61 = vor.u32 %v13858_v31, %v11730_v56 }
0x16aa   :  { %v6526_v6 = vpop.f32.mrf.mxu2  ;;  %v6545_v39 = vpop.f32.mrf.mxu3  ;;  %7011 = vmatpush.bf16.msrb.mxu0 %v11497_v14  ;;  %7030 = vmatpush.bf16.msrb.mxu1 %v11881_v49  ;;  %v11781_v60 = vor.u32 %v13870_v22, %v11778_v9  ;;  %v12165_v14 = vor.u32 %v13966_v35, %v12162_v32  ;;  %v11736_v36 = vld [vmem:[#allocation16 + $0x4a8] sm:$0xf]  ;;  %v13846_v22 = vld [vmem:[#allocation16 + $0x444] sm:$0xf]  ;;  %v11682_v9 = vld [vmem:[#allocation16 + $0x470] sm:$0xf0] }
0x16ab   :  { %v6527_v5 = vadd.f32 %v6526_v6, %v6508_v21  ;;  %v16470_v48 = vpack.c.bf16 %v7161_v2, %v7149_v59  ;;  %v13877_v21 = vld [vmem:[#allocation16 + $0x534] sm:$0xf0]  ;;  %v6510_v59 = vadd.f32 %v16434_v45, %v16458_v23  ;;  %v11401_v2 = vor.u32 %v13781_v12, %v11400_v7  ;;  %v13942_v35 = vld [vmem:[#allocation16 + $0x744] sm:$0xf]  ;;  %v11304_v12 = vld [vmem:[#allocation16 + $0x148] sm:$0xf] }
0x16ac   :  { %v11785_v49 = vor.u32 %v13877_v21, %v11784_v4  ;;  %v11685_v7 = vor.u32 %v13846_v22, %v11682_v9  ;;  %v6513_v4 = vadd.f32 %v16440_v50, %v16458_v23  ;;  %v13834_v50 = vld [vmem:[#allocation16 + $0x3e4] sm:$0xf] }
0x16ad   :  { %v16472_v10 = vadd.f32 %v6545_v39, %v6527_v5  ;;  %v6566_v18 = vpop.f32.mrf.mxu0  ;;  %v6585_v15 = vpop.f32.mrf.mxu1  ;;  %6974 = vmatpush.bf16.msra.mxu2 %v11829_v46  ;;  %6993 = vmatpush.bf16.msrb.mxu3 %v12213_v44  ;;  %v13954_v5 = vld [vmem:[#allocation16 + $0x7a4] sm:$0xf]  ;;  %v13769_v44 = vld [vmem:[#allocation16 + $0x1d4] sm:$0xf0] }
0x16ae   :  { %v6567_v63 = vadd.f32 %v6566_v18, %v16454_v11  ;;  %7012 = vmatpush.bf16.msrb.mxu0 %v11449_v58  ;;  %7031 = vmatpush.bf16.msrb.mxu1 %v11833_v25  ;;  %v12117_v3 = vor.u32 %v13954_v5, %v12114_v30  ;;  %v11353_v58 = vor.u32 %v13769_v44, %v11352_v33  ;;  %v12018_v44 = vld [vmem:[#allocation16 + $0x710] sm:$0xf0] }
0x16af   :  { %v11737_v25 = vor.u32 %v13865_v43, %v11736_v36  ;;  %v13745_v36 = vld [vmem:[#allocation16 + $0x114] sm:$0xf0] }
0x16b0   :  { %v16475_v37 = vadd.f32 %v6585_v15, %v6567_v63 }
0x16b1   :  { %6975 = vmatpush.bf16.msra.mxu2 %v11781_v60  ;;  %6994 = vmatpush.bf16.msrb.mxu3 %v12165_v14  ;;  %v7126_v60 = vmax.f32 %v16472_v10, 0.0  ;;  %v12066_v14 = vld [vmem:[#allocation16 + $0x770] sm:$0xf0]  ;;  %v11688_v10 = vld [vmem:[#allocation16 + $0x448] sm:$0xf] }
0x16b2   :  { %v6528_v6 = vpop.f32.mrf.mxu2  ;;  %v6547_v39 = vpop.f32.mrf.mxu3  ;;  %7013 = vmatpush.bf16.msrb.mxu0 %v11401_v2  ;;  %7032 = vmatpush.bf16.msrb.mxu1 %v11785_v49  ;;  %v13757_v2 = vld [vmem:[#allocation16 + $0x174] sm:$0xf0] }
0x16b3   :  { %v6529_v46 = vadd.f32 %v6528_v6, %v6510_v59  ;;  %v12069_v59 = vor.u32 %v13942_v35, %v12066_v14  ;;  %v13853_v49 = vld [vmem:[#allocation16 + $0x474] sm:$0xf0]  ;;  %v13822_v35 = vld [vmem:[#allocation16 + $0x384] sm:$0xf]  ;;  %v11970_v14 = vld [vmem:[#allocation16 + $0x6b0] sm:$0xf0] }
0x16b4   :  { %v11689_v31 = vor.u32 %v13853_v49, %v11688_v10  ;;  %v11592_v10 = vld [vmem:[#allocation16 + $0x388] sm:$0xf]  ;;  %v13829_v49 = vld [vmem:[#allocation16 + $0x3b4] sm:$0xf0] }
0x16b5   :  { %v6548_v45 = vadd.f32 %v6547_v39, %v6529_v46  ;;  %v6569_v18 = vpop.f32.mrf.mxu0  ;;  %v6588_v15 = vpop.f32.mrf.mxu1  ;;  %6976 = vmatpush.bf16.msra.mxu2 %v11733_v61  ;;  %6995 = vmatpush.bf16.msrb.mxu3 %v12117_v3  ;;  %v11305_v39 = vor.u32 %v13757_v2, %v11304_v12  ;;  %v11634_v46 = vld [vmem:[#allocation16 + $0x410] sm:$0xf0]  ;;  %v13930_v61 = vld [vmem:[#allocation16 + $0x6e4] sm:$0xf]  ;;  %v11256_v3 = vld [vmem:[#allocation16 + $0xe8] sm:$0xf] }
0x16b6   :  { %v6570_v63 = vadd.f32 %v6569_v18, %v16454_v11  ;;  %7014 = vmatpush.bf16.msrb.mxu0 %v11353_v58  ;;  %7033 = vmatpush.bf16.msrb.mxu1 %v11737_v25  ;;  %v11637_v33 = vor.u32 %v13834_v50, %v11634_v46  ;;  %v12021_v43 = vor.u32 %v13930_v61, %v12018_v44  ;;  %v13841_v18 = vld [vmem:[#allocation16 + $0x414] sm:$0xf0]  ;;  %v11208_v12 = vld [vmem:[#allocation16 + $0x88] sm:$0xf]  ;;  %v13810_v50 = vld [vmem:[#allocation16 + $0x324] sm:$0xf] }
0x16b7   :  { %v7138_v32 = vmax.f32 %v6548_v45, 0.0  ;;  %6834 = vmatmul.bf16.gmra.mxu2 %v16393_v51  ;;  %6853 = vmatmul.bf16.gmra.mxu3 %v16389_v42  ;;  %v11640_v45 = vld [vmem:[#allocation16 + $0x3e8] sm:$0xf]  ;;  %v13733_v2 = vld [vmem:[#allocation16 + $0xb4] sm:$0xf0] }
0x16b8   :  { %v16485_v21 = vadd.f32 %v6588_v15, %v6570_v63  ;;  %6872 = vmatmul.bf16.gmra.mxu0 %v16391_v26  ;;  %6891 = vmatmul.bf16.gmra.mxu1 %v16393_v51  ;;  %v11257_v63 = vor.u32 %v13745_v36, %v11256_v3  ;;  %v11641_v22 = vor.u32 %v13841_v18, %v11640_v45  ;;  %v11538_v46 = vld [vmem:[#allocation16 + $0x350] sm:$0xf0]  ;;  %v13906_v61 = vld [vmem:[#allocation16 + $0x624] sm:$0xf]  ;;  %v11160_v3 = vld [vmem:[#allocation16 + $0x28] sm:$0xf] }
0x16b9   :  { %v16489_v6 = vpack.c.bf16 %v7138_v32, %v7126_v60  ;;  %6977 = vmatpush.bf16.msra.mxu2 %v11685_v7  ;;  %6996 = vmatpush.bf16.msrb.mxu3 %v12069_v59  ;;  %v11586_v60 = vld [vmem:[#allocation16 + $0x3b0] sm:$0xf0]  ;;  %v13918_v32 = vld [vmem:[#allocation16 + $0x684] sm:$0xf]  ;;  %v13721_v36 = vld [vmem:[#allocation16 + $0x54] sm:$0xf0] }
0x16ba   :  { %v6531_v56 = vpop.f32.mrf.mxu2  ;;  %v6550_v5 = vpop.f32.mrf.mxu3  ;;  %7015 = vmatpush.bf16.msrb.mxu0 %v11305_v39  ;;  %7034 = vmatpush.bf16.msrb.mxu1 %v11689_v31  ;;  %v11589_v7 = vor.u32 %v13822_v35, %v11586_v60  ;;  %v11973_v59 = vor.u32 %v13918_v32, %v11970_v14  ;;  %v6515_v39 = vadd.f32 %v16447_v24, %v16458_v23  ;;  %v11922_v44 = vld [vmem:[#allocation16 + $0x650] sm:$0xf0]  ;;  %v11544_v45 = vld [vmem:[#allocation16 + $0x328] sm:$0xf]  ;;  %v13817_v18 = vld [vmem:[#allocation16 + $0x354] sm:$0xf0] }
0x16bb   :  { %v6532_v30 = vadd.f32 %v6531_v56, %v6513_v4  ;;  %v11593_v31 = vor.u32 %v13829_v49, %v11592_v10  ;;  %v13997_v35 = vld [vmem:[#allocation16 + $0x8f4] sm:$0xf0]  ;;  %v13799_v60 = vld [vmem:[#allocation16 + $0x2cc] sm:$0xf]  ;;  %v11882_v10 = vld [vmem:[#allocation16 + $0x5f8] sm:$0xf0] }
0x16bc   :  { %v13991_v49 = vld [vmem:[#allocation16 + $0x8cc] sm:$0xf] }
0x16bd   :  { %v16491_v15 = vadd.f32 %v6550_v5, %v6532_v30  ;;  %v6571_v58 = vpop.f32.mrf.mxu0  ;;  %v6590_v25 = vpop.f32.mrf.mxu1  ;;  %6978 = vmatpush.bf16.msra.mxu2 %v11637_v33  ;;  %6997 = vmatpush.bf16.msrb.mxu3 %v12021_v43  ;;  %v11541_v33 = vor.u32 %v13810_v50, %v11538_v46  ;;  %v11925_v43 = vor.u32 %v13906_v61, %v11922_v44  ;;  %v12216_v50 = vld [vmem:[#allocation16 + $0x868] sm:$0xf]  ;;  %v13985_v46 = vld [vmem:[#allocation16 + $0x894] sm:$0xf0]  ;;  %v13787_v61 = vld [vmem:[#allocation16 + $0x26c] sm:$0xf] }
0x16be   :  { %v6572_v9 = vadd.f32 %v6571_v58, %v16454_v11  ;;  %7016 = vmatpush.bf16.msrb.mxu0 %v11257_v63  ;;  %7035 = vmatpush.bf16.msrb.mxu1 %v11641_v22  ;;  %v11209_v11 = vor.u32 %v13733_v2, %v11208_v12  ;;  %v11161_v63 = vor.u32 %v13721_v36, %v11160_v3  ;;  %v11498_v12 = vld [vmem:[#allocation16 + $0x2f8] sm:$0xf0]  ;;  %v13883_v36 = vld [vmem:[#allocation16 + $0x56c] sm:$0xf] }
0x16bf   :  { %v11545_v22 = vor.u32 %v13817_v18, %v11544_v45  ;;  %v7150_v32 = vmax.f32 %v16491_v15, 0.0  ;;  %v11501_v2 = vor.u32 %v13799_v60, %v11498_v12  ;;  %v12217_v44 = vor.u32 %v13985_v46, %v12216_v50  ;;  %v11450_v3 = vld [vmem:[#allocation16 + $0x298] sm:$0xf0]  ;;  %v12120_v50 = vld [vmem:[#allocation16 + $0x7a8] sm:$0xf] }
0x16c0   :  { %v16494_v4 = vadd.f32 %v6590_v25, %v6572_v9  ;;  %v16499_v25 = vperm.slane %v16451_v19, 3  ;;  %v12264_v9 = vld [vmem:[#allocation16 + $0x8c8] sm:$0xf]  ;;  %v11453_v45 = vor.u32 %v13787_v61, %v11450_v3  ;;  %v13961_v46 = vld [vmem:[#allocation16 + $0x7d4] sm:$0xf0] }
0x16c1   :  { %6979 = vmatpush.bf16.msra.mxu2 %v11589_v7  ;;  %6998 = vmatpush.bf16.msrb.mxu3 %v11973_v59  ;;  %v12265_v14 = vor.u32 %v13997_v35, %v12264_v9  ;;  %v13895_v59 = vld [vmem:[#allocation16 + $0x5cc] sm:$0xf]  ;;  %v11354_v3 = vld [vmem:[#allocation16 + $0x1d8] sm:$0xf0] }
0x16c2   :  { %v6533_v56 = vpop.f32.mrf.mxu2  ;;  %v6552_v5 = vpop.f32.mrf.mxu3  ;;  %7017 = vmatpush.bf16.msrb.mxu0 %v11209_v11  ;;  %7036 = vmatpush.bf16.msrb.mxu1 %v11593_v31  ;;  %v11885_v11 = vor.u32 %v13895_v59, %v11882_v10  ;;  %v11402_v59 = vld [vmem:[#allocation16 + $0x238] sm:$0xf0]  ;;  %v13763_v61 = vld [vmem:[#allocation16 + $0x1ac] sm:$0xf] }
0x16c3   :  { %v6534_v30 = vadd.f32 %v6533_v56, %v6515_v39  ;;  %v12266_v39 = vld [vmem:[#allocation16 + $0x8f8] sm:$0xf0] }
0x16c4   :  { %v12269_v15 = vor.u32 %v13991_v49, %v12266_v39  ;;  %v11786_v10 = vld [vmem:[#allocation16 + $0x538] sm:$0xf0] }
0x16c5   :  { %v6553_v24 = vadd.f32 %v6552_v5, %v6534_v30  ;;  %v6640_v23 = vpop.f32.mrf.mxu0  ;;  %v6659_v58 = vpop.f32.mrf.mxu1  ;;  %6980 = vmatpush.bf16.msra.mxu2 %v11541_v33  ;;  %6999 = vmatpush.bf16.msrb.mxu3 %v11925_v43  ;;  %v11834_v43 = vld [vmem:[#allocation16 + $0x598] sm:$0xf0] }
0x16c6   :  { %7018 = vmatpush.bf16.msrb.mxu0 %v11161_v63  ;;  %7037 = vmatpush.bf16.msrb.mxu1 %v11545_v22  ;;  %v11837_v18 = vor.u32 %v13883_v36, %v11834_v43  ;;  %v12218_v63 = vld [vmem:[#allocation16 + $0x898] sm:$0xf0]  ;;  %v13859_v36 = vld [vmem:[#allocation16 + $0x4ac] sm:$0xf] }
0x16c7   :  { %v7162_v7 = vmax.f32 %v6553_v24, 0.0  ;;  %6905 = vmatmul.bf16.vlgmr.msrb.gmra.mxu2 %v16331_v28  ;;  %6924 = vmatmul.bf16.vlgmr.msra.gmra.mxu3 %v16333_v17  ;;  %v13979_v24 = vld [vmem:[#allocation16 + $0x86c] sm:$0xf]  ;;  %v11738_v43 = vld [vmem:[#allocation16 + $0x4d8] sm:$0xf0] }
0x16c8   :  { %6943 = vmatmul.bf16.vlgmr.msra.gmra.mxu0 %v16335_v16  ;;  %6962 = vmatmul.bf16.vlgmr.msra.gmra.mxu1 %v16331_v28  ;;  %v12221_v60 = vor.u32 %v13979_v24, %v12218_v63  ;;  %v13955_v24 = vld [vmem:[#allocation16 + $0x7ac] sm:$0xf]  ;;  %v12122_v63 = vld [vmem:[#allocation16 + $0x7d8] sm:$0xf0] }
0x16c9   :  { %v16506_v31 = vpack.c.bf16 %v7162_v7, %v7150_v32  ;;  %7049 = vmatpush.bf16.msrb.mxu2 %v12265_v14  ;;  %7068 = vmatpush.bf16.msra.mxu3 %v11501_v2  ;;  %v13973_v32 = vld [vmem:[#allocation16 + $0x834] sm:$0xf0]  ;;  %v13775_v7 = vld [vmem:[#allocation16 + $0x20c] sm:$0xf] }
0x16ca   :  { %v6602_v56 = vpop.f32.mrf.mxu2  ;;  %v6621_v5 = vpop.f32.mrf.mxu3  ;;  %7087 = vmatpush.bf16.msra.mxu0 %v11885_v11  ;;  %7106 = vmatpush.bf16.msra.mxu1 %v12269_v15  ;;  %v13871_v2 = vld [vmem:[#allocation16 + $0x50c] sm:$0xf]  ;;  %v11405_v49 = vor.u32 %v13775_v7, %v11402_v59  ;;  %v11741_v7 = vor.u32 %v13859_v36, %v11738_v43  ;;  %v13949_v59 = vld [vmem:[#allocation16 + $0x774] sm:$0xf0] }
0x16cb   :  { %v16509_v30 = vadd.f32 %v6602_v56, %v16463_v27  ;;  %v6622_v33 = vadd.f32 %v6621_v5, %v16499_v25  ;;  %v12168_v27 = vld [vmem:[#allocation16 + $0x808] sm:$0xf]  ;;  %v11789_v39 = vor.u32 %v13871_v2, %v11786_v10  ;;  %v13967_v11 = vld [vmem:[#allocation16 + $0x80c] sm:$0xf] }
0x16cc   :  { %v12169_v12 = vor.u32 %v13973_v32, %v12168_v27  ;;  %v13751_v2 = vld [vmem:[#allocation16 + $0x14c] sm:$0xf] }
0x16cd   :  { %v6641_v22 = vadd.f32 %v6640_v23, %v6622_v33  ;;  %v6642_v9 = vpop.f32.mrf.mxu0  ;;  %v6661_v35 = vpop.f32.mrf.mxu1  ;;  %7050 = vmatpush.bf16.msrb.mxu2 %v12217_v44  ;;  %7069 = vmatpush.bf16.msra.mxu3 %v11453_v45  ;;  %v12170_v23 = vld [vmem:[#allocation16 + $0x838] sm:$0xf0]  ;;  %v12121_v44 = vor.u32 %v13961_v46, %v12120_v50  ;;  %v7127_v45 = vmax.f32 %v16509_v30, 0.0 }
0x16ce   :  { %7088 = vmatpush.bf16.msra.mxu0 %v11837_v18  ;;  %7107 = vmatpush.bf16.msra.mxu1 %v12221_v60  ;;  %v12173_v15 = vor.u32 %v13967_v11, %v12170_v23  ;;  %v11357_v18 = vor.u32 %v13763_v61, %v11354_v3  ;;  %v13847_v11 = vld [vmem:[#allocation16 + $0x44c] sm:$0xf] }
0x16cf   :  { %v16512_v14 = vadd.f32 %v6659_v58, %v6641_v22  ;;  %v13739_v3 = vld [vmem:[#allocation16 + $0xec] sm:$0xf] }
0x16d1   :  { %7051 = vmatpush.bf16.msrb.mxu2 %v12169_v12  ;;  %7070 = vmatpush.bf16.msra.mxu3 %v11405_v49  ;;  %v12125_v12 = vor.u32 %v13955_v24, %v12122_v63  ;;  %v13835_v24 = vld [vmem:[#allocation16 + $0x3ec] sm:$0xf]  ;;  %v11642_v63 = vld [vmem:[#allocation16 + $0x418] sm:$0xf0] }
0x16d2   :  { %v6604_v56 = vpop.f32.mrf.mxu2  ;;  %v6623_v5 = vpop.f32.mrf.mxu3  ;;  %7089 = vmatpush.bf16.msra.mxu0 %v11789_v39  ;;  %7108 = vmatpush.bf16.msra.mxu1 %v12173_v15  ;;  %v11306_v39 = vld [vmem:[#allocation16 + $0x178] sm:$0xf0]  ;;  %v13943_v15 = vld [vmem:[#allocation16 + $0x74c] sm:$0xf] }
0x16d3   :  { %v6605_v58 = vadd.f32 %v6604_v56, %v16475_v37  ;;  %v6624_v33 = vadd.f32 %v6623_v5, %v16499_v25  ;;  %v12072_v37 = vld [vmem:[#allocation16 + $0x748] sm:$0xf]  ;;  %v11309_v23 = vor.u32 %v13751_v2, %v11306_v39  ;;  %v12074_v56 = vld [vmem:[#allocation16 + $0x778] sm:$0xf0]  ;;  %v7128_v5 = vmax.f32 %v16512_v14, 0.0 }
0x16d4   :  { %v12073_v30 = vor.u32 %v13949_v59, %v12072_v37  ;;  %v12077_v46 = vor.u32 %v13943_v15, %v12074_v56  ;;  %v11645_v2 = vor.u32 %v13835_v24, %v11642_v63  ;;  %v13727_v39 = vld [vmem:[#allocation16 + $0x8c] sm:$0xf]  ;;  %v11594_v56 = vld [vmem:[#allocation16 + $0x3b8] sm:$0xf0] }
0x16d5   :  { %v7139_v22 = vmax.f32 %v6605_v58, 0.0  ;;  %v6643_v60 = vadd.f32 %v6642_v9, %v6624_v33  ;;  %v6645_v27 = vpop.f32.mrf.mxu0  ;;  %v6664_v32 = vpop.f32.mrf.mxu1  ;;  %7052 = vmatpush.bf16.msrb.mxu2 %v12121_v44  ;;  %7071 = vmatpush.bf16.msra.mxu3 %v11357_v18  ;;  %v11690_v9 = vld [vmem:[#allocation16 + $0x478] sm:$0xf0]  ;;  %v12024_v33 = vld [vmem:[#allocation16 + $0x6e8] sm:$0xf] }
0x16d6   :  { %7090 = vmatpush.bf16.msra.mxu0 %v11741_v7  ;;  %7109 = vmatpush.bf16.msra.mxu1 %v12125_v12  ;;  %v13937_v44 = vld [vmem:[#allocation16 + $0x714] sm:$0xf0]  ;;  %v11258_v18 = vld [vmem:[#allocation16 + $0x118] sm:$0xf0]  ;;  %v13823_v15 = vld [vmem:[#allocation16 + $0x38c] sm:$0xf] }
0x16d7   :  { %v16517_v10 = vpack.c.bf16 %v7139_v22, %v7127_v45  ;;  %v6662_v49 = vadd.f32 %v6661_v35, %v6643_v60  ;;  %6910 = vmatmul.bf16.gmra.mxu2 %v16389_v42  ;;  %6929 = vmatmul.bf16.gmra.mxu3 %v16391_v26  ;;  %v11693_v35 = vor.u32 %v13847_v11, %v11690_v9  ;;  %v13931_v60 = vld [vmem:[#allocation16 + $0x6ec] sm:$0xf]  ;;  %v12026_v7 = vld [vmem:[#allocation16 + $0x718] sm:$0xf0] }
0x16d8   :  { %6948 = vmatmul.bf16.gmra.mxu0 %v16393_v51  ;;  %6967 = vmatmul.bf16.gmra.mxu1 %v16389_v42  ;;  %v12025_v14 = vor.u32 %v13937_v44, %v12024_v33  ;;  %v11261_v22 = vor.u32 %v13739_v3, %v11258_v18  ;;  %v11928_v33 = vld [vmem:[#allocation16 + $0x628] sm:$0xf]  ;;  %v13913_v44 = vld [vmem:[#allocation16 + $0x654] sm:$0xf0]  ;;  %v13715_v3 = vld [vmem:[#allocation16 + $0x2c] sm:$0xf] }
0x16d9   :  { %v7140_v50 = vmax.f32 %v6662_v49, 0.0  ;;  %7053 = vmatpush.bf16.msrb.mxu2 %v12073_v30  ;;  %7072 = vmatpush.bf16.msra.mxu3 %v11309_v23  ;;  %v12029_v49 = vor.u32 %v13931_v60, %v12026_v7  ;;  %v13925_v30 = vld [vmem:[#allocation16 + $0x6b4] sm:$0xf0]  ;;  %v11210_v23 = vld [vmem:[#allocation16 + $0xb8] sm:$0xf0]  ;;  %v16536_v60 = vperm.slane %v16451_v19, 4 }
0x16da   :  { %v6607_v61 = vpop.f32.mrf.mxu2  ;;  %v6626_v58 = vpop.f32.mrf.mxu3  ;;  %7091 = vmatpush.bf16.msra.mxu0 %v11693_v35  ;;  %7110 = vmatpush.bf16.msra.mxu1 %v12077_v46  ;;  %v11597_v35 = vor.u32 %v13823_v15, %v11594_v56  ;;  %v11162_v18 = vld [vmem:[#allocation16 + $0x58] sm:$0xf0]  ;;  %v13811_v24 = vld [vmem:[#allocation16 + $0x32c] sm:$0xf]  ;;  %v14044_v56 = vld [vmem:[#allocation19 + $0x170] sm:$0xf0] }
0x16db   :  { %v16524_v36 = vpack.c.bf16 %v7140_v50, %v7128_v5  ;;  %v16527_v43 = vadd.f32 %v6607_v61, %v16485_v21  ;;  %v6627_v45 = vadd.f32 %v6626_v58, %v16499_v25  ;;  %v11976_v21 = vld [vmem:[#allocation16 + $0x688] sm:$0xf]  ;;  %v11213_v5 = vor.u32 %v13727_v39, %v11210_v23  ;;  %v13919_v50 = vld [vmem:[#allocation16 + $0x68c] sm:$0xf]  ;;  %v11546_v63 = vld [vmem:[#allocation16 + $0x358] sm:$0xf0] }
0x16dc   :  { %v11977_v9 = vor.u32 %v13925_v30, %v11976_v21  ;;  %v11165_v7 = vor.u32 %v13715_v3, %v11162_v18  ;;  %v14020_v23 = vld [vmem:[#allocation19 + $0xb0] sm:$0xf0] }
0x16dd   :  { %v6646_v12 = vadd.f32 %v6645_v27, %v6627_v45  ;;  %v6647_v37 = vpop.f32.mrf.mxu0  ;;  %v6666_v59 = vpop.f32.mrf.mxu1  ;;  %7054 = vmatpush.bf16.msrb.mxu2 %v12025_v14  ;;  %7073 = vmatpush.bf16.msra.mxu3 %v11261_v22  ;;  %v11978_v27 = vld [vmem:[#allocation16 + $0x6b8] sm:$0xf0]  ;;  %v11929_v14 = vor.u32 %v13913_v44, %v11928_v33  ;;  %v7151_v22 = vmax.f32 %v16527_v43, 0.0  ;;  %v12452_v43 = vld [vmem:[#allocation19 + $0x168] sm:$0xf] }
0x16de   :  { %7092 = vmatpush.bf16.msra.mxu0 %v11645_v2  ;;  %7111 = vmatpush.bf16.msra.mxu1 %v12029_v49  ;;  %v11981_v46 = vor.u32 %v13919_v50, %v11978_v27  ;;  %v11930_v2 = vld [vmem:[#allocation16 + $0x658] sm:$0xf0]  ;;  %v12453_v27 = vor.u32 %v14044_v56, %v12452_v43  ;;  %v12332_v43 = vld [vmem:[#allocation19 + $0x78] sm:$0xf] }
0x16df   :  { %v16530_v11 = vadd.f32 %v6664_v32, %v6646_v12  ;;  %v13907_v12 = vld [vmem:[#allocation16 + $0x62c] sm:$0xf] }
0x16e1   :  { %7055 = vmatpush.bf16.msrb.mxu2 %v11977_v9  ;;  %7074 = vmatpush.bf16.msra.mxu3 %v11213_v5  ;;  %v12356_v9 = vld [vmem:[#allocation19 + $0xa8] sm:$0xf]  ;;  %v14068_v5 = vld [vmem:[#allocation19 + $0x230] sm:$0xf0] }
0x16e2   :  { %v6609_v61 = vpop.f32.mrf.mxu2  ;;  %v6628_v58 = vpop.f32.mrf.mxu3  ;;  %7093 = vmatpush.bf16.msra.mxu0 %v11597_v35  ;;  %7112 = vmatpush.bf16.msra.mxu1 %v11981_v46  ;;  %v12357_v19 = vor.u32 %v14020_v23, %v12356_v9  ;;  %v12644_v46 = vld [vmem:[#allocation19 + $0x2e8] sm:$0xf] }
0x16e3   :  { %v6610_v32 = vadd.f32 %v6609_v61, %v16494_v4  ;;  %v6629_v45 = vadd.f32 %v6628_v58, %v16499_v25  ;;  %v11549_v4 = vor.u32 %v13811_v24, %v11546_v63  ;;  %v11933_v25 = vor.u32 %v13907_v12, %v11930_v2  ;;  %v14092_v61 = vld [vmem:[#allocation19 + $0x2f0] sm:$0xf0]  ;;  %v14041_v63 = vld [vmem:[#allocation19 + $0x158] sm:$0xf0] }
0x16e4   :  { %v12645_v58 = vor.u32 %v14092_v61, %v12644_v46 }
0x16e5   :  { %v7163_v49 = vmax.f32 %v6610_v32, 0.0  ;;  %v6648_v21 = vadd.f32 %v6647_v37, %v6629_v45  ;;  %v6716_v30 = vpop.f32.mrf.mxu0  ;;  %v16538_v39 = vpop.f32.mrf.mxu1  ;;  %7056 = vmatpush.bf16.msrb.mxu2 %v11929_v14  ;;  %7075 = vmatpush.bf16.msra.mxu3 %v11165_v7  ;;  %v12548_v37 = vld [vmem:[#allocation19 + $0x228] sm:$0xf]  ;;  %v12344_v32 = vld [vmem:[#allocation19 + $0x90] sm:$0xf] }
0x16e6   :  { %v12549_v35 = vor.u32 %v14068_v5, %v12548_v37  ;;  %7094 = vmatpush.bf16.msra.mxu0 %v11549_v4  ;;  %7113 = vmatpush.bf16.msra.mxu1 %v11933_v25  ;;  %v14017_v45 = vld [vmem:[#allocation19 + $0x98] sm:$0xf0]  ;;  %v12440_v14 = vld [vmem:[#allocation19 + $0x150] sm:$0xf]  ;;  %v14038_v5 = vld [vmem:[#allocation19 + $0x140] sm:$0xf0] }
0x16e7   :  { %v6667_v15 = vadd.f32 %v6666_v59, %v6648_v21  ;;  %6981 = vmatmul.bf16.vlgmr.msra.gmra.mxu2 %v16333_v17  ;;  %7000 = vmatmul.bf16.vlgmr.msrb.gmra.mxu3 %v16335_v16  ;;  %v16542_v50 = vpack.c.bf16 %v7163_v49, %v7151_v22  ;;  %v7152_v59 = vmax.f32 %v16530_v11, 0.0  ;;  %v12345_v24 = vor.u32 %v14017_v45, %v12344_v32  ;;  %v12536_v22 = vld [vmem:[#allocation19 + $0x210] sm:$0xf]  ;;  %v14065_v7 = vld [vmem:[#allocation19 + $0x218] sm:$0xf0] }
0x16e8   :  { %7019 = vmatmul.bf16.vlgmr.msrb.gmra.mxu0 %v16331_v28  ;;  %7038 = vmatmul.bf16.vlgmr.msrb.gmra.mxu1 %v16333_v17  ;;  %v12441_v12 = vor.u32 %v14041_v63, %v12440_v14  ;;  %v12537_v2 = vor.u32 %v14065_v7, %v12536_v22  ;;  %v12632_v49 = vld [vmem:[#allocation19 + $0x2d0] sm:$0xf]  ;;  %v14089_v21 = vld [vmem:[#allocation19 + $0x2d8] sm:$0xf0]  ;;  %v12320_v32 = vld [vmem:[#allocation19 + $0x60] sm:$0xf] }
0x16e9   :  { %v7164_v33 = vmax.f32 %v6667_v15, 0.0  ;;  %9125 = vmatpush.bf16.msra.mxu2 %v12357_v19  ;;  %9144 = vmatpush.bf16.msrb.mxu3 %v12453_v27  ;;  %v12633_v23 = vor.u32 %v14089_v21, %v12632_v49  ;;  %v14014_v15 = vld [vmem:[#allocation19 + $0x80] sm:$0xf0]  ;;  %v12428_v19 = vld [vmem:[#allocation19 + $0x138] sm:$0xf] }
0x16ea   :  { %v6678_v44 = vpop.f32.mrf.mxu2  ;;  %v6697_v3 = vpop.f32.mrf.mxu3  ;;  %9163 = vmatpush.bf16.msrb.mxu0 %v12549_v35  ;;  %9182 = vmatpush.bf16.msrb.mxu1 %v12645_v58  ;;  %v12333_v37 = vor.u32 %v14014_v15, %v12332_v43  ;;  %v12524_v27 = vld [vmem:[#allocation19 + $0x1f8] sm:$0xf]  ;;  %v14062_v35 = vld [vmem:[#allocation19 + $0x200] sm:$0xf0]  ;;  %v12429_v46 = vor.u32 %v14038_v5, %v12428_v19  ;;  %v14011_v45 = vld [vmem:[#allocation19 + $0x68] sm:$0xf0] }
0x16eb   :  { %v6679_v18 = vadd.f32 %v6678_v44, %v16536_v60  ;;  %v16548_v11 = vpack.c.bf16 %v7164_v33, %v7152_v59  ;;  %v12525_v61 = vor.u32 %v14062_v35, %v12524_v27  ;;  %v12620_v59 = vld [vmem:[#allocation19 + $0x2b8] sm:$0xf]  ;;  %v14086_v58 = vld [vmem:[#allocation19 + $0x2c0] sm:$0xf0]  ;;  %v12416_v14 = vld [vmem:[#allocation19 + $0x120] sm:$0xf] }
0x16ec   :  { %v12621_v33 = vor.u32 %v14086_v58, %v12620_v59  ;;  %v12512_v63 = vld [vmem:[#allocation19 + $0x1e0] sm:$0xf]  ;;  %v14059_v22 = vld [vmem:[#allocation19 + $0x1e8] sm:$0xf0]  ;;  %v12308_v15 = vld [vmem:[#allocation19 + $0x48] sm:$0xf] }
0x16ed   :  { %17264 = vst [vmem:[#allocation62_spill] sm:$0xff] %v16548_v11  ;;  %v6698_v4 = vadd.f32 %v6697_v3, %v6679_v18  ;;  %v6718_v25 = vpop.f32.mrf.mxu0  ;;  %v16550_v9 = vpop.f32.mrf.mxu1  ;;  %9126 = vmatpush.bf16.msra.mxu2 %v12345_v24  ;;  %9145 = vmatpush.bf16.msrb.mxu3 %v12441_v12  ;;  %v12321_v18 = vor.u32 %v14011_v45, %v12320_v32  ;;  %v14035_v24 = vld [vmem:[#allocation19 + $0x128] sm:$0xf0]  ;;  %v12608_v12 = vld [vmem:[#allocation19 + $0x2a0] sm:$0xf] }
0x16ee   :  { %9164 = vmatpush.bf16.msrb.mxu0 %v12537_v2  ;;  %9183 = vmatpush.bf16.msrb.mxu1 %v12633_v23  ;;  %v12417_v7 = vor.u32 %v14035_v24, %v12416_v14  ;;  %v14083_v2 = vld [vmem:[#allocation19 + $0x2a8] sm:$0xf0]  ;;  %v12513_v23 = vor.u32 %v14059_v22, %v12512_v63  ;;  %v14008_v19 = vld [vmem:[#allocation19 + $0x50] sm:$0xf0]  ;;  %v12596_v58 = vld [vmem:[#allocation19 + $0x288] sm:$0xf] }
0x16ef   :  { %v16552_v56 = vadd.f32 %v6716_v30, %v6698_v4  ;;  %v12609_v43 = vor.u32 %v14083_v2, %v12608_v12  ;;  %v12309_v27 = vor.u32 %v14008_v19, %v12308_v15  ;;  %v14032_v35 = vld [vmem:[#allocation19 + $0x110] sm:$0xf0]  ;;  %v12392_v24 = vld [vmem:[#allocation19 + $0xf0] sm:$0xf]  ;;  %v14029_v12 = vld [vmem:[#allocation19 + $0xf8] sm:$0xf0] }
0x16f0   :  { %v12488_v2 = vld [vmem:[#allocation19 + $0x1b0] sm:$0xf] }
0x16f1   :  { %9127 = vmatpush.bf16.msra.mxu2 %v12333_v37  ;;  %9146 = vmatpush.bf16.msrb.mxu3 %v12429_v46  ;;  %v12404_v37 = vld [vmem:[#allocation19 + $0x108] sm:$0xf] }
0x16f2   :  { %v6680_v44 = vpop.f32.mrf.mxu2  ;;  %v6699_v3 = vpop.f32.mrf.mxu3  ;;  %9165 = vmatpush.bf16.msrb.mxu0 %v12525_v61  ;;  %9184 = vmatpush.bf16.msrb.mxu1 %v12621_v33  ;;  %v12500_v46 = vld [vmem:[#allocation19 + $0x1c8] sm:$0xf]  ;;  %v14056_v61 = vld [vmem:[#allocation19 + $0x1d0] sm:$0xf0]  ;;  %v12405_v59 = vor.u32 %v14032_v35, %v12404_v37  ;;  %v12284_v35 = vld [vmem:[#allocation19 + $0x18] sm:$0xf] }
0x16f3   :  { %v6681_v30 = vadd.f32 %v6680_v44, %v16536_v60  ;;  %v14080_v33 = vld [vmem:[#allocation19 + $0x290] sm:$0xf0]  ;;  %v7129_v44 = vmax.f32 %v16552_v56, 0.0  ;;  %v14053_v56 = vld [vmem:[#allocation19 + $0x1b8] sm:$0xf0] }
0x16f4   :  { %v12597_v32 = vor.u32 %v14080_v33, %v12596_v58  ;;  %v14026_v33 = vld [vmem:[#allocation19 + $0xe0] sm:$0xf0] }
0x16f5   :  { %v6700_v49 = vadd.f32 %v6699_v3, %v6681_v30  ;;  %v6721_v21 = vpop.f32.mrf.mxu0  ;;  %v16555_v4 = vpop.f32.mrf.mxu1  ;;  %9128 = vmatpush.bf16.msra.mxu2 %v12321_v18  ;;  %9147 = vmatpush.bf16.msrb.mxu3 %v12417_v7  ;;  %v12296_v30 = vld [vmem:[#allocation19 + $0x30] sm:$0xf]  ;;  %v14005_v18 = vld [vmem:[#allocation19 + $0x38] sm:$0xf0] }
0x16f6   :  { %9166 = vmatpush.bf16.msrb.mxu0 %v12513_v23  ;;  %9185 = vmatpush.bf16.msrb.mxu1 %v12609_v43  ;;  %v12297_v7 = vor.u32 %v14005_v18, %v12296_v30  ;;  %v12584_v23 = vld [vmem:[#allocation19 + $0x270] sm:$0xf]  ;;  %v14077_v43 = vld [vmem:[#allocation19 + $0x278] sm:$0xf0]  ;;  %v14074_v30 = vld [vmem:[#allocation19 + $0x260] sm:$0xf0] }
0x16f7   :  { %v6719_v5 = vadd.f32 %v6718_v25, %v6700_v49  ;;  %6986 = vmatmul.bf16.gmra.mxu2 %v16391_v26  ;;  %7005 = vmatmul.bf16.gmra.mxu3 %v16393_v51  ;;  %v12501_v25 = vor.u32 %v14056_v61, %v12500_v46  ;;  %v12393_v49 = vor.u32 %v14029_v12, %v12392_v24  ;;  %v14002_v46 = vld [vmem:[#allocation19 + $0x20] sm:$0xf0]  ;;  %v12380_v61 = vld [vmem:[#allocation19 + $0xd8] sm:$0xf]  ;;  %v12368_v12 = vld [vmem:[#allocation19 + $0xc0] sm:$0xf] }
0x16f8   :  { %7024 = vmatmul.bf16.gmra.mxu0 %v16389_v42  ;;  %7043 = vmatmul.bf16.gmra.mxu1 %v16391_v26  ;;  %v12285_v58 = vor.u32 %v14002_v46, %v12284_v35  ;;  %v14071_v35 = vld [vmem:[#allocation19 + $0x248] sm:$0xf0] }
0x16f9   :  { %v7141_v3 = vmax.f32 %v6719_v5, 0.0  ;;  %9129 = vmatpush.bf16.msra.mxu2 %v12309_v27  ;;  %9148 = vmatpush.bf16.msrb.mxu3 %v12405_v59  ;;  %v12489_v5 = vor.u32 %v14053_v56, %v12488_v2  ;;  %v12585_v27 = vor.u32 %v14077_v43, %v12584_v23  ;;  %v14023_v56 = vld [vmem:[#allocation19 + $0xc8] sm:$0xf0] }
0x16fa   :  { %v6683_v45 = vpop.f32.mrf.mxu2  ;;  %v6702_v14 = vpop.f32.mrf.mxu3  ;;  %9167 = vmatpush.bf16.msrb.mxu0 %v12501_v25  ;;  %9186 = vmatpush.bf16.msrb.mxu1 %v12597_v32  ;;  %v14047_v23 = vld [vmem:[#allocation19 + $0x188] sm:$0xf0]  ;;  %v12369_v43 = vor.u32 %v14023_v56, %v12368_v12 }
0x16fb   :  { %v16562_v63 = vpack.c.bf16 %v7141_v3, %v7129_v44  ;;  %v6684_v22 = vadd.f32 %v6683_v45, %v16536_v60  ;;  %v12476_v44 = vld [vmem:[#allocation19 + $0x198] sm:$0xf]  ;;  %v14050_v3 = vld [vmem:[#allocation19 + $0x1a0] sm:$0xf0]  ;;  %v12381_v45 = vor.u32 %v14026_v33, %v12380_v61  ;;  %v12740_v33 = vld [vmem:[#allocation19 + $0x3a8] sm:$0xf] }
0x16fc   :  { %v12477_v25 = vor.u32 %v14050_v3, %v12476_v44  ;;  %v12836_v44 = vld [vmem:[#allocation19 + $0x468] sm:$0xf] }
0x16fd   :  { %v6703_v15 = vadd.f32 %v6702_v14, %v6684_v22  ;;  %v6723_v19 = vpop.f32.mrf.mxu0  ;;  %v16565_v37 = vpop.f32.mrf.mxu1  ;;  %9130 = vmatpush.bf16.msra.mxu2 %v12297_v7  ;;  %9149 = vmatpush.bf16.msrb.mxu3 %v12393_v49  ;;  %v12572_v14 = vld [vmem:[#allocation19 + $0x258] sm:$0xf]  ;;  %v12272_v22 = vld [vmem:[#allocation19] sm:$0xf]  ;;  %v13999_v7 = vld [vmem:[#allocation19 + $0x8] sm:$0xf0] }
0x16fe   :  { %9168 = vmatpush.bf16.msrb.mxu0 %v12489_v5  ;;  %9187 = vmatpush.bf16.msrb.mxu1 %v12585_v27  ;;  %v12573_v32 = vor.u32 %v14074_v30, %v12572_v14  ;;  %v12273_v2 = vor.u32 %v13999_v7, %v12272_v22  ;;  %v12464_v49 = vld [vmem:[#allocation19 + $0x180] sm:$0xf]  ;;  %v14140_v14 = vld [vmem:[#allocation19 + $0x470] sm:$0xf0]  ;;  %v12932_v30 = vld [vmem:[#allocation19 + $0x528] sm:$0xf] }
0x16ff   :  { %v16567_v59 = vadd.f32 %v6721_v21, %v6703_v15  ;;  %v12560_v15 = vld [vmem:[#allocation19 + $0x240] sm:$0xf]  ;;  %v12465_v61 = vor.u32 %v14047_v23, %v12464_v49  ;;  %v14188_v22 = vld [vmem:[#allocation19 + $0x5f0] sm:$0xf0]  ;;  %v12824_v23 = vld [vmem:[#allocation19 + $0x450] sm:$0xf] }
0x1700   :  { %v16578_v7 = vld [vmem:[#allocation17] sm:$0xff] }
0x1701   :  { %9131 = vmatpush.bf16.msra.mxu2 %v12285_v58  ;;  %9150 = vmatpush.bf16.msrb.mxu3 %v12381_v45  ;;  %v12561_v58 = vor.u32 %v14071_v35, %v12560_v15  ;;  %v7153_v12 = vmax.f32 %v16567_v59, 0.0  ;;  %v12920_v15 = vld [vmem:[#allocation19 + $0x510] sm:$0xf]  ;;  %v14161_v59 = vld [vmem:[#allocation19 + $0x518] sm:$0xf0] }
0x1702   :  { %v6685_v18 = vpop.f32.mrf.mxu2  ;;  %v6704_v24 = vpop.f32.mrf.mxu3  ;;  %9169 = vmatpush.bf16.msrb.mxu0 %v12477_v25  ;;  %9188 = vmatpush.bf16.msrb.mxu1 %v12573_v32  ;;  %v12837_v25 = vor.u32 %v14140_v14, %v12836_v44  ;;  %v12716_v14 = vld [vmem:[#allocation19 + $0x378] sm:$0xf] }
0x1703   :  { %v6686_v21 = vadd.f32 %v6685_v18, %v16536_v60  ;;  %v14116_v60 = vld [vmem:[#allocation19 + $0x3b0] sm:$0xf0] }
0x1704   :  { %v12741_v45 = vor.u32 %v14116_v60, %v12740_v33  ;;  %v14164_v18 = vld [vmem:[#allocation19 + $0x530] sm:$0xf0]  ;;  %v13016_v33 = vld [vmem:[#allocation19 + $0x5d0] sm:$0xf] }
0x1705   :  { %v6705_v5 = vadd.f32 %v6704_v24, %v6686_v21  ;;  %v16570_v27 = vpop.f32.mrf.mxu0  ;;  %v16572_v46 = vpop.f32.mrf.mxu1  ;;  %9132 = vmatpush.bf16.msra.mxu2 %v12273_v2  ;;  %9151 = vmatpush.bf16.msrb.mxu3 %v12369_v43  ;;  %v12933_v32 = vor.u32 %v14164_v18, %v12932_v30  ;;  %v13028_v24 = vld [vmem:[#allocation19 + $0x5e8] sm:$0xf]  ;;  %v14137_v43 = vld [vmem:[#allocation19 + $0x458] sm:$0xf0]  ;;  %v14110_v30 = vld [vmem:[#allocation19 + $0x380] sm:$0xf0] }
0x1706   :  { %9170 = vmatpush.bf16.msrb.mxu0 %v12465_v61  ;;  %9189 = vmatpush.bf16.msrb.mxu1 %v12561_v58  ;;  %v13029_v21 = vor.u32 %v14188_v22, %v13028_v24  ;;  %v14185_v61 = vld [vmem:[#allocation19 + $0x5d8] sm:$0xf0]  ;;  %v12812_v18 = vld [vmem:[#allocation19 + $0x438] sm:$0xf]  ;;  %v14134_v24 = vld [vmem:[#allocation19 + $0x440] sm:$0xf0] }
0x1707   :  { %v6724_v3 = vadd.f32 %v6723_v19, %v6705_v5  ;;  %7057 = vmatmul.bf16.vlgmr.msrb.gmra.mxu2 %v16335_v16  ;;  %7076 = vmatmul.bf16.vlgmr.msra.gmra.mxu3 %v16331_v28  ;;  %v16581_v19 = vperm.slane %v16578_v7, 5  ;;  %v12825_v5 = vor.u32 %v14137_v43, %v12824_v23  ;;  %v12908_v22 = vld [vmem:[#allocation19 + $0x4f8] sm:$0xf] }
0x1708   :  { %7095 = vmatmul.bf16.vlgmr.msra.gmra.mxu0 %v16333_v17  ;;  %7114 = vmatmul.bf16.vlgmr.msra.gmra.mxu1 %v16335_v16  ;;  %v12728_v17 = vld [vmem:[#allocation19 + $0x390] sm:$0xf]  ;;  %v14113_v16 = vld [vmem:[#allocation19 + $0x398] sm:$0xf0] }
0x1709   :  { %v7165_v28 = vmax.f32 %v6724_v3, 0.0  ;;  %9201 = vmatpush.bf16.msrb.mxu2 %v12741_v45  ;;  %9220 = vmatpush.bf16.msra.mxu3 %v12837_v25  ;;  %v12729_v49 = vor.u32 %v14113_v16, %v12728_v17  ;;  %v6736_v58 = vadd.f32 %v16538_v39, %v16581_v19  ;;  %v12921_v3 = vor.u32 %v14161_v59, %v12920_v15  ;;  %v13004_v39 = vld [vmem:[#allocation19 + $0x5b8] sm:$0xf]  ;;  %v12704_v15 = vld [vmem:[#allocation19 + $0x360] sm:$0xf] }
0x170a   :  { %v6754_v2 = vpop.f32.mrf.mxu2  ;;  %v6773_v56 = vpop.f32.mrf.mxu3  ;;  %9239 = vmatpush.bf16.msra.mxu0 %v12933_v32  ;;  %9258 = vmatpush.bf16.msra.mxu1 %v13029_v21  ;;  %v13017_v45 = vor.u32 %v14185_v61, %v13016_v33  ;;  %v12717_v32 = vor.u32 %v14110_v30, %v12716_v14  ;;  %v14182_v21 = vld [vmem:[#allocation19 + $0x5c0] sm:$0xf0]  ;;  %v6738_v17 = vadd.f32 %v16550_v9, %v16581_v19  ;;  %v12992_v30 = vld [vmem:[#allocation19 + $0x5a0] sm:$0xf] }
0x170b   :  { %v16584_v35 = vpack.c.bf16 %v7165_v28, %v7153_v12  ;;  %v6755_v25 = vadd.f32 %v6754_v2, %v6736_v58  ;;  %v12813_v12 = vor.u32 %v14134_v24, %v12812_v18  ;;  %v14158_v28 = vld [vmem:[#allocation19 + $0x500] sm:$0xf0]  ;;  %v13005_v23 = vor.u32 %v14182_v21, %v13004_v39  ;;  %v14107_v2 = vld [vmem:[#allocation19 + $0x368] sm:$0xf0]  ;;  %v12788_v39 = vld [vmem:[#allocation19 + $0x408] sm:$0xf] }
0x170c   :  { %v12909_v16 = vor.u32 %v14158_v28, %v12908_v22  ;;  %v12705_v61 = vor.u32 %v14107_v2, %v12704_v15  ;;  %v14131_v58 = vld [vmem:[#allocation19 + $0x428] sm:$0xf0]  ;;  %v6453_v9 = vadd.f32 %v16436_v57, %v16387_v8  ;;  %v14104_v28 = vld [vmem:[#allocation19 + $0x350] sm:$0xf0]  ;;  %v12980_v15 = vld [vmem:[#allocation19 + $0x588] sm:$0xf] }
0x170d   :  { %v16588_v60 = vpop.f32.mrf.mxu0  ;;  %v16590_v44 = vpop.f32.mrf.mxu1  ;;  %9202 = vmatpush.bf16.msrb.mxu2 %v12729_v49  ;;  %9221 = vmatpush.bf16.msra.mxu3 %v12825_v5  ;;  %v12800_v5 = vld [vmem:[#allocation19 + $0x420] sm:$0xf]  ;;  %v6774_v59 = vadd.f32 %v6773_v56, %v6755_v25  ;;  %v14179_v18 = vld [vmem:[#allocation19 + $0x5a8] sm:$0xf0]  ;;  %v12692_v25 = vld [vmem:[#allocation19 + $0x348] sm:$0xf] }
0x170e   :  { %9240 = vmatpush.bf16.msra.mxu0 %v12921_v3  ;;  %9259 = vmatpush.bf16.msra.mxu1 %v13017_v45  ;;  %v12896_v3 = vld [vmem:[#allocation19 + $0x4e0] sm:$0xf]  ;;  %v14155_v45 = vld [vmem:[#allocation19 + $0x4e8] sm:$0xf0]  ;;  %v12801_v14 = vor.u32 %v14131_v58, %v12800_v5  ;;  %v12993_v56 = vor.u32 %v14179_v18, %v12992_v30  ;;  %v12693_v8 = vor.u32 %v14104_v28, %v12692_v25  ;;  %v14128_v57 = vld [vmem:[#allocation19 + $0x410] sm:$0xf0] }
0x170f   :  { %v7130_v21 = vmax.f32 %v6774_v59, 0.0  ;;  %v14176_v2 = vld [vmem:[#allocation19 + $0x590] sm:$0xf0]  ;;  %v12680_v58 = vld [vmem:[#allocation19 + $0x330] sm:$0xf] }
0x1710   :  { %v12968_v18 = vld [vmem:[#allocation19 + $0x570] sm:$0xf] }
0x1711   :  { %9203 = vmatpush.bf16.msrb.mxu2 %v12717_v32  ;;  %9222 = vmatpush.bf16.msra.mxu3 %v12813_v12  ;;  %v12897_v12 = vor.u32 %v14155_v45, %v12896_v3  ;;  %v12776_v3 = vld [vmem:[#allocation19 + $0x3f0] sm:$0xf]  ;;  %v14125_v45 = vld [vmem:[#allocation19 + $0x3f8] sm:$0xf0] }
0x1712   :  { %v6756_v49 = vpop.f32.mrf.mxu2  ;;  %v6775_v43 = vpop.f32.mrf.mxu3  ;;  %9241 = vmatpush.bf16.msra.mxu0 %v12909_v16  ;;  %9260 = vmatpush.bf16.msra.mxu1 %v13005_v23  ;;  %v12884_v16 = vld [vmem:[#allocation19 + $0x4c8] sm:$0xf]  ;;  %v6472_v23 = vadd.f32 %v16438_v62, %v6453_v9  ;;  %v14101_v62 = vld [vmem:[#allocation19 + $0x338] sm:$0xf0]  ;;  %v12777_v30 = vor.u32 %v14125_v45, %v12776_v3  ;;  %v12752_v45 = vld [vmem:[#allocation19 + $0x3c0] sm:$0xf] }
0x1713   :  { %v6757_v33 = vadd.f32 %v6756_v49, %v6738_v17  ;;  %v12789_v49 = vor.u32 %v14128_v57, %v12788_v39  ;;  %v14149_v9 = vld [vmem:[#allocation19 + $0x4b8] sm:$0xf0] }
0x1715   :  { %v6776_v24 = vadd.f32 %v6775_v43, %v6757_v33  ;;  %v16596_v32 = vpop.f32.mrf.mxu0  ;;  %v16598_v22 = vpop.f32.mrf.mxu1  ;;  %9204 = vmatpush.bf16.msrb.mxu2 %v12705_v61  ;;  %9223 = vmatpush.bf16.msra.mxu3 %v12801_v14  ;;  %v14152_v43 = vld [vmem:[#allocation19 + $0x4d0] sm:$0xf0]  ;;  %v12981_v33 = vor.u32 %v14176_v2, %v12980_v15  ;;  %v6491_v14 = vadd.f32 %v16432_v20, %v6472_v23  ;;  %v12860_v23 = vld [vmem:[#allocation19 + $0x498] sm:$0xf]  ;;  %v14170_v15 = vld [vmem:[#allocation19 + $0x560] sm:$0xf0] }
0x1716   :  { %9242 = vmatpush.bf16.msra.mxu0 %v12897_v12  ;;  %9261 = vmatpush.bf16.msra.mxu1 %v12993_v56  ;;  %v12885_v59 = vor.u32 %v14152_v43, %v12884_v16  ;;  %v6741_v12 = vadd.f32 %v16555_v4, %v16581_v19  ;;  %v14122_v16 = vld [vmem:[#allocation19 + $0x3e0] sm:$0xf0]  ;;  %v12956_v4 = vld [vmem:[#allocation19 + $0x558] sm:$0xf] }
0x1717   :  { %v7142_v17 = vmax.f32 %v6776_v24, 0.0  ;;  %7062 = vmatmul.bf16.gmra.mxu2 %v16393_v51  ;;  %7081 = vmatmul.bf16.gmra.mxu3 %v16389_v42  ;;  %v14173_v24 = vld [vmem:[#allocation19 + $0x578] sm:$0xf0]  ;;  %v14146_v43 = vld [vmem:[#allocation19 + $0x4a0] sm:$0xf0]  ;;  %v7137_v2 = vmax.f32 %v6491_v14, 0.0 }
0x1718   :  { %7100 = vmatmul.bf16.gmra.mxu0 %v16391_v26  ;;  %7119 = vmatmul.bf16.gmra.mxu1 %v16393_v51  ;;  %v12681_v26 = vor.u32 %v14101_v62, %v12680_v58  ;;  %v12872_v51 = vld [vmem:[#allocation19 + $0x4b0] sm:$0xf]  ;;  %v12969_v39 = vor.u32 %v14173_v24, %v12968_v18  ;;  %v12957_v58 = vor.u32 %v14170_v15, %v12956_v4  ;;  %v14119_v14 = vld [vmem:[#allocation19 + $0x3c8] sm:$0xf0]  ;;  %v12848_v24 = vld [vmem:[#allocation19 + $0x480] sm:$0xf] }
0x1719   :  { %v16605_v5 = vpack.c.bf16 %v7142_v17, %v7130_v21  ;;  %9205 = vmatpush.bf16.msrb.mxu2 %v12693_v8  ;;  %9224 = vmatpush.bf16.msra.mxu3 %v12789_v49  ;;  %v12873_v28 = vor.u32 %v14149_v9, %v12872_v51  ;;  %v12668_v21 = vld [vmem:[#allocation19 + $0x318] sm:$0xf]  ;;  %v14098_v17 = vld [vmem:[#allocation19 + $0x320] sm:$0xf0]  ;;  %v7125_v51 = vmax.f32 %v16400_v40, 0.0 }
0x171a   :  { %v6759_v42 = vpop.f32.mrf.mxu2  ;;  %v6778_v61 = vpop.f32.mrf.mxu3  ;;  %9243 = vmatpush.bf16.msra.mxu0 %v12885_v59  ;;  %9262 = vmatpush.bf16.msra.mxu1 %v12981_v33  ;;  %v12764_v8 = vld [vmem:[#allocation19 + $0x3d8] sm:$0xf]  ;;  %v12669_v57 = vor.u32 %v14098_v17, %v12668_v21  ;;  %v6743_v59 = vadd.f32 %v16565_v37, %v16581_v19  ;;  %v12861_v33 = vor.u32 %v14146_v43, %v12860_v23  ;;  %v14143_v37 = vld [vmem:[#allocation19 + $0x488] sm:$0xf0]  ;;  %v12944_v19 = vld [vmem:[#allocation19 + $0x540] sm:$0xf] }
0x171b   :  { %v6760_v20 = vadd.f32 %v6759_v42, %v6741_v12  ;;  %v12765_v49 = vor.u32 %v14122_v16, %v12764_v8  ;;  %v12656_v42 = vld [vmem:[#allocation19 + $0x300] sm:$0xf]  ;;  %v12753_v12 = vor.u32 %v14119_v14, %v12752_v45  ;;  %v12849_v8 = vor.u32 %v14143_v37, %v12848_v24 }
0x171c   :  { %v16633_v24 = vperm.slane %v16578_v7, 6 }
0x171d   :  { %v16610_v56 = vpop.f32.mrf.mxu0  ;;  %v16612_v25 = vpop.f32.mrf.mxu1  ;;  %9206 = vmatpush.bf16.msrb.mxu2 %v12681_v26  ;;  %9225 = vmatpush.bf16.msra.mxu3 %v12777_v30  ;;  %v14095_v26 = vld [vmem:[#allocation19 + $0x308] sm:$0xf0]  ;;  %v6779_v9 = vadd.f32 %v6778_v61, %v6760_v20  ;;  %v13124_v61 = vld [vmem:[#allocation19 + $0x6a8] sm:$0xf]  ;;  %v14212_v20 = vld [vmem:[#allocation19 + $0x6b0] sm:$0xf0] }
0x171e   :  { %9244 = vmatpush.bf16.msra.mxu0 %v12873_v28  ;;  %9263 = vmatpush.bf16.msra.mxu1 %v12969_v39  ;;  %v12657_v18 = vor.u32 %v14095_v26, %v12656_v42  ;;  %v16617_v28 = vpack.c.bf16 %v7137_v2, %v7125_v51  ;;  %v13112_v2 = vld [vmem:[#allocation19 + $0x690] sm:$0xf]  ;;  %v14206_v42 = vld [vmem:[#allocation19 + $0x680] sm:$0xf0] }
0x171f   :  { %v7154_v16 = vmax.f32 %v6779_v9, 0.0  ;;  %v13088_v9 = vld [vmem:[#allocation19 + $0x660] sm:$0xf] }
0x1721   :  { %9207 = vmatpush.bf16.msrb.mxu2 %v12669_v57  ;;  %9226 = vmatpush.bf16.msra.mxu3 %v12765_v49  ;;  %v14167_v57 = vld [vmem:[#allocation19 + $0x548] sm:$0xf0]  ;;  %v13125_v49 = vor.u32 %v14212_v20, %v13124_v61  ;;  %v6793_v20 = vadd.f32 %v16570_v27, %v16633_v24 }
0x1722   :  { %v6761_v62 = vpop.f32.mrf.mxu2  ;;  %v6780_v3 = vpop.f32.mrf.mxu3  ;;  %9245 = vmatpush.bf16.msra.mxu0 %v12861_v33  ;;  %9264 = vmatpush.bf16.msra.mxu1 %v12957_v58  ;;  %v12945_v40 = vor.u32 %v14167_v57, %v12944_v19  ;;  %v6795_v57 = vadd.f32 %v16588_v60, %v16633_v24  ;;  %v13064_v60 = vld [vmem:[#allocation19 + $0x630] sm:$0xf] }
0x1723   :  { %v6762_v30 = vadd.f32 %v6761_v62, %v6743_v59  ;;  %v14209_v59 = vld [vmem:[#allocation19 + $0x698] sm:$0xf0]  ;;  %v6812_v27 = vadd.f32 %v16572_v46, %v6793_v20  ;;  %v13196_v46 = vld [vmem:[#allocation19 + $0x738] sm:$0xf] }
0x1724   :  { %v13113_v33 = vor.u32 %v14209_v59, %v13112_v2  ;;  %v13220_v2 = vld [vmem:[#allocation19 + $0x768] sm:$0xf]  ;;  %v6814_v59 = vadd.f32 %v16590_v44, %v6795_v57 }
0x1725   :  { %v6781_v39 = vadd.f32 %v6780_v3, %v6762_v30  ;;  %v16619_v21 = vpop.f32.mrf.mxu0  ;;  %v16621_v17 = vpop.f32.mrf.mxu1  ;;  %9208 = vmatpush.bf16.msrb.mxu2 %v12657_v18  ;;  %9227 = vmatpush.bf16.msra.mxu3 %v12753_v12  ;;  %v13100_v3 = vld [vmem:[#allocation19 + $0x678] sm:$0xf]  ;;  %v14203_v30 = vld [vmem:[#allocation19 + $0x668] sm:$0xf0]  ;;  %v16630_v18 = vperm.slane %v16578_v7, 7 }
0x1726   :  { %9246 = vmatpush.bf16.msra.mxu0 %v12849_v8  ;;  %9265 = vmatpush.bf16.msra.mxu1 %v12945_v40  ;;  %v13101_v26 = vor.u32 %v14206_v42, %v13100_v3  ;;  %v13089_v14 = vor.u32 %v14203_v30, %v13088_v9  ;;  %v14200_v8 = vld [vmem:[#allocation19 + $0x650] sm:$0xf0]  ;;  %v13052_v30 = vld [vmem:[#allocation19 + $0x618] sm:$0xf] }
0x1727   :  { %v7166_v23 = vmax.f32 %v6781_v39, 0.0  ;;  %9133 = vmatmul.bf16.vlgmr.msra.gmra.mxu2 %v16617_v28  ;;  %9152 = vmatmul.bf16.vlgmr.msrb.gmra.mxu3 %v16489_v6  ;;  %v13076_v39 = vld [vmem:[#allocation19 + $0x648] sm:$0xf]  ;;  %v14236_v3 = vld [vmem:[#allocation19 + $0x770] sm:$0xf0] }
0x1728   :  { %9171 = vmatmul.bf16.vlgmr.msrb.gmra.mxu0 %v16517_v10  ;;  %9190 = vmatmul.bf16.vlgmr.msrb.gmra.mxu1 %v16524_v36  ;;  %v13077_v40 = vor.u32 %v14200_v8, %v13076_v39  ;;  %v13221_v42 = vor.u32 %v14236_v3, %v13220_v2  ;;  %v14233_v8 = vld [vmem:[#allocation19 + $0x758] sm:$0xf0] }
0x1729   :  { %v16627_v43 = vpack.c.bf16 %v7166_v23, %v7154_v16  ;;  %9277 = vmatpush.bf16.msra.mxu2 %v13125_v49  ;;  %v14197_v49 = vld [vmem:[#allocation19 + $0x638] sm:$0xf0] }
0x172a   :  { %v6830_v4 = vpop.f32.mrf.mxu2  ;;  %v6849_v15 = vpop.f32.mrf.mxu3  ;;  %9296 = vmatpush.bf16.msrb.mxu3 %v13221_v42 }
0x172b   :  { %v6850_v7 = vadd.f32 %v6849_v15, %v16630_v18 }
0x172d   :  { %v6870_v58 = vpop.f32.mrf.mxu0  ;;  %v6889_v62 = vpop.f32.mrf.mxu1  ;;  %9278 = vmatpush.bf16.msra.mxu2 %v13113_v33  ;;  %v13065_v33 = vor.u32 %v14197_v49, %v13064_v60  ;;  %v6869_v15 = vadd.f32 %v16619_v21, %v6850_v7  ;;  %v14230_v49 = vld [vmem:[#allocation19 + $0x740] sm:$0xf0] }
0x172f   :  { %v6888_v44 = vadd.f32 %v16621_v17, %v6869_v15 }
0x1731   :  { %9279 = vmatpush.bf16.msra.mxu2 %v13101_v26 }
0x1732   :  { %v6832_v45 = vpop.f32.mrf.mxu2  ;;  %v6851_v51 = vpop.f32.mrf.mxu3 }
0x1733   :  { %v6852_v12 = vadd.f32 %v6851_v51, %v16630_v18  ;;  %v6833_v26 = vadd.f32 %v6832_v45, %v6814_v59  ;;  %v7132_v59 = vmax.f32 %v6888_v44, 0.0  ;;  %v6798_v44 = vadd.f32 %v16596_v32, %v16633_v24 }
0x1735   :  { %v16636_v37 = vpop.f32.mrf.mxu0  ;;  %v16638_v19 = vpop.f32.mrf.mxu1  ;;  %9280 = vmatpush.bf16.msra.mxu2 %v13089_v14  ;;  %v6871_v61 = vadd.f32 %v6870_v58, %v6852_v12  ;;  %v14194_v14 = vld [vmem:[#allocation19 + $0x620] sm:$0xf0]  ;;  %v13208_v12 = vld [vmem:[#allocation19 + $0x750] sm:$0xf]  ;;  %v7143_v60 = vmax.f32 %v6833_v26, 0.0 }
0x1736   :  { %v13053_v39 = vor.u32 %v14194_v14, %v13052_v30  ;;  %v13209_v57 = vor.u32 %v14233_v8, %v13208_v12  ;;  %v13184_v26 = vld [vmem:[#allocation19 + $0x720] sm:$0xf]  ;;  %v6800_v30 = vadd.f32 %v16610_v56, %v16633_v24  ;;  %v12358_v12 = vld [vmem:[#allocation19 + $0xb4] sm:$0xf0]  ;;  %v13172_v56 = vld [vmem:[#allocation19 + $0x708] sm:$0xf]  ;;  %v6817_v24 = vadd.f32 %v16598_v22, %v6798_v44 }
0x1737   :  { %9138 = vmatmul.bf16.gmra.mxu2 %v16470_v48  ;;  %9157 = vmatmul.bf16.gmra.mxu3 %v16506_v31  ;;  %v6890_v51 = vadd.f32 %v6889_v62, %v6871_v61  ;;  %v13040_v62 = vld [vmem:[#allocation19 + $0x600] sm:$0xf]  ;;  %v14191_v61 = vld [vmem:[#allocation19 + $0x608] sm:$0xf0]  ;;  %v13148_v22 = vld [vmem:[#allocation19 + $0x6d8] sm:$0xf] }
0x1738   :  { %9176 = vmatmul.bf16.gmra.mxu0 %v16542_v50  ;;  %9195 = vmatmul.bf16.gmra.mxu1 %v16548_v11  ;;  %v13041_v20 = vor.u32 %v14191_v61, %v13040_v62  ;;  %v6819_v62 = vadd.f32 %v16612_v25, %v6800_v30  ;;  %v12334_v25 = vld [vmem:[#allocation19 + $0x84] sm:$0xf0]  ;;  %v12322_v44 = vld [vmem:[#allocation19 + $0x6c] sm:$0xf0] }
0x1739   :  { %9281 = vmatpush.bf16.msra.mxu2 %v13077_v40  ;;  %v6831_v40 = vadd.f32 %v6830_v4, %v6812_v27  ;;  %v7144_v21 = vmax.f32 %v6890_v51, 0.0  ;;  %9297 = vmatpush.bf16.msrb.mxu3 %v13209_v57  ;;  %v14227_v51 = vld [vmem:[#allocation19 + $0x728] sm:$0xf0] }
0x173a   :  { %v16649_v16 = vpop.f32.mrf.mxu2  ;;  %v6854_v23 = vpop.f32.mrf.mxu3  ;;  %v14019_v27 = vld [vmem:[#allocation19 + $0xac] sm:$0xf]  ;;  %v13185_v14 = vor.u32 %v14227_v51, %v13184_v26 }
0x173b   :  { %v7131_v2 = vmax.f32 %v6831_v40, 0.0  ;;  %v16662_v42 = vpack.c.bf16 %v7144_v21, %v7132_v59  ;;  %v12361_v8 = vor.u32 %v14019_v27, %v12358_v12  ;;  %v14224_v21 = vld [vmem:[#allocation19 + $0x710] sm:$0xf0]  ;;  %v14221_v59 = vld [vmem:[#allocation19 + $0x6f8] sm:$0xf0]  ;;  %v6836_v26 = vadd.f32 %v16649_v16, %v6817_v24 }
0x173c   :  { %v14218_v12 = vld [vmem:[#allocation19 + $0x6e0] sm:$0xf0] }
0x173d   :  { %v6875_v58 = vpop.f32.mrf.mxu0  ;;  %v6894_v9 = vpop.f32.mrf.mxu1  ;;  %9282 = vmatpush.bf16.msra.mxu2 %v13065_v33  ;;  %v13197_v33 = vor.u32 %v14230_v49, %v13196_v46  ;;  %v16660_v15 = vpack.c.bf16 %v7143_v60, %v7131_v2  ;;  %17266 = vst [vmem:[#allocation64_spill] sm:$0xff] %v16662_v42  ;;  %v13160_v2 = vld [vmem:[#allocation19 + $0x6f0] sm:$0xf]  ;;  %v7155_v16 = vmax.f32 %v6836_v26, 0.0 }
0x173f   :  { %17265 = vst [vmem:[#allocation63_spill] sm:$0xff] %v16660_v15  ;;  %9298 = vmatpush.bf16.msrb.mxu3 %v13197_v33  ;;  %v14013_v33 = vld [vmem:[#allocation19 + $0x7c] sm:$0xf] }
0x1740   :  { %v12337_v51 = vor.u32 %v14013_v33, %v12334_v25  ;;  %v13316_v33 = vld [vmem:[#allocation19 + $0x828] sm:$0xf] }
0x1741   :  { %9283 = vmatpush.bf16.msra.mxu2 %v13053_v39  ;;  %v6855_v39 = vadd.f32 %v6854_v23, %v16630_v18  ;;  %v12346_v23 = vld [vmem:[#allocation19 + $0x9c] sm:$0xf0] }
0x1742   :  { %v6837_v7 = vpop.f32.mrf.mxu2  ;;  %v6856_v45 = vpop.f32.mrf.mxu3 }
0x1743   :  { %v6857_v3 = vadd.f32 %v6856_v45, %v16630_v18  ;;  %9299 = vmatpush.bf16.msrb.mxu3 %v13185_v14  ;;  %v14016_v45 = vld [vmem:[#allocation19 + $0x94] sm:$0xf]  ;;  %v13173_v18 = vor.u32 %v14224_v21, %v13172_v56  ;;  %v6874_v61 = vadd.f32 %v16636_v37, %v6855_v39  ;;  %v14010_v39 = vld [vmem:[#allocation19 + $0x64] sm:$0xf] }
0x1744   :  { %v12349_v46 = vor.u32 %v14016_v45, %v12346_v23 }
0x1745   :  { %v16656_v4 = vpop.f32.mrf.mxu0  ;;  %v16658_v17 = vpop.f32.mrf.mxu1  ;;  %9284 = vmatpush.bf16.msra.mxu2 %v13041_v20  ;;  %v6876_v40 = vadd.f32 %v6875_v58, %v6857_v3  ;;  %v6838_v20 = vadd.f32 %v6837_v7, %v6819_v62  ;;  %v13161_v3 = vor.u32 %v14221_v59, %v13160_v2  ;;  %v6893_v37 = vadd.f32 %v16638_v19, %v6874_v61  ;;  %v13136_v61 = vld [vmem:[#allocation19 + $0x6c0] sm:$0xf]  ;;  %v12310_v2 = vld [vmem:[#allocation19 + $0x54] sm:$0xf0] }
0x1746   :  { %v12325_v19 = vor.u32 %v14010_v39, %v12322_v44  ;;  %v14257_v44 = vld [vmem:[#allocation19 + $0x818] sm:$0xf0] }
0x1747   :  { %9209 = vmatmul.bf16.vlgmr.msrb.gmra.mxu2 %v16562_v63  ;;  %9228 = vmatmul.bf16.vlgmr.msra.gmra.mxu3 %v16605_v5  ;;  %v6895_v58 = vadd.f32 %v6894_v9, %v6876_v40  ;;  %v7167_v7 = vmax.f32 %v6838_v20, 0.0  ;;  %v16684_v9 = vld [vmem:[#allocation17 + $0x8] sm:$0xf]  ;;  %v13149_v40 = vor.u32 %v14218_v12, %v13148_v22  ;;  %v7156_v56 = vmax.f32 %v6893_v37, 0.0  ;;  %v14007_v20 = vld [vmem:[#allocation19 + $0x4c] sm:$0xf] }
0x1748   :  { %9247 = vmatmul.bf16.vlgmr.msra.gmra.mxu0 %v16660_v15  ;;  %9266 = vmatmul.bf16.vlgmr.msra.gmra.mxu1 %v16662_v42  ;;  %v12313_v59 = vor.u32 %v14007_v20, %v12310_v2  ;;  %v12454_v12 = vld [vmem:[#allocation19 + $0x174] sm:$0xf0]  ;;  %v14001_v20 = vld [vmem:[#allocation19 + $0x1c] sm:$0xf] }
0x1749   :  { %9353 = vmatpush.bf16.msrb.mxu2 %v12361_v8  ;;  %9300 = vmatpush.bf16.msrb.mxu3 %v13173_v18  ;;  %v7168_v27 = vmax.f32 %v6895_v58, 0.0  ;;  %v16687_v8 = vperm.slane %v16684_v9, 0  ;;  %v16694_v18 = vpack.c.bf16 %v7167_v7, %v7155_v16  ;;  %v12298_v7 = vld [vmem:[#allocation19 + $0x3c] sm:$0xf0]  ;;  %v13412_v16 = vld [vmem:[#allocation19 + $0x8e8] sm:$0xf] }
0x174a   :  { %v6906_v57 = vpop.f32.mrf.mxu2  ;;  %v16673_v60 = vpop.f32.mrf.mxu3 }
0x174b   :  { %17267 = vst [vmem:[#allocation52_spill] sm:$0xff] %v16694_v18  ;;  %v16696_v23 = vpack.c.bf16 %v7168_v27, %v7156_v56  ;;  %v6907_v58 = vadd.f32 %v6906_v57, %v16687_v8  ;;  %v14004_v57 = vld [vmem:[#allocation19 + $0x34] sm:$0xf]  ;;  %v14043_v27 = vld [vmem:[#allocation19 + $0x16c] sm:$0xf] }
0x174c   :  { %v12301_v22 = vor.u32 %v14004_v57, %v12298_v7  ;;  %v12457_v39 = vor.u32 %v14043_v27, %v12454_v12  ;;  %v14281_v7 = vld [vmem:[#allocation19 + $0x8d8] sm:$0xf0] }
0x174d   :  { %v16677_v49 = vpop.f32.mrf.mxu0  ;;  %v16679_v32 = vpop.f32.mrf.mxu1  ;;  %9354 = vmatpush.bf16.msrb.mxu2 %v12349_v46  ;;  %9301 = vmatpush.bf16.msrb.mxu3 %v13161_v3  ;;  %17268 = vst [vmem:[#allocation53_spill] sm:$0xff] %v16696_v23  ;;  %v14215_v46 = vld [vmem:[#allocation19 + $0x6c8] sm:$0xf0]  ;;  %v14260_v3 = vld [vmem:[#allocation19 + $0x830] sm:$0xf0] }
0x174e   :  { %v13137_v24 = vor.u32 %v14215_v46, %v13136_v61  ;;  %v13317_v26 = vor.u32 %v14260_v3, %v13316_v33  ;;  %v14284_v61 = vld [vmem:[#allocation19 + $0x8f0] sm:$0xf0]  ;;  %v14254_v3 = vld [vmem:[#allocation19 + $0x800] sm:$0xf0] }
0x174f   :  { %v13413_v46 = vor.u32 %v14284_v61, %v13412_v16  ;;  %v12430_v16 = vld [vmem:[#allocation19 + $0x144] sm:$0xf0]  ;;  %v13280_v61 = vld [vmem:[#allocation19 + $0x7e0] sm:$0xf] }
0x1750   :  { %9315 = vmatpush.bf16.msrb.mxu0 %v13317_v26 }
0x1751   :  { %9355 = vmatpush.bf16.msrb.mxu2 %v12337_v51  ;;  %9302 = vmatpush.bf16.msrb.mxu3 %v13149_v40  ;;  %v13304_v40 = vld [vmem:[#allocation19 + $0x810] sm:$0xf] }
0x1752   :  { %v6908_v30 = vpop.f32.mrf.mxu2  ;;  %v6927_v14 = vpop.f32.mrf.mxu3  ;;  %9334 = vmatpush.bf16.msrb.mxu1 %v13413_v46  ;;  %v14251_v46 = vld [vmem:[#allocation19 + $0x7e8] sm:$0xf0] }
0x1753   :  { %v6909_v21 = vadd.f32 %v6908_v30, %v16687_v8  ;;  %v6926_v30 = vadd.f32 %v16673_v60, %v6907_v58  ;;  %v12286_v60 = vld [vmem:[#allocation19 + $0x24] sm:$0xf0]  ;;  %v14040_v58 = vld [vmem:[#allocation19 + $0x154] sm:$0xf] }
0x1754   :  { %v12289_v2 = vor.u32 %v14001_v20, %v12286_v60  ;;  %v13388_v20 = vld [vmem:[#allocation19 + $0x8b8] sm:$0xf] }
0x1755   :  { %v16690_v45 = vpop.f32.mrf.mxu0  ;;  %v16692_v62 = vpop.f32.mrf.mxu1  ;;  %9356 = vmatpush.bf16.msrb.mxu2 %v12325_v19  ;;  %v6928_v25 = vadd.f32 %v6927_v14, %v6909_v21  ;;  %9303 = vmatpush.bf16.msrb.mxu3 %v13137_v24  ;;  %v13305_v21 = vor.u32 %v14257_v44, %v13304_v40  ;;  %v6945_v24 = vadd.f32 %v16656_v4, %v6926_v30  ;;  %v12274_v40 = vld [vmem:[#allocation19 + $0xc] sm:$0xf0]  ;;  %v14037_v44 = vld [vmem:[#allocation19 + $0x13c] sm:$0xf] }
0x1757   :  { %9214 = vmatmul.bf16.gmra.mxu2 %v16584_v35  ;;  %9233 = vmatmul.bf16.gmra.mxu3 %v16627_v43  ;;  %v6947_v14 = vadd.f32 %v16677_v49, %v6928_v25  ;;  %v13292_v49 = vld [vmem:[#allocation19 + $0x7f8] sm:$0xf]  ;;  %v13400_v25 = vld [vmem:[#allocation19 + $0x8d0] sm:$0xf]  ;;  %v7133_v4 = vmax.f32 %v6945_v24, 0.0 }
0x1758   :  { %9252 = vmatmul.bf16.gmra.mxu0 %v16694_v18  ;;  %9271 = vmatmul.bf16.gmra.mxu1 %v16696_v23  ;;  %v13293_v57 = vor.u32 %v14254_v3, %v13292_v49  ;;  %v13401_v12 = vor.u32 %v14281_v7, %v13400_v25  ;;  %v14034_v49 = vld [vmem:[#allocation19 + $0x124] sm:$0xf]  ;;  %v12418_v3 = vld [vmem:[#allocation19 + $0x12c] sm:$0xf0]  ;;  %v14115_v25 = vld [vmem:[#allocation19 + $0x3ac] sm:$0xf] }
0x1759   :  { %9357 = vmatpush.bf16.msrb.mxu2 %v12313_v59  ;;  %9372 = vmatpush.bf16.msra.mxu3 %v12457_v39  ;;  %v12442_v59 = vld [vmem:[#allocation19 + $0x15c] sm:$0xf0]  ;;  %v7145_v26 = vmax.f32 %v6947_v14, 0.0  ;;  %v13998_v39 = vld [vmem:[#allocation19 + $0x4] sm:$0xf] }
0x175a   :  { %v16703_v37 = vpop.f32.mrf.mxu2  ;;  %v16705_v51 = vpop.f32.mrf.mxu3  ;;  %9316 = vmatpush.bf16.msrb.mxu0 %v13305_v21  ;;  %v12445_v33 = vor.u32 %v14040_v58, %v12442_v59  ;;  %v12277_v30 = vor.u32 %v13998_v39, %v12274_v40  ;;  %9335 = vmatpush.bf16.msrb.mxu1 %v13401_v12  ;;  %v12433_v21 = vor.u32 %v14037_v44, %v12430_v16  ;;  %v12742_v7 = vld [vmem:[#allocation19 + $0x3b4] sm:$0xf0]  ;;  %v13268_v12 = vld [vmem:[#allocation19 + $0x7c8] sm:$0xf]  ;;  %v14248_v39 = vld [vmem:[#allocation19 + $0x7d0] sm:$0xf0] }
0x175b   :  { %v16714_v14 = vpack.c.bf16 %v7145_v26, %v7133_v4  ;;  %v13281_v59 = vor.u32 %v14251_v46, %v13280_v61  ;;  %v12421_v26 = vor.u32 %v14034_v49, %v12418_v3  ;;  %v13376_v40 = vld [vmem:[#allocation19 + $0x8a0] sm:$0xf]  ;;  %v16725_v44 = vperm.slane %v16684_v9, 1  ;;  %v14275_v16 = vld [vmem:[#allocation19 + $0x8a8] sm:$0xf0] }
0x175c   :  { %v12406_v46 = vld [vmem:[#allocation19 + $0x114] sm:$0xf0]  ;;  %v13256_v3 = vld [vmem:[#allocation19 + $0x7b0] sm:$0xf] }
0x175d   :  { %v16709_v56 = vpop.f32.mrf.mxu0  ;;  %v16711_v19 = vpop.f32.mrf.mxu1  ;;  %9358 = vmatpush.bf16.msrb.mxu2 %v12301_v22  ;;  %9373 = vmatpush.bf16.msra.mxu3 %v12445_v33  ;;  %v14278_v33 = vld [vmem:[#allocation19 + $0x8c0] sm:$0xf0] }
0x175e   :  { %9317 = vmatpush.bf16.msrb.mxu0 %v13293_v57  ;;  %v13389_v24 = vor.u32 %v14278_v33, %v13388_v20  ;;  %v6912_v57 = vadd.f32 %v16703_v37, %v16687_v8  ;;  %v14031_v37 = vld [vmem:[#allocation19 + $0x10c] sm:$0xf]  ;;  %v14112_v33 = vld [vmem:[#allocation19 + $0x394] sm:$0xf] }
0x1760   :  { %9336 = vmatpush.bf16.msrb.mxu1 %v13389_v24  ;;  %v6931_v20 = vadd.f32 %v16705_v51, %v6912_v57  ;;  %v12730_v24 = vld [vmem:[#allocation19 + $0x39c] sm:$0xf0]  ;;  %v14272_v51 = vld [vmem:[#allocation19 + $0x890] sm:$0xf0] }
0x1761   :  { %9359 = vmatpush.bf16.msrb.mxu2 %v12289_v2  ;;  %9374 = vmatpush.bf16.msra.mxu3 %v12433_v21  ;;  %v12733_v49 = vor.u32 %v14112_v33, %v12730_v24  ;;  %v13352_v33 = vld [vmem:[#allocation19 + $0x870] sm:$0xf]  ;;  %v6966_v24 = vadd.f32 %v16679_v32, %v16725_v44  ;;  %v13232_v32 = vld [vmem:[#allocation19 + $0x780] sm:$0xf] }
0x1762   :  { %v6913_v27 = vpop.f32.mrf.mxu2  ;;  %v6932_v22 = vpop.f32.mrf.mxu3  ;;  %9318 = vmatpush.bf16.msrb.mxu0 %v13281_v59  ;;  %v12409_v59 = vor.u32 %v14031_v37, %v12406_v46  ;;  %v14242_v46 = vld [vmem:[#allocation19 + $0x7a0] sm:$0xf0] }
0x1763   :  { %v6914_v60 = vadd.f32 %v6913_v27, %v16687_v8  ;;  %v12745_v27 = vor.u32 %v14115_v25, %v12742_v7  ;;  %v13377_v8 = vor.u32 %v14275_v16, %v13376_v40  ;;  %v14245_v25 = vld [vmem:[#allocation19 + $0x7b8] sm:$0xf0]  ;;  %v12394_v40 = vld [vmem:[#allocation19 + $0xfc] sm:$0xf0]  ;;  %v6950_v16 = vadd.f32 %v16690_v45, %v6931_v20  ;;  %v12382_v20 = vld [vmem:[#allocation19 + $0xe4] sm:$0xf0] }
0x1765   :  { %v16717_v58 = vpop.f32.mrf.mxu0  ;;  %v16719_v2 = vpop.f32.mrf.mxu1  ;;  %9360 = vmatpush.bf16.msrb.mxu2 %v12277_v30  ;;  %v6933_v4 = vadd.f32 %v6932_v22, %v6914_v60  ;;  %v13269_v30 = vor.u32 %v14248_v39, %v13268_v12  ;;  %9375 = vmatpush.bf16.msra.mxu3 %v12421_v26  ;;  %v13364_v22 = vld [vmem:[#allocation19 + $0x888] sm:$0xf]  ;;  %v6964_v60 = vadd.f32 %v16658_v17, %v16725_v44  ;;  %v14028_v39 = vld [vmem:[#allocation19 + $0xf4] sm:$0xf] }
0x1766   :  { %9337 = vmatpush.bf16.msrb.mxu1 %v13377_v8  ;;  %v13257_v12 = vor.u32 %v14245_v25, %v13256_v3  ;;  %v13365_v57 = vor.u32 %v14272_v51, %v13364_v22  ;;  %v12397_v37 = vor.u32 %v14028_v39, %v12394_v40  ;;  %v12718_v17 = vld [vmem:[#allocation19 + $0x384] sm:$0xf0]  ;;  %v14269_v3 = vld [vmem:[#allocation19 + $0x878] sm:$0xf0]  ;;  %v12706_v40 = vld [vmem:[#allocation19 + $0x36c] sm:$0xf0] }
0x1767   :  { %9285 = vmatmul.bf16.vlgmr.msra.gmra.mxu2 %v16714_v14  ;;  %9319 = vmatpush.bf16.msrb.mxu0 %v13269_v30  ;;  %v6952_v26 = vadd.f32 %v16709_v56, %v6933_v4  ;;  %v14109_v30 = vld [vmem:[#allocation19 + $0x37c] sm:$0xf]  ;;  %v13244_v4 = vld [vmem:[#allocation19 + $0x798] sm:$0xf]  ;;  %v13353_v45 = vor.u32 %v14269_v3, %v13352_v33  ;;  %v14266_v3 = vld [vmem:[#allocation19 + $0x860] sm:$0xf0] }
0x1768   :  { %v12721_v56 = vor.u32 %v14109_v30, %v12718_v17  ;;  %v13340_v17 = vld [vmem:[#allocation19 + $0x858] sm:$0xf] }
0x1769   :  { %9429 = vmatpush.bf16.msra.mxu2 %v12745_v27  ;;  %9376 = vmatpush.bf16.msra.mxu3 %v12409_v59  ;;  %v7169_v59 = vmax.f32 %v6952_v26, 0.0  ;;  %v14239_v26 = vld [vmem:[#allocation19 + $0x788] sm:$0xf0] }
0x176a   :  { %v6982_v21 = vpop.f32.mrf.mxu2  ;;  %v7001_v61 = vpop.f32.mrf.mxu3  ;;  %9338 = vmatpush.bf16.msrb.mxu1 %v13365_v57  ;;  %v13233_v33 = vor.u32 %v14239_v26, %v13232_v32  ;;  %v14100_v32 = vld [vmem:[#allocation19 + $0x334] sm:$0xf]  ;;  %v12682_v26 = vld [vmem:[#allocation19 + $0x33c] sm:$0xf0] }
0x176b   :  { %v6983_v8 = vadd.f32 %v6982_v21, %v6964_v60  ;;  %9320 = vmatpush.bf16.msrb.mxu0 %v13257_v12  ;;  %v14025_v21 = vld [vmem:[#allocation19 + $0xdc] sm:$0xf]  ;;  %v14106_v60 = vld [vmem:[#allocation19 + $0x364] sm:$0xf]  ;;  %v7157_v12 = vmax.f32 %v6950_v16, 0.0 }
0x176c   :  { %v12385_v39 = vor.u32 %v14025_v21, %v12382_v20  ;;  %v12709_v30 = vor.u32 %v14106_v60, %v12706_v40  ;;  %v14022_v16 = vld [vmem:[#allocation19 + $0xc4] sm:$0xf]  ;;  %v13328_v20 = vld [vmem:[#allocation19 + $0x840] sm:$0xf]  ;;  %v14067_v60 = vld [vmem:[#allocation19 + $0x22c] sm:$0xf] }
0x176d   :  { %v16731_v7 = vpop.f32.mrf.mxu0  ;;  %v16733_v27 = vpop.f32.mrf.mxu1  ;;  %9430 = vmatpush.bf16.msra.mxu2 %v12733_v49  ;;  %v13245_v49 = vor.u32 %v14242_v46, %v13244_v4  ;;  %9377 = vmatpush.bf16.msra.mxu3 %v12397_v37  ;;  %v7002_v51 = vadd.f32 %v7001_v61, %v6983_v8  ;;  %v13341_v61 = vor.u32 %v14266_v3, %v13340_v17  ;;  %v12370_v8 = vld [vmem:[#allocation19 + $0xcc] sm:$0xf0]  ;;  %v14139_v17 = vld [vmem:[#allocation19 + $0x46c] sm:$0xf] }
0x176e   :  { %9339 = vmatpush.bf16.msrb.mxu1 %v13353_v45  ;;  %v12694_v45 = vld [vmem:[#allocation19 + $0x354] sm:$0xf0] }
0x176f   :  { %9321 = vmatpush.bf16.msrb.mxu0 %v13245_v49  ;;  %v7134_v49 = vmax.f32 %v7002_v51, 0.0 }
0x1771   :  { %9431 = vmatpush.bf16.msra.mxu2 %v12721_v56  ;;  %v16742_v56 = vpack.c.bf16 %v7169_v59, %v7157_v12  ;;  %9378 = vmatpush.bf16.msra.mxu3 %v12385_v39  ;;  %v14263_v59 = vld [vmem:[#allocation19 + $0x848] sm:$0xf0]  ;;  %v12550_v39 = vld [vmem:[#allocation19 + $0x234] sm:$0xf0] }
0x1772   :  { %v6984_v25 = vpop.f32.mrf.mxu2  ;;  %v7003_v22 = vpop.f32.mrf.mxu3  ;;  %9340 = vmatpush.bf16.msrb.mxu1 %v13341_v61  ;;  %v12553_v51 = vor.u32 %v14067_v60, %v12550_v39  ;;  %v14064_v61 = vld [vmem:[#allocation19 + $0x214] sm:$0xf] }
0x1773   :  { %v6985_v57 = vadd.f32 %v6984_v25, %v6966_v24  ;;  %17269 = vst [vmem:[#allocation50_spill] sm:$0xff] %v16742_v56  ;;  %v14103_v24 = vld [vmem:[#allocation19 + $0x34c] sm:$0xf]  ;;  %9322 = vmatpush.bf16.msrb.mxu0 %v13233_v33  ;;  %v12838_v33 = vld [vmem:[#allocation19 + $0x474] sm:$0xf0] }
0x1774   :  { %v12697_v21 = vor.u32 %v14103_v24, %v12694_v45  ;;  %v12841_v3 = vor.u32 %v14139_v17, %v12838_v33  ;;  %v6969_v24 = vadd.f32 %v16692_v62, %v16725_v44  ;;  %v12646_v45 = vld [vmem:[#allocation19 + $0x2f4] sm:$0xf0]  ;;  %v14136_v60 = vld [vmem:[#allocation19 + $0x454] sm:$0xf]  ;;  %v12526_v62 = vld [vmem:[#allocation19 + $0x204] sm:$0xf0]  ;;  %v6971_v33 = vadd.f32 %v16711_v19, %v16725_v44 }
0x1775   :  { %v7004_v4 = vadd.f32 %v7003_v22, %v6985_v57  ;;  %v16738_v46 = vpop.f32.mrf.mxu0  ;;  %v16740_v37 = vpop.f32.mrf.mxu1  ;;  %9432 = vmatpush.bf16.msra.mxu2 %v12709_v30  ;;  %v12373_v22 = vor.u32 %v14022_v16, %v12370_v8  ;;  %v13329_v57 = vor.u32 %v14263_v59, %v13328_v20  ;;  %v12538_v16 = vld [vmem:[#allocation19 + $0x21c] sm:$0xf0]  ;;  %v14091_v8 = vld [vmem:[#allocation19 + $0x2ec] sm:$0xf]  ;;  %v14097_v20 = vld [vmem:[#allocation19 + $0x31c] sm:$0xf] }
0x1776   :  { %v12670_v59 = vld [vmem:[#allocation19 + $0x324] sm:$0xf0]  ;;  %v14088_v17 = vld [vmem:[#allocation19 + $0x2d4] sm:$0xf]  ;;  %v14085_v19 = vld [vmem:[#allocation19 + $0x2bc] sm:$0xf] }
0x1777   :  { %v7146_v25 = vmax.f32 %v7004_v4, 0.0  ;;  %9290 = vmatmul.bf16.gmra.mxu2 %v16742_v56  ;;  %9379 = vmatpush.bf16.msra.mxu3 %v12373_v22  ;;  %v12685_v4 = vor.u32 %v14100_v32, %v12682_v26  ;;  %v12541_v22 = vor.u32 %v14064_v61, %v12538_v16  ;;  %v12673_v39 = vor.u32 %v14097_v20, %v12670_v59  ;;  %v14061_v26 = vld [vmem:[#allocation19 + $0x1fc] sm:$0xf]  ;;  %v12634_v16 = vld [vmem:[#allocation19 + $0x2dc] sm:$0xf0] }
0x1778   :  { %9341 = vmatpush.bf16.msrb.mxu1 %v13329_v57  ;;  %9391 = vmatpush.bf16.msra.mxu0 %v12553_v51  ;;  %v12826_v51 = vld [vmem:[#allocation19 + $0x45c] sm:$0xf0]  ;;  %v12529_v61 = vor.u32 %v14061_v26, %v12526_v62  ;;  %v12814_v59 = vld [vmem:[#allocation19 + $0x444] sm:$0xf0]  ;;  %v16757_v44 = vperm.slane %v16684_v9, 2 }
0x1779   :  { %v16745_v12 = vpack.c.bf16 %v7146_v25, %v7134_v49  ;;  %9433 = vmatpush.bf16.msra.mxu2 %v12697_v21  ;;  %v12649_v21 = vor.u32 %v14091_v8, %v12646_v45  ;;  %v12829_v32 = vor.u32 %v14136_v60, %v12826_v51  ;;  %v12637_v8 = vor.u32 %v14088_v17, %v12634_v16  ;;  %v14094_v45 = vld [vmem:[#allocation19 + $0x304] sm:$0xf]  ;;  %v12622_v62 = vld [vmem:[#allocation19 + $0x2c4] sm:$0xf0]  ;;  %v12802_v17 = vld [vmem:[#allocation19 + $0x42c] sm:$0xf0] }
0x177a   :  { %v6987_v40 = vpop.f32.mrf.mxu2  ;;  %v7006_v30 = vpop.f32.mrf.mxu3  ;;  %v14058_v51 = vld [vmem:[#allocation19 + $0x1e4] sm:$0xf] }
0x177b   :  { %17270 = vst [vmem:[#allocation51_spill] sm:$0xff] %v16745_v12  ;;  %9304 = vmatmul.bf16.vlgmr.msrb.gmra.mxu3 %v16745_v12  ;;  %v6988_v57 = vadd.f32 %v6987_v40, %v6969_v24  ;;  %v12658_v40 = vld [vmem:[#allocation19 + $0x30c] sm:$0xf0]  ;;  %v14133_v24 = vld [vmem:[#allocation19 + $0x43c] sm:$0xf] }
0x177c   :  { %9448 = vmatpush.bf16.msrb.mxu3 %v12841_v3  ;;  %9392 = vmatpush.bf16.msra.mxu0 %v12541_v22  ;;  %v12817_v60 = vor.u32 %v14133_v24, %v12814_v59  ;;  %v14082_v24 = vld [vmem:[#allocation19 + $0x2a4] sm:$0xf] }
0x177d   :  { %v16750_v49 = vpop.f32.mrf.mxu0  ;;  %v16752_v25 = vpop.f32.mrf.mxu1  ;;  %9434 = vmatpush.bf16.msra.mxu2 %v12685_v4  ;;  %9410 = vmatpush.bf16.msra.mxu1 %v12649_v21  ;;  %v7007_v20 = vadd.f32 %v7006_v30, %v6988_v57  ;;  %v12661_v21 = vor.u32 %v14094_v45, %v12658_v40  ;;  %v12625_v30 = vor.u32 %v14085_v19, %v12622_v62  ;;  %v14130_v57 = vld [vmem:[#allocation19 + $0x424] sm:$0xf]  ;;  %v13126_v45 = vld [vmem:[#allocation19 + $0x6b4] sm:$0xf0]  ;;  %v14055_v40 = vld [vmem:[#allocation19 + $0x1cc] sm:$0xf] }
0x177e   :  { %v12790_v62 = vld [vmem:[#allocation19 + $0x414] sm:$0xf0] }
0x1780   :  { %9449 = vmatpush.bf16.msrb.mxu3 %v12829_v32  ;;  %9393 = vmatpush.bf16.msra.mxu0 %v12529_v61  ;;  %v12517_v32 = vor.u32 %v14058_v51, %v12514_v1  ;;  %v7158_v61 = vmax.f32 %v7007_v20, 0.0  ;;  %v12502_v1 = vld [vmem:[#allocation19 + $0x1d4] sm:$0xf0] }
0x1781   :  { %9435 = vmatpush.bf16.msra.mxu2 %v12673_v39  ;;  %9411 = vmatpush.bf16.msra.mxu1 %v12637_v8  ;;  %v12805_v8 = vor.u32 %v14130_v57, %v12802_v17  ;;  %v12505_v59 = vor.u32 %v14055_v40, %v12502_v1  ;;  %v14208_v57 = vld [vmem:[#allocation19 + $0x694] sm:$0xf]  ;;  %v13114_v17 = vld [vmem:[#allocation19 + $0x69c] sm:$0xf0]  ;;  %v12598_v40 = vld [vmem:[#allocation19 + $0x294] sm:$0xf0] }
0x1782   :  { %v6989_v4 = vpop.f32.mrf.mxu2  ;;  %v7008_v3 = vpop.f32.mrf.mxu3 }
0x1783   :  { %v6990_v22 = vadd.f32 %v6989_v4, %v6971_v33  ;;  %v14211_v33 = vld [vmem:[#allocation19 + $0x6ac] sm:$0xf] }
0x1784   :  { %9450 = vmatpush.bf16.msrb.mxu3 %v12817_v60  ;;  %9394 = vmatpush.bf16.msra.mxu0 %v12517_v32  ;;  %v12610_v60 = vld [vmem:[#allocation19 + $0x2ac] sm:$0xf0]  ;;  %v14127_v32 = vld [vmem:[#allocation19 + $0x40c] sm:$0xf] }
0x1785   :  { %v7009_v26 = vadd.f32 %v7008_v3, %v6990_v22  ;;  %v16759_v39 = vpop.f32.mrf.mxu0  ;;  %9436 = vmatpush.bf16.msra.mxu2 %v12661_v21  ;;  %v16761_v4 = vpop.f32.mrf.mxu1  ;;  %9412 = vmatpush.bf16.msra.mxu1 %v12625_v30  ;;  %v13129_v3 = vor.u32 %v14211_v33, %v13126_v45  ;;  %v7021_v22 = vadd.f32 %v16717_v58, %v16757_v44  ;;  %v16767_v21 = vperm.slane %v16684_v9, 3  ;;  %v14052_v58 = vld [vmem:[#allocation19 + $0x1b4] sm:$0xf]  ;;  %v12490_v33 = vld [vmem:[#allocation19 + $0x1bc] sm:$0xf0] }
0x1786   :  { %v12793_v30 = vor.u32 %v14127_v32, %v12790_v62  ;;  %v13117_v9 = vor.u32 %v14208_v57, %v13114_v17  ;;  %v13102_v57 = vld [vmem:[#allocation19 + $0x684] sm:$0xf0] }
0x1787   :  { %v7170_v16 = vmax.f32 %v7009_v26, 0.0  ;;  %9361 = vmatmul.bf16.vlgmr.msrb.gmra.mxu2 %v16617_v28  ;;  %v12613_v26 = vor.u32 %v14082_v24, %v12610_v60  ;;  %v14124_v24 = vld [vmem:[#allocation19 + $0x3f4] sm:$0xf]  ;;  %v12778_v60 = vld [vmem:[#allocation19 + $0x3fc] sm:$0xf0] }
0x1788   :  { %9451 = vmatpush.bf16.msrb.mxu3 %v12805_v8  ;;  %9395 = vmatpush.bf16.msra.mxu0 %v12505_v59  ;;  %v7023_v8 = vadd.f32 %v16731_v7, %v16757_v44  ;;  %v14205_v59 = vld [vmem:[#allocation19 + $0x67c] sm:$0xf]  ;;  %v12781_v62 = vor.u32 %v14124_v24, %v12778_v60  ;;  %v12478_v17 = vld [vmem:[#allocation19 + $0x1a4] sm:$0xf0]  ;;  %v14076_v7 = vld [vmem:[#allocation19 + $0x274] sm:$0xf] }
0x1789   :  { %v16769_v20 = vpack.c.bf16 %v7170_v16, %v7158_v61  ;;  %9505 = vmatpush.bf16.msrb.mxu2 %v13129_v3  ;;  %9413 = vmatpush.bf16.msra.mxu1 %v12613_v26  ;;  %v14079_v61 = vld [vmem:[#allocation19 + $0x28c] sm:$0xf]  ;;  %v7040_v16 = vadd.f32 %v16719_v2, %v7021_v22  ;;  %v12493_v3 = vor.u32 %v14052_v58, %v12490_v33  ;;  %v14049_v22 = vld [vmem:[#allocation19 + $0x19c] sm:$0xf]  ;;  %v12586_v33 = vld [vmem:[#allocation19 + $0x27c] sm:$0xf0] }
0x178a   :  { %v7058_v51 = vpop.f32.mrf.mxu2  ;;  %v7077_v19 = vpop.f32.mrf.mxu3  ;;  %v12601_v1 = vor.u32 %v14079_v61, %v12598_v40  ;;  %v13105_v2 = vor.u32 %v14205_v59, %v13102_v57  ;;  %v12766_v24 = vld [vmem:[#allocation19 + $0x3e4] sm:$0xf0] }
0x178b   :  { %17271 = vst [vmem:[#allocation60_spill] sm:$0xff] %v16769_v20  ;;  %9309 = vmatmul.bf16.gmra.mxu3 %v16769_v20  ;;  %v7078_v45 = vadd.f32 %v7077_v19, %v16767_v21  ;;  %v7059_v26 = vadd.f32 %v7058_v51, %v7040_v16  ;;  %v7042_v19 = vadd.f32 %v16733_v27, %v7023_v8  ;;  %v14121_v16 = vld [vmem:[#allocation19 + $0x3dc] sm:$0xf]  ;;  %v12466_v8 = vld [vmem:[#allocation19 + $0x18c] sm:$0xf0] }
0x178c   :  { %9452 = vmatpush.bf16.msrb.mxu3 %v12793_v30  ;;  %9396 = vmatpush.bf16.msra.mxu0 %v12493_v3  ;;  %v12589_v51 = vor.u32 %v14076_v7, %v12586_v33  ;;  %v14202_v3 = vld [vmem:[#allocation19 + $0x664] sm:$0xf]  ;;  %v12769_v57 = vor.u32 %v14121_v16, %v12766_v24  ;;  %v12574_v7 = vld [vmem:[#allocation19 + $0x264] sm:$0xf0]  ;;  %v12754_v33 = vld [vmem:[#allocation19 + $0x3cc] sm:$0xf0]  ;;  %v7026_v24 = vadd.f32 %v16738_v46, %v16757_v44 }
0x178d   :  { %9506 = vmatpush.bf16.msrb.mxu2 %v13117_v9  ;;  %v7098_v32 = vpop.f32.mrf.mxu0  ;;  %9414 = vmatpush.bf16.msra.mxu1 %v12601_v1  ;;  %v7097_v58 = vadd.f32 %v16759_v39, %v7078_v45  ;;  %v7117_v30 = vpop.f32.mrf.mxu1  ;;  %v12481_v9 = vor.u32 %v14049_v22, %v12478_v17  ;;  %v7135_v1 = vmax.f32 %v7059_v26, 0.0  ;;  %v13093_v27 = vor.u32 %v14202_v3, %v13090_v13  ;;  %v14046_v39 = vld [vmem:[#allocation19 + $0x184] sm:$0xf]  ;;  %v14073_v45 = vld [vmem:[#allocation19 + $0x25c] sm:$0xf] }
0x178e   :  { %v12469_v17 = vor.u32 %v14046_v39, %v12466_v8  ;;  %v12577_v26 = vor.u32 %v14073_v45, %v12574_v7  ;;  %v14163_v16 = vld [vmem:[#allocation19 + $0x52c] sm:$0xf]  ;;  %v14196_v8 = vld [vmem:[#allocation19 + $0x634] sm:$0xf]  ;;  %v13066_v45 = vld [vmem:[#allocation19 + $0x63c] sm:$0xf0] }
0x178f   :  { %v7116_v22 = vadd.f32 %v16761_v4, %v7097_v58  ;;  %v14070_v58 = vld [vmem:[#allocation19 + $0x244] sm:$0xf]  ;;  %v13069_v46 = vor.u32 %v14196_v8, %v13066_v45  ;;  %v13018_v45 = vld [vmem:[#allocation19 + $0x5dc] sm:$0xf0] }
0x1790   :  { %9453 = vmatpush.bf16.msrb.mxu3 %v12781_v62  ;;  %9397 = vmatpush.bf16.msra.mxu0 %v12481_v9 }
0x1791   :  { %9507 = vmatpush.bf16.msrb.mxu2 %v13105_v2  ;;  %9415 = vmatpush.bf16.msra.mxu1 %v12589_v51  ;;  %v13078_v51 = vld [vmem:[#allocation19 + $0x654] sm:$0xf0]  ;;  %v7136_v3 = vmax.f32 %v7116_v22, 0.0 }
0x1792   :  { %v7060_v61 = vpop.f32.mrf.mxu2  ;;  %v7079_v40 = vpop.f32.mrf.mxu3  ;;  %v13222_v22 = vld [vmem:[#allocation19 + $0x774] sm:$0xf0] }
0x1793   :  { %v7061_v60 = vadd.f32 %v7060_v61, %v7042_v19  ;;  %v7080_v59 = vadd.f32 %v7079_v40, %v16767_v21  ;;  %v14118_v19 = vld [vmem:[#allocation19 + $0x3c4] sm:$0xf]  ;;  %v14199_v61 = vld [vmem:[#allocation19 + $0x64c] sm:$0xf] }
0x1794   :  { %9454 = vmatpush.bf16.msrb.mxu3 %v12769_v57  ;;  %v12757_v13 = vor.u32 %v14118_v19, %v12754_v33  ;;  %9398 = vmatpush.bf16.msra.mxu0 %v12469_v17  ;;  %v13081_v4 = vor.u32 %v14199_v61, %v13078_v51  ;;  %v12922_v19 = vld [vmem:[#allocation19 + $0x51c] sm:$0xf0]  ;;  %v14187_v33 = vld [vmem:[#allocation19 + $0x5ec] sm:$0xf]  ;;  %v7045_v61 = vadd.f32 %v16740_v37, %v7026_v24  ;;  %v14157_v24 = vld [vmem:[#allocation19 + $0x4fc] sm:$0xf] }
0x1795   :  { %v7147_v62 = vmax.f32 %v7061_v60, 0.0  ;;  %v7099_v2 = vadd.f32 %v7098_v32, %v7080_v59  ;;  %9508 = vmatpush.bf16.msrb.mxu2 %v13093_v27  ;;  %9416 = vmatpush.bf16.msra.mxu1 %v12577_v26  ;;  %v12562_v32 = vld [vmem:[#allocation19 + $0x24c] sm:$0xf0]  ;;  %v7101_v59 = vpop.f32.mrf.mxu0  ;;  %v7120_v17 = vpop.f32.mrf.mxu1  ;;  %v14160_v26 = vld [vmem:[#allocation19 + $0x514] sm:$0xf] }
0x1796   :  { %v12925_v51 = vor.u32 %v14160_v26, %v12922_v19  ;;  %v14229_v26 = vld [vmem:[#allocation19 + $0x73c] sm:$0xf] }
0x1797   :  { %v16780_v40 = vpack.c.bf16 %v7147_v62, %v7135_v1  ;;  %v7118_v9 = vadd.f32 %v7117_v30, %v7099_v2  ;;  %9366 = vmatmul.bf16.gmra.mxu2 %v16470_v48  ;;  %v12565_v1 = vor.u32 %v14070_v58, %v12562_v32  ;;  %v12934_v30 = vld [vmem:[#allocation19 + $0x534] sm:$0xf0]  ;;  %v14235_v62 = vld [vmem:[#allocation19 + $0x76c] sm:$0xf]  ;;  %v14193_v32 = vld [vmem:[#allocation19 + $0x61c] sm:$0xf] }
0x1798   :  { %9455 = vmatpush.bf16.msrb.mxu3 %v12757_v13  ;;  %v12937_v39 = vor.u32 %v14163_v16, %v12934_v30  ;;  %v13225_v7 = vor.u32 %v14235_v62, %v13222_v22  ;;  %v13054_v16 = vld [vmem:[#allocation19 + $0x624] sm:$0xf0]  ;;  %v13210_v30 = vld [vmem:[#allocation19 + $0x75c] sm:$0xf0] }
0x1799   :  { %17272 = vst [vmem:[#allocation59_spill] sm:$0xff] %v16780_v40  ;;  %v7148_v60 = vmax.f32 %v7118_v9, 0.0  ;;  %9323 = vmatmul.bf16.vlgmr.msrb.gmra.mxu0 %v16780_v40  ;;  %9509 = vmatpush.bf16.msrb.mxu2 %v13081_v4  ;;  %v7028_v9 = vadd.f32 %v16750_v49, %v16757_v44  ;;  %v13030_v4 = vld [vmem:[#allocation19 + $0x5f4] sm:$0xf0]  ;;  %v12910_v49 = vld [vmem:[#allocation19 + $0x504] sm:$0xf0] }
0x179a   :  { %v7063_v57 = vpop.f32.mrf.mxu2  ;;  %v7082_v27 = vpop.f32.mrf.mxu3  ;;  %9417 = vmatpush.bf16.msra.mxu1 %v12565_v1  ;;  %9467 = vmatpush.bf16.msrb.mxu0 %v12937_v39  ;;  %v13033_v58 = vor.u32 %v14187_v33, %v13030_v4  ;;  %v13057_v1 = vor.u32 %v14193_v32, %v13054_v16  ;;  %v14184_v44 = vld [vmem:[#allocation19 + $0x5d4] sm:$0xf]  ;;  %v12913_v8 = vor.u32 %v14157_v24, %v12910_v49  ;;  %v13198_v4 = vld [vmem:[#allocation19 + $0x744] sm:$0xf0]  ;;  %v14226_v24 = vld [vmem:[#allocation19 + $0x724] sm:$0xf] }
0x179b   :  { %v16786_v2 = vpack.c.bf16 %v7148_v60, %v7136_v3  ;;  %9380 = vmatmul.bf16.vlgmr.msra.gmra.mxu3 %v16489_v6  ;;  %v7083_v13 = vadd.f32 %v7082_v27, %v16767_v21  ;;  %v14232_v3 = vld [vmem:[#allocation19 + $0x754] sm:$0xf]  ;;  %v7064_v60 = vadd.f32 %v7063_v57, %v7045_v61  ;;  %v7047_v27 = vadd.f32 %v16752_v25, %v7028_v9  ;;  %v13042_v57 = vld [vmem:[#allocation19 + $0x60c] sm:$0xf0] }
0x179c   :  { %9524 = vmatpush.bf16.msra.mxu3 %v13225_v7  ;;  %v13213_v37 = vor.u32 %v14232_v3, %v13210_v30  ;;  %v13021_v22 = vor.u32 %v14184_v44, %v13018_v45  ;;  %v14190_v7 = vld [vmem:[#allocation19 + $0x604] sm:$0xf]  ;;  %v13201_v25 = vor.u32 %v14229_v26, %v13198_v4  ;;  %v12898_v9 = vld [vmem:[#allocation19 + $0x4ec] sm:$0xf0]  ;;  %v13006_v30 = vld [vmem:[#allocation19 + $0x5c4] sm:$0xf0] }
0x179d   :  { %17273 = vst [vmem:[#allocation67_spill] sm:$0xff] %v16786_v2  ;;  %9342 = vmatmul.bf16.vlgmr.msrb.gmra.mxu1 %v16786_v2  ;;  %9510 = vmatpush.bf16.msrb.mxu2 %v13069_v46  ;;  %v7102_v39 = vadd.f32 %v7101_v59, %v7083_v13  ;;  %v7159_v19 = vmax.f32 %v7064_v60, 0.0  ;;  %v14154_v59 = vld [vmem:[#allocation19 + $0x4e4] sm:$0xf]  ;;  %v14181_v13 = vld [vmem:[#allocation19 + $0x5bc] sm:$0xf] }
0x179e   :  { %9468 = vmatpush.bf16.msrb.mxu0 %v12925_v51  ;;  %9486 = vmatpush.bf16.msrb.mxu1 %v13033_v58  ;;  %v13045_v51 = vor.u32 %v14190_v7, %v13042_v57  ;;  %v7103_v58 = vpop.f32.mrf.mxu0  ;;  %v13009_v60 = vor.u32 %v14181_v13, %v13006_v30  ;;  %v12364_v49 = vld [vmem:[#allocation19 + $0xb0] sm:$0xf]  ;;  %v14021_v45 = vld [vmem:[#allocation19 + $0xb8] sm:$0xf0]  ;;  %v12352_v4 = vld [vmem:[#allocation19 + $0x98] sm:$0xf] }
0x179f   :  { %v7121_v32 = vadd.f32 %v7120_v17, %v7102_v39  ;;  %v12365_v17 = vor.u32 %v14021_v45, %v12364_v49  ;;  %v14151_v39 = vld [vmem:[#allocation19 + $0x4cc] sm:$0xf]  ;;  %v12994_v26 = vld [vmem:[#allocation19 + $0x5ac] sm:$0xf0]  ;;  %v14148_v13 = vld [vmem:[#allocation19 + $0x4b4] sm:$0xf] }
0x17a0   :  { %9525 = vmatpush.bf16.msra.mxu3 %v13213_v37  ;;  %v7122_v37 = vpop.f32.mrf.mxu1  ;;  %v14015_v49 = vld [vmem:[#allocation19 + $0x88] sm:$0xf0]  ;;  %v14145_v45 = vld [vmem:[#allocation19 + $0x49c] sm:$0xf] }
0x17a1   :  { %9511 = vmatpush.bf16.msrb.mxu2 %v13057_v1  ;;  %v12901_v1 = vor.u32 %v14154_v59, %v12898_v9  ;;  %v14018_v59 = vld [vmem:[#allocation19 + $0xa0] sm:$0xf0] }
0x17a2   :  { %v7065_v62 = vpop.f32.mrf.mxu2  ;;  %v7084_v46 = vpop.f32.mrf.mxu3  ;;  %9469 = vmatpush.bf16.msrb.mxu0 %v12913_v8  ;;  %9487 = vmatpush.bf16.msrb.mxu1 %v13021_v22  ;;  %v7160_v22 = vmax.f32 %v7121_v32, 0.0  ;;  %v12353_v9 = vor.u32 %v14018_v59, %v12352_v4  ;;  %v12874_v32 = vld [vmem:[#allocation19 + $0x4bc] sm:$0xf0]  ;;  %v12850_v59 = vld [vmem:[#allocation19 + $0x48c] sm:$0xf0] }
0x17a3   :  { %v7066_v33 = vadd.f32 %v7065_v62, %v7047_v27  ;;  %v7085_v61 = vadd.f32 %v7084_v46, %v16767_v21  ;;  %v13186_v21 = vld [vmem:[#allocation19 + $0x72c] sm:$0xf0]  ;;  %v12886_v62 = vld [vmem:[#allocation19 + $0x4d4] sm:$0xf0]  ;;  %v14178_v46 = vld [vmem:[#allocation19 + $0x5a4] sm:$0xf] }
0x17a4   :  { %9526 = vmatpush.bf16.msra.mxu3 %v13201_v25  ;;  %v13189_v8 = vor.u32 %v14226_v24, %v13186_v21  ;;  %v12889_v57 = vor.u32 %v14151_v39, %v12886_v62  ;;  %v12340_v24 = vld [vmem:[#allocation19 + $0x80] sm:$0xf]  ;;  %v14172_v39 = vld [vmem:[#allocation19 + $0x574] sm:$0xf] }
0x17a5   :  { %v7171_v16 = vmax.f32 %v7066_v33, 0.0  ;;  %v7104_v3 = vadd.f32 %v7103_v58, %v7085_v61  ;;  %9512 = vmatpush.bf16.msrb.mxu2 %v13045_v51  ;;  %v14223_v61 = vld [vmem:[#allocation19 + $0x70c] sm:$0xf]  ;;  %v13174_v51 = vld [vmem:[#allocation19 + $0x714] sm:$0xf0] }
0x17a6   :  { %9470 = vmatpush.bf16.msrb.mxu0 %v12901_v1  ;;  %9488 = vmatpush.bf16.msrb.mxu1 %v13009_v60  ;;  %v13177_v25 = vor.u32 %v14223_v61, %v13174_v51  ;;  %v12982_v1 = vld [vmem:[#allocation19 + $0x594] sm:$0xf0]  ;;  %v13162_v60 = vld [vmem:[#allocation19 + $0x6fc] sm:$0xf0]  ;;  %v14012_v51 = vld [vmem:[#allocation19 + $0x70] sm:$0xf0] }
0x17a7   :  { %v7123_v44 = vadd.f32 %v7122_v37, %v7104_v3  ;;  %9437 = vmatmul.bf16.vlgmr.msra.gmra.mxu2 %v16562_v63  ;;  %v16797_v27 = vpack.c.bf16 %v7171_v16, %v7159_v19  ;;  %v12997_v19 = vor.u32 %v14178_v46, %v12994_v26  ;;  %v14175_v16 = vld [vmem:[#allocation19 + $0x58c] sm:$0xf]  ;;  %v12877_v3 = vor.u32 %v14148_v13, %v12874_v32  ;;  %v14220_v37 = vld [vmem:[#allocation19 + $0x6f4] sm:$0xf]  ;;  %v12970_v46 = vld [vmem:[#allocation19 + $0x57c] sm:$0xf0] }
0x17a8   :  { %9527 = vmatpush.bf16.msra.mxu3 %v13189_v8  ;;  %v12985_v30 = vor.u32 %v14175_v16, %v12982_v1  ;;  %v13165_v21 = vor.u32 %v14220_v37, %v13162_v60  ;;  %v12341_v8 = vor.u32 %v14015_v49, %v12340_v24  ;;  %v13150_v26 = vld [vmem:[#allocation19 + $0x6e4] sm:$0xf0]  ;;  %v13138_v1 = vld [vmem:[#allocation19 + $0x6cc] sm:$0xf0]  ;;  %v14009_v60 = vld [vmem:[#allocation19 + $0x58] sm:$0xf0] }
0x17a9   :  { %9328 = vmatmul.bf16.gmra.mxu0 %v16797_v27  ;;  %v7172_v7 = vmax.f32 %v7123_v44, 0.0  ;;  %9581 = vmatpush.bf16.msra.mxu2 %v12365_v17  ;;  %v12862_v17 = vld [vmem:[#allocation19 + $0x4a4] sm:$0xf0]  ;;  %v12946_v49 = vld [vmem:[#allocation19 + $0x54c] sm:$0xf0] }
0x17aa   :  { %v16800_v33 = vpop.f32.mrf.mxu2  ;;  %9471 = vmatpush.bf16.msrb.mxu0 %v12889_v57  ;;  %9489 = vmatpush.bf16.msrb.mxu1 %v12997_v19  ;;  %v16806_v44 = vpop.f32.mrf.mxu3  ;;  %v12865_v62 = vor.u32 %v14145_v45, %v12862_v17  ;;  %v14217_v57 = vld [vmem:[#allocation19 + $0x6dc] sm:$0xf]  ;;  %v12328_v19 = vld [vmem:[#allocation19 + $0x68] sm:$0xf]  ;;  %v13318_v17 = vld [vmem:[#allocation19 + $0x834] sm:$0xf0] }
0x17ab   :  { %9385 = vmatmul.bf16.gmra.mxu3 %v16506_v31  ;;  %v16803_v58 = vpack.c.bf16 %v7172_v7, %v7160_v22  ;;  %v12973_v7 = vor.u32 %v14172_v39, %v12970_v46  ;;  %v13153_v61 = vor.u32 %v14217_v57, %v13150_v26  ;;  %v12329_v4 = vor.u32 %v14012_v51, %v12328_v19  ;;  %v12958_v32 = vld [vmem:[#allocation19 + $0x564] sm:$0xf0]  ;;  %v14006_v57 = vld [vmem:[#allocation19 + $0x40] sm:$0xf0]  ;;  %v12460_v26 = vld [vmem:[#allocation19 + $0x170] sm:$0xf] }
0x17ac   :  { %9528 = vmatpush.bf16.msra.mxu3 %v13177_v25  ;;  %v14142_v25 = vld [vmem:[#allocation19 + $0x484] sm:$0xf] }
0x17ad   :  { %9347 = vmatmul.bf16.gmra.mxu1 %v16803_v58  ;;  %9582 = vmatpush.bf16.msra.mxu2 %v12353_v9  ;;  %v14169_v9 = vld [vmem:[#allocation19 + $0x55c] sm:$0xf]  ;;  %v12853_v13 = vor.u32 %v14142_v25, %v12850_v59  ;;  %v13306_v25 = vld [vmem:[#allocation19 + $0x81c] sm:$0xf0]  ;;  %v14283_v59 = vld [vmem:[#allocation19 + $0x8ec] sm:$0xf] }
0x17ae   :  { %9472 = vmatpush.bf16.msrb.mxu0 %v12877_v3  ;;  %9490 = vmatpush.bf16.msrb.mxu1 %v12985_v30  ;;  %v12961_v16 = vor.u32 %v14169_v9, %v12958_v32  ;;  %v14214_v3 = vld [vmem:[#allocation19 + $0x6c4] sm:$0xf]  ;;  %v12316_v30 = vld [vmem:[#allocation19 + $0x50] sm:$0xf] }
0x17af   :  { %v13141_v37 = vor.u32 %v14214_v3, %v13138_v1  ;;  %v12317_v24 = vor.u32 %v14009_v60, %v12316_v30  ;;  %v14003_v3 = vld [vmem:[#allocation19 + $0x28] sm:$0xf0]  ;;  %v12448_v1 = vld [vmem:[#allocation19 + $0x158] sm:$0xf] }
0x17b0   :  { %9529 = vmatpush.bf16.msra.mxu3 %v13165_v21  ;;  %v14166_v21 = vld [vmem:[#allocation19 + $0x544] sm:$0xf] }
0x17b1   :  { %9583 = vmatpush.bf16.msra.mxu2 %v12341_v8  ;;  %v14259_v8 = vld [vmem:[#allocation19 + $0x82c] sm:$0xf]  ;;  %v12949_v45 = vor.u32 %v14166_v21, %v12946_v49  ;;  %v13294_v21 = vld [vmem:[#allocation19 + $0x804] sm:$0xf0]  ;;  %v14280_v49 = vld [vmem:[#allocation19 + $0x8d4] sm:$0xf] }
0x17b2   :  { %v16808_v22 = vpop.f32.mrf.mxu2  ;;  %9473 = vmatpush.bf16.msrb.mxu0 %v12865_v62  ;;  %9491 = vmatpush.bf16.msrb.mxu1 %v12973_v7  ;;  %v16812_v39 = vpop.f32.mrf.mxu3  ;;  %v13321_v46 = vor.u32 %v14259_v8, %v13318_v17  ;;  %v12304_v7 = vld [vmem:[#allocation19 + $0x38] sm:$0xf] }
0x17b3   :  { %v12305_v19 = vor.u32 %v14006_v57, %v12304_v7  ;;  %v12280_v7 = vld [vmem:[#allocation19 + $0x8] sm:$0xf]  ;;  %v14000_v57 = vld [vmem:[#allocation19 + $0x10] sm:$0xf0] }
0x17b4   :  { %9530 = vmatpush.bf16.msra.mxu3 %v13153_v61  ;;  %v14045_v61 = vld [vmem:[#allocation19 + $0x178] sm:$0xf0] }
0x17b5   :  { %9584 = vmatpush.bf16.msra.mxu2 %v12329_v4  ;;  %v12461_v51 = vor.u32 %v14045_v61, %v12460_v26  ;;  %v14256_v4 = vld [vmem:[#allocation19 + $0x814] sm:$0xf]  ;;  %v12436_v26 = vld [vmem:[#allocation19 + $0x140] sm:$0xf]  ;;  %v14039_v61 = vld [vmem:[#allocation19 + $0x148] sm:$0xf0] }
0x17b6   :  { %9474 = vmatpush.bf16.msrb.mxu0 %v12853_v13  ;;  %9492 = vmatpush.bf16.msrb.mxu1 %v12961_v16  ;;  %v13309_v9 = vor.u32 %v14256_v4, %v13306_v25  ;;  %v13414_v13 = vld [vmem:[#allocation19 + $0x8f4] sm:$0xf0]  ;;  %v12292_v16 = vld [vmem:[#allocation19 + $0x20] sm:$0xf]  ;;  %v12437_v4 = vor.u32 %v14039_v61, %v12436_v26  ;;  %v14250_v25 = vld [vmem:[#allocation19 + $0x7e4] sm:$0xf] }
0x17b7   :  { %9442 = vmatmul.bf16.gmra.mxu2 %v16584_v35  ;;  %v13417_v32 = vor.u32 %v14283_v59, %v13414_v13  ;;  %v12293_v30 = vor.u32 %v14003_v3, %v12292_v16  ;;  %v13282_v59 = vld [vmem:[#allocation19 + $0x7ec] sm:$0xf0]  ;;  %v12424_v3 = vld [vmem:[#allocation19 + $0x128] sm:$0xf]  ;;  %v14033_v61 = vld [vmem:[#allocation19 + $0x118] sm:$0xf0] }
0x17b8   :  { %9531 = vmatpush.bf16.msra.mxu3 %v13141_v37  ;;  %v14042_v37 = vld [vmem:[#allocation19 + $0x160] sm:$0xf0]  ;;  %v13285_v13 = vor.u32 %v14250_v25, %v13282_v59 }
0x17b9   :  { %9399 = vmatmul.bf16.vlgmr.msra.gmra.mxu0 %v16517_v10  ;;  %9585 = vmatpush.bf16.msra.mxu2 %v12317_v24  ;;  %v12449_v60 = vor.u32 %v14042_v37, %v12448_v1  ;;  %v14253_v24 = vld [vmem:[#allocation19 + $0x7fc] sm:$0xf]  ;;  %v14036_v1 = vld [vmem:[#allocation19 + $0x130] sm:$0xf0]  ;;  %v14114_v59 = vld [vmem:[#allocation19 + $0x3a0] sm:$0xf0] }
0x17ba   :  { %v16814_v62 = vpop.f32.mrf.mxu2  ;;  %9493 = vmatpush.bf16.msrb.mxu1 %v12949_v45  ;;  %9543 = vmatpush.bf16.msra.mxu0 %v13321_v46  ;;  %v13297_v8 = vor.u32 %v14253_v24, %v13294_v21  ;;  %v13402_v45 = vld [vmem:[#allocation19 + $0x8dc] sm:$0xf0]  ;;  %v12425_v37 = vor.u32 %v14036_v1, %v12424_v3  ;;  %v16823_v24 = vpop.f32.mrf.mxu0  ;;  %v14271_v3 = vld [vmem:[#allocation19 + $0x88c] sm:$0xf] }
0x17bb   :  { %9456 = vmatmul.bf16.vlgmr.msrb.gmra.mxu3 %v16605_v5  ;;  %v13405_v46 = vor.u32 %v14280_v49, %v13402_v45  ;;  %v14247_v49 = vld [vmem:[#allocation19 + $0x7cc] sm:$0xf]  ;;  %v14274_v45 = vld [vmem:[#allocation19 + $0x8a4] sm:$0xf] }
0x17bc   :  { %9600 = vmatpush.bf16.msrb.mxu3 %v12461_v51  ;;  %v16820_v51 = vpop.f32.mrf.mxu3 }
0x17bd   :  { %9418 = vmatmul.bf16.vlgmr.msra.gmra.mxu1 %v16524_v36  ;;  %9586 = vmatpush.bf16.msra.mxu2 %v12305_v19  ;;  %v12281_v19 = vor.u32 %v14000_v57, %v12280_v7  ;;  %v13378_v7 = vld [vmem:[#allocation19 + $0x8ac] sm:$0xf0] }
0x17be   :  { %9544 = vmatpush.bf16.msra.mxu0 %v13309_v9  ;;  %9562 = vmatpush.bf16.msra.mxu1 %v13417_v32  ;;  %v14277_v9 = vld [vmem:[#allocation19 + $0x8bc] sm:$0xf]  ;;  %v13390_v32 = vld [vmem:[#allocation19 + $0x8c4] sm:$0xf0]  ;;  %v13381_v26 = vor.u32 %v14274_v45, %v13378_v7  ;;  %v12724_v45 = vld [vmem:[#allocation19 + $0x380] sm:$0xf] }
0x17bf   :  { %v13393_v16 = vor.u32 %v14277_v9, %v13390_v32  ;;  %v16829_v9 = vpop.f32.mrf.mxu1  ;;  %v14244_v32 = vld [vmem:[#allocation19 + $0x7b4] sm:$0xf]  ;;  %v14111_v7 = vld [vmem:[#allocation19 + $0x388] sm:$0xf0] }
0x17c0   :  { %9601 = vmatpush.bf16.msrb.mxu3 %v12449_v60  ;;  %v14117_v60 = vld [vmem:[#allocation19 + $0x3b8] sm:$0xf0] }
0x17c1   :  { %9587 = vmatpush.bf16.msra.mxu2 %v12293_v30  ;;  %v12748_v30 = vld [vmem:[#allocation19 + $0x3b0] sm:$0xf] }
0x17c2   :  { %v16818_v17 = vpop.f32.mrf.mxu2  ;;  %9545 = vmatpush.bf16.msra.mxu0 %v13297_v8  ;;  %9563 = vmatpush.bf16.msra.mxu1 %v13405_v46  ;;  %v12749_v21 = vor.u32 %v14117_v60, %v12748_v30  ;;  %v13270_v8 = vld [vmem:[#allocation19 + $0x7d4] sm:$0xf0]  ;;  %v14030_v60 = vld [vmem:[#allocation19 + $0x100] sm:$0xf0] }
0x17c3   :  { %v13273_v46 = vor.u32 %v14247_v49, %v13270_v8  ;;  %v13366_v30 = vld [vmem:[#allocation19 + $0x894] sm:$0xf0] }
0x17c4   :  { %9602 = vmatpush.bf16.msrb.mxu3 %v12437_v4  ;;  %v12736_v4 = vld [vmem:[#allocation19 + $0x398] sm:$0xf]  ;;  %v13369_v49 = vor.u32 %v14271_v3, %v13366_v30  ;;  %v14027_v3 = vld [vmem:[#allocation19 + $0xe8] sm:$0xf0]  ;;  %v12712_v30 = vld [vmem:[#allocation19 + $0x368] sm:$0xf] }
0x17c5   :  { %9588 = vmatpush.bf16.msra.mxu2 %v12281_v19  ;;  %v12412_v19 = vld [vmem:[#allocation19 + $0x110] sm:$0xf] }
0x17c6   :  { %9546 = vmatpush.bf16.msra.mxu0 %v13285_v13  ;;  %9564 = vmatpush.bf16.msra.mxu1 %v13393_v16  ;;  %v12413_v25 = vor.u32 %v14033_v61, %v12412_v19  ;;  %v12737_v13 = vor.u32 %v14114_v59, %v12736_v4  ;;  %v13258_v16 = vld [vmem:[#allocation19 + $0x7bc] sm:$0xf0]  ;;  %v13246_v19 = vld [vmem:[#allocation19 + $0x7a4] sm:$0xf0]  ;;  %v14268_v61 = vld [vmem:[#allocation19 + $0x874] sm:$0xf] }
0x17c7   :  { %9513 = vmatmul.bf16.vlgmr.msrb.gmra.mxu2 %v16714_v14  ;;  %v13261_v1 = vor.u32 %v14244_v32, %v13258_v16  ;;  %v13354_v59 = vld [vmem:[#allocation19 + $0x87c] sm:$0xf0]  ;;  %v16834_v32 = vpop.f32.mrf.mxu0  ;;  %v16838_v34 = vpop.f32.mrf.mxu1 }
0x17c8   :  { %9603 = vmatpush.bf16.msrb.mxu3 %v12425_v37  ;;  %v12400_v37 = vld [vmem:[#allocation19 + $0xf8] sm:$0xf] }
0x17c9   :  { %9404 = vmatmul.bf16.gmra.mxu0 %v16542_v50  ;;  %9657 = vmatpush.bf16.msrb.mxu2 %v12749_v21  ;;  %v16832_v21 = vpop.f32.mrf.mxu3  ;;  %v12401_v8 = vor.u32 %v14030_v60, %v12400_v37  ;;  %v14108_v60 = vld [vmem:[#allocation19 + $0x370] sm:$0xf0] }
0x17ca   :  { %v16826_v57 = vpop.f32.mrf.mxu2  ;;  %9547 = vmatpush.bf16.msra.mxu0 %v13273_v46  ;;  %9565 = vmatpush.bf16.msra.mxu1 %v13381_v26  ;;  %v12725_v46 = vor.u32 %v14111_v7, %v12724_v45  ;;  %v14241_v26 = vld [vmem:[#allocation19 + $0x79c] sm:$0xf]  ;;  %v14238_v45 = vld [vmem:[#allocation19 + $0x784] sm:$0xf] }
0x17cb   :  { %9461 = vmatmul.bf16.gmra.mxu3 %v16627_v43  ;;  %v13249_v4 = vor.u32 %v14241_v26, %v13246_v19  ;;  %v14265_v26 = vld [vmem:[#allocation19 + $0x85c] sm:$0xf]  ;;  %v13342_v19 = vld [vmem:[#allocation19 + $0x864] sm:$0xf0] }
0x17cc   :  { %9604 = vmatpush.bf16.msrb.mxu3 %v12413_v25  ;;  %v13357_v25 = vor.u32 %v14268_v61, %v13354_v59  ;;  %v13345_v41 = vor.u32 %v14265_v26, %v13342_v19  ;;  %v12700_v61 = vld [vmem:[#allocation19 + $0x350] sm:$0xf]  ;;  %v12688_v26 = vld [vmem:[#allocation19 + $0x338] sm:$0xf]  ;;  %v14102_v19 = vld [vmem:[#allocation19 + $0x340] sm:$0xf0] }
0x17cd   :  { %9423 = vmatmul.bf16.gmra.mxu1 %v16548_v11  ;;  %9658 = vmatpush.bf16.msrb.mxu2 %v12737_v13  ;;  %v12388_v13 = vld [vmem:[#allocation19 + $0xe0] sm:$0xf]  ;;  %v12940_v11 = vld [vmem:[#allocation19 + $0x530] sm:$0xf] }
0x17ce   :  { %9548 = vmatpush.bf16.msra.mxu0 %v13261_v1  ;;  %9566 = vmatpush.bf16.msra.mxu1 %v13369_v49  ;;  %v12389_v37 = vor.u32 %v14027_v3, %v12388_v13  ;;  %v13234_v1 = vld [vmem:[#allocation19 + $0x78c] sm:$0xf0]  ;;  %v12713_v49 = vor.u32 %v14108_v60, %v12712_v30  ;;  %v14105_v13 = vld [vmem:[#allocation19 + $0x358] sm:$0xf0] }
0x17cf   :  { %v13237_v7 = vor.u32 %v14238_v45, %v13234_v1  ;;  %v13330_v30 = vld [vmem:[#allocation19 + $0x84c] sm:$0xf0]  ;;  %v16850_v0 = vpop.f32.mrf.mxu1 }
0x17d0   :  { %9605 = vmatpush.bf16.msrb.mxu3 %v12401_v8  ;;  %v12376_v8 = vld [vmem:[#allocation19 + $0xc8] sm:$0xf]  ;;  %v12556_v60 = vld [vmem:[#allocation19 + $0x230] sm:$0xf] }
0x17d1   :  { %9659 = vmatpush.bf16.msrb.mxu2 %v12725_v46  ;;  %v14024_v46 = vld [vmem:[#allocation19 + $0xd0] sm:$0xf0]  ;;  %v16841_v3 = vpop.f32.mrf.mxu3 }
0x17d2   :  { %v16836_v16 = vpop.f32.mrf.mxu2  ;;  %9549 = vmatpush.bf16.msra.mxu0 %v13249_v4  ;;  %9567 = vmatpush.bf16.msra.mxu1 %v13357_v25  ;;  %v12377_v59 = vor.u32 %v14024_v46, %v12376_v8  ;;  %v12701_v4 = vor.u32 %v14105_v13, %v12700_v61  ;;  %v14262_v25 = vld [vmem:[#allocation19 + $0x844] sm:$0xf]  ;;  %v12844_v8 = vld [vmem:[#allocation19 + $0x470] sm:$0xf]  ;;  %v16847_v46 = vpop.f32.mrf.mxu0  ;;  %v12544_v13 = vld [vmem:[#allocation19 + $0x218] sm:$0xf] }
0x17d3   :  { %v13333_v45 = vor.u32 %v14262_v25, %v13330_v30  ;;  %v14066_v25 = vld [vmem:[#allocation19 + $0x220] sm:$0xf0]  ;;  %v12652_v30 = vld [vmem:[#allocation19 + $0x2f0] sm:$0xf] }
0x17d4   :  { %9606 = vmatpush.bf16.msrb.mxu3 %v12389_v37  ;;  %v14069_v37 = vld [vmem:[#allocation19 + $0x238] sm:$0xf0] }
0x17d5   :  { %9660 = vmatpush.bf16.msrb.mxu2 %v12713_v49  ;;  %v12557_v49 = vor.u32 %v14069_v37, %v12556_v60  ;;  %v12676_v37 = vld [vmem:[#allocation19 + $0x320] sm:$0xf] }
0x17d6   :  { %9550 = vmatpush.bf16.msra.mxu0 %v13237_v7  ;;  %9568 = vmatpush.bf16.msra.mxu1 %v13345_v41  ;;  %v12689_v7 = vor.u32 %v14102_v19, %v12688_v26  ;;  %v14141_v41 = vld [vmem:[#allocation19 + $0x478] sm:$0xf0]  ;;  %v12677_v26 = vor.u32 %v14099_v54, %v12676_v37  ;;  %v14138_v19 = vld [vmem:[#allocation19 + $0x460] sm:$0xf0]  ;;  %v14096_v54 = vld [vmem:[#allocation19 + $0x310] sm:$0xf0] }
0x17d7   :  { %9518 = vmatmul.bf16.gmra.mxu2 %v16742_v56  ;;  %v12845_v61 = vor.u32 %v14141_v41, %v12844_v8  ;;  %v14063_v8 = vld [vmem:[#allocation19 + $0x208] sm:$0xf0]  ;;  %v12640_v41 = vld [vmem:[#allocation19 + $0x2d8] sm:$0xf]  ;;  %v16870_v56 = vld [vmem:[#allocation20] sm:$0x7] }
0x17d8   :  { %9607 = vmatpush.bf16.msrb.mxu3 %v12377_v59  ;;  %v12545_v59 = vor.u32 %v14066_v25, %v12544_v13  ;;  %v12664_v25 = vld [vmem:[#allocation19 + $0x308] sm:$0xf]  ;;  %v14135_v37 = vld [vmem:[#allocation19 + $0x448] sm:$0xf0]  ;;  %17274 = vst [vmem:[#allocation68_spill] sm:$0xff] %v16870_v56 }
0x17d9   :  { %9475 = vmatmul.bf16.vlgmr.msrb.gmra.mxu0 %v16660_v15  ;;  %9661 = vmatpush.bf16.msrb.mxu2 %v12701_v4  ;;  %v14093_v4 = vld [vmem:[#allocation19 + $0x2f8] sm:$0xf0]  ;;  %v16852_v13 = vpop.f32.mrf.mxu3 }
0x17da   :  { %v16844_v1 = vpop.f32.mrf.mxu2  ;;  %9569 = vmatpush.bf16.msra.mxu1 %v13333_v45  ;;  %9619 = vmatpush.bf16.msrb.mxu0 %v12557_v49  ;;  %v12653_v60 = vor.u32 %v14093_v4, %v12652_v30  ;;  %v12833_v45 = vor.u32 %v14138_v19, %v12832_v47  ;;  %v12532_v49 = vld [vmem:[#allocation19 + $0x200] sm:$0xf]  ;;  %v12665_v4 = vor.u32 %v14096_v54, %v12664_v25  ;;  %v14213_v54 = vld [vmem:[#allocation19 + $0x6b8] sm:$0xf0] }
0x17db   :  { %9532 = vmatmul.bf16.vlgmr.msra.gmra.mxu3 %v16745_v12  ;;  %v12533_v55 = vor.u32 %v14063_v8, %v12532_v49  ;;  %v12820_v30 = vld [vmem:[#allocation19 + $0x440] sm:$0xf]  ;;  %v14087_v8 = vld [vmem:[#allocation19 + $0x2c8] sm:$0xf0]  ;;  %v16856_v12 = vpop.f32.mrf.mxu0 }
0x17dc   :  { %9676 = vmatpush.bf16.msra.mxu3 %v12845_v61  ;;  %v12821_v47 = vor.u32 %v14135_v37, %v12820_v30  ;;  %v12628_v19 = vld [vmem:[#allocation19 + $0x2c0] sm:$0xf]  ;;  %v14057_v30 = vld [vmem:[#allocation19 + $0x1d8] sm:$0xf0]  ;;  %v12616_v37 = vld [vmem:[#allocation19 + $0x2a8] sm:$0xf] }
0x17dd   :  { %9494 = vmatmul.bf16.vlgmr.msrb.gmra.mxu1 %v16662_v42  ;;  %9662 = vmatpush.bf16.msrb.mxu2 %v12689_v7  ;;  %v14090_v42 = vld [vmem:[#allocation19 + $0x2e0] sm:$0xf0] }
0x17de   :  { %9620 = vmatpush.bf16.msrb.mxu0 %v12545_v59  ;;  %9638 = vmatpush.bf16.msrb.mxu1 %v12653_v60  ;;  %v12641_v61 = vor.u32 %v14090_v42, %v12640_v41  ;;  %v12520_v59 = vld [vmem:[#allocation19 + $0x1e8] sm:$0xf]  ;;  %v14060_v60 = vld [vmem:[#allocation19 + $0x1f0] sm:$0xf0]  ;;  %v13132_v41 = vld [vmem:[#allocation19 + $0x6b0] sm:$0xf] }
0x17df   :  { %v12521_v49 = vor.u32 %v14060_v60, %v12520_v59  ;;  %v14132_v42 = vld [vmem:[#allocation19 + $0x430] sm:$0xf0] }
0x17e0   :  { %9677 = vmatpush.bf16.msra.mxu3 %v12833_v45  ;;  %v12808_v45 = vld [vmem:[#allocation19 + $0x428] sm:$0xf]  ;;  %v14084_v60 = vld [vmem:[#allocation19 + $0x2b0] sm:$0xf0] }
0x17e1   :  { %9663 = vmatpush.bf16.msrb.mxu2 %v12677_v26  ;;  %v12629_v26 = vor.u32 %v14087_v8, %v12628_v19  ;;  %v12809_v25 = vor.u32 %v14132_v42, %v12808_v45  ;;  %v12617_v19 = vor.u32 %v14084_v60, %v12616_v37  ;;  %v14129_v8 = vld [vmem:[#allocation19 + $0x418] sm:$0xf0]  ;;  %v13120_v45 = vld [vmem:[#allocation19 + $0x698] sm:$0xf]  ;;  %v16865_v42 = vpop.f32.mrf.mxu3 }
0x17e2   :  { %v16854_v7 = vpop.f32.mrf.mxu2  ;;  %9621 = vmatpush.bf16.msrb.mxu0 %v12533_v55  ;;  %9639 = vmatpush.bf16.msrb.mxu1 %v12641_v61  ;;  %v13133_v55 = vor.u32 %v14213_v54, %v13132_v41  ;;  %v12508_v61 = vld [vmem:[#allocation19 + $0x1d0] sm:$0xf]  ;;  %v12496_v54 = vld [vmem:[#allocation19 + $0x1b8] sm:$0xf] }
0x17e3   :  { %v12509_v59 = vor.u32 %v14057_v30, %v12508_v61  ;;  %v14054_v61 = vld [vmem:[#allocation19 + $0x1c0] sm:$0xf0]  ;;  %v12604_v30 = vld [vmem:[#allocation19 + $0x290] sm:$0xf]  ;;  %v12784_v60 = vld [vmem:[#allocation19 + $0x3f8] sm:$0xf]  ;;  %v16868_v15 = vpop.f32.mrf.mxu0 }
0x17e4   :  { %9678 = vmatpush.bf16.msra.mxu3 %v12821_v47 }
0x17e5   :  { %9664 = vmatpush.bf16.msrb.mxu2 %v12665_v4  ;;  %v16860_v4 = vpop.f32.mrf.mxu1 }
0x17e6   :  { %9622 = vmatpush.bf16.msrb.mxu0 %v12521_v49  ;;  %9640 = vmatpush.bf16.msrb.mxu1 %v12629_v26  ;;  %v14210_v26 = vld [vmem:[#allocation19 + $0x6a0] sm:$0xf0] }
0x17e7   :  { %9589 = vmatmul.bf16.vlgmr.msra.gmra.mxu2 %v16617_v28  ;;  %v12796_v28 = vld [vmem:[#allocation19 + $0x410] sm:$0xf]  ;;  %v13121_v41 = vor.u32 %v14210_v26, %v13120_v45  ;;  %v14051_v45 = vld [vmem:[#allocation19 + $0x1a8] sm:$0xf0]  ;;  %v12592_v26 = vld [vmem:[#allocation19 + $0x278] sm:$0xf] }
0x17e8   :  { %9679 = vmatpush.bf16.msra.mxu3 %v12809_v25  ;;  %v12797_v49 = vor.u32 %v14129_v8, %v12796_v28  ;;  %v12497_v25 = vor.u32 %v14054_v61, %v12496_v54  ;;  %v14207_v8 = vld [vmem:[#allocation19 + $0x688] sm:$0xf0]  ;;  %v14078_v61 = vld [vmem:[#allocation19 + $0x280] sm:$0xf0] }
0x17e9   :  { %9480 = vmatmul.bf16.gmra.mxu0 %v16694_v18  ;;  %9733 = vmatpush.bf16.msra.mxu2 %v13133_v55  ;;  %v14081_v55 = vld [vmem:[#allocation19 + $0x298] sm:$0xf0]  ;;  %v14126_v18 = vld [vmem:[#allocation19 + $0x400] sm:$0xf0] }
0x17ea   :  { %v16862_v47 = vpop.f32.mrf.mxu2  ;;  %9623 = vmatpush.bf16.msrb.mxu0 %v12509_v59  ;;  %9641 = vmatpush.bf16.msrb.mxu1 %v12617_v19  ;;  %v12605_v37 = vor.u32 %v14081_v55, %v12604_v30  ;;  %v12785_v28 = vor.u32 %v14126_v18, %v12784_v60  ;;  %v12484_v19 = vld [vmem:[#allocation19 + $0x1a0] sm:$0xf]  ;;  %v14123_v18 = vld [vmem:[#allocation19 + $0x3e8] sm:$0xf0]  ;;  %v13096_v55 = vld [vmem:[#allocation19 + $0x668] sm:$0xf] }
0x17eb   :  { %9537 = vmatmul.bf16.gmra.mxu3 %v16769_v20  ;;  %v13108_v20 = vld [vmem:[#allocation19 + $0x680] sm:$0xf]  ;;  %v12485_v54 = vor.u32 %v14051_v45, %v12484_v19  ;;  %v16877_v19 = vperm.slane %v16870_v56, 0  ;;  %v14072_v56 = vld [vmem:[#allocation19 + $0x250] sm:$0xf0] }
0x17ec   :  { %9680 = vmatpush.bf16.msra.mxu3 %v12797_v49  ;;  %v13109_v59 = vor.u32 %v14207_v8, %v13108_v20  ;;  %v12772_v30 = vld [vmem:[#allocation19 + $0x3e0] sm:$0xf]  ;;  %v14048_v8 = vld [vmem:[#allocation19 + $0x190] sm:$0xf0] }
0x17ed   :  { %9499 = vmatmul.bf16.gmra.mxu1 %v16696_v23  ;;  %9734 = vmatpush.bf16.msra.mxu2 %v13121_v41  ;;  %v12593_v41 = vor.u32 %v14078_v61, %v12592_v26  ;;  %v12773_v60 = vor.u32 %v14123_v18, %v12772_v30  ;;  %v14204_v23 = vld [vmem:[#allocation19 + $0x670] sm:$0xf0]  ;;  %v12760_v61 = vld [vmem:[#allocation19 + $0x3c8] sm:$0xf]  ;;  %v13084_v18 = vld [vmem:[#allocation19 + $0x650] sm:$0xf] }
0x17ee   :  { %9624 = vmatpush.bf16.msrb.mxu0 %v12497_v25  ;;  %9642 = vmatpush.bf16.msrb.mxu1 %v12605_v37  ;;  %v16874_v25 = vpop.f32.mrf.mxu1  ;;  %v13097_v20 = vor.u32 %v14204_v23, %v13096_v55  ;;  %v12472_v37 = vld [vmem:[#allocation19 + $0x188] sm:$0xf]  ;;  %v14120_v30 = vld [vmem:[#allocation19 + $0x3d0] sm:$0xf0]  ;;  %v14201_v23 = vld [vmem:[#allocation19 + $0x658] sm:$0xf0] }
0x17ef   :  { %v12473_v45 = vor.u32 %v14048_v8, %v12472_v37  ;;  %v12568_v55 = vld [vmem:[#allocation19 + $0x248] sm:$0xf]  ;;  %v9135_v37 = vadd.f32 %v16800_v33, %v16877_v19 }
0x17f0   :  { %9681 = vmatpush.bf16.msra.mxu3 %v12785_v28  ;;  %v14075_v28 = vld [vmem:[#allocation19 + $0x268] sm:$0xf0] }
0x17f1   :  { %9735 = vmatpush.bf16.msra.mxu2 %v13109_v59  ;;  %v16879_v59 = vpop.f32.mrf.mxu3  ;;  %v12581_v26 = vor.u32 %v14075_v28, %v12580_v52  ;;  %v14165_v52 = vld [vmem:[#allocation19 + $0x538] sm:$0xf0]  ;;  %v14198_v28 = vld [vmem:[#allocation19 + $0x640] sm:$0xf0] }
0x17f2   :  { %v16872_v49 = vpop.f32.mrf.mxu2  ;;  %9625 = vmatpush.bf16.msrb.mxu0 %v12485_v54  ;;  %9643 = vmatpush.bf16.msrb.mxu1 %v12593_v41  ;;  %v12761_v54 = vor.u32 %v14120_v30, %v12760_v61  ;;  %v13085_v41 = vor.u32 %v14201_v23, %v13084_v18  ;;  %v14237_v30 = vld [vmem:[#allocation19 + $0x778] sm:$0xf0]  ;;  %v12928_v18 = vld [vmem:[#allocation19 + $0x518] sm:$0xf]  ;;  %v13036_v23 = vld [vmem:[#allocation19 + $0x5f0] sm:$0xf] }
0x17f4   :  { %9682 = vmatpush.bf16.msra.mxu3 %v12773_v60  ;;  %v12569_v60 = vor.u32 %v14072_v56, %v12568_v55  ;;  %v14162_v56 = vld [vmem:[#allocation19 + $0x520] sm:$0xf0]  ;;  %v9154_v55 = vadd.f32 %v16806_v44, %v9135_v37  ;;  %v12916_v44 = vld [vmem:[#allocation19 + $0x500] sm:$0xf]  ;;  %v14159_v37 = vld [vmem:[#allocation19 + $0x508] sm:$0xf0] }
0x17f5   :  { %9736 = vmatpush.bf16.msra.mxu2 %v13097_v20  ;;  %v16885_v20 = vpop.f32.mrf.mxu0 }
0x17f6   :  { %9626 = vmatpush.bf16.msrb.mxu0 %v12473_v45  ;;  %9644 = vmatpush.bf16.msrb.mxu1 %v12581_v26  ;;  %v13072_v45 = vld [vmem:[#allocation19 + $0x638] sm:$0xf]  ;;  %v13228_v26 = vld [vmem:[#allocation19 + $0x770] sm:$0xf] }
0x17f7   :  { %9594 = vmatmul.bf16.gmra.mxu2 %v16470_v48  ;;  %v12941_v48 = vor.u32 %v14165_v52, %v12940_v11  ;;  %v13073_v61 = vor.u32 %v14198_v28, %v13072_v45  ;;  %v13229_v33 = vor.u32 %v14237_v30, %v13228_v26  ;;  %v16892_v11 = vpop.f32.mrf.mxu1  ;;  %v13060_v45 = vld [vmem:[#allocation19 + $0x620] sm:$0xf]  ;;  %v14234_v26 = vld [vmem:[#allocation19 + $0x760] sm:$0xf0] }
0x17f8   :  { %9683 = vmatpush.bf16.msra.mxu3 %v12761_v54  ;;  %v12929_v54 = vor.u32 %v14162_v56, %v12928_v18  ;;  %v9173_v18 = vadd.f32 %v16823_v24, %v9154_v55  ;;  %v9137_v56 = vadd.f32 %v16808_v22, %v16877_v19  ;;  %v12904_v55 = vld [vmem:[#allocation19 + $0x4e8] sm:$0xf]  ;;  %v13012_v22 = vld [vmem:[#allocation19 + $0x5c0] sm:$0xf] }
0x17f9   :  { %9551 = vmatmul.bf16.vlgmr.msra.gmra.mxu0 %v16780_v40  ;;  %9737 = vmatpush.bf16.msra.mxu2 %v13085_v41  ;;  %v14189_v41 = vld [vmem:[#allocation19 + $0x5f8] sm:$0xf0]  ;;  %v12917_v40 = vor.u32 %v14159_v37, %v12916_v44 }
0x17fa   :  { %v16887_v8 = vpop.f32.mrf.mxu2  ;;  %9645 = vmatpush.bf16.msrb.mxu1 %v12569_v60  ;;  %9695 = vmatpush.bf16.msra.mxu0 %v12941_v48  ;;  %v14195_v60 = vld [vmem:[#allocation19 + $0x628] sm:$0xf0]  ;;  %v13216_v48 = vld [vmem:[#allocation19 + $0x758] sm:$0xf]  ;;  %v9156_v44 = vadd.f32 %v16812_v39, %v9137_v56  ;;  %v9192_v37 = vadd.f32 %v16829_v9, %v9173_v18  ;;  %v12892_v39 = vld [vmem:[#allocation19 + $0x4d0] sm:$0xf] }
0x17fb   :  { %9608 = vmatmul.bf16.vlgmr.msrb.gmra.mxu3 %v16489_v6  ;;  %v13037_v6 = vor.u32 %v14189_v41, %v13036_v23  ;;  %v13061_v28 = vor.u32 %v14195_v60, %v13060_v45  ;;  %v13217_v30 = vor.u32 %v14234_v26, %v13216_v48  ;;  %v13048_v41 = vld [vmem:[#allocation19 + $0x608] sm:$0xf]  ;;  %v14192_v45 = vld [vmem:[#allocation19 + $0x610] sm:$0xf0]  ;;  %v14231_v60 = vld [vmem:[#allocation19 + $0x748] sm:$0xf0] }
0x17fc   :  { %9752 = vmatpush.bf16.msrb.mxu3 %v13229_v33  ;;  %v14156_v26 = vld [vmem:[#allocation19 + $0x4f0] sm:$0xf0]  ;;  %v14153_v9 = vld [vmem:[#allocation19 + $0x4d8] sm:$0xf0]  ;;  %v13000_v18 = vld [vmem:[#allocation19 + $0x5a8] sm:$0xf]  ;;  %v9175_v56 = vadd.f32 %v16834_v32, %v9156_v44 }
0x17fd   :  { %9570 = vmatmul.bf16.vlgmr.msra.gmra.mxu1 %v16786_v2  ;;  %9738 = vmatpush.bf16.msra.mxu2 %v13073_v61  ;;  %v13024_v2 = vld [vmem:[#allocation19 + $0x5d8] sm:$0xf]  ;;  %v14186_v61 = vld [vmem:[#allocation19 + $0x5e0] sm:$0xf0]  ;;  %v16901_v48 = vpop.f32.mrf.mxu0 }
0x17fe   :  { %v16894_v52 = vpop.f32.mrf.mxu3  ;;  %9696 = vmatpush.bf16.msra.mxu0 %v12929_v54  ;;  %9714 = vmatpush.bf16.msra.mxu1 %v13037_v6  ;;  %v13025_v23 = vor.u32 %v14186_v61, %v13024_v2  ;;  %v13204_v54 = vld [vmem:[#allocation19 + $0x740] sm:$0xf]  ;;  %v13049_v6 = vor.u32 %v14192_v45, %v13048_v41  ;;  %v13192_v41 = vld [vmem:[#allocation19 + $0x728] sm:$0xf]  ;;  %v14228_v45 = vld [vmem:[#allocation19 + $0x730] sm:$0xf0] }
0x17ff   :  { %v13205_v24 = vor.u32 %v14231_v60, %v13204_v54  ;;  %v16909_v54 = vpop.f32.mrf.mxu1  ;;  %v12893_v60 = vor.u32 %v14153_v9, %v12892_v39  ;;  %v12880_v32 = vld [vmem:[#allocation19 + $0x4b8] sm:$0xf]  ;;  %v14150_v44 = vld [vmem:[#allocation19 + $0x4c0] sm:$0xf0] }
0x1800   :  { %9753 = vmatpush.bf16.msrb.mxu3 %v13217_v30  ;;  %v14183_v30 = vld [vmem:[#allocation19 + $0x5c8] sm:$0xf0] }
0x1801   :  { %9739 = vmatpush.bf16.msra.mxu2 %v13061_v28  ;;  %v12905_v28 = vor.u32 %v14156_v26, %v12904_v55  ;;  %v13013_v61 = vor.u32 %v14183_v30, %v13012_v22  ;;  %v13180_v55 = vld [vmem:[#allocation19 + $0x710] sm:$0xf]  ;;  %v14225_v26 = vld [vmem:[#allocation19 + $0x718] sm:$0xf0]  ;;  %v9194_v30 = vadd.f32 %v16838_v34, %v9175_v56  ;;  %v12868_v34 = vld [vmem:[#allocation19 + $0x4a0] sm:$0xf] }
0x1802   :  { %v16899_v33 = vpop.f32.mrf.mxu2  ;;  %9697 = vmatpush.bf16.msra.mxu0 %v12917_v40  ;;  %9715 = vmatpush.bf16.msra.mxu1 %v13025_v23  ;;  %v9211_v40 = vadd.f32 %v16826_v57, %v9192_v37  ;;  %v13193_v23 = vor.u32 %v14228_v45, %v13192_v41  ;;  %v13181_v37 = vor.u32 %v14225_v26, %v13180_v55  ;;  %v14177_v41 = vld [vmem:[#allocation19 + $0x598] sm:$0xf0]  ;;  %v12976_v56 = vld [vmem:[#allocation19 + $0x578] sm:$0xf] }
0x1803   :  { %v9213_v9 = vadd.f32 %v16836_v16, %v9194_v30  ;;  %v13156_v16 = vld [vmem:[#allocation19 + $0x6e0] sm:$0xf] }
0x1804   :  { %9754 = vmatpush.bf16.msrb.mxu3 %v13205_v24  ;;  %v14180_v24 = vld [vmem:[#allocation19 + $0x5b0] sm:$0xf0]  ;;  %v9230_v22 = vadd.f32 %v16841_v3, %v9211_v40  ;;  %v13168_v3 = vld [vmem:[#allocation19 + $0x6f8] sm:$0xf]  ;;  %v14222_v40 = vld [vmem:[#allocation19 + $0x700] sm:$0xf0] }
0x1805   :  { %9740 = vmatpush.bf16.msra.mxu2 %v13049_v6  ;;  %v9140_v6 = vadd.f32 %v16814_v62, %v16877_v19  ;;  %v12988_v62 = vld [vmem:[#allocation19 + $0x590] sm:$0xf]  ;;  %v16922_v45 = vpop.f32.mrf.mxu0 }
0x1806   :  { %v16905_v2 = vpop.f32.mrf.mxu3  ;;  %9698 = vmatpush.bf16.msra.mxu0 %v12905_v28  ;;  %9716 = vmatpush.bf16.msra.mxu1 %v13013_v61  ;;  %v12881_v61 = vor.u32 %v14150_v44, %v12880_v32  ;;  %v9249_v39 = vadd.f32 %v16868_v15, %v9230_v22  ;;  %v14219_v22 = vld [vmem:[#allocation19 + $0x6e8] sm:$0xf0] }
0x1807   :  { %9665 = vmatmul.bf16.vlgmr.msrb.gmra.mxu2 %v16562_v63  ;;  %v13001_v63 = vor.u32 %v14180_v24, %v13000_v18  ;;  %v9159_v28 = vadd.f32 %v16820_v51, %v9140_v6  ;;  %v13169_v18 = vor.u32 %v14222_v40, %v13168_v3  ;;  %v14147_v51 = vld [vmem:[#allocation19 + $0x4a8] sm:$0xf0]  ;;  %v16931_v55 = vpop.f32.mrf.mxu1  ;;  %v13157_v44 = vor.u32 %v14219_v22, %v13156_v16  ;;  %v14216_v40 = vld [vmem:[#allocation19 + $0x6d0] sm:$0xf0]  ;;  %v13420_v16 = vld [vmem:[#allocation19 + $0x8f0] sm:$0xf] }
0x1808   :  { %9755 = vmatpush.bf16.msrb.mxu3 %v13193_v23  ;;  %v12869_v24 = vor.u32 %v14147_v51, %v12868_v34  ;;  %v9268_v32 = vadd.f32 %v16874_v25, %v9249_v39  ;;  %v13144_v25 = vld [vmem:[#allocation19 + $0x6c8] sm:$0xf]  ;;  %v13324_v34 = vld [vmem:[#allocation19 + $0x830] sm:$0xf] }
0x1809   :  { %9556 = vmatmul.bf16.gmra.mxu0 %v16797_v27  ;;  %v9178_v6 = vadd.f32 %v16847_v46, %v9159_v28  ;;  %v12856_v46 = vld [vmem:[#allocation19 + $0x488] sm:$0xf] }
0x180a   :  { %v16915_v57 = vpop.f32.mrf.mxu2  ;;  %9699 = vmatpush.bf16.msra.mxu0 %v12893_v60  ;;  %9717 = vmatpush.bf16.msra.mxu1 %v13001_v63  ;;  %v9142_v60 = vadd.f32 %v16818_v17, %v16877_v19  ;;  %v14174_v63 = vld [vmem:[#allocation19 + $0x580] sm:$0xf0]  ;;  %v12964_v17 = vld [vmem:[#allocation19 + $0x560] sm:$0xf]  ;;  %v9287_v30 = vadd.f32 %v16862_v47, %v9268_v32  ;;  %v14168_v47 = vld [vmem:[#allocation19 + $0x550] sm:$0xf0] }
0x180b   :  { %9613 = vmatmul.bf16.gmra.mxu3 %v16506_v31  ;;  %v12989_v31 = vor.u32 %v14177_v41, %v12988_v62  ;;  %v12977_v15 = vor.u32 %v14174_v63, %v12976_v56  ;;  %v14144_v62 = vld [vmem:[#allocation19 + $0x490] sm:$0xf0]  ;;  %v9197_v28 = vadd.f32 %v16850_v0, %v9178_v6  ;;  %v14171_v41 = vld [vmem:[#allocation19 + $0x568] sm:$0xf0]  ;;  %v13145_v0 = vor.u32 %v14216_v40, %v13144_v25  ;;  %v13396_v25 = vld [vmem:[#allocation19 + $0x8c0] sm:$0xf] }
0x180c   :  { %9756 = vmatpush.bf16.msrb.mxu3 %v13181_v37  ;;  %v9232_v37 = vadd.f32 %v16852_v13, %v9213_v9  ;;  %v9161_v19 = vadd.f32 %v16832_v21, %v9142_v60  ;;  %v12965_v13 = vor.u32 %v14171_v41, %v12964_v17  ;;  %v12952_v21 = vld [vmem:[#allocation19 + $0x548] sm:$0xf]  ;;  %v14261_v60 = vld [vmem:[#allocation19 + $0x838] sm:$0xf0] }
0x180d   :  { %9575 = vmatmul.bf16.gmra.mxu1 %v16803_v58  ;;  %v9216_v9 = vadd.f32 %v16844_v1, %v9197_v28  ;;  %v12953_v6 = vor.u32 %v14168_v47, %v12952_v21  ;;  %v13325_v1 = vor.u32 %v14261_v60, %v13324_v34  ;;  %v14282_v28 = vld [vmem:[#allocation19 + $0x8e0] sm:$0xf0]  ;;  %v13276_v34 = vld [vmem:[#allocation19 + $0x7d0] sm:$0xf] }
0x180e   :  { %v16924_v23 = vpop.f32.mrf.mxu3  ;;  %9700 = vmatpush.bf16.msra.mxu0 %v12881_v61  ;;  %9718 = vmatpush.bf16.msra.mxu1 %v12989_v31  ;;  %v12857_v61 = vor.u32 %v14144_v62, %v12856_v46  ;;  %v9251_v39 = vadd.f32 %v16885_v20, %v9232_v37  ;;  %v9180_v51 = vadd.f32 %v16856_v12, %v9161_v19  ;;  %v13312_v12 = vld [vmem:[#allocation19 + $0x818] sm:$0xf] }
0x1810   :  { %9757 = vmatpush.bf16.msrb.mxu3 %v13169_v18  ;;  %v9306_v18 = vadd.f32 %v16894_v52, %v9287_v30  ;;  %v9270_v52 = vadd.f32 %v16892_v11, %v9251_v39 }
0x1812   :  { %v16933_v26 = vpop.f32.mrf.mxu2  ;;  %9701 = vmatpush.bf16.msra.mxu0 %v12869_v24  ;;  %9719 = vmatpush.bf16.msra.mxu1 %v12977_v15  ;;  %v14258_v15 = vld [vmem:[#allocation19 + $0x820] sm:$0xf0]  ;;  %v9289_v22 = vadd.f32 %v16872_v49, %v9270_v52  ;;  %v14255_v49 = vld [vmem:[#allocation19 + $0x808] sm:$0xf0]  ;;  %v13372_v52 = vld [vmem:[#allocation19 + $0x890] sm:$0xf] }
0x1813   :  { %v13313_v32 = vor.u32 %v14258_v15, %v13312_v12  ;;  %v17275_v12 = vld [vmem:[#allocation62_spill] sm:$0xff] }
0x1814   :  { %9758 = vmatpush.bf16.msrb.mxu3 %v13157_v44  ;;  %v9308_v17 = vadd.f32 %v16905_v2, %v9289_v22  ;;  %v13288_v2 = vld [vmem:[#allocation19 + $0x7e8] sm:$0xf] }
0x1816   :  { %v16940_v31 = vpop.f32.mrf.mxu3  ;;  %v9324_v3 = vpop.f32.mrf.mxu0  ;;  %9702 = vmatpush.bf16.msra.mxu0 %v12857_v61  ;;  %9720 = vmatpush.bf16.msra.mxu1 %v12965_v13  ;;  %v14252_v13 = vld [vmem:[#allocation19 + $0x7f0] sm:$0xf0] }
0x1817   :  { %9670 = vmatmul.bf16.gmra.mxu2 %v16584_v35  ;;  %v9325_v56 = vadd.f32 %v9324_v3, %v9306_v18  ;;  %v9235_v35 = vadd.f32 %v16865_v42, %v9216_v9  ;;  %v14285_v42 = vld [vmem:[#allocation19 + $0x8f8] sm:$0xf0]  ;;  %v13289_v9 = vor.u32 %v14252_v13, %v13288_v2  ;;  %v14279_v18 = vld [vmem:[#allocation19 + $0x8c8] sm:$0xf0]  ;;  %v14264_v2 = vld [vmem:[#allocation19 + $0x850] sm:$0xf0] }
0x1818   :  { %9759 = vmatpush.bf16.msrb.mxu3 %v13145_v0  ;;  %v13421_v46 = vor.u32 %v14285_v42, %v13420_v16  ;;  %v13397_v47 = vor.u32 %v14279_v18, %v13396_v25  ;;  %v14273_v16 = vld [vmem:[#allocation19 + $0x898] sm:$0xf0]  ;;  %v13360_v42 = vld [vmem:[#allocation19 + $0x878] sm:$0xf]  ;;  %v17278_v13 = vld [vmem:[#allocation63_spill] sm:$0xff] }
0x1819   :  { %9627 = vmatmul.bf16.vlgmr.msrb.gmra.mxu0 %v16517_v10  ;;  %v9199_v10 = vadd.f32 %v16860_v4, %v9180_v51  ;;  %v13300_v4 = vld [vmem:[#allocation19 + $0x800] sm:$0xf]  ;;  %v14249_v51 = vld [vmem:[#allocation19 + $0x7d8] sm:$0xf0]  ;;  %v13373_v22 = vor.u32 %v14273_v16, %v13372_v52  ;;  %v17284_v52 = vld [vmem:[#allocation68_spill] sm:$0xff] }
0x181a   :  { %v9343_v20 = vpop.f32.mrf.mxu1  ;;  %v16948_v24 = vpop.f32.mrf.mxu2  ;;  %9721 = vmatpush.bf16.msra.mxu1 %v12953_v6  ;;  %9771 = vmatpush.bf16.msrb.mxu0 %v13325_v1  ;;  %v14276_v6 = vld [vmem:[#allocation19 + $0x8b0] sm:$0xf0] }
0x181b   :  { %v9344_v63 = vadd.f32 %v9343_v20, %v9325_v56  ;;  %9684 = vmatmul.bf16.vlgmr.msra.gmra.mxu3 %v16605_v5  ;;  %v9254_v5 = vadd.f32 %v16901_v48, %v9235_v35  ;;  %v9218_v62 = vadd.f32 %v16854_v7, %v9199_v10 }
0x181d   :  { %v9809_v37 = vadd.f32 %v9344_v63, %v16171_v29  ;;  %9646 = vmatmul.bf16.vlgmr.msrb.gmra.mxu1 %v16524_v36  ;;  %v13408_v29 = vld [vmem:[#allocation19 + $0x8d8] sm:$0xf]  ;;  %v13301_v36 = vor.u32 %v14255_v49, %v13300_v4  ;;  %v9237_v3 = vadd.f32 %v16879_v59, %v9218_v62  ;;  %v9273_v48 = vadd.f32 %v16909_v54, %v9254_v5  ;;  %v14240_v4 = vld [vmem:[#allocation19 + $0x790] sm:$0xf0]  ;;  %v13348_v49 = vld [vmem:[#allocation19 + $0x860] sm:$0xf] }
0x181e   :  { %v9326_v44 = vpop.f32.mrf.mxu0  ;;  %v16957_v11 = vpop.f32.mrf.mxu3  ;;  %9772 = vmatpush.bf16.msrb.mxu0 %v13313_v32  ;;  %9790 = vmatpush.bf16.msrb.mxu1 %v13421_v46  ;;  %v13409_v41 = vor.u32 %v14282_v28, %v13408_v29  ;;  %v14243_v32 = vld [vmem:[#allocation19 + $0x7a8] sm:$0xf0]  ;;  %v14270_v46 = vld [vmem:[#allocation19 + $0x880] sm:$0xf0] }
0x181f   :  { %9821 = vst [vmem:[#allocation22] sm:$0xff] %v9809_v37  ;;  %v9327_v19 = vadd.f32 %v9326_v44, %v9308_v17  ;;  %v9292_v40 = vadd.f32 %v16887_v8, %v9273_v48  ;;  %v9256_v59 = vadd.f32 %v16922_v45, %v9237_v3  ;;  %v13384_v8 = vld [vmem:[#allocation19 + $0x8a8] sm:$0xf]  ;;  %v13361_v5 = vor.u32 %v14270_v46, %v13360_v42  ;;  %v17276_v29 = vld [vmem:[#allocation40_spill] sm:$0xff]  ;;  %v17277_v48 = vld [vmem:[#allocation50_spill] sm:$0xff] }
0x1820   :  { %v13385_v20 = vor.u32 %v14276_v6, %v13384_v8  ;;  %v13240_v17 = vld [vmem:[#allocation19 + $0x788] sm:$0xf]  ;;  %v14267_v28 = vld [vmem:[#allocation19 + $0x868] sm:$0xf0]  ;;  %v17283_v6 = vld [vmem:[#allocation53_spill] sm:$0xff] }
0x1821   :  { %v9311_v54 = vadd.f32 %v16924_v23, %v9292_v40  ;;  %v9275_v1 = vadd.f32 %v16931_v55, %v9256_v59  ;;  %v14246_v23 = vld [vmem:[#allocation19 + $0x7c0] sm:$0xf0]  ;;  %v13349_v3 = vor.u32 %v14267_v28, %v13348_v49  ;;  %v17281_v8 = vld [vmem:[#allocation52_spill] sm:$0xff] }
0x1822   :  { %v9345_v30 = vpop.f32.mrf.mxu1  ;;  %v16962_v61 = vpop.f32.mrf.mxu2  ;;  %9773 = vmatpush.bf16.msrb.mxu0 %v13301_v36  ;;  %9791 = vmatpush.bf16.msrb.mxu1 %v13409_v41  ;;  %v13241_v36 = vor.u32 %v14240_v4, %v13240_v17 }
0x1823   :  { %v9346_v7 = vadd.f32 %v9345_v30, %v9327_v19  ;;  %v9294_v63 = vadd.f32 %v16899_v33, %v9275_v1 }
0x1825   :  { %v9812_v39 = vadd.f32 %v9346_v7, %v16154_v53  ;;  %v13277_v53 = vor.u32 %v14249_v51, %v13276_v34  ;;  %v9313_v37 = vadd.f32 %v16940_v31, %v9294_v63  ;;  %v13336_v7 = vld [vmem:[#allocation19 + $0x848] sm:$0xf]  ;;  %v7584_v63 = vperm.slane %v17284_v52, 1 }
0x1826   :  { %v9329_v0 = vpop.f32.mrf.mxu0  ;;  %v16968_v21 = vpop.f32.mrf.mxu3  ;;  %9774 = vmatpush.bf16.msrb.mxu0 %v13289_v9  ;;  %9792 = vmatpush.bf16.msrb.mxu1 %v13397_v47  ;;  %v13337_v25 = vor.u32 %v14264_v2, %v13336_v7  ;;  %v17280_v9 = vld [vmem:[#allocation64_spill] sm:$0xff] }
0x1827   :  { %9824 = vst [vmem:[#allocation22 + $0x18] sm:$0xff] %v9812_v39  ;;  %9741 = vmatmul.bf16.vlgmr.msra.gmra.mxu2 %v16714_v14  ;;  %v9330_v56 = vadd.f32 %v9329_v0, %v9311_v54  ;;  %v13264_v14 = vld [vmem:[#allocation19 + $0x7b8] sm:$0xf]  ;;  %v17279_v39 = vld [vmem:[#allocation51_spill] sm:$0xff] }
0x1828   :  { %v13265_v15 = vor.u32 %v14246_v23, %v13264_v14 }
0x1829   :  { %9632 = vmatmul.bf16.gmra.mxu0 %v16542_v50 }
0x182a   :  { %v9348_v60 = vpop.f32.mrf.mxu1  ;;  %v16975_v35 = vpop.f32.mrf.mxu2  ;;  %9775 = vmatpush.bf16.msrb.mxu0 %v13277_v53  ;;  %9793 = vmatpush.bf16.msrb.mxu1 %v13385_v20  ;;  %v17282_v53 = vld [vmem:[#allocation60_spill] sm:$0xff] }
0x182b   :  { %v9349_v45 = vadd.f32 %v9348_v60, %v9330_v56  ;;  %9689 = vmatmul.bf16.gmra.mxu3 %v16627_v43  ;;  %v13252_v43 = vld [vmem:[#allocation19 + $0x7a0] sm:$0xf] }
0x182c   :  { %v13253_v33 = vor.u32 %v14243_v32, %v13252_v43 }
0x182d   :  { %v9815_v50 = vadd.f32 %v9349_v45, %v16226_v38  ;;  %9651 = vmatmul.bf16.gmra.mxu1 %v17275_v12 }
0x182e   :  { %v9331_v10 = vpop.f32.mrf.mxu0  ;;  %v16981_v55 = vpop.f32.mrf.mxu3  ;;  %9776 = vmatpush.bf16.msrb.mxu0 %v13265_v15  ;;  %9794 = vmatpush.bf16.msrb.mxu1 %v13373_v22  ;;  %v9363_v15 = vadd.f32 %v16915_v57, %v7584_v63 }
0x182f   :  { %9827 = vst [vmem:[#allocation22 + $0x30] sm:$0xff] %v9815_v50  ;;  %v9332_v44 = vadd.f32 %v9331_v10, %v9313_v37  ;;  %v17285_v50 = vld [vmem:[#allocation59_spill] sm:$0xff] }
0x1830   :  { %v17286_v10 = vld [vmem:[#allocation67_spill] sm:$0xff]  ;;  %v9382_v43 = vadd.f32 %v16957_v11, %v9363_v15  ;;  %v9368_v11 = vadd.f32 %v16948_v24, %v7584_v63 }
0x1832   :  { %v9350_v38 = vpop.f32.mrf.mxu1  ;;  %9777 = vmatpush.bf16.msrb.mxu0 %v13253_v33  ;;  %9795 = vmatpush.bf16.msrb.mxu1 %v13361_v5  ;;  %v16985_v31 = vpop.f32.mrf.mxu2  ;;  %v9365_v33 = vadd.f32 %v16933_v26, %v7584_v63  ;;  %v9387_v28 = vadd.f32 %v16981_v55, %v9368_v11  ;;  %v17290_v11 = vld [vmem:[#allocation43_spill] sm:$0xff] }
0x1833   :  { %v9351_v62 = vadd.f32 %v9350_v38, %v9332_v44 }
0x1834   :  { %v9384_v5 = vadd.f32 %v16968_v21, %v9365_v33 }
0x1835   :  { %v9818_v19 = vadd.f32 %v9351_v62, %v17276_v29 }
0x1836   :  { %v16987_v30 = vpop.f32.mrf.mxu3  ;;  %v9400_v41 = vpop.f32.mrf.mxu0  ;;  %9778 = vmatpush.bf16.msrb.mxu0 %v13241_v36  ;;  %9796 = vmatpush.bf16.msrb.mxu1 %v13349_v3 }
0x1837   :  { %9830 = vst [vmem:[#allocation22 + $0x48] sm:$0xff] %v9818_v19  ;;  %9746 = vmatmul.bf16.gmra.mxu2 %v17277_v48  ;;  %v9401_v32 = vadd.f32 %v9400_v41, %v9382_v43 }
0x1839   :  { %9703 = vmatmul.bf16.vlgmr.msra.gmra.mxu0 %v17278_v13  ;;  %v9370_v13 = vadd.f32 %v16962_v61, %v7584_v63 }
0x183a   :  { %v9419_v40 = vpop.f32.mrf.mxu1  ;;  %9797 = vmatpush.bf16.msrb.mxu1 %v13337_v25  ;;  %v9443_v47 = vpop.f32.mrf.mxu2 }
0x183b   :  { %9760 = vmatmul.bf16.vlgmr.msrb.gmra.mxu3 %v17279_v39  ;;  %v9420_v44 = vadd.f32 %v9419_v40, %v9401_v32 }
0x183d   :  { %9722 = vmatmul.bf16.vlgmr.msra.gmra.mxu1 %v17280_v9  ;;  %v9439_v62 = vadd.f32 %v16975_v35, %v9420_v44 }
0x183e   :  { %v9402_v18 = vpop.f32.mrf.mxu0  ;;  %v9457_v0 = vpop.f32.mrf.mxu3 }
0x183f   :  { %v9403_v57 = vadd.f32 %v9402_v18, %v9384_v5  ;;  %v9458_v49 = vadd.f32 %v9457_v0, %v9439_v62 }
0x1842   :  { %v9421_v59 = vpop.f32.mrf.mxu1  ;;  %v16993_v51 = vpop.f32.mrf.mxu2 }
0x1843   :  { %v9422_v29 = vadd.f32 %v9421_v59, %v9403_v57 }
0x1845   :  { %v9441_v21 = vadd.f32 %v16985_v31, %v9422_v29 }
0x1846   :  { %v9405_v54 = vpop.f32.mrf.mxu0  ;;  %v9459_v34 = vpop.f32.mrf.mxu3 }
0x1847   :  { %v9406_v35 = vadd.f32 %v9405_v54, %v9387_v28  ;;  %v9460_v7 = vadd.f32 %v9459_v34, %v9441_v21 }
0x1849   :  { %9708 = vmatmul.bf16.gmra.mxu0 %v17281_v8 }
0x184a   :  { %v9424_v56 = vpop.f32.mrf.mxu1  ;;  %v9514_v45 = vpop.f32.mrf.mxu2 }
0x184b   :  { %9765 = vmatmul.bf16.gmra.mxu3 %v17282_v53 }
0x184d   :  { %9727 = vmatmul.bf16.gmra.mxu1 %v17283_v6  ;;  %v17287_v6 = vld [vmem:[#allocation41_spill] sm:$0xff] }
0x184e   :  { %v9407_v60 = vpop.f32.mrf.mxu0  ;;  %v9462_v20 = vpop.f32.mrf.mxu3 }
0x1852   :  { %v9426_v1 = vpop.f32.mrf.mxu1  ;;  %v9516_v16 = vpop.f32.mrf.mxu2 }
0x1856   :  { %v16998_v14 = vpop.f32.mrf.mxu3  ;;  %v9476_v23 = vpop.f32.mrf.mxu0 }
0x1857   :  { %v9477_v19 = vadd.f32 %v9476_v23, %v9458_v49 }
0x1859   :  { %9779 = vmatmul.bf16.vlgmr.msrb.gmra.mxu0 %v17285_v50 }
0x185a   :  { %v9495_v12 = vpop.f32.mrf.mxu1  ;;  %v9519_v17 = vpop.f32.mrf.mxu2 }
0x185b   :  { %v9496_v41 = vadd.f32 %v9495_v12, %v9477_v19 }
0x185d   :  { %9798 = vmatmul.bf16.vlgmr.msrb.gmra.mxu1 %v17286_v10  ;;  %v9515_v2 = vadd.f32 %v9514_v45, %v9496_v41 }
0x185e   :  { %v9478_v22 = vpop.f32.mrf.mxu0  ;;  %v9533_v37 = vpop.f32.mrf.mxu3 }
0x185f   :  { %v9479_v25 = vadd.f32 %v9478_v22, %v9460_v7  ;;  %v9534_v9 = vadd.f32 %v9533_v37, %v9515_v2 }
0x1862   :  { %v9497_v42 = vpop.f32.mrf.mxu1  ;;  %v9521_v3 = vpop.f32.mrf.mxu2 }
0x1863   :  { %v9498_v18 = vadd.f32 %v9497_v42, %v9479_v25 }
0x1865   :  { %v9517_v8 = vadd.f32 %v9516_v16, %v9498_v18  ;;  %v17288_v16 = vld [vmem:[#allocation54_spill] sm:$0xff] }
0x1866   :  { %v9481_v46 = vpop.f32.mrf.mxu0  ;;  %v9535_v38 = vpop.f32.mrf.mxu3 }
0x1867   :  { %v9536_v50 = vadd.f32 %v9535_v38, %v9517_v8  ;;  %v17289_v38 = vld [vmem:[#allocation56_spill] sm:$0xff] }
0x1869   :  { %9784 = vmatmul.bf16.gmra.mxu0 %v16797_v27  ;;  %v9425_v27 = vadd.f32 %v9424_v56, %v9406_v35 }
0x186a   :  { %v9500_v4 = vpop.f32.mrf.mxu1  ;;  %v9590_v34 = vpop.f32.mrf.mxu2 }
0x186b   :  { %v9444_v39 = vadd.f32 %v9443_v47, %v9425_v27 }
0x186d   :  { %9803 = vmatmul.bf16.gmra.mxu1 %v16803_v58  ;;  %v9389_v58 = vadd.f32 %v16987_v30, %v9370_v13  ;;  %v9463_v59 = vadd.f32 %v9462_v20, %v9444_v39  ;;  %v7585_v39 = vperm.slane %v17284_v52, 2 }
0x186e   :  { %v9483_v36 = vpop.f32.mrf.mxu0  ;;  %v9538_v26 = vpop.f32.mrf.mxu3 }
0x186f   :  { %v9408_v55 = vadd.f32 %v9407_v60, %v9389_v58  ;;  %v9482_v56 = vadd.f32 %v9481_v46, %v9463_v59 }
0x1871   :  { %v9427_v54 = vadd.f32 %v9426_v1, %v9408_v55  ;;  %v9501_v30 = vadd.f32 %v9500_v4, %v9482_v56  ;;  %v9591_v55 = vadd.f32 %v9590_v34, %v7585_v39 }
0x1872   :  { %v9502_v48 = vpop.f32.mrf.mxu1  ;;  %v9592_v22 = vpop.f32.mrf.mxu2 }
0x1873   :  { %v9446_v63 = vadd.f32 %v16993_v51, %v9427_v54  ;;  %v9520_v15 = vadd.f32 %v9519_v17, %v9501_v30 }
0x1875   :  { %v9465_v60 = vadd.f32 %v16998_v14, %v9446_v63  ;;  %v9539_v43 = vadd.f32 %v9538_v26, %v9520_v15 }
0x1876   :  { %v9540_v24 = vpop.f32.mrf.mxu3  ;;  %v9552_v40 = vpop.f32.mrf.mxu0 }
0x1877   :  { %v9553_v0 = vadd.f32 %v9552_v40, %v9534_v9  ;;  %v9484_v1 = vadd.f32 %v9483_v36, %v9465_v60 }
0x1879   :  { %v9503_v32 = vadd.f32 %v9502_v48, %v9484_v1 }
0x187a   :  { %v9571_v31 = vpop.f32.mrf.mxu1  ;;  %v9595_v14 = vpop.f32.mrf.mxu2 }
0x187b   :  { %v9572_v53 = vadd.f32 %v9571_v31, %v9553_v0  ;;  %v9522_v33 = vadd.f32 %v9521_v3, %v9503_v32  ;;  %v9596_v52 = vadd.f32 %v9595_v14, %v7585_v39 }
0x187d   :  { %v9810_v45 = vadd.f32 %v9572_v53, %v17287_v6  ;;  %v9541_v57 = vadd.f32 %v9540_v24, %v9522_v33  ;;  %v9593_v6 = vadd.f32 %v9592_v22, %v7585_v39 }
0x187e   :  { %v9554_v61 = vpop.f32.mrf.mxu0  ;;  %v9609_v23 = vpop.f32.mrf.mxu3 }
0x187f   :  { %9822 = vst [vmem:[#allocation22 + $0x8] sm:$0xff] %v9810_v45  ;;  %v9555_v47 = vadd.f32 %v9554_v61, %v9536_v50  ;;  %v9610_v31 = vadd.f32 %v9609_v23, %v9591_v55 }
0x1882   :  { %v9573_v12 = vpop.f32.mrf.mxu1  ;;  %v9597_v26 = vpop.f32.mrf.mxu2 }
0x1883   :  { %v9574_v20 = vadd.f32 %v9573_v12, %v9555_v47 }
0x1885   :  { %v9813_v10 = vadd.f32 %v9574_v20, %v17288_v16 }
0x1886   :  { %v9557_v37 = vpop.f32.mrf.mxu0  ;;  %v9611_v42 = vpop.f32.mrf.mxu3 }
0x1887   :  { %9825 = vst [vmem:[#allocation22 + $0x20] sm:$0xff] %v9813_v10  ;;  %v9558_v44 = vadd.f32 %v9557_v37, %v9539_v43  ;;  %v9612_v61 = vadd.f32 %v9611_v42, %v9593_v6  ;;  %v17293_v6 = vld [vmem:[#allocation65_spill] sm:$0xff] }
0x188a   :  { %v9576_v51 = vpop.f32.mrf.mxu1  ;;  %v9666_v3 = vpop.f32.mrf.mxu2 }
0x188b   :  { %v9577_v46 = vadd.f32 %v9576_v51, %v9558_v44  ;;  %v9598_v44 = vadd.f32 %v9597_v26, %v7585_v39  ;;  %v17292_v39 = vld [vmem:[#allocation55_spill] sm:$0xff] }
0x188d   :  { %v9816_v5 = vadd.f32 %v9577_v46, %v17289_v38 }
0x188e   :  { %v9559_v62 = vpop.f32.mrf.mxu0  ;;  %v9614_v4 = vpop.f32.mrf.mxu3 }
0x188f   :  { %9828 = vst [vmem:[#allocation22 + $0x38] sm:$0xff] %v9816_v5  ;;  %v9560_v17 = vadd.f32 %v9559_v62, %v9541_v57  ;;  %v9615_v1 = vadd.f32 %v9614_v4, %v9596_v52 }
0x1892   :  { %v9578_v49 = vpop.f32.mrf.mxu1  ;;  %v9668_v2 = vpop.f32.mrf.mxu2 }
0x1893   :  { %v9579_v29 = vadd.f32 %v9578_v49, %v9560_v17 }
0x1895   :  { %v9819_v19 = vadd.f32 %v9579_v29, %v17290_v11 }
0x1896   :  { %v9628_v36 = vpop.f32.mrf.mxu0  ;;  %v9616_v21 = vpop.f32.mrf.mxu3 }
0x1897   :  { %9831 = vst [vmem:[#allocation22 + $0x50] sm:$0xff] %v9819_v19  ;;  %v9629_v59 = vadd.f32 %v9628_v36, %v9610_v31  ;;  %v9617_v46 = vadd.f32 %v9616_v21, %v9598_v44 }
0x189a   :  { %v9647_v28 = vpop.f32.mrf.mxu1  ;;  %v9671_v58 = vpop.f32.mrf.mxu2 }
0x189b   :  { %v9648_v53 = vadd.f32 %v9647_v28, %v9629_v59  ;;  %v17291_v28 = vld [vmem:[#allocation42_spill] sm:$0xff] }
0x189d   :  { %v9667_v63 = vadd.f32 %v9666_v3, %v9648_v53 }
0x189e   :  { %v9630_v41 = vpop.f32.mrf.mxu0  ;;  %v9685_v48 = vpop.f32.mrf.mxu3 }
0x189f   :  { %v9631_v50 = vadd.f32 %v9630_v41, %v9612_v61  ;;  %v9686_v47 = vadd.f32 %v9685_v48, %v9667_v63 }
0x18a2   :  { %v9649_v35 = vpop.f32.mrf.mxu1  ;;  %v9673_v54 = vpop.f32.mrf.mxu2 }
0x18a3   :  { %v9650_v12 = vadd.f32 %v9649_v35, %v9631_v50 }
0x18a5   :  { %v9669_v23 = vadd.f32 %v9668_v2, %v9650_v12 }
0x18a6   :  { %v9633_v7 = vpop.f32.mrf.mxu0  ;;  %v9687_v25 = vpop.f32.mrf.mxu3 }
0x18a7   :  { %v9634_v10 = vadd.f32 %v9633_v7, %v9615_v1  ;;  %v9688_v43 = vadd.f32 %v9687_v25, %v9669_v23 }
0x18aa   :  { %v9652_v27 = vpop.f32.mrf.mxu1  ;;  %v9742_v60 = vpop.f32.mrf.mxu2 }
0x18ab   :  { %v9653_v32 = vadd.f32 %v9652_v27, %v9634_v10 }
0x18ad   :  { %v9672_v38 = vadd.f32 %v9671_v58, %v9653_v32 }
0x18ae   :  { %v9635_v13 = vpop.f32.mrf.mxu0  ;;  %v9690_v9 = vpop.f32.mrf.mxu3 }
0x18af   :  { %v9636_v14 = vadd.f32 %v9635_v13, %v9617_v46  ;;  %v9691_v4 = vadd.f32 %v9690_v9, %v9672_v38 }
0x18b2   :  { %v9654_v24 = vpop.f32.mrf.mxu1  ;;  %v9744_v51 = vpop.f32.mrf.mxu2 }
0x18b3   :  { %v9655_v29 = vadd.f32 %v9654_v24, %v9636_v14 }
0x18b5   :  { %v9674_v26 = vadd.f32 %v9673_v54, %v9655_v29 }
0x18b6   :  { %v9704_v40 = vpop.f32.mrf.mxu0  ;;  %v9692_v56 = vpop.f32.mrf.mxu3 }
0x18b7   :  { %v9705_v15 = vadd.f32 %v9704_v40, %v9686_v47  ;;  %v9693_v25 = vadd.f32 %v9692_v56, %v9674_v26  ;;  %v17294_v47 = vld [vmem:[#allocation61_spill] sm:$0xff] }
0x18ba   :  { %v9723_v18 = vpop.f32.mrf.mxu1  ;;  %v9747_v21 = vpop.f32.mrf.mxu2 }
0x18bb   :  { %v9724_v16 = vadd.f32 %v9723_v18, %v9705_v15 }
0x18bd   :  { %v9743_v22 = vadd.f32 %v9742_v60, %v9724_v16 }
0x18be   :  { %v9706_v0 = vpop.f32.mrf.mxu0  ;;  %v9761_v20 = vpop.f32.mrf.mxu3 }
0x18bf   :  { %v9707_v42 = vadd.f32 %v9706_v0, %v9688_v43  ;;  %v9762_v5 = vadd.f32 %v9761_v20, %v9743_v22 }
0x18c2   :  { %v9725_v8 = vpop.f32.mrf.mxu1  ;;  %v9749_v31 = vpop.f32.mrf.mxu2 }
0x18c3   :  { %v9726_v62 = vadd.f32 %v9725_v8, %v9707_v42 }
0x18c5   :  { %v9745_v11 = vadd.f32 %v9744_v51, %v9726_v62 }
0x18c6   :  { %v9709_v45 = vpop.f32.mrf.mxu0  ;;  %v9763_v57 = vpop.f32.mrf.mxu3 }
0x18c7   :  { %v9710_v36 = vadd.f32 %v9709_v45, %v9691_v4  ;;  %v9764_v3 = vadd.f32 %v9763_v57, %v9745_v11 }
0x18ca   :  { %v9728_v30 = vpop.f32.mrf.mxu1 }
0x18cb   :  { %v9729_v48 = vadd.f32 %v9728_v30, %v9710_v36 }
0x18cd   :  { %v9748_v13 = vadd.f32 %v9747_v21, %v9729_v48 }
0x18ce   :  { %v9711_v34 = vpop.f32.mrf.mxu0  ;;  %v9766_v27 = vpop.f32.mrf.mxu3 }
0x18cf   :  { %v9712_v58 = vadd.f32 %v9711_v34, %v9693_v25  ;;  %v9767_v18 = vadd.f32 %v9766_v27, %v9748_v13 }
0x18d2   :  { %v9730_v37 = vpop.f32.mrf.mxu1 }
0x18d3   :  { %v9731_v55 = vadd.f32 %v9730_v37, %v9712_v58 }
0x18d5   :  { %v9750_v54 = vadd.f32 %v9749_v31, %v9731_v55 }
0x18d6   :  { %v9780_v33 = vpop.f32.mrf.mxu0  ;;  %v9768_v53 = vpop.f32.mrf.mxu3 }
0x18d7   :  { %v9781_v17 = vadd.f32 %v9780_v33, %v9762_v5  ;;  %v9769_v63 = vadd.f32 %v9768_v53, %v9750_v54 }
0x18da   :  { %v9799_v49 = vpop.f32.mrf.mxu1 }
0x18db   :  { %v9800_v19 = vadd.f32 %v9799_v49, %v9781_v17 }
0x18dd   :  { %v9811_v41 = vadd.f32 %v9800_v19, %v17291_v28 }
0x18de   :  { %v9782_v35 = vpop.f32.mrf.mxu0 }
0x18df   :  { %9823 = vst [vmem:[#allocation22 + $0x10] sm:$0xff] %v9811_v41  ;;  %v9783_v7 = vadd.f32 %v9782_v35, %v9764_v3 }
0x18e2   :  { %v9801_v2 = vpop.f32.mrf.mxu1 }
0x18e3   :  { %v9802_v40 = vadd.f32 %v9801_v2, %v9783_v7 }
0x18e5   :  { %v9814_v24 = vadd.f32 %v9802_v40, %v17292_v39 }
0x18e6   :  { %v9785_v9 = vpop.f32.mrf.mxu0 }
0x18e7   :  { %9826 = vst [vmem:[#allocation22 + $0x28] sm:$0xff] %v9814_v24  ;;  %v9786_v0 = vadd.f32 %v9785_v9, %v9767_v18 }
0x18ea   :  { %v9804_v59 = vpop.f32.mrf.mxu1 }
0x18eb   :  { %v9805_v8 = vadd.f32 %v9804_v59, %v9786_v0 }
0x18ed   :  { %v9817_v45 = vadd.f32 %v9805_v8, %v17293_v6 }
0x18ee   :  { %v9787_v61 = vpop.f32.mrf.mxu0 }
0x18ef   :  { %9829 = vst [vmem:[#allocation22 + $0x40] sm:$0xff] %v9817_v45  ;;  %v9788_v56 = vadd.f32 %v9787_v61, %v9769_v63 }
0x18f2   :  { %v9806_v50 = vpop.f32.mrf.mxu1 }
0x18f3   :  { %v9807_v30 = vadd.f32 %v9806_v50, %v9788_v56 }
0x18f5   :  { %v9820_v12 = vadd.f32 %v9807_v30, %v17294_v47 }
0x18f7   :  { %9832 = vst [vmem:[#allocation22 + $0x58] sm:$0xff] %v9820_v12 }
0x18f8   :  { %9845 = dma.vmem_to_hbm [thread:$0]  %s9838_s20, 1536, %s9840_s22, [#allocation4], %s14803_s13, %s14803_s13, %s14804_s14  }
0x18f9   :  { %14793 = dma.done.wait [#allocation4], 1536  }
0x18fa   :  { %14794 = vsyncadd [#allocation4], 4294965760 }
0x18fb   :  { %9850 = vsyncpa [#allocation3], 1 }
0x18fc   :  { %9851 = vsyncpa [#allocation6], 1 }
0x18fd   :  { %9852 = vsyncpa [#allocation9], 1 }
0x18fe   :  { %9853 = vsyncpa [#allocation12], 1 }
0x18ff   :  { %9854 = vsyncpa [#allocation15], 1 }
0x1900   :  { %9855 = vsyncpa [#allocation18], 1 }
0x1901   :  { %9856 = vsyncpa [#allocation21], 1 }
0x1902   :  { %9857 = vsyncpa [#allocation4], 1 }

</bundles_post_ra>
